<compile_context>
chip_gen: v7x
topology: tpu7x:2x2x1
jax: 0.10.0
libtpu: 0.0.40
codegen_flags: <defaults>
</compile_context>

<pallas_src>
import functools

import jax
import jax.numpy as jnp
from jax.experimental import pallas as pl
from jax.experimental.pallas import tpu as pltpu

LANE = 128
BN_EPS = 1e-5


def _round_up(x, m):
    return (x + m - 1) // m * m


def _vmem_limit_bytes():
    cap = 64 * 1024 * 1024                       # conservative default (v7x)
    try:
        info = pltpu.get_tpu_info()
        cap = int(getattr(info, "vmem_capacity_bytes", cap))
    except Exception:
        pass
    # ~75% of physical VMEM, capped at 96 MiB:
    #   v5e/v6e (128 MiB) -> 96 MiB, v7x (64 MiB) -> 48 MiB.
    return int(min(96 * 1024 * 1024, cap * 3 // 4))


# ----------------------------------------------------------------------------
# Pallas kernel: implicit-im2col conv + folded-BN bias (+residual) (+ReLU)
# optionally fused with the 1x1 downsample conv reading the same input block.
# ----------------------------------------------------------------------------
def _conv_kernel(x_ref, w_ref, b_ref, *rest, kh, kw, stride, oh, ow, cp, relu,
                 has_residual, has_ds, ds_q, ds_d):
    rest = list(rest)
    r_ref = rest.pop(0) if has_residual else None
    if has_ds:
        wd_ref = rest.pop(0)
        bd_ref = rest.pop(0)
    o_ref = rest.pop(0)
    od_ref = rest.pop(0) if has_ds else None

    m = oh * ow
    co = o_ref.shape[-1]

    # Main 3x3 conv: kh taps accumulated in a local f32 value; per-ki the kw
    # taps are concatenated along channels so K = kw*cp per matmul.
    acc = jnp.zeros((m, co), jnp.float32)
    for ki in range(kh):
        qh, dh = ki % stride, ki // stride
        taps = []
        for kj in range(kw):
            qw, dw = kj % stride, kj // stride
            p = qh * stride + qw
            xs = x_ref[0, p, dh:dh + oh, dw:dw + ow, :]       # (oh, ow, cp)
            taps.append(xs.reshape(m, cp))
        xcat = taps[0] if kw == 1 else jnp.concatenate(taps, axis=-1)
        acc = acc + jnp.dot(xcat, w_ref[ki],
                            preferred_element_type=jnp.float32)

    y = (acc + b_ref[...]).reshape(oh, ow, co)                # folded-BN bias
    if has_residual:
        y = y + r_ref[0].astype(jnp.float32)
    if relu:
        y = jnp.maximum(y, 0.0)
    o_ref[0] = y.astype(o_ref.dtype)

    # Fused 1x1 downsample conv (same stride, reads the same x block).
    if has_ds:
        xd = x_ref[0, ds_q * stride + ds_q,
                   ds_d:ds_d + oh, ds_d:ds_d + ow, :].reshape(m, cp)
        yd = jnp.dot(xd, wd_ref[0],
                     preferred_element_type=jnp.float32) + bd_ref[...]
        od_ref[0] = yd.reshape(oh, ow, -1).astype(od_ref.dtype)


def conv_bn_act(x, w, b, *, stride=1, pad=0, relu=True, residual=None,
                ds_w=None, ds_b=None):
    """y = act(conv(x, w) + b [+ residual]);  optionally also 1x1 ds conv.

    x:        (N, H, W, Cp)          bf16, channels lane-padded.
    w:        (kh, kw*Cp, Coutp)     bf16, BN scale folded, kw packed into K.
    b:        (1, Coutp)             f32 folded BN bias.
    residual: optional (N, OH, OW, Coutp) bf16, added before the final ReLU.
    ds_w/ds_b: optional 1x1-conv (downsample) weights (1, Cp, Coutp)/(1, Coutp).
    """
    N, H, W, Cp = x.shape
    kh = w.shape[0]
    assert w.shape[1] % Cp == 0, "weight K dim must be kw * Cp"
    kw = w.shape[1] // Cp
    Coutp = w.shape[2]
    assert stride >= 1 and pad >= 0

    OH = (H + 2 * pad - kh) // stride + 1
    OW = (W + 2 * pad - kw) // stride + 1

    xp = jnp.pad(x, ((0, 0), (pad, pad), (pad, pad), (0, 0))) if pad else x

    S = stride
    if S == 1:
        # No wrapper copy: free size-1 phase dim.
        Hq, Wq = H + 2 * pad, W + 2 * pad
        xs = xp.reshape(N, 1, Hq, Wq, Cp)
    else:
        # One-time stride-phase split (shared by the fused downsample conv).
        Hq = OH + (kh - 1) // S
        Wq = OW + (kw - 1) // S
        phases = []
        for qh in range(S):
            for qw in range(S):
                ph = xp[:, qh::S, qw::S, :][:, :Hq, :Wq, :]
                ph_h, ph_w = Hq - ph.shape[1], Wq - ph.shape[2]
                if ph_h or ph_w:
                    ph = jnp.pad(ph, ((0, 0), (0, ph_h), (0, ph_w), (0, 0)))
                phases.append(ph)
        xs = jnp.stack(phases, axis=1)                  # (N, S*S, Hq, Wq, Cp)

    in_specs = [
        pl.BlockSpec((1, S * S, Hq, Wq, Cp), lambda n: (n, 0, 0, 0, 0)),
        pl.BlockSpec((kh, kw * Cp, Coutp), lambda n: (0, 0, 0)),  # resident
        pl.BlockSpec((1, Coutp), lambda n: (0, 0)),
    ]
    args = [xs, w, b]

    has_residual = residual is not None
    if has_residual:
        in_specs.append(pl.BlockSpec((1, OH, OW, Coutp),
                                     lambda n: (n, 0, 0, 0)))
        args.append(residual)

    has_ds = ds_w is not None
    if has_ds:
        assert ds_w.shape == (1, Cp, Coutp)
        in_specs += [pl.BlockSpec((1, Cp, Coutp), lambda n: (0, 0, 0)),
                     pl.BlockSpec((1, Coutp), lambda n: (0, 0))]
        args += [ds_w, ds_b]

    out_shapes = [jax.ShapeDtypeStruct((N, OH, OW, Coutp), jnp.bfloat16)]
    out_specs = [pl.BlockSpec((1, OH, OW, Coutp), lambda n: (n, 0, 0, 0))]
    if has_ds:
        out_shapes.append(jax.ShapeDtypeStruct((N, OH, OW, Coutp), jnp.bfloat16))
        out_specs.append(pl.BlockSpec((1, OH, OW, Coutp),
                                      lambda n: (n, 0, 0, 0)))

    kernel = functools.partial(
        _conv_kernel, kh=kh, kw=kw, stride=S, oh=OH, ow=OW, cp=Cp, relu=relu,
        has_residual=has_residual, has_ds=has_ds,
        ds_q=pad % S, ds_d=pad // S)

    return pl.pallas_call(
        kernel,
        out_shape=tuple(out_shapes) if has_ds else out_shapes[0],
        grid=(N,),
        in_specs=in_specs,
        out_specs=tuple(out_specs) if has_ds else out_specs[0],
        compiler_params=pltpu.CompilerParams(
            dimension_semantics=("parallel",),
            vmem_limit_bytes=_vmem_limit_bytes()),
    )(*args)


# ----------------------------------------------------------------------------
# Parameters (deterministic, synthetic): BN folding + lane padding + K packing
# ----------------------------------------------------------------------------
def _make_conv_bn(key, ksize, cin, cout):
    kw_, kg, kb, km, kv = jax.random.split(key, 5)
    w = 0.05 * jax.random.normal(kw_, (ksize, ksize, cin, cout), jnp.float32)
    gamma = 1.0 + 0.1 * jax.random.normal(kg, (cout,), jnp.float32)
    beta = 0.1 * jax.random.normal(kb, (cout,), jnp.float32)
    mean = 0.1 * jax.random.normal(km, (cout,), jnp.float32)
    var = 1.0 + 0.1 * jnp.abs(jax.random.normal(kv, (cout,), jnp.float32))

    scale = gamma / jnp.sqrt(var + BN_EPS)          # inference-mode BN fold
    bias = beta - mean * scale
    w_folded = w * scale[None, None, None, :]

    cinp, coutp = _round_up(cin, LANE), _round_up(cout, LANE)
    wp = jnp.zeros((ksize, ksize, cinp, coutp), jnp.float32)
    wp = wp.at[:, :, :cin, :cout].set(w_folded)
    wp = wp.reshape(ksize, ksize * cinp, coutp).astype(jnp.bfloat16)  # K-pack
    bp = jnp.zeros((1, coutp), jnp.float32).at[0, :cout].set(bias)
    return (wp, bp), (w_folded, bias)


def make_basic_block_params(key, inplanes, planes, stride):
    """Returns (kernel_params, reference_params)."""
    k1, k2, k3 = jax.random.split(key, 3)
    (c1w, c1b), (r1w, r1b) = _make_conv_bn(k1, 3, inplanes, planes)
    (c2w, c2b), (r2w, r2b) = _make_conv_bn(k2, 3, planes, planes)
    params = {"conv1_w": c1w, "conv1_b": c1b, "conv2_w": c2w, "conv2_b": c2b}
    ref = {"conv1_w": r1w, "conv1_b": r1b, "conv2_w": r2w, "conv2_b": r2b}
    if stride != 1 or inplanes != planes:           # 1x1 conv + BN downsample
        (dw, db), (rdw, rdb) = _make_conv_bn(k3, 1, inplanes, planes)
        params["ds_w"], params["ds_b"] = dw, db
        ref["ds_w"], ref["ds_b"] = rdw, rdb
    return params, ref


# ----------------------------------------------------------------------------
# BasicBlock forward (Pallas) and a pure-JAX f32 reference
# ----------------------------------------------------------------------------
def basic_block_forward_nhwc(x, params, *, stride):
    """Core block: NHWC bf16 with lane-padded channels in, same layout out."""
    if "ds_w" in params:
        out1, identity = conv_bn_act(
            x, params["conv1_w"], params["conv1_b"], stride=stride, pad=1,
            relu=True, ds_w=params["ds_w"], ds_b=params["ds_b"])
    else:
        identity = x
        out1 = conv_bn_act(x, params["conv1_w"], params["conv1_b"],
                           stride=stride, pad=1, relu=True)
    return conv_bn_act(out1, params["conv2_w"], params["conv2_b"],
                       stride=1, pad=1, relu=True, residual=identity)


@functools.partial(jax.jit, static_argnames=("stride", "planes"))
def basic_block_forward(x_nchw, params, *, stride, planes):
    # NCHW f32 boundary wrapper (layout conversion happens once per block).
    N, C, H, W = x_nchw.shape
    cin_p = _round_up(C, LANE)
    x = jnp.transpose(x_nchw, (0, 2, 3, 1))
    x = jnp.pad(x, ((0, 0), (0, 0), (0, 0), (0, cin_p - C))).astype(jnp.bfloat16)
    out = basic_block_forward_nhwc(x, params, stride=stride)
    out = out[..., :planes].astype(jnp.float32)     # drop channel padding
    return jnp.transpose(out, (0, 3, 1, 2))         # back to NCHW


def basic_block_reference(x_nchw, rp, *, stride):
    x = jnp.transpose(x_nchw, (0, 2, 3, 1)).astype(jnp.float32)

    def conv(h, w, b, s, p, relu):
        y = jax.lax.conv_general_dilated(
            h, w, window_strides=(s, s), padding=[(p, p), (p, p)],
            dimension_numbers=("NHWC", "HWIO", "NHWC"))
        y = y + b[None, None, None, :]
        return jnp.maximum(y, 0.0) if relu else y

    identity = (conv(x, rp["ds_w"], rp["ds_b"], stride, 0, False)
                if "ds_w" in rp else x)
    out = conv(x, rp["conv1_w"], rp["conv1_b"], stride, 1, True)
    out = conv(out, rp["conv2_w"], rp["conv2_b"], 1, 1, False)
    out = jnp.maximum(out + identity, 0.0)
    return jnp.transpose(out, (0, 3, 1, 2))


# ----------------------------------------------------------------------------
if __name__ == "__main__":
    key = jax.random.PRNGKey(0)

    # (inplanes, planes, stride, hw): a downsampling block and an identity block.
    configs = [(32, 64, 2, 32), (32, 32, 1, 16)]
    batch = 2

    for inplanes, planes, stride, hw in configs:
        key, k_params, k_x = jax.random.split(key, 3)
        x = jax.random.uniform(k_x, (batch, inplanes, hw, hw), jnp.float32)
        params, ref_params = make_basic_block_params(
            k_params, inplanes, planes, stride)

        out = basic_block_forward(x, params, stride=stride, planes=planes)
        out = jax.block_until_ready(out)
        assert out.shape == (batch, planes, hw // stride, hw // stride)
        assert out.dtype == jnp.float32

        ref = basic_block_reference(x, ref_params, stride=stride)
        max_err = float(jnp.max(jnp.abs(out - ref)))
        scale = float(jnp.max(jnp.abs(ref))) + 1e-6
        assert max_err / scale < 6e-2, \
            f"relative error {max_err / scale:.4f} (abs {max_err:.4f})"

    print("KERNEL_OK")
</pallas_src>

<mosaic_0001>
module attributes {stable_mosaic.version = 11 : i64} {
  func.func @_conv_kernel(%arg0: i32, %arg1: memref<1x4x17x17x128xbf16, #tpu.memory_space<vmem>>, %arg2: memref<3x384x128xbf16, #tpu.memory_space<vmem>>, %arg3: memref<1x128xf32, #tpu.memory_space<vmem>>, %arg4: memref<1x128x128xbf16, #tpu.memory_space<vmem>>, %arg5: memref<1x128xf32, #tpu.memory_space<vmem>>, %arg6: memref<1x16x16x128xbf16, #tpu.memory_space<vmem>>, %arg7: memref<1x16x16x128xbf16, #tpu.memory_space<vmem>>) attributes {dimension_semantics = [#tpu.dimension_semantics<parallel>], iteration_bounds = array<i64: 2>, scalar_prefetch = 0 : i64, scratch_operands = 0 : i64, tpu.core_type = #tpu.core_type<tc>, window_params = [{transform_indices = @transform_0, window_bounds = array<i64: 1, 4, 17, 17, 128>}, {pipeline_mode = #tpu.pipeline_mode<synchronous>, transform_indices = @transform_1, window_bounds = array<i64: 3, 384, 128>}, {pipeline_mode = #tpu.pipeline_mode<synchronous>, transform_indices = @transform_2, window_bounds = array<i64: 1, 128>}, {pipeline_mode = #tpu.pipeline_mode<synchronous>, transform_indices = @transform_3, window_bounds = array<i64: 1, 128, 128>}, {pipeline_mode = #tpu.pipeline_mode<synchronous>, transform_indices = @transform_4, window_bounds = array<i64: 1, 128>}, {transform_indices = @transform_5, window_bounds = array<i64: 1, 16, 16, 128>}, {transform_indices = @transform_6, window_bounds = array<i64: 1, 16, 16, 128>}]} {
    %cst = arith.constant 0.000000e+00 : f32
    %0 = vector.broadcast %cst : f32 to vector<256x128xf32>
    %c0 = arith.constant 0 : index
    %c0_0 = arith.constant 0 : index
    %c0_1 = arith.constant 0 : index
    %c0_2 = arith.constant 0 : index
    %c0_3 = arith.constant 0 : index
    %1 = vector.load %arg1[%c0, %c0_0, %c0_1, %c0_2, %c0_3] : memref<1x4x17x17x128xbf16, #tpu.memory_space<vmem>>, vector<1x1x16x16x128xbf16>
    %2 = vector.shape_cast %1 : vector<1x1x16x16x128xbf16> to vector<16x16x128xbf16>
    %3 = vector.shape_cast %2 : vector<16x16x128xbf16> to vector<256x128xbf16>
    %c0_4 = arith.constant 0 : index
    %c1 = arith.constant 1 : index
    %c0_5 = arith.constant 0 : index
    %c0_6 = arith.constant 0 : index
    %c0_7 = arith.constant 0 : index
    %4 = vector.load %arg1[%c0_4, %c1, %c0_5, %c0_6, %c0_7] : memref<1x4x17x17x128xbf16, #tpu.memory_space<vmem>>, vector<1x1x16x16x128xbf16>
    %5 = vector.shape_cast %4 : vector<1x1x16x16x128xbf16> to vector<16x16x128xbf16>
    %6 = vector.shape_cast %5 : vector<16x16x128xbf16> to vector<256x128xbf16>
    %c0_8 = arith.constant 0 : index
    %c0_9 = arith.constant 0 : index
    %c0_10 = arith.constant 0 : index
    %c1_11 = arith.constant 1 : index
    %c0_12 = arith.constant 0 : index
    %7 = vector.load %arg1[%c0_8, %c0_9, %c0_10, %c1_11, %c0_12] : memref<1x4x17x17x128xbf16, #tpu.memory_space<vmem>>, vector<1x1x16x16x128xbf16>
    %8 = vector.shape_cast %7 : vector<1x1x16x16x128xbf16> to vector<16x16x128xbf16>
    %9 = vector.shape_cast %8 : vector<16x16x128xbf16> to vector<256x128xbf16>
    %10 = tpu.concatenate %3, %6, %9 in 1 : vector<256x128xbf16>, vector<256x128xbf16>, vector<256x128xbf16> -> vector<256x384xbf16>
    %c0_13 = arith.constant 0 : index
    %c0_14 = arith.constant 0 : index
    %c0_15 = arith.constant 0 : index
    %11 = vector.load %arg2[%c0_13, %c0_14, %c0_15] : memref<3x384x128xbf16, #tpu.memory_space<vmem>>, vector<1x384x128xbf16>
    %12 = vector.shape_cast %11 : vector<1x384x128xbf16> to vector<384x128xbf16>
    %cst_16 = arith.constant dense<0.000000e+00> : vector<256x128xf32>
    %13 = tpu.matmul %10, %12, %cst_16 {dimension_numbers = #tpu.dot_dimension_numbers<[1], [0], [0], [1], [0, 0, 1, 1], [], []>} : vector<256x384xbf16>, vector<384x128xbf16>, vector<256x128xf32> -> vector<256x128xf32>
    %14 = arith.addf %0, %13 : vector<256x128xf32>
    %c0_17 = arith.constant 0 : index
    %c2 = arith.constant 2 : index
    %c0_18 = arith.constant 0 : index
    %c0_19 = arith.constant 0 : index
    %c0_20 = arith.constant 0 : index
    %15 = vector.load %arg1[%c0_17, %c2, %c0_18, %c0_19, %c0_20] : memref<1x4x17x17x128xbf16, #tpu.memory_space<vmem>>, vector<1x1x16x16x128xbf16>
    %16 = vector.shape_cast %15 : vector<1x1x16x16x128xbf16> to vector<16x16x128xbf16>
    %17 = vector.shape_cast %16 : vector<16x16x128xbf16> to vector<256x128xbf16>
    %c0_21 = arith.constant 0 : index
    %c3 = arith.constant 3 : index
    %c0_22 = arith.constant 0 : index
    %c0_23 = arith.constant 0 : index
    %c0_24 = arith.constant 0 : index
    %18 = vector.load %arg1[%c0_21, %c3, %c0_22, %c0_23, %c0_24] : memref<1x4x17x17x128xbf16, #tpu.memory_space<vmem>>, vector<1x1x16x16x128xbf16>
    %19 = vector.shape_cast %18 : vector<1x1x16x16x128xbf16> to vector<16x16x128xbf16>
    %20 = vector.shape_cast %19 : vector<16x16x128xbf16> to vector<256x128xbf16>
    %c0_25 = arith.constant 0 : index
    %c2_26 = arith.constant 2 : index
    %c0_27 = arith.constant 0 : index
    %c1_28 = arith.constant 1 : index
    %c0_29 = arith.constant 0 : index
    %21 = vector.load %arg1[%c0_25, %c2_26, %c0_27, %c1_28, %c0_29] : memref<1x4x17x17x128xbf16, #tpu.memory_space<vmem>>, vector<1x1x16x16x128xbf16>
    %22 = vector.shape_cast %21 : vector<1x1x16x16x128xbf16> to vector<16x16x128xbf16>
    %23 = vector.shape_cast %22 : vector<16x16x128xbf16> to vector<256x128xbf16>
    %24 = tpu.concatenate %17, %20, %23 in 1 : vector<256x128xbf16>, vector<256x128xbf16>, vector<256x128xbf16> -> vector<256x384xbf16>
    %c1_30 = arith.constant 1 : index
    %c0_31 = arith.constant 0 : index
    %c0_32 = arith.constant 0 : index
    %25 = vector.load %arg2[%c1_30, %c0_31, %c0_32] : memref<3x384x128xbf16, #tpu.memory_space<vmem>>, vector<1x384x128xbf16>
    %26 = vector.shape_cast %25 : vector<1x384x128xbf16> to vector<384x128xbf16>
    %cst_33 = arith.constant dense<0.000000e+00> : vector<256x128xf32>
    %27 = tpu.matmul %24, %26, %cst_33 {dimension_numbers = #tpu.dot_dimension_numbers<[1], [0], [0], [1], [0, 0, 1, 1], [], []>} : vector<256x384xbf16>, vector<384x128xbf16>, vector<256x128xf32> -> vector<256x128xf32>
    %28 = arith.addf %14, %27 : vector<256x128xf32>
    %c0_34 = arith.constant 0 : index
    %c0_35 = arith.constant 0 : index
    %c1_36 = arith.constant 1 : index
    %c0_37 = arith.constant 0 : index
    %c0_38 = arith.constant 0 : index
    %29 = vector.load %arg1[%c0_34, %c0_35, %c1_36, %c0_37, %c0_38] : memref<1x4x17x17x128xbf16, #tpu.memory_space<vmem>>, vector<1x1x16x16x128xbf16>
    %30 = vector.shape_cast %29 : vector<1x1x16x16x128xbf16> to vector<16x16x128xbf16>
    %31 = vector.shape_cast %30 : vector<16x16x128xbf16> to vector<256x128xbf16>
    %c0_39 = arith.constant 0 : index
    %c1_40 = arith.constant 1 : index
    %c1_41 = arith.constant 1 : index
    %c0_42 = arith.constant 0 : index
    %c0_43 = arith.constant 0 : index
    %32 = vector.load %arg1[%c0_39, %c1_40, %c1_41, %c0_42, %c0_43] : memref<1x4x17x17x128xbf16, #tpu.memory_space<vmem>>, vector<1x1x16x16x128xbf16>
    %33 = vector.shape_cast %32 : vector<1x1x16x16x128xbf16> to vector<16x16x128xbf16>
    %34 = vector.shape_cast %33 : vector<16x16x128xbf16> to vector<256x128xbf16>
    %c0_44 = arith.constant 0 : index
    %c0_45 = arith.constant 0 : index
    %c1_46 = arith.constant 1 : index
    %c1_47 = arith.constant 1 : index
    %c0_48 = arith.constant 0 : index
    %35 = vector.load %arg1[%c0_44, %c0_45, %c1_46, %c1_47, %c0_48] : memref<1x4x17x17x128xbf16, #tpu.memory_space<vmem>>, vector<1x1x16x16x128xbf16>
    %36 = vector.shape_cast %35 : vector<1x1x16x16x128xbf16> to vector<16x16x128xbf16>
    %37 = vector.shape_cast %36 : vector<16x16x128xbf16> to vector<256x128xbf16>
    %38 = tpu.concatenate %31, %34, %37 in 1 : vector<256x128xbf16>, vector<256x128xbf16>, vector<256x128xbf16> -> vector<256x384xbf16>
    %c2_49 = arith.constant 2 : index
    %c0_50 = arith.constant 0 : index
    %c0_51 = arith.constant 0 : index
    %39 = vector.load %arg2[%c2_49, %c0_50, %c0_51] : memref<3x384x128xbf16, #tpu.memory_space<vmem>>, vector<1x384x128xbf16>
    %40 = vector.shape_cast %39 : vector<1x384x128xbf16> to vector<384x128xbf16>
    %cst_52 = arith.constant dense<0.000000e+00> : vector<256x128xf32>
    %41 = tpu.matmul %38, %40, %cst_52 {dimension_numbers = #tpu.dot_dimension_numbers<[1], [0], [0], [1], [0, 0, 1, 1], [], []>} : vector<256x384xbf16>, vector<384x128xbf16>, vector<256x128xf32> -> vector<256x128xf32>
    %42 = arith.addf %28, %41 : vector<256x128xf32>
    %c0_53 = arith.constant 0 : index
    %c0_54 = arith.constant 0 : index
    %43 = vector.load %arg3[%c0_53, %c0_54] : memref<1x128xf32, #tpu.memory_space<vmem>>, vector<1x128xf32>
    %44 = vector.broadcast %43 : vector<1x128xf32> to vector<256x128xf32>
    %45 = arith.addf %42, %44 : vector<256x128xf32>
    %46 = vector.shape_cast %45 : vector<256x128xf32> to vector<16x16x128xf32>
    %cst_55 = arith.constant 0.000000e+00 : f32
    %47 = vector.broadcast %cst_55 : f32 to vector<16x16x128xf32>
    %48 = arith.maximumf %46, %47 : vector<16x16x128xf32>
    %49 = arith.truncf %48 : vector<16x16x128xf32> to vector<16x16x128xbf16>
    %c0_56 = arith.constant 0 : index
    %c0_57 = arith.constant 0 : index
    %c0_58 = arith.constant 0 : index
    %c0_59 = arith.constant 0 : index
    %50 = vector.load %arg6[%c0_56, %c0_57, %c0_58, %c0_59] : memref<1x16x16x128xbf16, #tpu.memory_space<vmem>>, vector<1x16x16x128xbf16>
    %51 = vector.shape_cast %50 : vector<1x16x16x128xbf16> to vector<16x16x128xbf16>
    %52 = vector.shape_cast %49 : vector<16x16x128xbf16> to vector<1x16x16x128xbf16>
    tpu.vector_store %arg6[%c0_56, %c0_57, %c0_58, %c0_59], %52 {strides = array<i32>} : memref<1x16x16x128xbf16, #tpu.memory_space<vmem>>, vector<1x16x16x128xbf16>,
    %c0_60 = arith.constant 0 : index
    %c3_61 = arith.constant 3 : index
    %c0_62 = arith.constant 0 : index
    %c0_63 = arith.constant 0 : index
    %c0_64 = arith.constant 0 : index
    %53 = vector.load %arg1[%c0_60, %c3_61, %c0_62, %c0_63, %c0_64] : memref<1x4x17x17x128xbf16, #tpu.memory_space<vmem>>, vector<1x1x16x16x128xbf16>
    %54 = vector.shape_cast %53 : vector<1x1x16x16x128xbf16> to vector<16x16x128xbf16>
    %55 = vector.shape_cast %54 : vector<16x16x128xbf16> to vector<256x128xbf16>
    %c0_65 = arith.constant 0 : index
    %c0_66 = arith.constant 0 : index
    %c0_67 = arith.constant 0 : index
    %56 = vector.load %arg4[%c0_65, %c0_66, %c0_67] : memref<1x128x128xbf16, #tpu.memory_space<vmem>>, vector<1x128x128xbf16>
    %57 = vector.shape_cast %56 : vector<1x128x128xbf16> to vector<128x128xbf16>
    %cst_68 = arith.constant dense<0.000000e+00> : vector<256x128xf32>
    %58 = tpu.matmul %55, %57, %cst_68 {dimension_numbers = #tpu.dot_dimension_numbers<[1], [0], [0], [1], [0, 0, 1, 1], [], []>} : vector<256x128xbf16>, vector<128x128xbf16>, vector<256x128xf32> -> vector<256x128xf32>
    %c0_69 = arith.constant 0 : index
    %c0_70 = arith.constant 0 : index
    %59 = vector.load %arg5[%c0_69, %c0_70] : memref<1x128xf32, #tpu.memory_space<vmem>>, vector<1x128xf32>
    %60 = vector.broadcast %59 : vector<1x128xf32> to vector<256x128xf32>
    %61 = arith.addf %58, %60 : vector<256x128xf32>
    %62 = vector.shape_cast %61 : vector<256x128xf32> to vector<16x16x128xf32>
    %63 = arith.truncf %62 : vector<16x16x128xf32> to vector<16x16x128xbf16>
    %c0_71 = arith.constant 0 : index
    %c0_72 = arith.constant 0 : index
    %c0_73 = arith.constant 0 : index
    %c0_74 = arith.constant 0 : index
    %64 = vector.load %arg7[%c0_71, %c0_72, %c0_73, %c0_74] : memref<1x16x16x128xbf16, #tpu.memory_space<vmem>>, vector<1x16x16x128xbf16>
    %65 = vector.shape_cast %64 : vector<1x16x16x128xbf16> to vector<16x16x128xbf16>
    %66 = vector.shape_cast %63 : vector<16x16x128xbf16> to vector<1x16x16x128xbf16>
    tpu.vector_store %arg7[%c0_71, %c0_72, %c0_73, %c0_74], %66 {strides = array<i32>} : memref<1x16x16x128xbf16, #tpu.memory_space<vmem>>, vector<1x16x16x128xbf16>,
    return
  }
  func.func @transform_0(%arg0: i32) -> (i32, i32, i32, i32, i32) {
    %c0_i32 = arith.constant 0 : i32
    %c0_i32_0 = arith.constant 0 : i32
    %c0_i32_1 = arith.constant 0 : i32
    %c0_i32_2 = arith.constant 0 : i32
    %c0_i32_3 = arith.constant 0 : i32
    return %arg0, %c0_i32, %c0_i32_0, %c0_i32_1, %c0_i32_2 : i32, i32, i32, i32, i32
  }
  func.func @transform_1(%arg0: i32) -> (i32, i32, i32) {
    %c0_i32 = arith.constant 0 : i32
    %c0_i32_0 = arith.constant 0 : i32
    %c0_i32_1 = arith.constant 0 : i32
    %c0_i32_2 = arith.constant 0 : i32
    return %c0_i32, %c0_i32_0, %c0_i32_1 : i32, i32, i32
  }
  func.func @transform_2(%arg0: i32) -> (i32, i32) {
    %c0_i32 = arith.constant 0 : i32
    %c0_i32_0 = arith.constant 0 : i32
    %c0_i32_1 = arith.constant 0 : i32
    return %c0_i32, %c0_i32_0 : i32, i32
  }
  func.func @transform_3(%arg0: i32) -> (i32, i32, i32) {
    %c0_i32 = arith.constant 0 : i32
    %c0_i32_0 = arith.constant 0 : i32
    %c0_i32_1 = arith.constant 0 : i32
    %c0_i32_2 = arith.constant 0 : i32
    return %c0_i32, %c0_i32_0, %c0_i32_1 : i32, i32, i32
  }
  func.func @transform_4(%arg0: i32) -> (i32, i32) {
    %c0_i32 = arith.constant 0 : i32
    %c0_i32_0 = arith.constant 0 : i32
    %c0_i32_1 = arith.constant 0 : i32
    return %c0_i32, %c0_i32_0 : i32, i32
  }
  func.func @transform_5(%arg0: i32) -> (i32, i32, i32, i32) {
    %c0_i32 = arith.constant 0 : i32
    %c0_i32_0 = arith.constant 0 : i32
    %c0_i32_1 = arith.constant 0 : i32
    %c0_i32_2 = arith.constant 0 : i32
    return %arg0, %c0_i32, %c0_i32_0, %c0_i32_1 : i32, i32, i32, i32
  }
  func.func @transform_6(%arg0: i32) -> (i32, i32, i32, i32) {
    %c0_i32 = arith.constant 0 : i32
    %c0_i32_0 = arith.constant 0 : i32
    %c0_i32_1 = arith.constant 0 : i32
    %c0_i32_2 = arith.constant 0 : i32
    return %arg0, %c0_i32, %c0_i32_0, %c0_i32_1 : i32, i32, i32, i32
  }
}

module attributes {stable_mosaic.version = 11 : i64} {
  func.func @_conv_kernel(%arg0: i32, %arg1: memref<1x1x18x18x128xbf16, #tpu.memory_space<vmem>>, %arg2: memref<3x384x128xbf16, #tpu.memory_space<vmem>>, %arg3: memref<1x128xf32, #tpu.memory_space<vmem>>, %arg4: memref<1x16x16x128xbf16, #tpu.memory_space<vmem>>, %arg5: memref<1x16x16x128xbf16, #tpu.memory_space<vmem>>) attributes {dimension_semantics = [#tpu.dimension_semantics<parallel>], iteration_bounds = array<i64: 2>, scalar_prefetch = 0 : i64, scratch_operands = 0 : i64, tpu.core_type = #tpu.core_type<tc>, window_params = [{transform_indices = @transform_0, window_bounds = array<i64: 1, 1, 18, 18, 128>}, {pipeline_mode = #tpu.pipeline_mode<synchronous>, transform_indices = @transform_1, window_bounds = array<i64: 3, 384, 128>}, {pipeline_mode = #tpu.pipeline_mode<synchronous>, transform_indices = @transform_2, window_bounds = array<i64: 1, 128>}, {transform_indices = @transform_3, window_bounds = array<i64: 1, 16, 16, 128>}, {transform_indices = @transform_4, window_bounds = array<i64: 1, 16, 16, 128>}]} {
    %cst = arith.constant 0.000000e+00 : f32
    %0 = vector.broadcast %cst : f32 to vector<256x128xf32>
    %c0 = arith.constant 0 : index
    %c0_0 = arith.constant 0 : index
    %c0_1 = arith.constant 0 : index
    %c0_2 = arith.constant 0 : index
    %c0_3 = arith.constant 0 : index
    %1 = vector.load %arg1[%c0, %c0_0, %c0_1, %c0_2, %c0_3] : memref<1x1x18x18x128xbf16, #tpu.memory_space<vmem>>, vector<1x1x16x16x128xbf16>
    %2 = vector.shape_cast %1 : vector<1x1x16x16x128xbf16> to vector<16x16x128xbf16>
    %3 = vector.shape_cast %2 : vector<16x16x128xbf16> to vector<256x128xbf16>
    %c0_4 = arith.constant 0 : index
    %c0_5 = arith.constant 0 : index
    %c0_6 = arith.constant 0 : index
    %c1 = arith.constant 1 : index
    %c0_7 = arith.constant 0 : index
    %4 = vector.load %arg1[%c0_4, %c0_5, %c0_6, %c1, %c0_7] : memref<1x1x18x18x128xbf16, #tpu.memory_space<vmem>>, vector<1x1x16x16x128xbf16>
    %5 = vector.shape_cast %4 : vector<1x1x16x16x128xbf16> to vector<16x16x128xbf16>
    %6 = vector.shape_cast %5 : vector<16x16x128xbf16> to vector<256x128xbf16>
    %c0_8 = arith.constant 0 : index
    %c0_9 = arith.constant 0 : index
    %c0_10 = arith.constant 0 : index
    %c2 = arith.constant 2 : index
    %c0_11 = arith.constant 0 : index
    %7 = vector.load %arg1[%c0_8, %c0_9, %c0_10, %c2, %c0_11] : memref<1x1x18x18x128xbf16, #tpu.memory_space<vmem>>, vector<1x1x16x16x128xbf16>
    %8 = vector.shape_cast %7 : vector<1x1x16x16x128xbf16> to vector<16x16x128xbf16>
    %9 = vector.shape_cast %8 : vector<16x16x128xbf16> to vector<256x128xbf16>
    %10 = tpu.concatenate %3, %6, %9 in 1 : vector<256x128xbf16>, vector<256x128xbf16>, vector<256x128xbf16> -> vector<256x384xbf16>
    %c0_12 = arith.constant 0 : index
    %c0_13 = arith.constant 0 : index
    %c0_14 = arith.constant 0 : index
    %11 = vector.load %arg2[%c0_12, %c0_13, %c0_14] : memref<3x384x128xbf16, #tpu.memory_space<vmem>>, vector<1x384x128xbf16>
    %12 = vector.shape_cast %11 : vector<1x384x128xbf16> to vector<384x128xbf16>
    %cst_15 = arith.constant dense<0.000000e+00> : vector<256x128xf32>
    %13 = tpu.matmul %10, %12, %cst_15 {dimension_numbers = #tpu.dot_dimension_numbers<[1], [0], [0], [1], [0, 0, 1, 1], [], []>} : vector<256x384xbf16>, vector<384x128xbf16>, vector<256x128xf32> -> vector<256x128xf32>
    %14 = arith.addf %0, %13 : vector<256x128xf32>
    %c0_16 = arith.constant 0 : index
    %c0_17 = arith.constant 0 : index
    %c1_18 = arith.constant 1 : index
    %c0_19 = arith.constant 0 : index
    %c0_20 = arith.constant 0 : index
    %15 = vector.load %arg1[%c0_16, %c0_17, %c1_18, %c0_19, %c0_20] : memref<1x1x18x18x128xbf16, #tpu.memory_space<vmem>>, vector<1x1x16x16x128xbf16>
    %16 = vector.shape_cast %15 : vector<1x1x16x16x128xbf16> to vector<16x16x128xbf16>
    %17 = vector.shape_cast %16 : vector<16x16x128xbf16> to vector<256x128xbf16>
    %c0_21 = arith.constant 0 : index
    %c0_22 = arith.constant 0 : index
    %c1_23 = arith.constant 1 : index
    %c1_24 = arith.constant 1 : index
    %c0_25 = arith.constant 0 : index
    %18 = vector.load %arg1[%c0_21, %c0_22, %c1_23, %c1_24, %c0_25] : memref<1x1x18x18x128xbf16, #tpu.memory_space<vmem>>, vector<1x1x16x16x128xbf16>
    %19 = vector.shape_cast %18 : vector<1x1x16x16x128xbf16> to vector<16x16x128xbf16>
    %20 = vector.shape_cast %19 : vector<16x16x128xbf16> to vector<256x128xbf16>
    %c0_26 = arith.constant 0 : index
    %c0_27 = arith.constant 0 : index
    %c1_28 = arith.constant 1 : index
    %c2_29 = arith.constant 2 : index
    %c0_30 = arith.constant 0 : index
    %21 = vector.load %arg1[%c0_26, %c0_27, %c1_28, %c2_29, %c0_30] : memref<1x1x18x18x128xbf16, #tpu.memory_space<vmem>>, vector<1x1x16x16x128xbf16>
    %22 = vector.shape_cast %21 : vector<1x1x16x16x128xbf16> to vector<16x16x128xbf16>
    %23 = vector.shape_cast %22 : vector<16x16x128xbf16> to vector<256x128xbf16>
    %24 = tpu.concatenate %17, %20, %23 in 1 : vector<256x128xbf16>, vector<256x128xbf16>, vector<256x128xbf16> -> vector<256x384xbf16>
    %c1_31 = arith.constant 1 : index
    %c0_32 = arith.constant 0 : index
    %c0_33 = arith.constant 0 : index
    %25 = vector.load %arg2[%c1_31, %c0_32, %c0_33] : memref<3x384x128xbf16, #tpu.memory_space<vmem>>, vector<1x384x128xbf16>
    %26 = vector.shape_cast %25 : vector<1x384x128xbf16> to vector<384x128xbf16>
    %cst_34 = arith.constant dense<0.000000e+00> : vector<256x128xf32>
    %27 = tpu.matmul %24, %26, %cst_34 {dimension_numbers = #tpu.dot_dimension_numbers<[1], [0], [0], [1], [0, 0, 1, 1], [], []>} : vector<256x384xbf16>, vector<384x128xbf16>, vector<256x128xf32> -> vector<256x128xf32>
    %28 = arith.addf %14, %27 : vector<256x128xf32>
    %c0_35 = arith.constant 0 : index
    %c0_36 = arith.constant 0 : index
    %c2_37 = arith.constant 2 : index
    %c0_38 = arith.constant 0 : index
    %c0_39 = arith.constant 0 : index
    %29 = vector.load %arg1[%c0_35, %c0_36, %c2_37, %c0_38, %c0_39] : memref<1x1x18x18x128xbf16, #tpu.memory_space<vmem>>, vector<1x1x16x16x128xbf16>
    %30 = vector.shape_cast %29 : vector<1x1x16x16x128xbf16> to vector<16x16x128xbf16>
    %31 = vector.shape_cast %30 : vector<16x16x128xbf16> to vector<256x128xbf16>
    %c0_40 = arith.constant 0 : index
    %c0_41 = arith.constant 0 : index
    %c2_42 = arith.constant 2 : index
    %c1_43 = arith.constant 1 : index
    %c0_44 = arith.constant 0 : index
    %32 = vector.load %arg1[%c0_40, %c0_41, %c2_42, %c1_43, %c0_44] : memref<1x1x18x18x128xbf16, #tpu.memory_space<vmem>>, vector<1x1x16x16x128xbf16>
    %33 = vector.shape_cast %32 : vector<1x1x16x16x128xbf16> to vector<16x16x128xbf16>
    %34 = vector.shape_cast %33 : vector<16x16x128xbf16> to vector<256x128xbf16>
    %c0_45 = arith.constant 0 : index
    %c0_46 = arith.constant 0 : index
    %c2_47 = arith.constant 2 : index
    %c2_48 = arith.constant 2 : index
    %c0_49 = arith.constant 0 : index
    %35 = vector.load %arg1[%c0_45, %c0_46, %c2_47, %c2_48, %c0_49] : memref<1x1x18x18x128xbf16, #tpu.memory_space<vmem>>, vector<1x1x16x16x128xbf16>
    %36 = vector.shape_cast %35 : vector<1x1x16x16x128xbf16> to vector<16x16x128xbf16>
    %37 = vector.shape_cast %36 : vector<16x16x128xbf16> to vector<256x128xbf16>
    %38 = tpu.concatenate %31, %34, %37 in 1 : vector<256x128xbf16>, vector<256x128xbf16>, vector<256x128xbf16> -> vector<256x384xbf16>
    %c2_50 = arith.constant 2 : index
    %c0_51 = arith.constant 0 : index
    %c0_52 = arith.constant 0 : index
    %39 = vector.load %arg2[%c2_50, %c0_51, %c0_52] : memref<3x384x128xbf16, #tpu.memory_space<vmem>>, vector<1x384x128xbf16>
    %40 = vector.shape_cast %39 : vector<1x384x128xbf16> to vector<384x128xbf16>
    %cst_53 = arith.constant dense<0.000000e+00> : vector<256x128xf32>
    %41 = tpu.matmul %38, %40, %cst_53 {dimension_numbers = #tpu.dot_dimension_numbers<[1], [0], [0], [1], [0, 0, 1, 1], [], []>} : vector<256x384xbf16>, vector<384x128xbf16>, vector<256x128xf32> -> vector<256x128xf32>
    %42 = arith.addf %28, %41 : vector<256x128xf32>
    %c0_54 = arith.constant 0 : index
    %c0_55 = arith.constant 0 : index
    %43 = vector.load %arg3[%c0_54, %c0_55] : memref<1x128xf32, #tpu.memory_space<vmem>>, vector<1x128xf32>
    %44 = vector.broadcast %43 : vector<1x128xf32> to vector<256x128xf32>
    %45 = arith.addf %42, %44 : vector<256x128xf32>
    %46 = vector.shape_cast %45 : vector<256x128xf32> to vector<16x16x128xf32>
    %c0_56 = arith.constant 0 : index
    %c0_57 = arith.constant 0 : index
    %c0_58 = arith.constant 0 : index
    %c0_59 = arith.constant 0 : index
    %47 = vector.load %arg4[%c0_56, %c0_57, %c0_58, %c0_59] : memref<1x16x16x128xbf16, #tpu.memory_space<vmem>>, vector<1x16x16x128xbf16>
    %48 = vector.shape_cast %47 : vector<1x16x16x128xbf16> to vector<16x16x128xbf16>
    %49 = arith.extf %48 : vector<16x16x128xbf16> to vector<16x16x128xf32>
    %50 = arith.addf %46, %49 : vector<16x16x128xf32>
    %cst_60 = arith.constant 0.000000e+00 : f32
    %51 = vector.broadcast %cst_60 : f32 to vector<16x16x128xf32>
    %52 = arith.maximumf %50, %51 : vector<16x16x128xf32>
    %53 = arith.truncf %52 : vector<16x16x128xf32> to vector<16x16x128xbf16>
    %c0_61 = arith.constant 0 : index
    %c0_62 = arith.constant 0 : index
    %c0_63 = arith.constant 0 : index
    %c0_64 = arith.constant 0 : index
    %54 = vector.load %arg5[%c0_61, %c0_62, %c0_63, %c0_64] : memref<1x16x16x128xbf16, #tpu.memory_space<vmem>>, vector<1x16x16x128xbf16>
    %55 = vector.shape_cast %54 : vector<1x16x16x128xbf16> to vector<16x16x128xbf16>
    %56 = vector.shape_cast %53 : vector<16x16x128xbf16> to vector<1x16x16x128xbf16>
    tpu.vector_store %arg5[%c0_61, %c0_62, %c0_63, %c0_64], %56 {strides = array<i32>} : memref<1x16x16x128xbf16, #tpu.memory_space<vmem>>, vector<1x16x16x128xbf16>,
    return
  }
  func.func @transform_0(%arg0: i32) -> (i32, i32, i32, i32, i32) {
    %c0_i32 = arith.constant 0 : i32
    %c0_i32_0 = arith.constant 0 : i32
    %c0_i32_1 = arith.constant 0 : i32
    %c0_i32_2 = arith.constant 0 : i32
    %c0_i32_3 = arith.constant 0 : i32
    return %arg0, %c0_i32, %c0_i32_0, %c0_i32_1, %c0_i32_2 : i32, i32, i32, i32, i32
  }
  func.func @transform_1(%arg0: i32) -> (i32, i32, i32) {
    %c0_i32 = arith.constant 0 : i32
    %c0_i32_0 = arith.constant 0 : i32
    %c0_i32_1 = arith.constant 0 : i32
    %c0_i32_2 = arith.constant 0 : i32
    return %c0_i32, %c0_i32_0, %c0_i32_1 : i32, i32, i32
  }
  func.func @transform_2(%arg0: i32) -> (i32, i32) {
    %c0_i32 = arith.constant 0 : i32
    %c0_i32_0 = arith.constant 0 : i32
    %c0_i32_1 = arith.constant 0 : i32
    return %c0_i32, %c0_i32_0 : i32, i32
  }
  func.func @transform_3(%arg0: i32) -> (i32, i32, i32, i32) {
    %c0_i32 = arith.constant 0 : i32
    %c0_i32_0 = arith.constant 0 : i32
    %c0_i32_1 = arith.constant 0 : i32
    %c0_i32_2 = arith.constant 0 : i32
    return %arg0, %c0_i32, %c0_i32_0, %c0_i32_1 : i32, i32, i32, i32
  }
  func.func @transform_4(%arg0: i32) -> (i32, i32, i32, i32) {
    %c0_i32 = arith.constant 0 : i32
    %c0_i32_0 = arith.constant 0 : i32
    %c0_i32_1 = arith.constant 0 : i32
    %c0_i32_2 = arith.constant 0 : i32
    return %arg0, %c0_i32, %c0_i32_0, %c0_i32_1 : i32, i32, i32, i32
  }
}

</mosaic_0001>

<bundles_post_ra>
// kernel: basic_block_forward.2
= control target key start
LH: loop header
LB: loop body
LE: loop exit
PB: predicated region body
PF: predicated region fallthrough
CT: control target
= control target key end

     0   :  { %s6773_s21 = smov 0   ;;  %s8882_s0 = inlined_call_operand.vmem [shape: bf16[2,4,17,17,128], index: 0, kind: input, shape index: {}]   ;;  %s8883_s1 = inlined_call_operand.vmem [shape: bf16[3,384,128], index: 1, kind: input, shape index: {}]   ;;  %s8884_s2 = inlined_call_operand.vmem [shape: f32[1,128], index: 2, kind: input, shape index: {}]   ;;  %s8885_s3 = inlined_call_operand.vmem [shape: bf16[1,128,128], index: 3, kind: input, shape index: {}]   ;;  %s8886_s4 = inlined_call_operand.vmem [shape: f32[1,128], index: 4, kind: input, shape index: {}]   ;;  %s8887_s5 = inlined_call_operand.vmem [shape: bf16[2,16,16,128], index: 5, kind: output, shape index: {0}]   ;;  %s8888_s6 = inlined_call_operand.vmem [shape: bf16[2,16,16,128], index: 6, kind: output, shape index: {1}]  }
   0x1 LB: > { %s4849_s22 = sadd.s32 4294967295, %s6736_s21   ;;  %p4853_p0 = scmp.ge.s32.totalorder %s6736_s21, 1  ;;  %s6736_s21 = sphi %s6773_s21, %s17_s21  }
   0x2   : > { %p215_p1 = scmp.lt.s32.totalorder %s6736_s21, 3 }
   0x4   : > { %p216_p2 = pnand %p4853_p0, %p215_p1 }
   0x6   : > { %219 = sbr.rel (%p216_p2) target bundleno = 602 (0x25a), region = 40 }
   0xd   : > { %v6536_v0 = vld [vmem:[%s8883_s1 + $0x100] sm:$0xff]   ;;  %v6539_v3 = vld [vmem:[%s8883_s1 + $0x108] sm:$0xff]   ;;  %v6542_v6 = vld [vmem:[%s8883_s1 + $0x110] sm:$0xff]   ;;  %p250_p3 = scmp.lt.s32.totalorder %s4849_s22, 1  ;;  %vm347_vm0 = vsmask.f32 3328 }
   0xe   : > { %v6537_v1 = vld [vmem:[%s8883_s1 + $0x140] sm:$0xff]   ;;  %5743 = vmatprep.subr.bf16.mxu0 %v6536_v0  ;;  %v6540_v4 = vld [vmem:[%s8883_s1 + $0x148] sm:$0xff]   ;;  %v6543_v7 = vld [vmem:[%s8883_s1 + $0x150] sm:$0xff]   ;;  %vm348_vm1 = vsmask.f32 7440 }
   0xf   : > { %v6538_v2 = vld [vmem:[%s8883_s1 + $0xc0] sm:$0xff]   ;;  %6175 = vmatprep.subr.bf16.mxu1 %v6537_v1  ;;  %v6541_v5 = vld [vmem:[%s8883_s1 + $0xc8] sm:$0xff]   ;;  %v6544_v8 = vld [vmem:[%s8883_s1 + $0xd0] sm:$0xff]   ;;  %s9124_s22 = smov (!%p250_p3, %s4849_s22), 1 }
  0x10   : > { %5744 = vmatpush3.bf16.msra.mxu0 %v6538_v2  ;;  %6176 = vmatpush3.bf16.msra.mxu1 %v6537_v1  ;;  %v6545_v9 = vld [vmem:[%s8883_s1 + $0x118] sm:$0xff]   ;;  %v6548_v12 = vld [vmem:[%s8883_s1 + $0x120] sm:$0xff]   ;;  %v6551_v15 = vld [vmem:[%s8883_s1 + $0x128] sm:$0xff]   ;;  %s6527_s11 = smul.u32 816, %s9124_s22  ;;  %s5487_s15 = sshll.u32 %s9124_s22, 7 }
  0x11   : > { %5745 = vmatprep.subr.bf16.mxu0 %v6539_v3  ;;  %6177 = vmatprep.subr.bf16.mxu1 %v6540_v4  ;;  %v6546_v10 = vld [vmem:[%s8883_s1 + $0x158] sm:$0xff]   ;;  %v6549_v13 = vld [vmem:[%s8883_s1 + $0x160] sm:$0xff]   ;;  %v6552_v16 = vld [vmem:[%s8883_s1 + $0x168] sm:$0xff]   ;;  %s8740_s18 = scalar_lea.vmem %s8888_s6, %s5487_s15  ;;  %s8776_s26 = scalar_lea.vmem %s8887_s5, %s5487_s15 }
  0x12   : > { %v6547_v11 = vld [vmem:[%s8883_s1 + $0xd8] sm:$0xff]   ;;  %v6550_v14 = vld [vmem:[%s8883_s1 + $0xe0] sm:$0xff]   ;;  %v6553_v17 = vld [vmem:[%s8883_s1 + $0xe8] sm:$0xff]   ;;  %s6854_s24 = scalar_lea.vmem %s8882_s0, %s6527_s11 }
  0x13   : > { %v6554_v18 = vld [vmem:[%s8883_s1 + $0x130] sm:$0xff]   ;;  %v6557_v21 = vld [vmem:[%s8883_s1 + $0x138] sm:$0xff]   ;;  %v6560_v23 = vld [vmem:[%s6854_s24 + $0x264] sm:$0xff]  }
  0x14   : > { %5746 = vmatpush3.bf16.msra.mxu0 %v6541_v5  ;;  %6178 = vmatpush3.bf16.msra.mxu1 %v6540_v4  ;;  %v6555_v19 = vld [vmem:[%s8883_s1 + $0x170] sm:$0xff]   ;;  %v6558_v22 = vld [vmem:[%s8883_s1 + $0x178] sm:$0xff]   ;;  %v5003_v27 = vld [vmem:[%s6854_s24 + $0x1a0] sm:$0x1] }
  0x15   : > { %5747 = vmatprep.subr.bf16.mxu0 %v6542_v6  ;;  %6179 = vmatprep.subr.bf16.mxu1 %v6543_v7  ;;  %v6556_v20 = vld [vmem:[%s8883_s1 + $0xf0] sm:$0xff]   ;;  %v4939_v24 = vld [vmem:[%s6854_s24 + $0x198] sm:$0xf]  ;;  %v4940_v26 = vld [vmem:[%s6854_s24 + $0x19c] sm:$0xf]  ;;  %v1140_v32 = vshll.u32 %v5003_v27, 16 }
  0x16   : > { %v6559_v25 = vld [vmem:[%s8883_s1 + $0xf8] sm:$0xff]   ;;  %1985 = vmatprep.mubr.bf16.mxu0 %v6560_v23  ;;  %v1121_v28 = vshrl.u32 %v4939_v24, 16  ;;  %v1124_v29 = vshll.u32 %v4939_v24, 16  ;;  %v1130_v30 = vshll.u32 %v4940_v26, 16  ;;  %v1134_v31 = vshrl.u32 %v4940_v26, 16  ;;  %v6562_v34 = vld [vmem:[%s8883_s1 + $0x40] sm:$0xff]   ;;  %vm6885_vm2 = vmor %vm347_vm0, %vm348_vm1 }
  0x17   : > { %v6870_v33 = vld [vmem:[%s6854_s24 + $0x1a4] sm:$0xf]  ;;  %v6876_v37 = vld [vmem:[%s6854_s24 + $0x1a8] sm:$0xf]  ;;  %v5004_v38 = vld [vmem:[%s6854_s24 + $0x1ac] sm:$0x1]  ;;  %v5019_v49 = vcombine.low %v4939_v24, %v4940_v26 }
  0x18   : > { %5748 = vmatpush3.bf16.msra.mxu0 %v6544_v8  ;;  %6180 = vmatpush3.bf16.msra.mxu1 %v6543_v7  ;;  %v1123_v35 = vrot.slane %v1121_v28, 4  ;;  %v1126_v36 = vrot.slane %v1124_v29, 5  ;;  %v1132_v39 = vrot.slane %v1130_v30, 5  ;;  %v1136_v40 = vrot.slane %v1134_v31, 4  ;;  %v6564_v58 = vld [vmem:[%s8883_s1 + $0x1c0] sm:$0xff]   ;;  %v6566_v0 = vld [vmem:[%s6854_s24 + $0x270] sm:$0xff]  }
  0x19   : > { %5749 = vmatprep.subr.bf16.mxu0 %v6545_v9  ;;  %6181 = vmatprep.subr.bf16.mxu1 %v6546_v10  ;;  %v1142_v41 = vrot.slane %v1140_v32, 5  ;;  %v1145_v42 = vshrl.u32 %v6870_v33, 16  ;;  %v1148_v44 = vshll.u32 %v6870_v33, 16  ;;  %v1154_v45 = vshll.u32 %v6876_v37, 16  ;;  %v6565_v59 = vld [vmem:[%s8883_s1 + $0x180] sm:$0xff]   ;;  %v6568_v24 = vld [vmem:[%s8883_s1 + $0x48] sm:$0xff]  }
  0x1a   : > { %v1127_v43 = vor.u32 %v1126_v36, %v1123_v35  ;;  %v1158_v46 = vshrl.u32 %v6876_v37, 16  ;;  %v1137_v48 = vor.u32 %v1136_v40, %v1132_v39  ;;  %v1164_v51 = vshll.u32 %v5004_v38, 16  ;;  %v6901_v1 = vld [vmem:[%s6854_s24 + $0x1b0] sm:$0xf]  ;;  %v6563_v5 = vld [vmem:[%s8883_s1] sm:$0xff]  }
  0x1b   : > { %v1147_v50 = vrot.slane %v1145_v42, 4  ;;  %v1150_v53 = vrot.slane %v1148_v44, 5  ;;  %v1156_v54 = vrot.slane %v1154_v45, 5  ;;  %v6907_v6 = vld [vmem:[%s6854_s24 + $0x1b4] sm:$0xf]  ;;  %v5020_v8 = vcombine.low %v6870_v33, %v6876_v37  ;;  %v6569_v33 = vld [vmem:[%s8883_s1 + $0x8] sm:$0xff]  }
  0x1c   : > { %5750 = vmatpush3.bf16.msra.mxu0 %v6547_v11  ;;  %6182 = vmatpush3.bf16.msra.mxu1 %v6546_v10  ;;  %v1128_v52 = vrot.slane %v1127_v43, 4  ;;  %v1160_v55 = vrot.slane %v1158_v46, 4  ;;  %v1138_v56 = vrot.slane %v1137_v48, 4  ;;  %v1166_v57 = vrot.slane %v1164_v51, 5  ;;  %v5005_v7 = vld [vmem:[%s6854_s24 + $0x1b8] sm:$0x1] }
  0x1d   : > { %5751 = vmatprep.subr.bf16.mxu0 %v6548_v12  ;;  %6183 = vmatprep.subr.bf16.mxu1 %v6549_v13  ;;  %v1151_v61 = vor.u32 %v1150_v53, %v1147_v50  ;;  %v1169_v9 = vshrl.u32 %v6901_v1, 16  ;;  %v1172_v10 = vshll.u32 %v6901_v1, 16  ;;  %v1178_v11 = vshll.u32 %v6907_v6, 16  ;;  %v6570_v36 = vld [vmem:[%s6854_s24 + $0x27c] sm:$0xff]   ;;  %v6939_v43 = vld [vmem:[%s6854_s24 + $0x1c8] sm:$0xf] }
  0x1e   : > { %v1133_v60 = vsel %vm6885_vm2, %v1128_v52, %v1132_v39  ;;  %v1161_v62 = vor.u32 %v1160_v55, %v1156_v54  ;;  %v1143_v63 = vsel %vm6885_vm2, %v1138_v56, %v1142_v41  ;;  %v1182_v12 = vshrl.u32 %v6907_v6, 16  ;;  %v6942_v44 = vld [vmem:[%s6854_s24 + $0x1cc] sm:$0xf]  ;;  %v6572_v46 = vld [vmem:[%s8883_s1 + $0x50] sm:$0xff]  }
  0x1f   : > { %v5051_v2 = vcombine.low %v1133_v60, %v1143_v63  ;;  %v1152_v3 = vrot.slane %v1151_v61, 4  ;;  %v1180_v23 = vrot.slane %v1178_v11, 5  ;;  %v5021_v45 = vcombine.low %v6901_v1, %v6907_v6  ;;  %v5007_v50 = vld [vmem:[%s6854_s24 + $0x1d0] sm:$0x1]  ;;  %v6955_v53 = vld [vmem:[%s6854_s24 + $0x1d4] sm:$0xf] }
  0x20   : > { %5752 = vmatpush3.bf16.msra.mxu0 %v6550_v14  ;;  %6184 = vmatpush3.bf16.msra.mxu1 %v6549_v13  ;;  %v1162_v4 = vrot.slane %v1161_v62, 4  ;;  %v6917_v13 = vld [vmem:[%s6854_s24 + $0x1bc] sm:$0xf]  ;;  %v1217_v51 = vshrl.u32 %v6939_v43, 16  ;;  %v1220_v52 = vshll.u32 %v6939_v43, 16  ;;  %v1226_v56 = vshll.u32 %v6942_v44, 16 }
  0x21   : > { %5753 = vmatprep.subr.bf16.mxu0 %v6551_v15  ;;  %6185 = vmatprep.subr.bf16.mxu1 %v6552_v16  ;;  %v1157_v14 = vsel %vm6885_vm2, %v1152_v3, %v1156_v54  ;;  %v1196_v28 = vshll.u32 %v6917_v13, 16  ;;  %v6574_v1 = vld [vmem:[%s8883_s1 + $0x1c8] sm:$0xff]  }
  0x22   : > { %6191 = vmatprep.mubr.bf16.mxu1 %v5051_v2  ;;  %v1167_v15 = vsel %vm6885_vm2, %v1162_v4, %v1166_v57  ;;  %v1230_v57 = vshrl.u32 %v6942_v44, 16  ;;  %v1219_v62 = vrot.slane %v1217_v51, 4  ;;  %v1222_v63 = vrot.slane %v1220_v52, 5  ;;  %v6575_v6 = vld [vmem:[%s8883_s1 + $0x188] sm:$0xff]  }
  0x23   : > { %v1198_v35 = vrot.slane %v1196_v28, 5  ;;  %v1228_v3 = vrot.slane %v1226_v56, 5  ;;  %v6578_v28 = vld [vmem:[%s8883_s1 + $0x58] sm:$0xff]  }
  0x24   : > { %5754 = vmatpush3.bf16.msra.mxu0 %v6553_v17  ;;  %6186 = vmatpush3.bf16.msra.mxu1 %v6552_v16  ;;  %v1188_v16 = vshll.u32 %v5005_v7, 16  ;;  %v6924_v17 = vld [vmem:[%s6854_s24 + $0x1c0] sm:$0xf]  ;;  %v1232_v4 = vrot.slane %v1230_v57, 4 }
  0x25   : > { %5755 = vmatprep.subr.bf16.mxu0 %v6554_v18  ;;  %6187 = vmatprep.subr.bf16.mxu1 %v6555_v19  ;;  %v5006_v18 = vld [vmem:[%s6854_s24 + $0x1c4] sm:$0x1]  ;;  %v1202_v30 = vshll.u32 %v6924_v17, 16  ;;  %v1206_v31 = vshrl.u32 %v6924_v17, 16 }
  0x26   : > { %v1190_v26 = vrot.slane %v1188_v16, 5  ;;  %v1212_v32 = vshll.u32 %v5006_v18, 16 }
  0x27   : > { %v1204_v38 = vrot.slane %v1202_v30, 5  ;;  %v1208_v39 = vrot.slane %v1206_v31, 4  ;;  %v6991_v31 = vld [vmem:[%s6854_s24 + $0x1e0] sm:$0xf] }
  0x28   : > { %5756 = vmatpush3.bf16.msra.mxu0 %v6556_v20  ;;  %6188 = vmatpush3.bf16.msra.mxu1 %v6555_v19  ;;  %v1193_v19 = vshrl.u32 %v6917_v13, 16  ;;  %v5052_v20 = vcombine.low %v1157_v14, %v1167_v15  ;;  %v1214_v40 = vrot.slane %v1212_v32, 5  ;;  %v5022_v32 = vcombine.low %v6917_v13, %v6924_v17 }
  0x29   : > { %5757 = vmatprep.subr.bf16.mxu0 %v6557_v21  ;;  %6189 = vmatprep.subr.bf16.mxu1 %v6558_v22  ;;  %v1171_v21 = vrot.slane %v1169_v9, 4  ;;  %v1241_v9 = vshrl.u32 %v6955_v53, 16 }
  0x2a   : > { %v1195_v27 = vrot.slane %v1193_v19, 4 }
  0x2b   : > { %v1243_v18 = vrot.slane %v1241_v9, 4 }
  0x2c   : > { %5758 = vmatpush3.bf16.msra.mxu0 %v6559_v25  ;;  %6190 = vmatpush3.bf16.msra.mxu1 %v6558_v22  ;;  %v1174_v22 = vrot.slane %v1172_v10, 5  ;;  %v1184_v25 = vrot.slane %v1182_v12, 4  ;;  %v1199_v42 = vor.u32 %v1198_v35, %v1195_v27  ;;  %v1244_v10 = vshll.u32 %v6955_v53, 16 }
  0x2d   : > { %5879 = vmatprep.subr.bf16.mxu1 %v6562_v34  ;;  %6015 = vmatprep.subr.bf16.mxu0 %v6564_v58  ;;  %v6962_v58 = vld [vmem:[%s6854_s24 + $0x1d8] sm:$0xf]  ;;  %v1233_v12 = vor.u32 %v1232_v4, %v1228_v3 }
  0x2e   : > { %v1175_v29 = vor.u32 %v1174_v22, %v1171_v21  ;;  %v1185_v34 = vor.u32 %v1184_v25, %v1180_v23  ;;  %v1200_v55 = vrot.slane %v1199_v42, 4  ;;  %v1250_v15 = vshll.u32 %v6962_v58, 16  ;;  %v7007_v42 = vld [vmem:[%s6854_s24 + $0x1ec] sm:$0xf] }
  0x2f   : > { %1986 = vmatmul.mubr.bf16.vlgmr.msra.gmra.mrb[0].mxu0 %v5019_v49  ;;  %6192 = vmatmul.mubr.bf16.vlgmr.msra.gmra.mrb[0].mxu1 %v5052_v20  ;;  %v1209_v49 = vor.u32 %v1208_v39, %v1204_v38  ;;  %v1246_v19 = vrot.slane %v1244_v10, 5  ;;  %v1254_v20 = vshrl.u32 %v6962_v58, 16  ;;  %v1234_v21 = vrot.slane %v1233_v12, 4  ;;  %v6583_v10 = vld [vmem:[%s8883_s1 + $0x20] sm:$0xff]  }
  0x30   : > { %6016 = vmatpush3.bf16.msra.mxu0 %v6565_v59  ;;  %1993 = vmatprep.mubr.bf16.mxu0 %v6566_v0  ;;  %v1176_v37 = vrot.slane %v1175_v29, 4  ;;  %v1186_v41 = vrot.slane %v1185_v34, 4  ;;  %v6573_v59 = vld [vmem:[%s8883_s1 + $0x10] sm:$0xff]   ;;  %v5008_v0 = vld [vmem:[%s6854_s24 + $0x1dc] sm:$0x1]  ;;  %v1205_v2 = vsel %vm6885_vm2, %v1200_v55, %v1204_v38  ;;  %v1252_v22 = vrot.slane %v1250_v15, 5 }
  0x31   : > { %5880 = vmatpush3.bf16.msra.mxu1 %v6563_v5  ;;  %v1210_v61 = vrot.slane %v1209_v49, 4  ;;  %v1236_v5 = vshll.u32 %v5007_v50, 16  ;;  %6017 = vmatprep.subr.bf16.mxu0 %v6574_v1  ;;  %v1256_v27 = vrot.slane %v1254_v20, 4  ;;  %v5009_v38 = vld [vmem:[%s6854_s24 + $0x1e8] sm:$0x1]  ;;  %v1265_v39 = vshrl.u32 %v6991_v31, 16 }
  0x32   : > { %5881 = vmatprep.subr.bf16.mxu1 %v6568_v24  ;;  %v1181_v48 = vsel %vm6885_vm2, %v1176_v37, %v1180_v23  ;;  %v1191_v54 = vsel %vm6885_vm2, %v1186_v41, %v1190_v26  ;;  %v1260_v23 = vshll.u32 %v5008_v0, 16  ;;  %v6576_v24 = vld [vmem:[%s6854_s24 + $0x288] sm:$0xff]   ;;  %v1247_v26 = vor.u32 %v1246_v19, %v1243_v18  ;;  %v6999_v37 = vld [vmem:[%s6854_s24 + $0x1e4] sm:$0xf]  ;;  %v7012_v49 = vld [vmem:[%s6854_s24 + $0x1f0] sm:$0xf] }
  0x33   : > { %v5053_v60 = vcombine.low %v1181_v48, %v1191_v54  ;;  %v1215_v7 = vsel %vm6885_vm2, %v1210_v61, %v1214_v40  ;;  %v1238_v14 = vrot.slane %v1236_v5, 5  ;;  %v1268_v40 = vshll.u32 %v6991_v31, 16  ;;  %v5010_v50 = vld [vmem:[%s6854_s24 + $0x1f4] sm:$0x1]  ;;  %v7032_v15 = vld [vmem:[%s6854_s24 + $0x1fc] sm:$0xf] }
  0x34   : > { %v5054_v11 = vcombine.low %v1205_v2, %v1215_v7  ;;  %6018 = vmatpush3.bf16.msra.mxu0 %v6575_v6  ;;  %v1262_v30 = vrot.slane %v1260_v23, 5  ;;  %v1248_v35 = vrot.slane %v1247_v26, 4  ;;  %v1274_v41 = vshll.u32 %v6999_v37, 16  ;;  %v6580_v61 = vld [vmem:[%s6854_s24 + $0x294] sm:$0xff]   ;;  %v6582_v2 = vld [vmem:[%s8883_s1 + $0x60] sm:$0xff]  }
  0x35   : > { %5882 = vmatpush3.bf16.msra.mxu1 %v6569_v33  ;;  %6195 = vmatprep.mubr.bf16.mxu1 %v5053_v60  ;;  %v1239_v29 = vsel %vm6885_vm2, %v1234_v21, %v1238_v14  ;;  %v6579_v33 = vld [vmem:[%s8883_s1 + $0x18] sm:$0xff]   ;;  %v1278_v13 = vshrl.u32 %v6999_v37, 16  ;;  %v1284_v17 = vshll.u32 %v5009_v38, 16  ;;  %v1267_v48 = vrot.slane %v1265_v39, 4  ;;  %v6584_v18 = vld [vmem:[%s8883_s1 + $0x1d0] sm:$0xff]  }
  0x36   : > { %5883 = vmatprep.subr.bf16.mxu1 %v6572_v46  ;;  %v1270_v51 = vrot.slane %v1268_v40, 5  ;;  %v1276_v52 = vrot.slane %v1274_v41, 5  ;;  %v1289_v57 = vshrl.u32 %v7007_v42, 16  ;;  %v1298_v60 = vshll.u32 %v7012_v49, 16  ;;  %v7029_v14 = vld [vmem:[%s6854_s24 + $0x1f8] sm:$0xf]  ;;  %6019 = vmatprep.subr.bf16.mxu0 %v6584_v18 }
  0x37   : > { %1994 = vmatmul.mubr.bf16.gmra.mrb[4].mxu0 %v5020_v8  ;;  %v1223_v8 = vor.u32 %v1222_v63, %v1219_v62  ;;  %6196 = vmatmul.mubr.bf16.gmra.mrb[4].mxu1 %v5054_v11  ;;  %v1280_v54 = vrot.slane %v1278_v13, 4  ;;  %v1286_v55 = vrot.slane %v1284_v17, 5  ;;  %v1302_v1 = vshrl.u32 %v7012_v49, 16  ;;  %v6588_v41 = vld [vmem:[%s8883_s1 + $0x68] sm:$0xff]  }
  0x38   : > { %2001 = vmatprep.mubr.bf16.mxu0 %v6570_v36  ;;  %v1257_v36 = vor.u32 %v1256_v27, %v1252_v22  ;;  %v1271_v63 = vor.u32 %v1270_v51, %v1267_v48  ;;  %v1300_v5 = vrot.slane %v1298_v60, 5  ;;  %v1308_v6 = vshll.u32 %v5010_v50, 16  ;;  %v6589_v48 = vld [vmem:[%s8883_s1 + $0x28] sm:$0xff]  }
  0x39   : > { %5884 = vmatpush3.bf16.msra.mxu1 %v6573_v59  ;;  %v1224_v16 = vrot.slane %v1223_v8, 4  ;;  %v1292_v59 = vshll.u32 %v7007_v42, 16  ;;  %v1281_v0 = vor.u32 %v1280_v54, %v1276_v52  ;;  %v1304_v9 = vrot.slane %v1302_v1, 4  ;;  %v6590_v60 = vld [vmem:[%s6854_s24 + $0x2ac] sm:$0xff]  }
  0x3a   : > { %5885 = vmatprep.subr.bf16.mxu1 %v6578_v28  ;;  %v1258_v46 = vrot.slane %v1257_v36, 4  ;;  %v1272_v7 = vrot.slane %v1271_v63, 4  ;;  %v1310_v12 = vrot.slane %v1308_v6, 5  ;;  %v1313_v23 = vshrl.u32 %v7029_v14, 16  ;;  %v7054_v28 = vld [vmem:[%s6854_s24 + $0x208] sm:$0xf] }
  0x3b   : > { %v1229_v25 = vsel %vm6885_vm2, %v1224_v16, %v1228_v3  ;;  %v1291_v3 = vrot.slane %v1289_v57, 4  ;;  %v1294_v4 = vrot.slane %v1292_v59, 5  ;;  %v1282_v8 = vrot.slane %v1281_v0, 4  ;;  %v7082_v6 = vld [vmem:[%s6854_s24 + $0x210] sm:$0xf] }
  0x3c   : > { %v5055_v34 = vcombine.low %v1229_v25, %v1239_v29  ;;  %v1263_v56 = vsel %vm6885_vm2, %v1258_v46, %v1262_v30  ;;  %v5023_v16 = vcombine.low %v6939_v43, %v6942_v44  ;;  %v1277_v19 = vsel %vm6885_vm2, %v1272_v7, %v1276_v52  ;;  %v6585_v43 = vld [vmem:[%s8883_s1 + $0x190] sm:$0xff]   ;;  %v6586_v29 = vld [vmem:[%s6854_s24 + $0x2a0] sm:$0xff]  }
  0x3d   : > { %5886 = vmatpush3.bf16.msra.mxu1 %v6579_v33  ;;  %v1295_v11 = vor.u32 %v1294_v4, %v1291_v3  ;;  %v1287_v20 = vsel %vm6885_vm2, %v1282_v8, %v1286_v55  ;;  %v1305_v21 = vor.u32 %v1304_v9, %v1300_v5  ;;  %v1316_v26 = vshll.u32 %v7029_v14, 16  ;;  %6020 = vmatpush3.bf16.msra.mxu0 %v6585_v43  ;;  %v6592_v4 = vld [vmem:[%s8883_s1 + $0x70] sm:$0xff]   ;;  %v7105_v43 = vld [vmem:[%s6854_s24 + $0x220] sm:$0xf] }
  0x3e   : > { %6199 = vmatprep.mubr.bf16.mxu1 %v5055_v34  ;;  %5887 = vmatprep.subr.bf16.mxu1 %v6582_v2  ;;  %v5057_v44 = vcombine.low %v1277_v19, %v1287_v20  ;;  %v1322_v27 = vshll.u32 %v7032_v15, 16  ;;  %v1326_v33 = vshrl.u32 %v7032_v15, 16  ;;  %v1346_v54 = vshll.u32 %v7054_v28, 16  ;;  %v7089_v9 = vld [vmem:[%s6854_s24 + $0x214] sm:$0xf] }
  0x3f   : > { %2002 = vmatmul.mubr.bf16.gmra.mrb[8].mxu0 %v5021_v45  ;;  %v1253_v45 = vsel %vm6885_vm2, %v1248_v35, %v1252_v22  ;;  %v5011_v22 = vld [vmem:[%s6854_s24 + $0x200] sm:$0x1]  ;;  %v1296_v25 = vrot.slane %v1295_v11, 4  ;;  %v1306_v30 = vrot.slane %v1305_v21, 4  ;;  %v5012_v35 = vld [vmem:[%s6854_s24 + $0x20c] sm:$0x1]  ;;  %v5024_v63 = vcombine.low %v6955_v53, %v6962_v58 }
  0x40   : > { %2009 = vmatprep.mubr.bf16.mxu0 %v6576_v24  ;;  %v5056_v62 = vcombine.low %v1253_v45, %v1263_v56  ;;  %v7046_v24 = vld [vmem:[%s6854_s24 + $0x204] sm:$0xf]  ;;  %v1332_v34 = vshll.u32 %v5011_v22, 16  ;;  %v1318_v38 = vrot.slane %v1316_v26, 5  ;;  %v1324_v39 = vrot.slane %v1322_v27, 5  ;;  %v6593_v19 = vld [vmem:[%s8883_s1 + $0x30] sm:$0xff]  }
  0x41   : > { %5888 = vmatpush3.bf16.msra.mxu1 %v6583_v10  ;;  %v1301_v36 = vsel %vm6885_vm2, %v1296_v25, %v1300_v5  ;;  %v1337_v40 = vshrl.u32 %v7046_v24, 16  ;;  %v1311_v13 = vsel %vm6885_vm2, %v1306_v30, %v1310_v12  ;;  %v1328_v17 = vrot.slane %v1326_v33, 4  ;;  %v5013_v10 = vld [vmem:[%s6854_s24 + $0x218] sm:$0x1] }
  0x42   : > { %6200 = vmatmul.mubr.bf16.gmra.mrb[8].mxu1 %v5056_v62  ;;  %v1334_v45 = vrot.slane %v1332_v34, 5  ;;  %v1340_v46 = vshll.u32 %v7046_v24, 16  ;;  %v5058_v50 = vcombine.low %v1301_v36, %v1311_v13  ;;  %5889 = vmatprep.subr.bf16.mxu1 %v6588_v41  ;;  %v1350_v57 = vshrl.u32 %v7054_v28, 16  ;;  %v6595_v36 = vld [vmem:[%s8883_s1 + $0x198] sm:$0xff]  }
  0x43   : > { %6203 = vmatprep.mubr.bf16.mxu1 %v5057_v44  ;;  %v1339_v52 = vrot.slane %v1337_v40, 4  ;;  %v1329_v55 = vor.u32 %v1328_v17, %v1324_v39  ;;  %v1356_v59 = vshll.u32 %v5012_v35, 16  ;;  %v1348_v62 = vrot.slane %v1346_v54, 5  ;;  %v6594_v44 = vld [vmem:[%s8883_s1 + $0x1d8] sm:$0xff]  }
  0x44   : > { %v1342_v56 = vrot.slane %v1340_v46, 5  ;;  %v1352_v2 = vrot.slane %v1350_v57, 4  ;;  %v5025_v7 = vcombine.low %v6991_v31, %v6999_v37  ;;  %v1361_v11 = vshrl.u32 %v7082_v6, 16  ;;  %v7097_v37 = vld [vmem:[%s6854_s24 + $0x21c] sm:$0xf]  ;;  %6021 = vmatprep.subr.bf16.mxu0 %v6594_v44 }
  0x45   : > { %5890 = vmatpush3.bf16.msra.mxu1 %v6589_v48  ;;  %v1330_v0 = vrot.slane %v1329_v55, 4  ;;  %v1358_v3 = vrot.slane %v1356_v59, 5  ;;  %v1370_v18 = vshll.u32 %v7089_v9, 16  ;;  %v1374_v31 = vshrl.u32 %v7089_v9, 16  ;;  %v6596_v13 = vld [vmem:[%s6854_s24 + $0x2b8] sm:$0xff]   ;;  %6022 = vmatpush3.bf16.msra.mxu0 %v6595_v36 }
  0x46   : > { %v1343_v1 = vor.u32 %v1342_v56, %v1339_v52  ;;  %v1353_v8 = vor.u32 %v1352_v2, %v1348_v62  ;;  %5891 = vmatprep.subr.bf16.mxu1 %v6592_v4  ;;  %v1363_v22 = vrot.slane %v1361_v11, 4  ;;  %v1385_v30 = vshrl.u32 %v7097_v37, 16  ;;  %v7122_v56 = vld [vmem:[%s6854_s24 + $0x228] sm:$0xf]  ;;  %v7125_v57 = vld [vmem:[%s6854_s24 + $0x22c] sm:$0xf] }
  0x47   : > { %2010 = vmatmul.mubr.bf16.gmra.mrb[12].mxu0 %v5022_v32  ;;  %v1315_v32 = vrot.slane %v1313_v23, 4  ;;  %v1335_v53 = vsel %vm6885_vm2, %v1330_v0, %v1334_v45  ;;  %v1380_v23 = vshll.u32 %v5013_v10, 16  ;;  %v1372_v26 = vrot.slane %v1370_v18, 5  ;;  %v5016_v10 = vld [vmem:[%s6854_s24 + $0x23c] sm:$0x1] }
  0x48   : > { %2017 = vmatprep.mubr.bf16.mxu0 %v6580_v61  ;;  %v1344_v58 = vrot.slane %v1343_v1, 4  ;;  %v1354_v21 = vrot.slane %v1353_v8, 4  ;;  %v1376_v27 = vrot.slane %v1374_v31, 4  ;;  %v1388_v34 = vshll.u32 %v7097_v37, 16  ;;  %v7137_v1 = vld [vmem:[%s6854_s24 + $0x234] sm:$0xf] }
  0x49   : > { %v1319_v51 = vor.u32 %v1318_v38, %v1315_v32  ;;  %5892 = vmatpush3.bf16.msra.mxu1 %v6593_v19  ;;  %v1382_v33 = vrot.slane %v1380_v23, 5  ;;  %v1394_v35 = vshll.u32 %v7105_v43, 16  ;;  %v1387_v41 = vrot.slane %v1385_v30, 4  ;;  %v6598_v18 = vld [vmem:[%s8883_s1 + $0x78] sm:$0xff]  }
  0x4a   : > { %6204 = vmatmul.mubr.bf16.gmra.mrb[12].mxu1 %v5058_v50  ;;  %v1349_v20 = vsel %vm6885_vm2, %v1344_v58, %v1348_v62  ;;  %v1359_v32 = vsel %vm6885_vm2, %v1354_v21, %v1358_v3  ;;  %v1377_v40 = vor.u32 %v1376_v27, %v1372_v26  ;;  %v1390_v17 = vrot.slane %v1388_v34, 5  ;;  %v5015_v62 = vld [vmem:[%s6854_s24 + $0x230] sm:$0x1]  ;;  %5893 = vmatprep.subr.bf16.mxu1 %v6598_v18  ;;  %v6600_v27 = vld [vmem:[%s6854_s24 + $0x2c4] sm:$0xff]  }
  0x4b   : > { %v1320_v61 = vrot.slane %v1319_v51, 4  ;;  %v5060_v38 = vcombine.low %v1349_v20, %v1359_v32  ;;  %v1396_v45 = vrot.slane %v1394_v35, 5  ;;  %v1398_v46 = vshrl.u32 %v7105_v43, 16 }
  0x4c   : > { %v1378_v51 = vrot.slane %v1377_v40, 4  ;;  %v1391_v52 = vor.u32 %v1390_v17, %v1387_v41  ;;  %v5026_v59 = vcombine.low %v7007_v42, %v7012_v49  ;;  %v1412_v0 = vshll.u32 %v7122_v56, 16  ;;  %v7141_v49 = vld [vmem:[%s6854_s24 + $0x238] sm:$0xf]  ;;  %v7165_v41 = vld [vmem:[%s8883_s1 + $0x80] sm:$0xff]  }
  0x4d   : > { %v1325_v5 = vsel %vm6885_vm2, %v1320_v61, %v1324_v39  ;;  %v1400_v54 = vrot.slane %v1398_v46, 4  ;;  %v1418_v42 = vshll.u32 %v7125_v57, 16  ;;  %v1422_v58 = vshrl.u32 %v7125_v57, 16  ;;  %v6605_v46 = vld [vmem:[%s8883_s1 + $0x1e0] sm:$0xff]  }
  0x4e   : > { %v5059_v12 = vcombine.low %v1325_v5, %v1335_v53  ;;  %v1383_v61 = vsel %vm6885_vm2, %v1378_v51, %v1382_v33  ;;  %v1392_v3 = vrot.slane %v1391_v52, 4  ;;  %v1414_v53 = vrot.slane %v1412_v0, 5  ;;  %v7176_v51 = vld [vmem:[%s6854_s24 + $0x244] sm:$0xf]  ;;  %v5017_v52 = vld [vmem:[%s6854_s24 + $0x248] sm:$0x1]  ;;  %6023 = vmatprep.subr.bf16.mxu0 %v6605_v46 }
  0x4f   : > { %2018 = vmatmul.mubr.bf16.gmra.mrb[16].mxu0 %v5023_v16  ;;  %v1364_v16 = vshll.u32 %v7082_v6, 16  ;;  %v1401_v4 = vor.u32 %v1400_v54, %v1396_v45  ;;  %v1428_v8 = vshll.u32 %v5015_v62, 16  ;;  %v1424_v19 = vrot.slane %v1422_v58, 4  ;;  %v6606_v0 = vld [vmem:[%s8883_s1 + $0x1a0] sm:$0xff]   ;;  %v5018_v58 = vld [vmem:[%s6854_s24 + $0x254] sm:$0x1] }
  0x50   : > { %2025 = vmatprep.mubr.bf16.mxu0 %v6586_v29  ;;  %6207 = vmatprep.mubr.bf16.mxu1 %v5059_v12  ;;  %v5014_v29 = vld [vmem:[%s6854_s24 + $0x224] sm:$0x1]  ;;  %v1420_v12 = vrot.slane %v1418_v42, 5  ;;  %v1436_v21 = vshll.u32 %v7137_v1, 16  ;;  %v1452_v36 = vshll.u32 %v5016_v10, 16  ;;  %v1466_v62 = vshll.u32 %v7176_v51, 16 }
  0x51   : > { %v1366_v25 = vrot.slane %v1364_v16, 5  ;;  %v1404_v48 = vshll.u32 %v5014_v29, 16  ;;  %v1402_v11 = vrot.slane %v1401_v4, 4  ;;  %v1433_v16 = vshrl.u32 %v7137_v1, 16  ;;  %v7195_v4 = vld [vmem:[%s6854_s24 + $0x250] sm:$0xf]  ;;  %6024 = vmatpush3.bf16.msra.mxu0 %v6606_v0 }
  0x52   : > { %6208 = vmatmul.mubr.bf16.gmra.mrb[16].mxu1 %v5060_v38  ;;  %v1430_v20 = vrot.slane %v1428_v8, 5  ;;  %v1425_v32 = vor.u32 %v1424_v19, %v1420_v12  ;;  %v1438_v33 = vrot.slane %v1436_v21, 5  ;;  %v1454_v17 = vrot.slane %v1452_v36, 5  ;;  %v6607_v10 = vld [vmem:[%s6854_s24 + $0x2d0] sm:$0xff]   ;;  %v6617_v46 = vld [vmem:[%s8883_s1 + $0x1a8] sm:$0xff]  }
  0x53   : > { %v1367_v39 = vor.u32 %v1366_v25, %v1363_v22  ;;  %v1406_v55 = vrot.slane %v1404_v48, 5  ;;  %v6599_v22 = vld [vmem:[%s8883_s1 + $0x38] sm:$0xff]   ;;  %v1435_v44 = vrot.slane %v1433_v16, 4  ;;  %v1442_v25 = vshll.u32 %v7141_v49, 16 }
  0x54   : > { %5894 = vmatpush3.bf16.msra.mxu1 %v6599_v22  ;;  %v1490_v19 = vshll.u32 %v7195_v4, 16 }
  0x55   : > { %v1368_v50 = vrot.slane %v1367_v39, 4  ;;  %v1407_v23 = vsel %vm6885_vm2, %v1402_v11, %v1406_v55  ;;  %v1444_v34 = vrot.slane %v1442_v25, 5  ;;  %v1426_v39 = vrot.slane %v1425_v32, 4  ;;  %6223 = vmatprep.subr.bf16.mxu1 %v7165_v41 }
  0x56   : > { %v1439_v40 = vor.u32 %v1438_v33, %v1435_v44  ;;  %v5027_v55 = vcombine.low %v7029_v14, %v7032_v15  ;;  %v1492_v25 = vrot.slane %v1490_v19, 5  ;;  %v7256_v19 = vld [vmem:[%s6854_s24 + $0x24] sm:$0xf] }
  0x57   : > { %2026 = vmatmul.mubr.bf16.gmra.mrb[20].mxu0 %v5024_v63  ;;  %v1409_v63 = vshrl.u32 %v7122_v56, 16  ;;  %v1431_v48 = vsel %vm6885_vm2, %v1426_v39, %v1430_v20  ;;  %v1494_v20 = vshrl.u32 %v7195_v4, 16  ;;  %v6616_v39 = vld [vmem:[%s8883_s1 + $0x1e8] sm:$0xff]  }
  0x58   : > { %2033 = vmatprep.mubr.bf16.mxu0 %v6590_v60  ;;  %v1373_v60 = vsel %vm6885_vm2, %v1368_v50, %v1372_v26  ;;  %v1446_v26 = vshrl.u32 %v7141_v49, 16  ;;  %v1440_v50 = vrot.slane %v1439_v40, 4  ;;  %6025 = vmatprep.subr.bf16.mxu0 %v6616_v39  ;;  %v6629_v39 = vld [vmem:[%s6854_s24 + $0x300] sm:$0xff]  }
  0x59   : > { %v5061_v2 = vcombine.low %v1373_v60, %v1383_v61  ;;  %v1411_v5 = vrot.slane %v1409_v63, 4  ;;  %v7186_v63 = vld [vmem:[%s6854_s24 + $0x24c] sm:$0xf]  ;;  %6026 = vmatpush3.bf16.msra.mxu0 %v6617_v46  ;;  %v6619_v46 = vld [vmem:[%s6854_s24 + $0xf0] sm:$0xff]  }
  0x5a   : > { %v1448_v35 = vrot.slane %v1446_v26, 4  ;;  %v1445_v14 = vsel %vm6885_vm2, %v1440_v50, %v1444_v34  ;;  %v1481_v8 = vshrl.u32 %v7186_v63, 16  ;;  %v1484_v16 = vshll.u32 %v7186_v63, 16  ;;  %v268_v50 = vld [vmem:[%s6854_s24 + $0xc] sm:$0xf] }
  0x5b   : > { %6211 = vmatprep.mubr.bf16.mxu1 %v5061_v2  ;;  %v1415_v31 = vor.u32 %v1414_v53, %v1411_v5  ;;  %v1470_v2 = vshrl.u32 %v7176_v51, 16  ;;  %v1468_v53 = vrot.slane %v1466_v62, 5  ;;  %v1496_v26 = vrot.slane %v1494_v20, 4 }
  0x5c   : > { %v1486_v22 = vrot.slane %v1484_v16, 5 }
  0x5d   : > { %v1416_v30 = vrot.slane %v1415_v31, 4  ;;  %v1472_v11 = vrot.slane %v1470_v2, 4  ;;  %v1483_v31 = vrot.slane %v1481_v8, 4  ;;  %v1497_v32 = vor.u32 %v1496_v26, %v1492_v25  ;;  %v6628_v26 = vld [vmem:[%s8883_s1 + $0x1b0] sm:$0xff]  }
  0x5f   : > { %2034 = vmatmul.mubr.bf16.gmra.mrb[24].mxu0 %v5025_v7  ;;  %v1397_v7 = vsel %vm6885_vm2, %v1392_v3, %v1396_v45  ;;  %v1421_v38 = vsel %vm6885_vm2, %v1416_v30, %v1420_v12  ;;  %v7168_v45 = vld [vmem:[%s6854_s24 + $0x240] sm:$0xf]  ;;  %v1476_v3 = vshll.u32 %v5017_v52, 16  ;;  %v1473_v21 = vor.u32 %v1472_v11, %v1468_v53 }
  0x60   : > { %2041 = vmatprep.mubr.bf16.mxu0 %v6596_v13  ;;  %v5062_v29 = vcombine.low %v1397_v7, %v1407_v23  ;;  %v1449_v13 = vor.u32 %v1448_v35, %v1444_v34  ;;  %v1457_v54 = vshrl.u32 %v7168_v45, 16  ;;  %v1460_v61 = vshll.u32 %v7168_v45, 16  ;;  %v6611_v34 = vld [vmem:[%s6854_s24 + $0x2dc] sm:$0xff]  }
  0x61   : > { %v1478_v12 = vrot.slane %v1476_v3, 5  ;;  %v1500_v23 = vshll.u32 %v5018_v58, 16  ;;  %v266_v52 = vld [vmem:[%s6854_s24] sm:$0xf]  ;;  %v6608_v3 = vld [vmem:[%s6854_s24 + $0xd8] sm:$0xff]   ;;  %v6618_v58 = vld [vmem:[%s6854_s24 + $0x2e8] sm:$0xff]   ;;  %v5030_v11 = vcombine.low %v7097_v37, %v7105_v43 }
  0x62   : > { %6212 = vmatmul.mubr.bf16.gmra.mrb[20].mxu1 %v5062_v29  ;;  %v1450_v60 = vrot.slane %v1449_v13, 4  ;;  %v1459_v15 = vrot.slane %v1457_v54, 4  ;;  %v1462_v5 = vrot.slane %v1460_v61, 5  ;;  %v1487_v29 = vor.u32 %v1486_v22, %v1483_v31  ;;  %v6612_v31 = vld [vmem:[%s6854_s24 + $0xe4] sm:$0xff]   ;;  %v7264_v43 = vld [vmem:[%s6854_s24 + $0x1c] sm:$0xf] }
  0x63   : > { %v1502_v33 = vrot.slane %v1500_v23, 5  ;;  %v1498_v13 = vrot.slane %v1497_v32, 4  ;;  %v375_v54 = vshrl.u32 %v268_v50, 16  ;;  %v351_v8 = vshrl.u32 %v266_v52, 16 }
  0x64   : > { %v1455_v42 = vsel %vm6885_vm2, %v1450_v60, %v1454_v17  ;;  %v1463_v18 = vor.u32 %v1462_v5, %v1459_v15  ;;  %v1488_v36 = vrot.slane %v1487_v29, 4  ;;  %v6601_v17 = vld [vmem:[%s6854_s24 + $0xcc] sm:$0xff]   ;;  %v7229_v60 = vld [vmem:[%s6854_s24 + $0x4] sm:$0xf]  ;;  %v354_v16 = vshll.u32 %v266_v52, 16 }
  0x65   : > { %v5064_v7 = vcombine.low %v1445_v14, %v1455_v42  ;;  %v377_v61 = vrot.slane %v375_v54, 4  ;;  %v5029_v14 = vcombine.low %v7082_v6, %v7089_v9  ;;  %v4891_v2 = vcombine.low %v266_v52, %v7229_v60  ;;  %v6615_v42 = vld [vmem:[%s8883_s1 + $0x88] sm:$0xff]   ;;  %v270_v9 = vld [vmem:[%s6854_s24 + $0x18] sm:$0xf]  ;;  %v7299_v52 = vld [vmem:[%s6854_s24 + $0x34] sm:$0xf] }
  0x66   : > { %v1464_v44 = vrot.slane %v1463_v18, 4  ;;  %v353_v20 = vrot.slane %v351_v8, 4  ;;  %v423_v23 = vshrl.u32 %v7256_v19, 16  ;;  %v426_v37 = vshll.u32 %v7256_v19, 16 }
  0x67   : > { %2042 = vmatmul.mubr.bf16.gmra.mrb[28].mxu0 %v5026_v59  ;;  %v5063_v59 = vcombine.low %v1421_v38, %v1431_v48  ;;  %v5028_v38 = vcombine.low %v7046_v24, %v7054_v28  ;;  %v1493_v48 = vsel %vm6885_vm2, %v1488_v36, %v1492_v25  ;;  %v1503_v24 = vsel %vm6885_vm2, %v1498_v13, %v1502_v33 }
  0x68   : > { %2049 = vmatprep.mubr.bf16.mxu0 %v6600_v27  ;;  %v1474_v27 = vrot.slane %v1473_v21, 4  ;;  %v1469_v30 = vsel %vm6885_vm2, %v1464_v44, %v1468_v53  ;;  %v5066_v28 = vcombine.low %v1493_v48, %v1503_v24  ;;  %v6627_v44 = vld [vmem:[%s8883_s1 + $0x1f0] sm:$0xff]   ;;  %v356_v25 = vrot.slane %v354_v16, 5  ;;  %v7292_v48 = vld [vmem:[%s6854_s24 + $0x28] sm:$0xf]  ;;  %v6639_v16 = vld [vmem:[%s8883_s1 + $0x1b8] sm:$0xff]  }
  0x69   : > { %6215 = vmatprep.mubr.bf16.mxu1 %v5063_v59  ;;  %v7226_v59 = vld [vmem:[%s6854_s24 + $0x10] sm:$0xf]  ;;  %v5031_v29 = vcombine.low %v7122_v56, %v7125_v57  ;;  %v408_v33 = vshll.u32 %v7264_v43, 16  ;;  %6027 = vmatprep.subr.bf16.mxu0 %v6627_v44  ;;  %v4893_v56 = vcombine.low %v270_v9, %v7264_v43  ;;  %v5032_v8 = vcombine.low %v7137_v1, %v7141_v49 }
  0x6a   : > { %6216 = vmatmul.mubr.bf16.gmra.mrb[24].mxu1 %v5064_v7  ;;  %v1479_v35 = vsel %vm6885_vm2, %v1474_v27, %v1478_v12  ;;  %v384_v0 = vshll.u32 %v7226_v59, 16  ;;  %v402_v7 = vshll.u32 %v270_v9, 16  ;;  %v6622_v12 = vld [vmem:[%s6854_s24 + $0x2f4] sm:$0xff]   ;;  %v4892_v18 = vcombine.low %v268_v50, %v7226_v59  ;;  %6028 = vmatpush3.bf16.msra.mxu0 %v6628_v26 }
  0x6b   : > { %v5065_v40 = vcombine.low %v1469_v30, %v1479_v35  ;;  %v360_v27 = vshll.u32 %v7229_v60, 16  ;;  %v7276_v30 = vld [vmem:[%s6854_s24 + $0x30] sm:$0xf]  ;;  %v357_v32 = vor.u32 %v356_v25, %v353_v20  ;;  %v428_v35 = vrot.slane %v426_v37, 5  ;;  %v7343_v37 = vld [vmem:[%s6854_s24 + $0x54] sm:$0xf] }
  0x6c   : > { %v7241_v53 = vrot.slane %v384_v0, 5  ;;  %v404_v22 = vrot.slane %v402_v7, 5  ;;  %v447_v36 = vshrl.u32 %v7276_v30, 16  ;;  %v7307_v0 = vld [vmem:[%s6854_s24 + $0x48] sm:$0xf]  ;;  %v6638_v7 = vld [vmem:[%s8883_s1 + $0x1f8] sm:$0xff]   ;;  %v4894_v49 = vcombine.low %v7256_v19, %v7292_v48 }
  0x6d   : > { %6219 = vmatprep.mubr.bf16.mxu1 %v5065_v40  ;;  %v7283_v40 = vld [vmem:[%s6854_s24 + $0x3c] sm:$0xf]  ;;  %v7286_v57 = vrot.slane %v357_v32, 4  ;;  %v7288_v13 = vrot.slane %v360_v27, 5  ;;  %6029 = vmatprep.subr.bf16.mxu0 %v6638_v7  ;;  %v388_v27 = vshrl.u32 %v7226_v59, 16  ;;  %v460_v7 = vshrl.u32 %v7299_v52, 16 }
  0x6e   : > { %v471_v24 = vshrl.u32 %v7283_v40, 16  ;;  %v449_v54 = vrot.slane %v447_v36, 4  ;;  %6030 = vmatpush3.bf16.msra.mxu0 %v6639_v16  ;;  %v7355_v32 = vld [vmem:[%s6854_s24 + $0x4c] sm:$0xf]  ;;  %v5033_v36 = vcombine.low %v7168_v45, %v7176_v51  ;;  %v364_v45 = vshrl.u32 %v7229_v60, 16  ;;  %v6645_v16 = vld [vmem:[%s6854_s24 + $0xd8] sm:$0xff]  }
  0x6f   : > { %2050 = vmatmul.mubr.bf16.gmra.mrb[32].mxu0 %v5027_v55  ;;  %v378_v55 = vshll.u32 %v268_v50, 16  ;;  %v432_v50 = vshll.u32 %v7292_v48, 16  ;;  %v504_v59 = vshll.u32 %v7355_v32, 16 }
  0x70   : > { %2057 = vmatprep.mubr.bf16.mxu0 %v6607_v10  ;;  %v399_v10 = vshrl.u32 %v270_v9, 16  ;;  %v495_v9 = vshrl.u32 %v7307_v0, 16 }
  0x71   : > { %v380_v62 = vrot.slane %v378_v55, 5 }
  0x72   : > { %6220 = vmatmul.mubr.bf16.gmra.mrb[28].mxu1 %v5066_v28  ;;  %v401_v21 = vrot.slane %v399_v10, 4  ;;  %v7295_v28 = vrot.slane %v408_v33, 5  ;;  %v498_v10 = vshll.u32 %v7307_v0, 16  ;;  %v522_v33 = vshll.u32 %v7343_v37, 16 }
  0x73   : > { %2451 = vmatprep.mubr.bf16.mxu1 %v6601_v17  ;;  %v381_v15 = vor.u32 %v380_v62, %v377_v61  ;;  %v474_v62 = vshll.u32 %v7283_v40, 16 }
  0x74   : > { %v405_v17 = vor.u32 %v404_v22, %v401_v21  ;;  %v7340_v21 = vld [vmem:[%s6854_s24 + $0x40] sm:$0xf]  ;;  %v497_v22 = vrot.slane %v495_v9, 4  ;;  %v524_v51 = vrot.slane %v522_v33, 5 }
  0x75   : > { %v7239_v5 = vrot.slane %v381_v15, 4  ;;  %v480_v44 = vshll.u32 %v7340_v21, 16 }
  0x76   : > { %v7312_v15 = vrot.slane %v405_v17, 4  ;;  %v6647_v17 = vld [vmem:[%s8883_s1 + $0xa0] sm:$0xff]  }
  0x77   : > { %2058 = vmatmul.mubr.bf16.gmra.mrb[36].mxu0 %v5028_v38  ;;  %v450_v38 = vshll.u32 %v7276_v30, 16 }
  0x78   : > { %2065 = vmatprep.mubr.bf16.mxu0 %v6611_v34  ;;  %v425_v34 = vrot.slane %v423_v23, 4  ;;  %v500_v23 = vrot.slane %v498_v10, 5 }
  0x79   : > { %v452_v61 = vrot.slane %v450_v38, 5 }
  0x7a   : > { %2452 = vmatmul.mubr.bf16.vlgmr.msra.gmra.mrb[32].mxu1 %v4891_v2  ;;  %v429_v2 = vor.u32 %v428_v35, %v425_v34  ;;  %v412_v35 = vshrl.u32 %v7264_v43, 16  ;;  %v501_v38 = vor.u32 %v500_v23, %v497_v22  ;;  %v6630_v43 = vld [vmem:[%s6854_s24 + $0x108] sm:$0xff]  }
  0x7b   : > { %6224 = vmatpush3.bf16.msra.mxu1 %v7165_v41  ;;  %2459 = vmatprep.mubr.bf16.mxu1 %v6608_v3  ;;  %v6626_v41 = vld [vmem:[%s8883_s1 + $0x90] sm:$0xff]   ;;  %v456_v3 = vshll.u32 %v7299_v52, 16  ;;  %v453_v1 = vor.u32 %v452_v61, %v449_v54  ;;  %v7381_v61 = vld [vmem:[%s8885_s3] sm:$0xff]  }
  0x7c   : > { %6225 = vmatprep.subr.bf16.mxu1 %v6615_v42  ;;  %v414_v60 = vrot.slane %v412_v35, 4  ;;  %6319 = vmatprep.subr.bf16.mxu0 %v7381_v61 }
  0x7d   : > { %v7337_v20 = vrot.slane %v456_v3, 5  ;;  %v7350_v25 = vrot.slane %v453_v1, 4  ;;  %v366_v3 = vrot.slane %v364_v45, 4 }
  0x7e   : > { %v415_v1 = vor.u32 %v414_v60, %v7295_v28 }
  0x7f   : > { %2066 = vmatmul.mubr.bf16.gmra.mrb[40].mxu0 %v5029_v14  ;;  %6226 = vmatpush3.bf16.msra.mxu1 %v6615_v42  ;;  %v6637_v14 = vld [vmem:[%s8883_s1 + $0x98] sm:$0xff]   ;;  %v473_v42 = vrot.slane %v471_v24, 4  ;;  %v390_v24 = vrot.slane %v388_v27, 4  ;;  %v367_v22 = vor.u32 %v366_v3, %v7288_v13  ;;  %v5163_v27 = vld [vmem:[%s6854_s24 + $0xc] sm:$0xf] }
  0x80   : > { %2073 = vmatprep.mubr.bf16.mxu0 %v6618_v58  ;;  %6227 = vmatprep.subr.bf16.mxu1 %v6626_v41  ;;  %v6633_v58 = vld [vmem:[%s6854_s24 + $0x30c] sm:$0xff]  }
  0x81   : > { %v391_v10 = vor.u32 %v390_v24, %v7241_v53 }
  0x82   : > { %2460 = vmatmul.mubr.bf16.gmra.mrb[36].mxu1 %v4892_v18  ;;  %v7332_v18 = vrot.slane %v429_v2, 4  ;;  %v7393_v2 = vld [vmem:[%s6854_s24 + $0x58] sm:$0xf] }
  0x83   : > { %2467 = vmatprep.mubr.bf16.mxu1 %v6612_v31  ;;  %6228 = vmatpush3.bf16.msra.mxu1 %v6626_v41  ;;  %v7334_v31 = vrot.slane %v432_v50, 5  ;;  %v6623_v41 = vld [vmem:[%s6854_s24 + $0xfc] sm:$0xff]   ;;  %v4895_v50 = vcombine.low %v7276_v30, %v7299_v52  ;;  %v7389_v30 = vrot.slane %v501_v38, 4  ;;  %v528_v9 = vshll.u32 %v7393_v2, 16 }
  0x84   : > { %6229 = vmatprep.subr.bf16.mxu1 %v6637_v14  ;;  %v7435_v38 = vrot.slane %v415_v1, 4 }
  0x85   : > { %8942 = vst [vmem:[#allocation3_spill] sm:$0xff] %v7389_v30  ;;  %v7413_v52 = vrot.slane %v528_v9, 5  ;;  %v7452_v9 = vld [vmem:[%s6854_s24 + $0x6c] sm:$0xf] }
  0x87   : > { %2074 = vmatmul.mubr.bf16.gmra.mrb[44].mxu0 %v5030_v11  ;;  %6230 = vmatpush3.bf16.msra.mxu1 %v6637_v14  ;;  %v7387_v14 = vrot.slane %v504_v59, 5  ;;  %8943 = vst [vmem:[#allocation4_spill] sm:$0xff] %v7413_v52  ;;  %v7433_v59 = vrot.slane %v367_v22, 4  ;;  %v7466_v22 = vld [vmem:[%s6854_s24 + $0x70] sm:$0xf] }
  0x88   : > { %2081 = vmatprep.mubr.bf16.mxu0 %v6622_v12  ;;  %v476_v12 = vrot.slane %v474_v62, 5  ;;  %6231 = vmatprep.subr.bf16.mxu1 %v6647_v17  ;;  %v6655_v62 = vld [vmem:[%s6854_s24 + $0xf0] sm:$0xff]  }
  0x89   : > { %8941 = vst [vmem:[#allocation2_spill] sm:$0xff] %v7387_v14 }
  0x8a   : > { %2468 = vmatmul.mubr.bf16.gmra.mrb[40].mxu1 %v4893_v56  ;;  %v477_v26 = vor.u32 %v476_v12, %v473_v42  ;;  %v6640_v56 = vld [vmem:[%s6854_s24 + $0x318] sm:$0xff]   ;;  %v5034_v12 = vcombine.low %v7186_v63, %v7195_v4  ;;  %v7417_v63 = vrot.slane %v391_v10, 4  ;;  %v462_v4 = vrot.slane %v460_v7, 4 }
  0x8b   : > { %2475 = vmatprep.mubr.bf16.mxu1 %v6619_v46  ;;  %6232 = vmatpush3.bf16.msra.mxu1 %v6647_v17  ;;  %v4897_v10 = vcombine.low %v7307_v0, %v7355_v32 }
  0x8c   : > { %v7372_v46 = vrot.slane %v477_v26, 4 }
  0x8f   : > { %2082 = vmatmul.mubr.bf16.gmra.mrb[48].mxu0 %v5031_v29  ;;  %v519_v29 = vshrl.u32 %v7343_v37, 16 }
  0x90   : > { %2089 = vmatprep.mubr.bf16.mxu0 %v6629_v39  ;;  %v7366_v39 = vrot.slane %v480_v44, 5  ;;  %v6634_v44 = vld [vmem:[%s6854_s24 + $0x114] sm:$0xff]  }
  0x91   : > { %v521_v54 = vrot.slane %v519_v29, 4 }
  0x92   : > { %2476 = vmatmul.mubr.bf16.gmra.mrb[44].mxu1 %v4894_v49  ;;  %v484_v49 = vshrl.u32 %v7340_v21, 16 }
  0x93   : > { %2483 = vmatprep.mubr.bf16.mxu1 %v6623_v41  ;;  %v508_v41 = vshrl.u32 %v7355_v32, 16 }
  0x94   : > { %v7428_v33 = vrot.slane %v484_v49, 4 }
  0x95   : > { %v510_v35 = vrot.slane %v508_v41, 4  ;;  %v570_v41 = vshll.u32 %v7452_v9, 16 }
  0x97   : > { %2090 = vmatmul.mubr.bf16.gmra.mrb[52].mxu0 %v5032_v8  ;;  %v525_v8 = vor.u32 %v524_v51, %v521_v54  ;;  %v532_v54 = vshrl.u32 %v7393_v2, 16  ;;  %v6651_v51 = vld [vmem:[%s6854_s24 + $0xe4] sm:$0xff]  }
  0x98   : > { %2097 = vmatprep.mubr.bf16.mxu0 %v6633_v58  ;;  %v436_v58 = vshrl.u32 %v7292_v48, 16  ;;  %v4896_v48 = vcombine.low %v7283_v40, %v7340_v21  ;;  %v6657_v40 = vld [vmem:[%s8883_s1 + $0xa8] sm:$0xff]   ;;  %v5164_v21 = vld [vmem:[%s6854_s24 + $0x10] sm:$0xf] }
  0x99   : > { %v7415_v26 = vrot.slane %v525_v8, 4  ;;  %6233 = vmatprep.subr.bf16.mxu1 %v6657_v40  ;;  %v5243_v45 = vcombine.low %v5163_v27, %v5164_v21  ;;  %v463_v8 = vor.u32 %v462_v4, %v7337_v20  ;;  %v7471_v4 = vrot.slane %v532_v54, 4  ;;  %v5166_v21 = vld [vmem:[%s6854_s24 + $0x1c] sm:$0xf] }
  0x9a   : > { %2484 = vmatmul.mubr.bf16.gmra.mrb[48].mxu1 %v4895_v50  ;;  %v438_v23 = vrot.slane %v436_v58, 4  ;;  %v7443_v50 = vld [vmem:[%s6854_s24 + $0x18] sm:$0xf]  ;;  %v6641_v58 = vld [vmem:[%s6854_s24 + $0x120] sm:$0xff]  }
  0x9b   : > { %2491 = vmatprep.mubr.bf16.mxu1 %v6630_v43  ;;  %8944 = vst [vmem:[#allocation5_spill] sm:$0xff] %v7415_v26  ;;  %6234 = vmatpush3.bf16.msra.mxu1 %v6657_v40  ;;  %v2848_v60 = vshrl.u32 %v7443_v50, 16  ;;  %v2851_v3 = vshll.u32 %v7443_v50, 16  ;;  %v576_v40 = vshll.u32 %v7466_v22, 16 }
  0x9c   : > { %v439_v43 = vor.u32 %v438_v23, %v7334_v31 }
  0x9d   : > { %v2850_v0 = vrot.slane %v2848_v60, 4  ;;  %v2853_v32 = vrot.slane %v2851_v3, 5  ;;  %v5244_v3 = vcombine.low %v7443_v50, %v5166_v21  ;;  %v7491_v42 = vrot.slane %v576_v40, 5 }
  0x9e   : > { %v7468_v23 = vrot.slane %v439_v43, 4  ;;  %v2861_v43 = vshrl.u32 %v5166_v21, 16 }
  0x9f   : > { %2098 = vmatmul.mubr.bf16.gmra.mrb[56].mxu0 %v5033_v36  ;;  %v7431_v36 = vld [vmem:[%s6854_s24 + $0x60] sm:$0xf]  ;;  %v2854_v60 = vor.u32 %v2853_v32, %v2850_v0  ;;  %8946 = vst [vmem:[#allocation7_spill] sm:$0xff] %v7491_v42 }
  0xa0   : > { %2105 = vmatprep.mubr.bf16.mxu0 %v6640_v56  ;;  %v7438_v56 = vld [vmem:[%s6854_s24 + $0x64] sm:$0xf]  ;;  %v543_v17 = vshrl.u32 %v7431_v36, 16  ;;  %v546_v24 = vshll.u32 %v7431_v36, 16 }
  0xa1   : > { %v552_v7 = vshll.u32 %v7438_v56, 16  ;;  %v556_v27 = vshrl.u32 %v7438_v56, 16 }
  0xa2   : > { %2492 = vmatmul.mubr.bf16.gmra.mrb[52].mxu1 %v4896_v48  ;;  %v545_v1 = vrot.slane %v543_v17, 4  ;;  %v548_v49 = vrot.slane %v546_v24, 5  ;;  %v567_v48 = vshrl.u32 %v7452_v9, 16  ;;  %v580_v24 = vshrl.u32 %v7466_v22, 16 }
  0xa3   : > { %2499 = vmatprep.mubr.bf16.mxu1 %v6634_v44  ;;  %v511_v44 = vor.u32 %v510_v35, %v7387_v14  ;;  %v7479_v17 = vrot.slane %v552_v7, 5  ;;  %v2857_v35 = vshll.u32 %v5166_v21, 16  ;;  %v6644_v7 = vld [vmem:[%s6854_s24 + $0x12c] sm:$0xff]   ;;  %v7489_v29 = vrot.slane %v556_v27, 4  ;;  %v5167_v21 = vld [vmem:[%s6854_s24 + $0x24] sm:$0xf] }
  0xa4   : > { %v569_v54 = vrot.slane %v567_v48, 4  ;;  %v7505_v0 = vrot.slane %v580_v24, 4  ;;  %v7513_v27 = vrot.slane %v2854_v60, 4  ;;  %v5168_v24 = vld [vmem:[%s6854_s24 + $0x28] sm:$0xf]  ;;  %v2875_v60 = vshll.u32 %v5167_v21, 16 }
  0xa5   : > { %8945 = vst [vmem:[#allocation6_spill] sm:$0xff] %v7479_v17  ;;  %v7496_v48 = vrot.slane %v511_v44, 4  ;;  %v7500_v50 = vrot.slane %v2857_v35, 5 }
  0xa6   : > { %8950 = vst [vmem:[#allocation11_spill] sm:$0xff] %v7513_v27 }
  0xa7   : > { %2106 = vmatmul.mubr.bf16.gmra.mrb[60].mxu0 %v5034_v12  ;;  %v6659_v12 = vld [vmem:[%s8885_s3 + $0x8] sm:$0xff]   ;;  %8947 = vst [vmem:[#allocation8_spill] sm:$0xff] %v7496_v48  ;;  %8948 = vst [vmem:[#allocation9_spill] sm:$0xff] %v7500_v50 }
  0xa8   : > { %3688 = vmatprep.mubr.bf16.mxu0 %v6645_v16  ;;  %v487_v16 = vor.u32 %v7428_v33, %v7366_v39  ;;  %v7477_v33 = vrot.slane %v463_v8, 4 }
  0xaa   : > { %2500 = vmatmul.mubr.bf16.gmra.mrb[56].mxu1 %v4897_v10 }
  0xab   : > { %2507 = vmatprep.mubr.bf16.mxu1 %v6641_v58  ;;  %v7494_v58 = vrot.slane %v487_v16, 4 }
  0xaf   : > { %3689 = vmatmul.mubr.bf16.vlgmr.msra.gmra.mrb[64].mxu0 %v5243_v45  ;;  %v572_v45 = vrot.slane %v570_v41, 5  ;;  %v7503_v41 = vld [vmem:[%s6854_s24 + $0x7c] sm:$0xf] }
  0xb0   : > { %6320 = vmatpush3.bf16.msra.mxu0 %v7381_v61  ;;  %3696 = vmatprep.mubr.bf16.mxu0 %v6651_v51  ;;  %v7483_v61 = vld [vmem:[%s6854_s24 + $0x78] sm:$0xf]  ;;  %v549_v51 = vor.u32 %v548_v49, %v545_v1  ;;  %v4898_v1 = vcombine.low %v7343_v37, %v7393_v2  ;;  %v2863_v49 = vrot.slane %v2861_v43, 4  ;;  %v600_v32 = vshll.u32 %v7503_v41, 16 }
  0xb1   : > { %6321 = vmatprep.subr.bf16.mxu0 %v6659_v12  ;;  %v591_v8 = vshrl.u32 %v7483_v61, 16  ;;  %v594_v10 = vshll.u32 %v7483_v61, 16  ;;  %v573_v44 = vor.u32 %v572_v45, %v569_v54  ;;  %v604_v40 = vshrl.u32 %v7503_v41, 16  ;;  %v6669_v54 = vld [vmem:[%s8885_s3 + $0x10] sm:$0xff]  }
  0xb2   : > { %v7511_v16 = vrot.slane %v549_v51, 4  ;;  %2508 = vmatmul.mubr.bf16.gmra.mrb[60].mxu1 %v4898_v1  ;;  %v2864_v35 = vor.u32 %v2863_v49, %v7500_v50  ;;  %v2872_v43 = vshrl.u32 %v5167_v21, 16  ;;  %v7532_v51 = vrot.slane %v600_v32, 5  ;;  %v7547_v32 = vld [vmem:[%s6854_s24 + $0x88] sm:$0xf] }
  0xb3   : > { %v7515_v37 = vrot.slane %v591_v8, 4  ;;  %v7517_v2 = vrot.slane %v594_v10, 5  ;;  %2515 = vmatprep.mubr.bf16.mxu1 %v6644_v7  ;;  %v2881_v8 = vshll.u32 %v5168_v24, 16  ;;  %v5245_v10 = vcombine.low %v5167_v21, %v5168_v24  ;;  %v5169_v7 = vld [vmem:[%s6854_s24 + $0x30] sm:$0xf] }
  0xb4   : > { %6322 = vmatpush3.bf16.msra.mxu0 %v6659_v12  ;;  %v6667_v12 = vld [vmem:[%s8883_s1 + $0xb0] sm:$0xff]   ;;  %8949 = vst [vmem:[#allocation10_spill] sm:$0xff] %v7511_v16  ;;  %v7537_v1 = vrot.slane %v573_v44, 4  ;;  %v7543_v49 = vrot.slane %v604_v40, 4  ;;  %v535_v21 = vor.u32 %v7471_v4, %v7413_v52  ;;  %v7552_v44 = vrot.slane %v2864_v35, 4 }
  0xb5   : > { %6235 = vmatprep.subr.bf16.mxu1 %v6667_v12  ;;  %6323 = vmatprep.subr.bf16.mxu0 %v6669_v54  ;;  %v7554_v45 = vrot.slane %v2872_v43, 4  ;;  %v624_v40 = vshll.u32 %v7547_v32, 16  ;;  %v628_v19 = vshrl.u32 %v7547_v32, 16  ;;  %v2896_v11 = vshrl.u32 %v5169_v7, 16  ;;  %v5170_v43 = vld [vmem:[%s6854_s24 + $0x34] sm:$0xf] }
  0xb6   : > { %6236 = vmatpush3.bf16.msra.mxu1 %v6667_v12  ;;  %8951 = vst [vmem:[#allocation12_spill] sm:$0xff] %v7537_v1  ;;  %8952 = vst [vmem:[#allocation13_spill] sm:$0xff] %v7552_v44  ;;  %v2899_v6 = vshll.u32 %v5169_v7, 16  ;;  %v7565_v4 = vrot.slane %v2875_v60, 5  ;;  %v7567_v35 = vrot.slane %v2881_v8, 5  ;;  %v2905_v27 = vshll.u32 %v5170_v43, 16 }
  0xb7   : > { %3697 = vmatmul.mubr.bf16.gmra.mrb[68].mxu0 %v5244_v3  ;;  %v7535_v3 = vld [vmem:[%s6854_s24 + $0x84] sm:$0xf]  ;;  %8953 = vst [vmem:[#allocation14_spill] sm:$0xff] %v7554_v45  ;;  %v7574_v44 = vrot.slane %v535_v21, 4  ;;  %v2909_v60 = vshrl.u32 %v5170_v43, 16  ;;  %v7578_v8 = vrot.slane %v624_v40, 5  ;;  %v559_v52 = vor.u32 %v7489_v29, %v7479_v17 }
  0xb8   : > { %3704 = vmatprep.mubr.bf16.mxu0 %v6655_v62  ;;  %v4899_v62 = vcombine.low %v7431_v36, %v7438_v56  ;;  %v2885_v36 = vshrl.u32 %v5168_v24, 16  ;;  %v6661_v56 = vld [vmem:[%s6854_s24 + $0xfc] sm:$0xff]   ;;  %v615_v12 = vshrl.u32 %v7535_v3, 16  ;;  %6324 = vmatpush3.bf16.msra.mxu0 %v6669_v54  ;;  %v618_v34 = vshll.u32 %v7535_v3, 16  ;;  %8954 = vst [vmem:[#allocation15_spill] sm:$0xff] %v7567_v35 }
  0xb9   : > { %v6650_v24 = vld [vmem:[%s6854_s24 + $0x138] sm:$0xff]   ;;  %8956 = vst [vmem:[#allocation17_spill] sm:$0xff] %v7574_v44  ;;  %v7582_v54 = vrot.slane %v2896_v11, 4  ;;  %v7588_v1 = vld [vmem:[%s6854_s24 + $0x90] sm:$0xf]  ;;  %v7605_v40 = vrot.slane %v2909_v60, 4 }
  0xba   : > { %v7570_v55 = vrot.slane %v2885_v36, 4  ;;  %v7572_v50 = vrot.slane %v615_v12, 4  ;;  %2516 = vmatmul.mubr.bf16.gmra.mrb[64].mxu1 %v4899_v62  ;;  %v7576_v16 = vrot.slane %v618_v34, 5  ;;  %v7584_v36 = vrot.slane %v2899_v6, 5  ;;  %v7595_v21 = vld [vmem:[%s6854_s24 + $0x94] sm:$0xf] }
  0xbb   : > { %2523 = vmatprep.mubr.bf16.mxu1 %v6650_v24  ;;  %8957 = vst [vmem:[#allocation18_spill] sm:$0xff] %v7582_v54  ;;  %v5246_v12 = vcombine.low %v5169_v7, %v5170_v43  ;;  %v4900_v34 = vcombine.low %v7452_v9, %v7466_v22  ;;  %v7592_v62 = vrot.slane %v2905_v27, 5  ;;  %v6677_v11 = vld [vmem:[%s8883_s1 + $0xb8] sm:$0xff]   ;;  %v6654_v7 = vld [vmem:[%s6854_s24 + $0x144] sm:$0xff]   ;;  %8960 = vst [vmem:[#allocation21_spill] sm:$0xff] %v7605_v40  ;;  %v642_v24 = vshll.u32 %v7588_v1, 16 }
  0xbc   : > { %8955 = vst [vmem:[#allocation16_spill] sm:$0xff] %v7570_v55  ;;  %8958 = vst [vmem:[#allocation19_spill] sm:$0xff] %v7584_v36  ;;  %v6679_v6 = vld [vmem:[%s8885_s3 + $0x18] sm:$0xff]   ;;  %v648_v9 = vshll.u32 %v7595_v21, 16  ;;  %v652_v22 = vshrl.u32 %v7595_v21, 16  ;;  %6237 = vmatprep.subr.bf16.mxu1 %v6677_v11 }
  0xbd   : > { %8959 = vst [vmem:[#allocation20_spill] sm:$0xff] %v7592_v62  ;;  %v5171_v27 = vld [vmem:[%s6854_s24 + $0x3c] sm:$0xf]  ;;  %6325 = vmatprep.subr.bf16.mxu0 %v6679_v6  ;;  %v5172_v43 = vld [vmem:[%s6854_s24 + $0x40] sm:$0xf]  ;;  %6238 = vmatpush3.bf16.msra.mxu1 %v6677_v11  ;;  %v7616_v30 = vrot.slane %v642_v24, 5  ;;  %v583_v11 = vor.u32 %v7505_v0, %v7491_v42  ;;  %v4901_v62 = vcombine.low %v7483_v61, %v7503_v41 }
  0xbe   : > { %v2920_v26 = vshrl.u32 %v5171_v27, 16  ;;  %v2923_v44 = vshll.u32 %v5171_v27, 16  ;;  %v2929_v14 = vshll.u32 %v5172_v43, 16  ;;  %6326 = vmatpush3.bf16.msra.mxu0 %v6679_v6  ;;  %v2933_v48 = vshrl.u32 %v5172_v43, 16  ;;  %v331_v0 = vld [vmem:[%s6854_s24 + $0x8] sm:$0x1] }
  0xbf   : > { %3705 = vmatmul.mubr.bf16.gmra.mrb[72].mxu0 %v5245_v10  ;;  %v7580_v10 = vrot.slane %v628_v19, 4  ;;  %v639_v19 = vshrl.u32 %v7588_v1, 16  ;;  %v7623_v29 = vrot.slane %v648_v9, 5  ;;  %v7635_v42 = vrot.slane %v559_v52, 4  ;;  %v7650_v54 = vld [vmem:[%s6854_s24 + $0xa0] sm:$0xf] }
  0xc0   : > { %3712 = vmatprep.mubr.bf16.mxu0 %v6661_v56  ;;  %v6665_v56 = vld [vmem:[%s6854_s24 + $0x108] sm:$0xff]   ;;  %v7638_v9 = vrot.slane %v2920_v26, 4  ;;  %v7647_v36 = vrot.slane %v2933_v48, 4  ;;  %8965 = vst [vmem:[#allocation26_spill] sm:$0xff] %v7650_v54  ;;  %v7652_v55 = vrot.slane %v583_v11, 4 }
  0xc1   : > { %v7614_v60 = vrot.slane %v639_v19, 4  ;;  %v5247_v19 = vcombine.low %v5171_v27, %v5172_v43  ;;  %8961 = vst [vmem:[#allocation22_spill] sm:$0xff] %v7635_v42  ;;  %v7642_v27 = vrot.slane %v2929_v14, 5  ;;  %v6671_v43 = vld [vmem:[%s6854_s24 + $0x114] sm:$0xff]   ;;  %v370_v42 = vshll.u32 %v331_v0, 16 }
  0xc2   : > { %2524 = vmatmul.mubr.bf16.gmra.mrb[68].mxu1 %v4900_v34  ;;  %v7629_v34 = vld [vmem:[%s6854_s24 + $0x48] sm:$0xf]  ;;  %8962 = vst [vmem:[#allocation23_spill] sm:$0xff] %v7638_v9  ;;  %v332_v14 = vld [vmem:[%s6854_s24 + $0x14] sm:$0x1]  ;;  %v8996_v9 = vld [vmem:[#allocation5_spill] sm:$0xff] }
  0xc3   : > { %2531 = vmatprep.mubr.bf16.mxu1 %v6654_v7  ;;  %v2944_v17 = vshrl.u32 %v7629_v34, 16  ;;  %v2947_v40 = vshll.u32 %v7629_v34, 16  ;;  %v6660_v7 = vld [vmem:[%s6854_s24 + $0x150] sm:$0xff]   ;;  %8964 = vst [vmem:[#allocation25_spill] sm:$0xff] %v7642_v27  ;;  %v394_v41 = vshll.u32 %v332_v14, 16  ;;  %v372_v26 = vrot.slane %v370_v42, 5 }
  0xc4   : > { %v4902_v42 = vcombine.low %v7535_v3, %v7547_v32  ;;  %v8970_v3 = vsel %vm6885_vm2, %v7286_v57, %v7288_v13  ;;  %v334_v13 = vld [vmem:[%s6854_s24 + $0x2c] sm:$0x1] }
  0xc5   : > { %v7662_v61 = vrot.slane %v2944_v17, 4  ;;  %v7664_v48 = vrot.slane %v2947_v40, 5  ;;  %v6687_v17 = vld [vmem:[%s8885_s3 + $0x20] sm:$0xff]   ;;  %v373_v14 = vsel %vm6885_vm2, %v7433_v59, %v372_v26 }
  0xc6   : > { %v7700_v32 = vcombine.low %v8970_v3, %v373_v14  ;;  %6327 = vmatprep.subr.bf16.mxu0 %v6687_v17  ;;  %v333_v59 = vld [vmem:[%s6854_s24 + $0x20] sm:$0x1]  ;;  %v7724_v3 = vld [vmem:[%s6854_s24 + $0xac] sm:$0xf] }
  0xc7   : > { %3713 = vmatmul.mubr.bf16.gmra.mrb[76].mxu0 %v5246_v12  ;;  %v7619_v12 = vld [vmem:[%s6854_s24 + $0x9c] sm:$0xf]  ;;  %v418_v57 = vshll.u32 %v333_v59, 16  ;;  %8973 = vst [vmem:[#allocation32_spill] sm:$0xff] %v7724_v3  ;;  %v4903_v59 = vcombine.low %v7588_v1, %v7595_v21 }
  0xc8   : > { %3720 = vmatprep.mubr.bf16.mxu0 %v6665_v56  ;;  %v7625_v56 = vrot.slane %v652_v22, 4  ;;  %v663_v6 = vshrl.u32 %v7619_v12, 16  ;;  %v666_v24 = vshll.u32 %v7619_v12, 16  ;;  %v7640_v22 = vrot.slane %v2923_v44, 5  ;;  %v6664_v26 = vld [vmem:[%s6854_s24 + $0x15c] sm:$0xff]   ;;  %6328 = vmatpush3.bf16.msra.mxu0 %v6687_v17 }
  0xc9   : > { %v396_v44 = vrot.slane %v394_v41, 5 }
  0xca   : > { %8963 = vst [vmem:[#allocation24_spill] sm:$0xff] %v7640_v22  ;;  %v7654_v52 = vrot.slane %v663_v6, 4  ;;  %v7659_v27 = vrot.slane %v666_v24, 5  ;;  %v5174_v22 = vld [vmem:[%s6854_s24 + $0x4c] sm:$0xf]  ;;  %2532 = vmatmul.mubr.bf16.gmra.mrb[72].mxu1 %v4901_v62  ;;  %v6675_v62 = vld [vmem:[%s6854_s24 + $0x120] sm:$0xff]  }
  0xcb   : > { %v2953_v11 = vshll.u32 %v5174_v22, 16  ;;  %v7667_v6 = vld [vmem:[%s6854_s24 + $0x54] sm:$0xf]  ;;  %v2957_v0 = vshrl.u32 %v5174_v22, 16  ;;  %2539 = vmatprep.mubr.bf16.mxu1 %v6660_v7  ;;  %v7683_v24 = vld [vmem:[%s6854_s24 + $0x58] sm:$0xf]  ;;  %v397_v40 = vsel %vm6885_vm2, %v7417_v63, %v396_v44 }
  0xcc   : > { %8966 = vst [vmem:[#allocation27_spill] sm:$0xff] %v7654_v52  ;;  %8967 = vst [vmem:[#allocation28_spill] sm:$0xff] %v7659_v27  ;;  %v5248_v27 = vcombine.low %v7629_v34, %v5174_v22  ;;  %v7693_v7 = vld [vmem:[%s6854_s24 + $0xa8] sm:$0xf]  ;;  %v2971_v34 = vshll.u32 %v7667_v6, 16  ;;  %v8971_v22 = vsel %vm6885_vm2, %v7239_v5, %v7241_v53  ;;  %v2977_v52 = vshll.u32 %v7683_v24, 16 }
  0xcd   : > { %8969 = vst [vmem:[#allocation30_spill] sm:$0xff] %v7693_v7  ;;  %v7714_v41 = vcombine.low %v8971_v22, %v397_v40  ;;  %v7719_v44 = vrot.slane %v2953_v11, 5  ;;  %v7721_v14 = vrot.slane %v2957_v0, 4  ;;  %v420_v40 = vrot.slane %v418_v57, 5  ;;  %v335_v22 = vld [vmem:[%s6854_s24 + $0x38] sm:$0x1] }
  0xce   : > { %v2981_v11 = vshrl.u32 %v7683_v24, 16  ;;  %v7738_v53 = vrot.slane %v2971_v34, 5  ;;  %v7741_v57 = vld [vmem:[%s6854_s24 + $0x60] sm:$0xf]  ;;  %v336_v34 = vld [vmem:[%s6854_s24 + $0x44] sm:$0x1] }
  0xcf   : > { %3721 = vmatmul.mubr.bf16.gmra.mrb[80].mxu0 %v5247_v19  ;;  %v7672_v19 = vld [vmem:[%s8883_s1 + $0x200] sm:$0xff]   ;;  %8972 = vst [vmem:[#allocation31_spill] sm:$0xff] %v7714_v41  ;;  %v421_v1 = vsel %vm6885_vm2, %v7435_v38, %v420_v40  ;;  %v466_v38 = vshll.u32 %v335_v22, 16  ;;  %v6681_v40 = vld [vmem:[%s6854_s24 + $0x12c] sm:$0xff]   ;;  %v2995_v17 = vshll.u32 %v7741_v57, 16 }
  0xd0   : > { %3728 = vmatprep.mubr.bf16.mxu0 %v6671_v43  ;;  %8968 = vst [vmem:[#allocation29_spill] sm:$0xff] %v7672_v19  ;;  %v2968_v43 = vshrl.u32 %v7667_v6, 16  ;;  %6271 = vmatprep.subr.bf16.mxu1 %v7672_v19  ;;  %v442_v19 = vshll.u32 %v334_v13, 16 }
  0xd2   : > { %v444_v0 = vrot.slane %v442_v19, 5  ;;  %v7736_v5 = vrot.slane %v2968_v43, 4  ;;  %2540 = vmatmul.mubr.bf16.gmra.mrb[76].mxu1 %v4902_v42  ;;  %v8974_v19 = vsel %vm6885_vm2, %v7312_v15, %v7295_v28  ;;  %v7763_v42 = vld [vmem:[%s6854_s24 + $0x64] sm:$0xf]  ;;  %v8976_v28 = vsel %vm6885_vm2, %v7332_v18, %v7334_v31  ;;  %v6670_v18 = vld [vmem:[%s6854_s24 + $0x168] sm:$0xff]  }
  0xd3   : > { %2547 = vmatprep.mubr.bf16.mxu1 %v6664_v26  ;;  %v6694_v26 = vld [vmem:[%s8885_s3 + $0x28] sm:$0xff]   ;;  %v3001_v22 = vshll.u32 %v7763_v42, 16 }
  0xd4   : > { %v445_v43 = vsel %vm6885_vm2, %v7468_v23, %v444_v0  ;;  %v490_v23 = vshll.u32 %v336_v34, 16  ;;  %v5249_v0 = vcombine.low %v7667_v6, %v7683_v24  ;;  %6329 = vmatprep.subr.bf16.mxu0 %v6694_v26  ;;  %v8978_v6 = vsel %vm6885_vm2, %v7350_v25, %v7337_v20  ;;  %v338_v25 = vld [vmem:[%s6854_s24 + $0x5c] sm:$0x1] }
  0xd5   : > { %v7772_v15 = vcombine.low %v8976_v28, %v445_v43  ;;  %v3005_v43 = vshrl.u32 %v7763_v42, 16  ;;  %6330 = vmatpush3.bf16.msra.mxu0 %v6694_v26 }
  0xd6   : > { %v492_v34 = vrot.slane %v490_v23, 5  ;;  %v7801_v23 = vrot.slane %v2981_v11, 4  ;;  %v8980_v11 = vsel %vm6885_vm2, %v7372_v46, %v7366_v39  ;;  %v7833_v39 = vld [vmem:[%s6854_s24 + $0xb4] sm:$0xf]  ;;  %v7836_v46 = vld [vmem:[%s6854_s24 + $0xb8] sm:$0xf] }
  0xd7   : > { %3729 = vmatmul.mubr.bf16.gmra.mrb[84].mxu0 %v5248_v27  ;;  %v7748_v27 = vrot.slane %v2977_v52, 5  ;;  %v2992_v52 = vshrl.u32 %v7741_v57, 16  ;;  %8977 = vst [vmem:[#allocation34_spill] sm:$0xff] %v7772_v15  ;;  %v337_v15 = vld [vmem:[%s6854_s24 + $0x50] sm:$0x1]  ;;  %8983 = vst [vmem:[#allocation37_spill] sm:$0xff] %v7833_v39 }
  0xd8   : > { %3736 = vmatprep.mubr.bf16.mxu0 %v6675_v62  ;;  %v7755_v62 = vcombine.low %v8974_v19, %v421_v1  ;;  %v7781_v1 = vld [vmem:[%s6854_s24 + $0x6c] sm:$0xf]  ;;  %v468_v19 = vrot.slane %v466_v38, 5  ;;  %v7794_v38 = vld [vmem:[%s6854_s24 + $0x70] sm:$0xf]  ;;  %v493_v31 = vsel %vm6885_vm2, %v7494_v58, %v492_v34  ;;  %v514_v20 = vshll.u32 %v337_v15, 16 }
  0xd9   : > { %v3016_v28 = vshrl.u32 %v7781_v1, 16  ;;  %v3019_v21 = vshll.u32 %v7781_v1, 16  ;;  %v3025_v63 = vshll.u32 %v7794_v38, 16  ;;  %v7821_v26 = vcombine.low %v8980_v11, %v493_v31  ;;  %8984 = vst [vmem:[#allocation38_spill] sm:$0xff] %v7836_v46 }
  0xda   : > { %8975 = vst [vmem:[#allocation33_spill] sm:$0xff] %v7755_v62  ;;  %v469_v13 = vsel %vm6885_vm2, %v7477_v33, %v468_v19  ;;  %v3029_v33 = vshrl.u32 %v7794_v38, 16  ;;  %v7826_v58 = vrot.slane %v2992_v52, 4  ;;  %v7830_v34 = vrot.slane %v3001_v22, 5  ;;  %2548 = vmatmul.mubr.bf16.gmra.mrb[80].mxu1 %v4903_v59  ;;  %v6684_v52 = vld [vmem:[%s6854_s24 + $0x138] sm:$0xff]  }
  0xdb   : > { %v7809_v24 = vcombine.low %v8978_v6, %v469_v13  ;;  %8981 = vst [vmem:[#allocation36_spill] sm:$0xff] %v7821_v26  ;;  %v538_v6 = vshll.u32 %v338_v25, 16  ;;  %v7838_v15 = vrot.slane %v3005_v43, 4  ;;  %v7840_v31 = vrot.slane %v3016_v28, 4  ;;  %2555 = vmatprep.mubr.bf16.mxu1 %v6670_v18  ;;  %v339_v59 = vld [vmem:[%s6854_s24 + $0x68] sm:$0x1] }
  0xdc   : > { %v7842_v11 = vrot.slane %v3019_v21, 5  ;;  %v5250_v21 = vcombine.low %v7741_v57, %v7763_v42  ;;  %v7854_v28 = vrot.slane %v3029_v33, 4  ;;  %v7857_v18 = vld [vmem:[%s6854_s24 + $0x78] sm:$0xf]  ;;  %v8991_v57 = vld [vmem:[#allocation3_spill] sm:$0xff]  ;;  %v8992_v42 = vld [vmem:[#allocation2_spill] sm:$0xff] }
  0xdd   : > { %8979 = vst [vmem:[#allocation35_spill] sm:$0xff] %v7809_v24  ;;  %v540_v22 = vrot.slane %v538_v6, 5  ;;  %v6701_v6 = vld [vmem:[%s8885_s3 + $0x30] sm:$0xff]   ;;  %v3040_v62 = vshrl.u32 %v7857_v18, 16  ;;  %v8993_v33 = vsel %vm6885_vm2, %v8991_v57, %v8992_v42  ;;  %v8995_v43 = vld [vmem:[#allocation17_spill] sm:$0xff]  ;;  %v3043_v41 = vshll.u32 %v7857_v18, 16 }
  0xde   : > { %v340_v25 = vld [vmem:[%s6854_s24 + $0x74] sm:$0x1]  ;;  %v7881_v13 = vld [vmem:[%s6854_s24 + $0x7c] sm:$0xf]  ;;  %6331 = vmatprep.subr.bf16.mxu0 %v6701_v6  ;;  %v9000_v57 = vor.u32 %v7517_v2, %v7515_v37  ;;  %v7898_v42 = vld [vmem:[%s6854_s24 + $0x84] sm:$0xf] }
  0xdf   : > { %3737 = vmatmul.mubr.bf16.gmra.mrb[88].mxu0 %v5249_v0  ;;  %v7828_v0 = vrot.slane %v2995_v17, 5  ;;  %v7845_v17 = vrot.slane %v3025_v63, 5  ;;  %v6674_v19 = vld [vmem:[%s6854_s24 + $0x174] sm:$0xff]  }
  0xe0   : > { %3744 = vmatprep.mubr.bf16.mxu0 %v6681_v40  ;;  %v516_v40 = vrot.slane %v514_v20, 5  ;;  %v8989_v20 = vld [vmem:[#allocation8_spill] sm:$0xff]  ;;  %6332 = vmatpush3.bf16.msra.mxu0 %v6701_v6  ;;  %v7910_v6 = vrot.slane %v3040_v62, 4  ;;  %v9005_v62 = vld [vmem:[#allocation6_spill] sm:$0xff] }
  0xe1   : > { %v8997_v26 = vld [vmem:[#allocation4_spill] sm:$0xff] }
  0xe2   : > { %v517_v63 = vsel %vm6885_vm2, %v8989_v20, %v516_v40  ;;  %v541_v40 = vsel %vm6885_vm2, %v8995_v43, %v540_v22  ;;  %v562_v20 = vshll.u32 %v339_v59, 16  ;;  %v8998_v35 = vsel %vm6885_vm2, %v8996_v9, %v8997_v26 }
  0xe3   : > { %v7873_v24 = vcombine.low %v8993_v33, %v517_v63  ;;  %v7889_v45 = vcombine.low %v8998_v35, %v541_v40  ;;  %v586_v63 = vshll.u32 %v340_v25, 16  ;;  %v598_v22 = vrot.slane %v9000_v57, 4  ;;  %v7913_v40 = vld [vmem:[%s6854_s24 + $0x88] sm:$0xf]  ;;  %v341_v35 = vld [vmem:[%s6854_s24 + $0x80] sm:$0x1] }
  0xe4   : > { %v3049_v43 = vshll.u32 %v7881_v13, 16  ;;  %v564_v33 = vrot.slane %v562_v20, 5  ;;  %v3053_v9 = vshrl.u32 %v7881_v13, 16  ;;  %v5251_v25 = vcombine.low %v7781_v1, %v7794_v38  ;;  %v9002_v20 = vld [vmem:[#allocation22_spill] sm:$0xff] }
  0xe5   : > { %8994 = vst [vmem:[#allocation8_spill] sm:$0xff] %v7873_v24  ;;  %8999 = vst [vmem:[#allocation3_spill] sm:$0xff] %v7889_v45  ;;  %v9001_v24 = vld [vmem:[#allocation25_spill] sm:$0xff]  ;;  %v588_v26 = vrot.slane %v586_v63, 5  ;;  %v603_v37 = vsel %vm6885_vm2, %v598_v22, %v7532_v51  ;;  %v9003_v57 = vcombine.low %v7619_v12, %v7650_v54  ;;  %v9004_v1 = vld [vmem:[#allocation10_spill] sm:$0xff] }
  0xe6   : > { %v565_v63 = vsel %vm6885_vm2, %v9002_v20, %v564_v33  ;;  %v9006_v38 = vsel %vm6885_vm2, %v9004_v1, %v9005_v62  ;;  %v9008_v33 = vor.u32 %v7543_v49, %v7532_v51  ;;  %v9009_v20 = vld [vmem:[#allocation12_spill] sm:$0xff]  ;;  %v342_v1 = vld [vmem:[%s6854_s24 + $0x8c] sm:$0x1]  ;;  %v9013_v62 = vor.u32 %v7576_v16, %v7572_v50  ;;  %v6688_v51 = vld [vmem:[%s6854_s24 + $0x144] sm:$0xff]  }
  0xe7   : > { %3745 = vmatmul.mubr.bf16.gmra.mrb[92].mxu0 %v5250_v21  ;;  %v3064_v21 = vshrl.u32 %v7898_v42, 16  ;;  %2556 = vmatmul.mubr.bf16.gmra.mrb[84].mxu1 %v9003_v57  ;;  %v7928_v22 = vcombine.low %v9006_v38, %v565_v63  ;;  %v589_v2 = vsel %vm6885_vm2, %v7652_v55, %v588_v26  ;;  %v9010_v57 = vld [vmem:[#allocation7_spill] sm:$0xff]  ;;  %v610_v63 = vshll.u32 %v341_v35, 16  ;;  %v8113_v45 = vld [vmem:[%s6854_s24 + $0xc4] sm:$0xf] }
  0xe8   : > { %3752 = vmatprep.mubr.bf16.mxu0 %v6684_v52  ;;  %v3067_v52 = vshll.u32 %v7898_v42, 16  ;;  %v608_v12 = vrot.slane %v9008_v33, 4  ;;  %2563 = vmatprep.mubr.bf16.mxu1 %v6674_v19  ;;  %v9011_v59 = vsel %vm6885_vm2, %v9009_v20, %v9010_v57  ;;  %v622_v38 = vrot.slane %v9013_v62, 4  ;;  %v7959_v33 = vld [vmem:[%s6854_s24 + $0x90] sm:$0xf]  ;;  %9036 = vst [vmem:[#allocation48_spill] sm:$0xff] %v8113_v45 }
  0xe9   : > { %9007 = vst [vmem:[#allocation2_spill] sm:$0xff] %v7928_v22  ;;  %v7942_v54 = vcombine.low %v9011_v59, %v589_v2  ;;  %v3073_v49 = vshll.u32 %v7913_v40, 16  ;;  %v3077_v19 = vshrl.u32 %v7913_v40, 16  ;;  %v9014_v26 = vor.u32 %v7580_v10, %v7578_v8  ;;  %v8063_v22 = vld [vmem:[%s6854_s24 + $0xb8] sm:$0xf] }
  0xea   : > { %v634_v35 = vshll.u32 %v342_v1, 16  ;;  %v7956_v2 = vrot.slane %v3043_v41, 5  ;;  %v612_v50 = vrot.slane %v610_v63, 5  ;;  %v627_v16 = vsel %vm6885_vm2, %v622_v38, %v7578_v8  ;;  %v6680_v41 = vld [vmem:[%s6854_s24 + $0x180] sm:$0xff]   ;;  %v343_v8 = vld [vmem:[%s6854_s24 + $0x98] sm:$0x1] }
  0xeb   : > { %9012 = vst [vmem:[#allocation17_spill] sm:$0xff] %v7942_v54  ;;  %v632_v59 = vrot.slane %v9014_v26, 4  ;;  %v7966_v57 = vrot.slane %v3049_v43, 5  ;;  %v7968_v62 = vrot.slane %v3053_v9, 4  ;;  %v3088_v10 = vshrl.u32 %v7959_v33, 16  ;;  %9030 = vst [vmem:[#allocation43_spill] sm:$0xff] %v8063_v22 }
  0xec   : > { %v636_v1 = vrot.slane %v634_v35, 5  ;;  %v7972_v26 = vrot.slane %v3064_v21, 4  ;;  %v7974_v55 = vrot.slane %v3067_v52, 5  ;;  %v613_v63 = vsel %vm6885_vm2, %v608_v12, %v612_v50  ;;  %v7991_v52 = vld [vmem:[%s6854_s24 + $0x94] sm:$0xf] }
  0xed   : > { %v9017_v38 = vor.u32 %v7616_v30, %v7614_v60  ;;  %v7982_v9 = vrot.slane %v3073_v49, 5  ;;  %v7984_v20 = vrot.slane %v3077_v19, 4  ;;  %v7986_v35 = vcombine.low %v603_v37, %v613_v63 }
  0xee   : > { %9015 = vst [vmem:[#allocation5_spill] sm:$0xff] %v7972_v26  ;;  %9016 = vst [vmem:[#allocation4_spill] sm:$0xff] %v7974_v55  ;;  %v637_v21 = vsel %vm6885_vm2, %v632_v59, %v636_v1  ;;  %v9020_v60 = vor.u32 %v7625_v56, %v7623_v29  ;;  %v658_v49 = vshll.u32 %v343_v8, 16  ;;  %v9021_v37 = vcombine.low %v7693_v7, %v7724_v3  ;;  %v6691_v1 = vld [vmem:[%s6854_s24 + $0x150] sm:$0xff]   ;;  %v6708_v8 = vld [vmem:[%s8885_s3 + $0x38] sm:$0xff]  }
  0xef   : > { %v646_v43 = vrot.slane %v9017_v38, 4  ;;  %3753 = vmatmul.mubr.bf16.gmra.mrb[96].mxu0 %v5251_v25  ;;  %9018 = vst [vmem:[#allocation25_spill] sm:$0xff] %v7986_v35  ;;  %v7993_v12 = vcombine.low %v627_v16, %v637_v21  ;;  %v8004_v19 = vrot.slane %v3088_v10, 4  ;;  %v3097_v59 = vshll.u32 %v7991_v52, 16  ;;  %v8010_v16 = vld [vmem:[%s6854_s24 + $0x9c] sm:$0xf]  ;;  %6333 = vmatprep.subr.bf16.mxu0 %v6708_v8 }
  0xf0   : > { %3760 = vmatprep.mubr.bf16.mxu0 %v6688_v51  ;;  %v656_v25 = vrot.slane %v9020_v60, 4  ;;  %2564 = vmatmul.mubr.bf16.gmra.mrb[88].mxu1 %v9021_v37  ;;  %v3091_v51 = vshll.u32 %v7959_v33, 16  ;;  %v3101_v50 = vshrl.u32 %v7991_v52, 16  ;;  %v3112_v56 = vshrl.u32 %v8010_v16, 16  ;;  %v8029_v37 = vld [vmem:[%s6854_s24 + $0xa8] sm:$0xf] }
  0xf1   : > { %9019 = vst [vmem:[#allocation22_spill] sm:$0xff] %v7993_v12  ;;  %v651_v30 = vsel %vm6885_vm2, %v646_v43, %v7623_v29  ;;  %9022 = vst [vmem:[#allocation10_spill] sm:$0xff] %v8004_v19  ;;  %2571 = vmatprep.mubr.bf16.mxu1 %v6680_v41  ;;  %v8014_v29 = vld [vmem:[%s6854_s24 + $0xa0] sm:$0xf]  ;;  %v660_v63 = vrot.slane %v658_v49, 5  ;;  %v5252_v38 = vcombine.low %v7857_v18, %v7881_v13  ;;  %v3115_v43 = vshll.u32 %v8010_v16, 16 }
  0xf2   : > { %v3121_v41 = vshll.u32 %v8014_v29, 16  ;;  %v3125_v60 = vshrl.u32 %v8014_v29, 16  ;;  %9023 = vst [vmem:[#allocation6_spill] sm:$0xff] %v8029_v37  ;;  %v5253_v21 = vcombine.low %v7898_v42, %v7913_v40  ;;  %v8043_v10 = vld [vmem:[%s6854_s24 + $0xac] sm:$0xf]  ;;  %v3136_v12 = vshrl.u32 %v8029_v37, 16  ;;  %6334 = vmatpush3.bf16.msra.mxu0 %v6708_v8 }
  0xf3   : > { %v661_v49 = vsel %vm6885_vm2, %v656_v25, %v660_v63  ;;  %9024 = vst [vmem:[#allocation12_spill] sm:$0xff] %v8043_v10  ;;  %v3139_v25 = vshll.u32 %v8029_v37, 16  ;;  %v8049_v35 = vrot.slane %v3091_v51, 5  ;;  %v8051_v54 = vrot.slane %v3097_v59, 5  ;;  %v8060_v40 = vld [vmem:[%s6854_s24 + $0xb4] sm:$0xf] }
  0xf4   : > { %v8047_v63 = vcombine.low %v651_v30, %v661_v49  ;;  %v8053_v13 = vrot.slane %v3101_v50, 4  ;;  %v3145_v7 = vshll.u32 %v8043_v10, 16  ;;  %v8056_v18 = vrot.slane %v3112_v56, 4  ;;  %9029 = vst [vmem:[#allocation42_spill] sm:$0xff] %v8060_v40  ;;  %v6695_v51 = vld [vmem:[%s6854_s24 + $0x15c] sm:$0xff]   ;;  %v9040_v55 = vld [vmem:[#allocation15_spill] sm:$0xff] }
  0xf5   : > { %9026 = vst [vmem:[#allocation39_spill] sm:$0xff] %v8051_v54  ;;  %v3149_v42 = vshrl.u32 %v8043_v10, 16  ;;  %v8069_v59 = vrot.slane %v3115_v43, 5  ;;  %v3160_v50 = vshrl.u32 %v8060_v40, 16  ;;  %v3163_v56 = vshll.u32 %v8060_v40, 16  ;;  %v9042_v37 = vld [vmem:[#allocation16_spill] sm:$0xff] }
  0xf6   : > { %9025 = vst [vmem:[#allocation7_spill] sm:$0xff] %v8047_v63  ;;  %9027 = vst [vmem:[#allocation40_spill] sm:$0xff] %v8053_v13  ;;  %v9032_v49 = vcombine.low %v7833_v39, %v7836_v46  ;;  %v8077_v30 = vrot.slane %v3121_v41, 5  ;;  %v8079_v63 = vrot.slane %v3125_v60, 4  ;;  %v8083_v43 = vrot.slane %v3139_v25, 5  ;;  %v9044_v54 = vld [vmem:[#allocation19_spill] sm:$0xff] }
  0xf7   : > { %3761 = vmatmul.mubr.bf16.gmra.mrb[100].mxu0 %v5252_v38  ;;  %9028 = vst [vmem:[#allocation41_spill] sm:$0xff] %v8056_v18  ;;  %9031 = vst [vmem:[#allocation44_spill] sm:$0xff] %v8069_v59  ;;  %v3169_v38 = vshll.u32 %v8063_v22, 16  ;;  %v8089_v40 = vrot.slane %v3145_v7, 5  ;;  %v3173_v46 = vshrl.u32 %v8063_v22, 16  ;;  %v8099_v60 = vrot.slane %v3149_v42, 4 }
  0xf8   : > { %3768 = vmatprep.mubr.bf16.mxu0 %v6691_v1  ;;  %2572 = vmatmul.mubr.bf16.gmra.mrb[92].mxu1 %v9032_v49  ;;  %9033 = vst [vmem:[#allocation45_spill] sm:$0xff] %v8077_v30  ;;  %9034 = vst [vmem:[#allocation46_spill] sm:$0xff] %v8079_v63  ;;  %v8081_v1 = vrot.slane %v3136_v12, 4  ;;  %v8093_v49 = vld [vmem:[%s6854_s24 + $0xc0] sm:$0xf]  ;;  %v8105_v8 = vrot.slane %v3160_v50, 4 }
  0xf9   : > { %6239 = vmatprep.mubr.bf16.mxu1 %v7700_v32  ;;  %9035 = vst [vmem:[#allocation47_spill] sm:$0xff] %v8093_v49  ;;  %v3184_v32 = vshrl.u32 %v8093_v49, 16  ;;  %v5228_v25 = vld [vmem:[%s6854_s24 + $0x20] sm:$0x1]  ;;  %v8107_v39 = vrot.slane %v3163_v56, 5  ;;  %v8109_v22 = vrot.slane %v3169_v38, 5 }
  0xfa   : > { %v3187_v41 = vshll.u32 %v8093_v49, 16  ;;  %v2867_v42 = vshll.u32 %v5228_v25, 16  ;;  %v9037_v12 = vld [vmem:[#allocation14_spill] sm:$0xff]  ;;  %v8124_v38 = vrot.slane %v3173_v46, 4  ;;  %v3193_v7 = vshll.u32 %v8113_v45, 16  ;;  %v9047_v13 = vld [vmem:[#allocation31_spill] sm:$0xff] }
  0xfb   : > { %v9038_v3 = vor.u32 %v7565_v4, %v9037_v12  ;;  %v5229_v49 = vld [vmem:[%s6854_s24 + $0x2c] sm:$0x1]  ;;  %v3197_v12 = vshrl.u32 %v8113_v45, 16  ;;  %v5230_v56 = vld [vmem:[%s6854_s24 + $0x38] sm:$0x1]  ;;  %v9043_v25 = vor.u32 %v9042_v37, %v9040_v55  ;;  %v9050_v19 = vld [vmem:[#allocation20_spill] sm:$0xff] }
  0xfc   : > { %v6690_v4 = vld [vmem:[%s8883_s1 + $0x208] sm:$0xff]   ;;  %v2869_v50 = vrot.slane %v2867_v42, 5  ;;  %v8140_v10 = vrot.slane %v3187_v41, 5  ;;  %v2891_v59 = vshll.u32 %v5229_v49, 16  ;;  %v9048_v42 = vld [vmem:[#allocation13_spill] sm:$0xff] }
  0xfd   : > { %v2879_v26 = vrot.slane %v9038_v3, 4  ;;  %v8133_v3 = vrot.slane %v3184_v32, 4  ;;  %v2889_v18 = vrot.slane %v9043_v25, 4  ;;  %v9052_v37 = vld [vmem:[#allocation29_spill] sm:$0xff]  ;;  %v9055_v25 = vld [vmem:[#allocation11_spill] sm:$0xff] }
  0xfe   : > { %9041 = vst [vmem:[#allocation15_spill] sm:$0xff] %v8140_v10  ;;  %v2870_v45 = vsel %vm6885_vm2, %v9048_v42, %v2869_v50  ;;  %v2915_v10 = vshll.u32 %v5230_v56, 16  ;;  %v9053_v49 = vld [vmem:[#allocation33_spill] sm:$0xff]  ;;  %v8162_v50 = vrot.slane %v3193_v7, 5  ;;  %v2893_v42 = vrot.slane %v2891_v59, 5  ;;  %v9058_v7 = vld [vmem:[#allocation24_spill] sm:$0xff] }
  0xff   : > { %3769 = vmatmul.mubr.bf16.gmra.mrb[104].mxu0 %v5253_v21  ;;  %9039 = vst [vmem:[#allocation14_spill] sm:$0xff] %v8133_v3  ;;  %v2884_v46 = vsel %vm6885_vm2, %v2879_v26, %v9040_v55  ;;  %v9045_v21 = vld [vmem:[#allocation18_spill] sm:$0xff]  ;;  %v9049_v26 = vld [vmem:[#allocation21_spill] sm:$0xff] }
 0x100   : > { %3776 = vmatprep.mubr.bf16.mxu0 %v6695_v51  ;;  %v9046_v32 = vor.u32 %v9044_v54, %v9045_v21  ;;  %6240 = vmatmul.mubr.bf16.vlgmr.msra.gmra.mrb[0].mxu1 %v9047_v13  ;;  %v9051_v51 = vor.u32 %v9049_v26, %v9050_v19  ;;  %v6693_v54 = vld [vmem:[%s8883_s1 + $0x210] sm:$0xff]   ;;  %9054 = vst [vmem:[#allocation16_spill] sm:$0xff] %v8162_v50  ;;  %v9056_v56 = vld [vmem:[#allocation9_spill] sm:$0xff]  ;;  %v5231_v55 = vld [vmem:[%s6854_s24 + $0x44] sm:$0x1] }
 0x101   : > { %6272 = vmatpush3.bf16.msra.mxu1 %v9052_v37  ;;  %6243 = vmatprep.mubr.bf16.mxu1 %v9053_v49  ;;  %v9057_v21 = vsel %vm6885_vm2, %v9055_v25, %v9056_v56  ;;  %v8174_v37 = vrot.slane %v3197_v12, 4  ;;  %v2917_v49 = vrot.slane %v2915_v10, 5  ;;  %v9059_v50 = vld [vmem:[#allocation23_spill] sm:$0xff]  ;;  %v3142_v25 = vor.u32 %v8083_v43, %v8081_v1  ;;  %v5233_v10 = vld [vmem:[%s6854_s24 + $0x5c] sm:$0x1] }
 0x102   : > { %v2903_v3 = vrot.slane %v9046_v32, 4  ;;  %v2913_v41 = vrot.slane %v9051_v51, 4  ;;  %v5759_v13 = vpop.f32.mrb[0].mxu0  ;;  %v8169_v32 = vcombine.low %v9057_v21, %v2870_v45  ;;  %6273 = vmatprep.subr.bf16.mxu1 %v6690_v4  ;;  %v9060_v30 = vor.u32 %v9058_v7, %v9059_v50  ;;  %v6698_v56 = vld [vmem:[%s6854_s24 + $0x168] sm:$0xff]  }
 0x103   : > { %v5760_v51 = vpop.f32.mrb[1].mxu0  ;;  %v2939_v12 = vshll.u32 %v5231_v55, 16  ;;  %v5234_v55 = vld [vmem:[%s6854_s24 + $0x68] sm:$0x1] }
 0x104   : > { %v2908_v26 = vsel %vm6885_vm2, %v2903_v3, %v9050_v19  ;;  %v2927_v63 = vrot.slane %v9060_v30, 4  ;;  %v8182_v45 = vadd.f32 %v5760_v51, %v5759_v13  ;;  %v5762_v59 = vpop.f32.mrb[2].mxu0  ;;  %v2894_v19 = vsel %vm6885_vm2, %v2889_v18, %v2893_v42  ;;  %v5232_v3 = vld [vmem:[%s6854_s24 + $0x50] sm:$0x1]  ;;  %v6697_v30 = vld [vmem:[%s8883_s1 + $0x218] sm:$0xff]  }
 0x105   : > { %v5763_v50 = vpop.f32.mrb[3].mxu0  ;;  %v8195_v13 = vcombine.low %v2884_v46, %v2894_v19  ;;  %v2918_v21 = vsel %vm6885_vm2, %v2913_v41, %v2917_v49  ;;  %v3176_v42 = vor.u32 %v8124_v38, %v8109_v22  ;;  %6274 = vmatpush3.bf16.msra.mxu1 %v6690_v4  ;;  %v9061_v46 = vor.u32 %v7647_v36, %v9001_v24 }
 0x106   : > { %v2932_v18 = vsel %vm6885_vm2, %v2927_v63, %v9001_v24  ;;  %v8204_v51 = vadd.f32 %v5763_v50, %v5762_v59  ;;  %v8206_v7 = vcombine.low %v2908_v26, %v2918_v21  ;;  %6275 = vmatprep.subr.bf16.mxu1 %v6693_v54  ;;  %v9062_v41 = vcombine.low %v7959_v33, %v7991_v52 }
 0x107   : > { %v2937_v19 = vrot.slane %v9061_v46, 4  ;;  %v9063_v63 = vor.u32 %v7664_v48, %v7662_v61  ;;  %v9064_v4 = vor.u32 %v7721_v14, %v7719_v44  ;;  %v2963_v59 = vshll.u32 %v5232_v3, 16  ;;  %v9068_v46 = vld [vmem:[#allocation34_spill] sm:$0xff]  ;;  %v9070_v3 = vld [vmem:[#allocation35_spill] sm:$0xff] }
 0x108   : > { %3777 = vmatmul.mubr.bf16.gmra.mrb[108].mxu0 %v9062_v41  ;;  %v9065_v36 = vor.u32 %v7738_v53, %v7736_v5  ;;  %v2941_v50 = vrot.slane %v2939_v12, 5  ;;  %v9066_v33 = vor.u32 %v7801_v23, %v7748_v27  ;;  %v2987_v21 = vshll.u32 %v5233_v10, 16  ;;  %6244 = vmatmul.mubr.bf16.gmra.mrb[4].mxu1 %v9068_v46  ;;  %v6702_v41 = vld [vmem:[%s6854_s24 + $0x174] sm:$0xff]  }
 0x109   : > { %v2951_v49 = vrot.slane %v9063_v63, 4  ;;  %v2961_v26 = vrot.slane %v9064_v4, 4  ;;  %3784 = vmatprep.mubr.bf16.mxu0 %v6698_v56  ;;  %v9067_v61 = vor.u32 %v7828_v0, %v7826_v58  ;;  %v2965_v5 = vrot.slane %v2963_v59, 5  ;;  %6247 = vmatprep.mubr.bf16.mxu1 %v9070_v3  ;;  %v6700_v0 = vld [vmem:[%s8883_s1 + $0x220] sm:$0xff]   ;;  %v9076_v3 = vld [vmem:[#allocation4_spill] sm:$0xff] }
 0x10a   : > { %v2975_v24 = vrot.slane %v9065_v36, 4  ;;  %v2985_v52 = vrot.slane %v9066_v33, 4  ;;  %v9069_v23 = vor.u32 %v7838_v15, %v7830_v34  ;;  %6276 = vmatpush3.bf16.msra.mxu1 %v6693_v54  ;;  %v5765_v58 = vpop.f32.mrb[4].mxu0  ;;  %v2989_v10 = vrot.slane %v2987_v21, 5  ;;  %v5236_v33 = vld [vmem:[%s6854_s24 + $0x80] sm:$0x1] }
 0x10b   : > { %v2999_v48 = vrot.slane %v9067_v61, 4  ;;  %v2956_v14 = vsel %vm6885_vm2, %v2951_v49, %v7719_v44  ;;  %v2942_v44 = vsel %vm6885_vm2, %v2937_v19, %v2941_v50  ;;  %v3011_v12 = vshll.u32 %v5234_v55, 16  ;;  %6277 = vmatprep.subr.bf16.mxu1 %v6697_v30  ;;  %v5766_v15 = vpop.f32.mrb[5].mxu0  ;;  %v5235_v49 = vld [vmem:[%s6854_s24 + $0x74] sm:$0x1] }
 0x10c   : > { %v2980_v53 = vsel %vm6885_vm2, %v2975_v24, %v7748_v27  ;;  %v3009_v56 = vrot.slane %v9069_v23, 4  ;;  %v8251_v63 = vcombine.low %v2932_v18, %v2942_v44  ;;  %v2966_v54 = vsel %vm6885_vm2, %v2961_v26, %v2965_v5 }
 0x10d   : > { %v3004_v27 = vsel %vm6885_vm2, %v2999_v48, %v7830_v34  ;;  %v9071_v4 = vor.u32 %v7842_v11, %v7840_v31  ;;  %v9072_v59 = vor.u32 %v7854_v28, %v7845_v17  ;;  %v8262_v24 = vadd.f32 %v5766_v15, %v5765_v58  ;;  %v5768_v34 = vpop.f32.mrb[6].mxu0  ;;  %v6704_v31 = vld [vmem:[%s8883_s1 + $0x228] sm:$0xff]  }
 0x10e   : > { %v8264_v55 = vcombine.low %v2956_v14, %v2966_v54  ;;  %v2990_v18 = vsel %vm6885_vm2, %v2985_v52, %v2989_v10  ;;  %v3013_v50 = vrot.slane %v3011_v12, 5  ;;  %v5769_v26 = vpop.f32.mrb[7].mxu0  ;;  %v3035_v21 = vshll.u32 %v5235_v49, 16  ;;  %6278 = vmatpush3.bf16.msra.mxu1 %v6697_v30  ;;  %v5237_v30 = vld [vmem:[%s6854_s24 + $0x8c] sm:$0x1]  ;;  %v9082_v49 = vld [vmem:[#allocation36_spill] sm:$0xff] }
 0x10f   : > { %v3023_v19 = vrot.slane %v9071_v4, 4  ;;  %v3033_v36 = vrot.slane %v9072_v59, 4  ;;  %v8272_v11 = vcombine.low %v2980_v53, %v2990_v18  ;;  %v9073_v61 = vor.u32 %v7956_v2, %v7910_v6  ;;  %6279 = vmatprep.subr.bf16.mxu1 %v6700_v0  ;;  %v9083_v4 = vld [vmem:[#allocation40_spill] sm:$0xff] }
 0x110   : > { %v8280_v48 = vadd.f32 %v5769_v26, %v5768_v34  ;;  %v3014_v46 = vsel %vm6885_vm2, %v3009_v56, %v3013_v50  ;;  %v9074_v14 = vor.u32 %v7968_v62, %v7966_v57  ;;  %v3059_v53 = vshll.u32 %v5236_v33, 16  ;;  %v9077_v56 = vld [vmem:[#allocation5_spill] sm:$0xff]  ;;  %6248 = vmatmul.mubr.bf16.gmra.mrb[8].mxu1 %v9082_v49  ;;  %v9086_v18 = vld [vmem:[#allocation8_spill] sm:$0xff] }
 0x111   : > { %v3028_v28 = vsel %vm6885_vm2, %v3023_v19, %v7845_v17  ;;  %v3047_v52 = vrot.slane %v9073_v61, 4  ;;  %v9075_v23 = vcombine.low %v8010_v16, %v8014_v29  ;;  %v8290_v17 = vcombine.low %v3004_v27, %v3014_v46  ;;  %v5238_v62 = vld [vmem:[%s6854_s24 + $0x98] sm:$0x1]  ;;  %v9080_v27 = vld [vmem:[#allocation10_spill] sm:$0xff]  ;;  %v9084_v19 = vld [vmem:[#allocation39_spill] sm:$0xff]  ;;  %6251 = vmatprep.mubr.bf16.mxu1 %v9086_v18 }
 0x112   : > { %v3057_v5 = vrot.slane %v9074_v14, 4  ;;  %v3037_v6 = vrot.slane %v3035_v21, 5  ;;  %v9078_v58 = vor.u32 %v9076_v3, %v9077_v56  ;;  %v3061_v10 = vrot.slane %v3059_v53, 5  ;;  %6280 = vmatpush3.bf16.msra.mxu1 %v6700_v0  ;;  %v5771_v50 = vpop.f32.mrb[8].mxu0  ;;  %v5239_v46 = vld [vmem:[%s6854_s24 + $0xa4] sm:$0x1] }
 0x113   : > { %3785 = vmatmul.mubr.bf16.gmra.mrb[112].mxu0 %v9075_v23  ;;  %v3052_v2 = vsel %vm6885_vm2, %v3047_v52, %v7966_v57  ;;  %v9079_v16 = vor.u32 %v7984_v20, %v7982_v9  ;;  %v3083_v12 = vshll.u32 %v5237_v30, 16  ;;  %v9081_v15 = vor.u32 %v8049_v35, %v9080_v27  ;;  %v6707_v57 = vld [vmem:[%s8883_s1 + $0x230] sm:$0xff]   ;;  %v5772_v21 = vpop.f32.mrb[9].mxu0  ;;  %6281 = vmatprep.subr.bf16.mxu1 %v6704_v31  ;;  %v9088_v0 = vld [vmem:[#allocation41_spill] sm:$0xff]  ;;  %v9090_v23 = vld [vmem:[#allocation46_spill] sm:$0xff] }
 0x114   : > { %v3071_v44 = vrot.slane %v9078_v58, 4  ;;  %3792 = vmatprep.mubr.bf16.mxu0 %v6702_v41  ;;  %v3038_v41 = vsel %vm6885_vm2, %v3033_v36, %v3037_v6  ;;  %v9085_v59 = vor.u32 %v9083_v4, %v9084_v19  ;;  %v3107_v35 = vshll.u32 %v5238_v62, 16  ;;  %v9087_v14 = vld [vmem:[#allocation44_spill] sm:$0xff]  ;;  %v9091_v6 = vld [vmem:[#allocation45_spill] sm:$0xff]  ;;  %v5774_v56 = vpop.f32.mrb[10].mxu0  ;;  %v6705_v58 = vld [vmem:[%s6854_s24 + $0x180] sm:$0xff]  }
 0x115   : > { %v3081_v29 = vrot.slane %v9079_v16, 4  ;;  %v3095_v54 = vrot.slane %v9081_v15, 4  ;;  %v8319_v33 = vcombine.low %v3028_v28, %v3038_v41  ;;  %v3062_v36 = vsel %vm6885_vm2, %v3057_v5, %v3061_v10  ;;  %v9093_v16 = vld [vmem:[#allocation32_spill] sm:$0xff]  ;;  %v5775_v27 = vpop.f32.mrb[11].mxu0 }
 0x116   : > { %v3076_v20 = vsel %vm6885_vm2, %v3071_v44, %v7982_v9  ;;  %v3105_v34 = vrot.slane %v9085_v59, 4  ;;  %v3085_v26 = vrot.slane %v3083_v12, 5  ;;  %v8326_v61 = vcombine.low %v3052_v2, %v3062_v36  ;;  %v5240_v2 = vld [vmem:[%s6854_s24 + $0xb0] sm:$0x1]  ;;  %6282 = vmatpush3.bf16.msra.mxu1 %v6704_v31  ;;  %v9099_v36 = vld [vmem:[#allocation14_spill] sm:$0xff] }
 0x117   : > { %v3100_v9 = vsel %vm6885_vm2, %v3095_v54, %v9084_v19  ;;  %v3109_v52 = vrot.slane %v3107_v35, 5  ;;  %v9089_v53 = vor.u32 %v9087_v14, %v9088_v0  ;;  %v9092_v30 = vor.u32 %v9090_v23, %v9091_v6  ;;  %6283 = vmatprep.subr.bf16.mxu1 %v6707_v57  ;;  %v6711_v19 = vld [vmem:[%s8883_s1 + $0x238] sm:$0xff]   ;;  %v9102_v0 = vld [vmem:[#allocation3_spill] sm:$0xff]  ;;  %v9103_v23 = vld [vmem:[#allocation2_spill] sm:$0xff] }
 0x118   : > { %v8335_v5 = vadd.f32 %v5772_v21, %v5771_v50  ;;  %v3086_v44 = vsel %vm6885_vm2, %v3081_v29, %v3085_v26  ;;  %v3131_v62 = vshll.u32 %v5239_v46, 16  ;;  %v3143_v10 = vrot.slane %v3142_v25, 4  ;;  %v9094_v25 = vld [vmem:[#allocation6_spill] sm:$0xff]  ;;  %v5241_v35 = vld [vmem:[%s6854_s24 + $0xbc] sm:$0x1]  ;;  %v9100_v26 = vld [vmem:[#allocation15_spill] sm:$0xff]  ;;  %6252 = vmatmul.mubr.bf16.gmra.mrb[12].mxu1 %v9102_v0 }
 0x119   : > { %v3119_v28 = vrot.slane %v9089_v53, 4  ;;  %v3129_v3 = vrot.slane %v9092_v30, 4  ;;  %v700_v12 = vshrl.u32 %v9093_v16, 16  ;;  %v8345_v15 = vcombine.low %v3076_v20, %v3086_v44  ;;  %v9095_v20 = vld [vmem:[#allocation12_spill] sm:$0xff]  ;;  %6255 = vmatprep.mubr.bf16.mxu1 %v9103_v23  ;;  %v9106_v44 = vld [vmem:[#allocation43_spill] sm:$0xff] }
 0x11a   : > { %v3110_v54 = vsel %vm6885_vm2, %v3105_v34, %v3109_v52  ;;  %v8352_v29 = vadd.f32 %v5775_v27, %v5774_v56  ;;  %v3133_v1 = vrot.slane %v3131_v62, 5  ;;  %v3148_v43 = vsel %vm6885_vm2, %v3143_v10, %v8089_v40  ;;  %v5777_v38 = vpop.f32.mrb[12].mxu0  ;;  %6284 = vmatpush3.bf16.msra.mxu1 %v6707_v57  ;;  %v9107_v62 = vld [vmem:[#allocation42_spill] sm:$0xff]  ;;  %v9117_v23 = vld [vmem:[#allocation28_spill] sm:$0xff] }
 0x11b   : > { %v3124_v49 = vsel %vm6885_vm2, %v3119_v28, %v9091_v6  ;;  %v8354_v41 = vcombine.low %v3100_v9, %v3110_v54  ;;  %v9096_v4 = vcombine.low %v9094_v25, %v9095_v20  ;;  %v9097_v31 = vor.u32 %v8099_v60, %v8089_v40  ;;  %v5242_v40 = vld [vmem:[%s6854_s24 + $0xc8] sm:$0x1]  ;;  %v9101_v60 = vld [vmem:[#allocation16_spill] sm:$0xff]  ;;  %6285 = vmatprep.subr.bf16.mxu1 %v6711_v19 }
 0x11c   : > { %v3155_v34 = vshll.u32 %v5240_v2, 16  ;;  %v9098_v18 = vor.u32 %v8107_v39, %v8105_v8  ;;  %v3190_v9 = vor.u32 %v9100_v26, %v9099_v36  ;;  %v3134_v21 = vsel %vm6885_vm2, %v3129_v3, %v3133_v1  ;;  %v9104_v3 = vld [vmem:[#allocation26_spill] sm:$0xff]  ;;  %v6709_v54 = vld [vmem:[%s6854_s24 + $0x18c] sm:$0xff]  }
 0x11d   : > { %3793 = vmatmul.mubr.bf16.gmra.mrb[116].mxu0 %v9096_v4  ;;  %v3153_v59 = vrot.slane %v9097_v31, 4  ;;  %v3177_v52 = vrot.slane %v3176_v42, 4  ;;  %v3179_v46 = vshll.u32 %v5241_v35, 16  ;;  %v3200_v14 = vor.u32 %v8174_v37, %v9101_v60  ;;  %v9109_v31 = vld [vmem:[#allocation30_spill] sm:$0xff] }
 0x11e   : > { %v3167_v50 = vrot.slane %v9098_v18, 4  ;;  %3800 = vmatprep.mubr.bf16.mxu0 %v6705_v58  ;;  %v8383_v39 = vcombine.low %v3124_v49, %v3134_v21  ;;  %v3157_v8 = vrot.slane %v3155_v34, 5  ;;  %v3191_v28 = vrot.slane %v3190_v9, 4  ;;  %v5778_v58 = vpop.f32.mrb[13].mxu0  ;;  %6286 = vmatpush3.bf16.msra.mxu1 %v6711_v19  ;;  %v9116_v19 = vld [vmem:[#allocation27_spill] sm:$0xff] }
 0x11f   : > { %v3181_v42 = vrot.slane %v3179_v46, 5  ;;  %v3201_v6 = vrot.slane %v3200_v14, 4  ;;  %v3203_v30 = vshll.u32 %v5242_v40, 16  ;;  %v9105_v37 = vshll.u32 %v9104_v3, 16  ;;  %v5780_v27 = vpop.f32.mrb[14].mxu0  ;;  %v9113_v14 = vld [vmem:[#allocation37_spill] sm:$0xff] }
 0x120   : > { %v3172_v53 = vsel %vm6885_vm2, %v3167_v50, %v8109_v22  ;;  %v5257_v2 = vcombine.low %v9107_v62, %v9106_v44  ;;  %v3158_v22 = vsel %vm6885_vm2, %v3153_v59, %v3157_v8  ;;  %v3196_v57 = vsel %vm6885_vm2, %v3191_v28, %v9101_v60  ;;  %v5781_v50 = vpop.f32.mrb[15].mxu0  ;;  %v345_v40 = vld [vmem:[%s6854_s24 + $0xb0] sm:$0x1]  ;;  %v9115_v28 = vld [vmem:[#allocation17_spill] sm:$0xff]  ;;  %v6728_v62 = vld [vmem:[%s6854_s24 + $0xc] sm:$0xf] }
 0x121   : > { %v8391_v56 = vrot.slane %v9105_v37, 5  ;;  %v8400_v10 = vadd.f32 %v5778_v58, %v5777_v38  ;;  %v8403_v49 = vcombine.low %v3148_v43, %v3158_v22  ;;  %v3182_v1 = vsel %vm6885_vm2, %v3177_v52, %v3181_v42  ;;  %v344_v52 = vld [vmem:[%s6854_s24 + $0xa4] sm:$0x1]  ;;  %6256 = vmatmul.mubr.bf16.gmra.mrb[16].mxu1 %v9115_v28 }
 0x122   : > { %v3205_v25 = vrot.slane %v3203_v30, 5  ;;  %v9108_v20 = vshrl.u32 %v9104_v3, 16  ;;  %v9110_v59 = vshrl.u32 %v9109_v31, 16  ;;  %v9111_v35 = vshll.u32 %v9109_v31, 16  ;;  %v9118_v30 = vld [vmem:[#allocation25_spill] sm:$0xff]  ;;  %v5783_v3 = vpop.f32.mrb[16].mxu0 }
 0x123   : > { %v8413_v36 = vcombine.low %v3172_v53, %v3182_v1  ;;  %v9112_v26 = vshll.u32 %v9093_v16, 16  ;;  %v702_v9 = vrot.slane %v700_v12, 4  ;;  %v8419_v21 = vadd.f32 %v5781_v50, %v5780_v27  ;;  %v9114_v16 = vld [vmem:[#allocation38_spill] sm:$0xff]  ;;  %6259 = vmatprep.mubr.bf16.mxu1 %v9118_v30  ;;  %v5784_v22 = vpop.f32.mrb[17].mxu0  ;;  %v9120_v27 = vld [vmem:[#allocation47_spill] sm:$0xff] }
 0x124   : > { %v678_v4 = vrot.slane %v9108_v20, 4  ;;  %v689_v34 = vrot.slane %v9110_v59, 4  ;;  %v692_v18 = vrot.slane %v9111_v35, 5  ;;  %v3206_v46 = vsel %vm6885_vm2, %v3201_v6, %v3205_v25  ;;  %v6729_v25 = vld [vmem:[%s6854_s24 + $0x10] sm:$0xf]  ;;  %v6712_v50 = vld [vmem:[%s6854_s24 + $0x264] sm:$0xff]  }
 0x125   : > { %v8417_v43 = vrot.slane %v9112_v26, 5  ;;  %3801 = vmatmul.mubr.bf16.gmra.mrb[120].mxu0 %v5257_v2  ;;  %v8425_v60 = vcombine.low %v3196_v57, %v3206_v46  ;;  %v711_v0 = vshrl.u32 %v9113_v14, 16  ;;  %v714_v8 = vshll.u32 %v9113_v14, 16  ;;  %v9119_v57 = vld [vmem:[#allocation48_spill] sm:$0xff] }
 0x126   : > { %v720_v53 = vshll.u32 %v9114_v16, 16  ;;  %3808 = vmatprep.mubr.bf16.mxu0 %v6709_v54  ;;  %v724_v12 = vshrl.u32 %v9114_v16, 16  ;;  %v669_v38 = vor.u32 %v9117_v23, %v9116_v19  ;;  %v679_v42 = vor.u32 %v678_v4, %v8391_v56  ;;  %v346_v23 = vld [vmem:[%s6854_s24 + $0xbc] sm:$0x1] }
 0x127   : > { %v682_v6 = vshll.u32 %v344_v52, 16  ;;  %v693_v37 = vor.u32 %v692_v18, %v689_v34  ;;  %v703_v58 = vor.u32 %v702_v9, %v8417_v43  ;;  %v706_v44 = vshll.u32 %v345_v40, 16  ;;  %v5786_v18 = vpop.f32.mrb[18].mxu0 }
 0x128   : > { %v2824_v2 = vshrl.u32 %v6728_v62, 16  ;;  %v5258_v54 = vcombine.low %v9120_v27, %v9119_v57  ;;  %v2827_v1 = vshll.u32 %v6728_v62, 16  ;;  %v2833_v20 = vshll.u32 %v6729_v25, 16  ;;  %v5787_v40 = vpop.f32.mrb[19].mxu0  ;;  %v9121_v62 = vld [vmem:[#allocation22_spill] sm:$0xff] }
 0x129   : > { %v2837_v31 = vshrl.u32 %v6729_v25, 16  ;;  %v713_v4 = vrot.slane %v711_v0, 4  ;;  %v716_v59 = vrot.slane %v714_v8, 5  ;;  %v8441_v35 = vrot.slane %v720_v53, 5  ;;  %6260 = vmatmul.mubr.bf16.gmra.mrb[20].mxu1 %v9121_v62  ;;  %v6713_v25 = vld [vmem:[%s6854_s24 + $0x270] sm:$0xff]  }
 0x12a   : > { %v8443_v34 = vadd.f32 %v5784_v22, %v5783_v3  ;;  %v726_v26 = vrot.slane %v724_v12, 4  ;;  %v670_v9 = vrot.slane %v669_v38, 4  ;;  %v680_v52 = vrot.slane %v679_v42, 4  ;;  %v5227_v3 = vld [vmem:[%s6854_s24 + $0x14] sm:$0x1]  ;;  %v9122_v42 = vld [vmem:[#allocation7_spill] sm:$0xff] }
 0x12b   : > { %v684_v46 = vrot.slane %v682_v6, 5  ;;  %v694_v14 = vrot.slane %v693_v37, 4  ;;  %v704_v16 = vrot.slane %v703_v58, 4  ;;  %v708_v28 = vrot.slane %v706_v44, 5  ;;  %6263 = vmatprep.mubr.bf16.mxu1 %v9122_v42 }
 0x12c   : > { %v8446_v19 = vadd.f32 %v5787_v40, %v5786_v18  ;;  %v2826_v0 = vrot.slane %v2824_v2, 4  ;;  %v2829_v8 = vrot.slane %v2827_v1, 5  ;;  %v2835_v53 = vrot.slane %v2833_v20, 5  ;;  %v5789_v2 = vpop.f32.mrb[20].mxu0 }
 0x12d   : > { %3809 = vmatmul.mubr.bf16.gmra.mrb[124].mxu0 %v5258_v54  ;;  %v2839_v30 = vrot.slane %v2837_v31, 4  ;;  %v717_v12 = vor.u32 %v716_v59, %v713_v4  ;;  %v727_v38 = vor.u32 %v726_v26, %v8441_v35  ;;  %v675_v6 = vsel %vm6885_vm2, %v670_v9, %v8391_v56  ;;  %v5790_v57 = vpop.f32.mrb[21].mxu0  ;;  %v6714_v31 = vld [vmem:[%s6854_s24 + $0x27c] sm:$0xff]  }
 0x12e   : > { %6335 = vmatprep.mubr.bf16.mxu0 %v6712_v50  ;;  %v685_v37 = vsel %vm6885_vm2, %v680_v52, %v684_v46  ;;  %v699_v58 = vsel %vm6885_vm2, %v694_v14, %v8417_v43  ;;  %v730_v44 = vshll.u32 %v346_v23, 16  ;;  %v709_v22 = vsel %vm6885_vm2, %v704_v16, %v708_v28  ;;  %v5792_v56 = vpop.f32.mrb[22].mxu0 }
 0x12f   : > { %v2830_v27 = vor.u32 %v2829_v8, %v2826_v0  ;;  %v2840_v54 = vor.u32 %v2839_v30, %v2835_v53  ;;  %v2843_v1 = vshll.u32 %v5227_v3, 16  ;;  %v8464_v20 = vadd.f32 %v5790_v57, %v5789_v2  ;;  %v5793_v18 = vpop.f32.mrb[23].mxu0  ;;  %v6715_v30 = vld [vmem:[%s6854_s24 + $0x288] sm:$0xff]  }
 0x130   : > { %v4936_v4 = vcombine.low %v675_v6, %v685_v37  ;;  %v718_v59 = vrot.slane %v717_v12, 4  ;;  %v4937_v50 = vcombine.low %v699_v58, %v709_v22  ;;  %v728_v26 = vrot.slane %v727_v38, 4  ;;  %v6716_v12 = vld [vmem:[%s6854_s24 + $0x294] sm:$0xff]   ;;  %v6717_v37 = vld [vmem:[%s6854_s24 + $0x2a0] sm:$0xff]   ;;  %v6718_v2 = vld [vmem:[%s6854_s24 + $0x2ac] sm:$0xff]  }
 0x131   : > { %v732_v43 = vrot.slane %v730_v44, 5  ;;  %v8467_v9 = vadd.f32 %v5793_v18, %v5792_v56  ;;  %v2831_v52 = vrot.slane %v2830_v27, 4  ;;  %v2841_v46 = vrot.slane %v2840_v54, 4  ;;  %v6721_v18 = vld [vmem:[%s6854_s24 + $0x2d0] sm:$0xff]  }
 0x132   : > { %v2845_v40 = vrot.slane %v2843_v1, 5  ;;  %6264 = vmatmul.mubr.bf16.gmra.mrb[24].mxu1 %v4936_v4  ;;  %v723_v14 = vsel %vm6885_vm2, %v718_v59, %v8441_v35  ;;  %v5795_v28 = vpop.f32.mrb[24].mxu0  ;;  %v6719_v1 = vld [vmem:[%s6854_s24 + $0x2b8] sm:$0xff]  }
 0x133   : > { %6267 = vmatprep.mubr.bf16.mxu1 %v4937_v50  ;;  %v733_v16 = vsel %vm6885_vm2, %v728_v26, %v732_v43  ;;  %v2836_v23 = vsel %vm6885_vm2, %v2831_v52, %v2835_v53  ;;  %v5796_v8 = vpop.f32.mrb[25].mxu0  ;;  %v6722_v43 = vld [vmem:[%s6854_s24 + $0x2dc] sm:$0xff]  }
 0x134   : > { %v2846_v0 = vsel %vm6885_vm2, %v2841_v46, %v2845_v40  ;;  %v8479_v3 = vadd.f32 %v5796_v8, %v5795_v28  ;;  %v5798_v62 = vpop.f32.mrb[26].mxu0  ;;  %v4938_v38 = vcombine.low %v723_v14, %v733_v16 }
 0x135   : > { %6336 = vmatmul.mubr.bf16.vlgmr.msra.gmra.mrb[128].mxu0 %v6713_v25  ;;  %v5799_v35 = vpop.f32.mrb[27].mxu0  ;;  %v5275_v42 = vcombine.low %v2836_v23, %v2846_v0  ;;  %v6724_v23 = vld [vmem:[%s6854_s24 + $0x2f4] sm:$0xff]  }
 0x136   : > { %6339 = vmatprep.mubr.bf16.mxu0 %v6714_v31  ;;  %v8482_v6 = vadd.f32 %v5799_v35, %v5798_v62  ;;  %v6720_v31 = vld [vmem:[%s6854_s24 + $0x2c4] sm:$0xff]  }
 0x13a   : > { %6268 = vmatmul.mubr.bf16.gmra.mrb[28].mxu1 %v4938_v38  ;;  %v5801_v47 = vpop.f32.mrb[28].mxu0 }
 0x13b   : > { %6287 = vmatprep.mubr.bf16.mxu1 %v5275_v42  ;;  %v5802_v53 = vpop.f32.mrb[29].mxu0 }
 0x13c   : > { %v8485_v58 = vadd.f32 %v5802_v53, %v5801_v47  ;;  %v5804_v44 = vpop.f32.mrb[30].mxu0  ;;  %v6725_v53 = vld [vmem:[%s6854_s24 + $0x300] sm:$0xff]  }
 0x13d   : > { %6340 = vmatmul.mubr.bf16.gmra.mrb[132].mxu0 %v6715_v30  ;;  %v5805_v22 = vpop.f32.mrb[31].mxu0 }
 0x13e   : > { %6343 = vmatprep.mubr.bf16.mxu0 %v6716_v12  ;;  %v8488_v57 = vadd.f32 %v5805_v22, %v5804_v44  ;;  %v6726_v22 = vld [vmem:[%s6854_s24 + $0x30c] sm:$0xff]  }
 0x142   : > { %6288 = vmatmul.mubr.bf16.vlgmr.msra.gmra.mrb[0].mxu1 %v8169_v32  ;;  %v5807_v27 = vpop.f32.mrb[32].mxu0 }
 0x143   : > { %6291 = vmatprep.mubr.bf16.mxu1 %v8195_v13  ;;  %v5808_v54 = vpop.f32.mrb[33].mxu0 }
 0x144   : > { %v8493_v25 = vadd.f32 %v5808_v54, %v5807_v27  ;;  %v5810_v56 = vpop.f32.mrb[34].mxu0 }
 0x145   : > { %6344 = vmatmul.mubr.bf16.gmra.mrb[136].mxu0 %v6717_v37  ;;  %v5811_v4 = vpop.f32.mrb[35].mxu0 }
 0x146   : > { %6347 = vmatprep.mubr.bf16.mxu0 %v6718_v2  ;;  %v8496_v59 = vadd.f32 %v5811_v4, %v5810_v56 }
 0x14a   : > { %6292 = vmatmul.mubr.bf16.gmra.mrb[4].mxu1 %v8206_v7  ;;  %v5813_v32 = vpop.f32.mrb[36].mxu0 }
 0x14b   : > { %6295 = vmatprep.mubr.bf16.mxu1 %v8251_v63  ;;  %v5814_v13 = vpop.f32.mrb[37].mxu0  ;;  %v6723_v63 = vld [vmem:[%s6854_s24 + $0x2e8] sm:$0xff]  }
 0x14c   : > { %v8501_v50 = vadd.f32 %v5814_v13, %v5813_v32  ;;  %v5816_v26 = vpop.f32.mrb[38].mxu0  ;;  %v6727_v13 = vld [vmem:[%s6854_s24 + $0x318] sm:$0xff]  }
 0x14d   : > { %6348 = vmatmul.mubr.bf16.gmra.mrb[140].mxu0 %v6719_v1  ;;  %v5817_v52 = vpop.f32.mrb[39].mxu0  ;;  %v5895_v14 = vpop.f32.mrb[32].mxu1 }
 0x14e   : > { %6351 = vmatprep.mubr.bf16.mxu0 %v6720_v31  ;;  %v8504_v46 = vadd.f32 %v5817_v52, %v5816_v26  ;;  %v5896_v0 = vpop.f32.mrb[33].mxu1 }
 0x14f   : > { %v5897_v30 = vadd.f32 %v5896_v0, %v5895_v14  ;;  %v5898_v62 = vpop.f32.mrb[34].mxu1 }
 0x150   : > { %v5899_v38 = vpop.f32.mrb[35].mxu1 }
 0x152   : > { %6296 = vmatmul.mubr.bf16.gmra.mrb[8].mxu1 %v8264_v55  ;;  %v5819_v7 = vpop.f32.mrb[40].mxu0  ;;  %v8515_v55 = vadd.f32 %v5897_v30, %v8182_v45 }
 0x153   : > { %6299 = vmatprep.mubr.bf16.mxu1 %v8272_v11  ;;  %v5820_v40 = vpop.f32.mrb[41].mxu0  ;;  %v5900_v11 = vadd.f32 %v5899_v38, %v5898_v62 }
 0x154   : > { %v8509_v16 = vadd.f32 %v5820_v40, %v5819_v7  ;;  %v5822_v28 = vpop.f32.mrb[42].mxu0 }
 0x155   : > { %6352 = vmatmul.mubr.bf16.gmra.mrb[144].mxu0 %v6721_v18  ;;  %v5823_v8 = vpop.f32.mrb[43].mxu0  ;;  %v8519_v35 = vadd.f32 %v5900_v11, %v8204_v51  ;;  %v5901_v37 = vpop.f32.mrb[36].mxu1 }
 0x156   : > { %6355 = vmatprep.mubr.bf16.mxu0 %v6722_v43  ;;  %v8512_v12 = vadd.f32 %v5823_v8, %v5822_v28  ;;  %v5902_v45 = vpop.f32.mrb[37].mxu1 }
 0x157   : > { %v5903_v54 = vadd.f32 %v5902_v45, %v5901_v37  ;;  %v5904_v1 = vpop.f32.mrb[38].mxu1 }
 0x159   : > { %v8529_v51 = vadd.f32 %v5903_v54, %v8262_v24 }
 0x15a   : > { %6300 = vmatmul.mubr.bf16.gmra.mrb[12].mxu1 %v8290_v17  ;;  %v5825_v42 = vpop.f32.mrb[44].mxu0  ;;  %v5905_v17 = vpop.f32.mrb[39].mxu1 }
 0x15b   : > { %6303 = vmatprep.mubr.bf16.mxu1 %v8319_v33  ;;  %v5826_v47 = vpop.f32.mrb[45].mxu0  ;;  %v5906_v33 = vadd.f32 %v5905_v17, %v5904_v1 }
 0x15c   : > { %v8523_v44 = vadd.f32 %v5826_v47, %v5825_v42  ;;  %v5828_v2 = vpop.f32.mrb[46].mxu0 }
 0x15d   : > { %6356 = vmatmul.mubr.bf16.gmra.mrb[148].mxu0 %v6723_v63  ;;  %v5829_v27 = vpop.f32.mrb[47].mxu0  ;;  %v8533_v31 = vadd.f32 %v5906_v33, %v8280_v48  ;;  %v5907_v18 = vpop.f32.mrb[40].mxu1 }
 0x15e   : > { %6359 = vmatprep.mubr.bf16.mxu0 %v6724_v23  ;;  %v8526_v56 = vadd.f32 %v5829_v27, %v5828_v2  ;;  %v5908_v52 = vpop.f32.mrb[41].mxu1 }
 0x15f   : > { %v5909_v24 = vadd.f32 %v5908_v52, %v5907_v18  ;;  %v5910_v40 = vpop.f32.mrb[42].mxu1 }
 0x160   : > { %v5911_v14 = vpop.f32.mrb[43].mxu1 }
 0x161   : > { %v8542_v48 = vadd.f32 %v5909_v24, %v8335_v5 }
 0x162   : > { %6304 = vmatmul.mubr.bf16.gmra.mrb[16].mxu1 %v8326_v61  ;;  %v5831_v4 = vpop.f32.mrb[48].mxu0  ;;  %v5912_v61 = vadd.f32 %v5911_v14, %v5910_v40 }
 0x163   : > { %6307 = vmatprep.mubr.bf16.mxu1 %v8345_v15  ;;  %v5832_v32 = vpop.f32.mrb[49].mxu0 }
 0x164   : > { %v8537_v26 = vadd.f32 %v5832_v32, %v5831_v4  ;;  %v5834_v43 = vpop.f32.mrb[50].mxu0  ;;  %v8546_v15 = vadd.f32 %v5912_v61, %v8352_v29 }
 0x165   : > { %6360 = vmatmul.mubr.bf16.gmra.mrb[152].mxu0 %v6725_v53  ;;  %v5835_v7 = vpop.f32.mrb[51].mxu0  ;;  %v5913_v0 = vpop.f32.mrb[44].mxu1 }
 0x166   : > { %6363 = vmatprep.mubr.bf16.mxu0 %v6726_v22  ;;  %v8539_v63 = vadd.f32 %v5835_v7, %v5834_v43  ;;  %v5914_v62 = vpop.f32.mrb[45].mxu1 }
 0x167   : > { %v5915_v11 = vadd.f32 %v5914_v62, %v5913_v0  ;;  %v5916_v42 = vpop.f32.mrb[46].mxu1 }
 0x168   : > { %v5917_v47 = vpop.f32.mrb[47].mxu1 }
 0x169   : > { %v5918_v29 = vadd.f32 %v5917_v47, %v5916_v42 }
 0x16a   : > { %6308 = vmatmul.mubr.bf16.gmra.mrb[20].mxu1 %v8354_v41  ;;  %v5837_v28 = vpop.f32.mrb[52].mxu0  ;;  %v8554_v41 = vadd.f32 %v5915_v11, %v8400_v10 }
 0x16b   : > { %6311 = vmatprep.mubr.bf16.mxu1 %v8383_v39  ;;  %v5838_v23 = vpop.f32.mrb[53].mxu0  ;;  %v8558_v39 = vadd.f32 %v5918_v29, %v8419_v21 }
 0x16c   : > { %v8549_v8 = vadd.f32 %v5838_v23, %v5837_v28  ;;  %v5840_v30 = vpop.f32.mrb[54].mxu0 }
 0x16d   : > { %6364 = vmatmul.mubr.bf16.gmra.mrb[156].mxu0 %v6727_v13  ;;  %v5841_v38 = vpop.f32.mrb[55].mxu0  ;;  %v5919_v2 = vpop.f32.mrb[48].mxu1 }
 0x16e   : > { %v8551_v5 = vadd.f32 %v5841_v38, %v5840_v30  ;;  %v5920_v27 = vpop.f32.mrb[49].mxu1 }
 0x16f   : > { %v5921_v1 = vadd.f32 %v5920_v27, %v5919_v2  ;;  %v5922_v17 = vpop.f32.mrb[50].mxu1 }
 0x170   : > { %v5923_v33 = vpop.f32.mrb[51].mxu1 }
 0x171   : > { %v5924_v21 = vadd.f32 %v5923_v33, %v5922_v17 }
 0x172   : > { %6312 = vmatmul.mubr.bf16.gmra.mrb[24].mxu1 %v8403_v49  ;;  %v5843_v53 = vpop.f32.mrb[56].mxu0  ;;  %v8566_v49 = vadd.f32 %v5921_v1, %v8443_v34 }
 0x173   : > { %6315 = vmatprep.mubr.bf16.mxu1 %v8413_v36  ;;  %v5844_v37 = vpop.f32.mrb[57].mxu0  ;;  %v8570_v36 = vadd.f32 %v5924_v21, %v8446_v19 }
 0x174   : > { %v8561_v22 = vadd.f32 %v5844_v37, %v5843_v53  ;;  %v5846_v45 = vpop.f32.mrb[58].mxu0 }
 0x175   : > { %v5847_v54 = vpop.f32.mrb[59].mxu0  ;;  %v5925_v13 = vpop.f32.mrb[52].mxu1 }
 0x176   : > { %v8563_v10 = vadd.f32 %v5847_v54, %v5846_v45  ;;  %v5926_v52 = vpop.f32.mrb[53].mxu1 }
 0x177   : > { %v5927_v24 = vadd.f32 %v5926_v52, %v5925_v13  ;;  %v5928_v40 = vpop.f32.mrb[54].mxu1 }
 0x178   : > { %v5929_v34 = vpop.f32.mrb[55].mxu1 }
 0x179   : > { %v8577_v61 = vadd.f32 %v5927_v24, %v8464_v20 }
 0x17a   : > { %6316 = vmatmul.mubr.bf16.gmra.mrb[28].mxu1 %v8425_v60  ;;  %v5849_v4 = vpop.f32.mrb[60].mxu0  ;;  %v5930_v60 = vadd.f32 %v5929_v34, %v5928_v40 }
 0x17b   : > { %v5850_v32 = vpop.f32.mrb[61].mxu0 }
 0x17c   : > { %v8572_v18 = vadd.f32 %v5850_v32, %v5849_v4  ;;  %v5852_v43 = vpop.f32.mrb[62].mxu0  ;;  %v8580_v19 = vadd.f32 %v5930_v60, %v8467_v9 }
 0x17d   : > { %v5853_v7 = vpop.f32.mrb[63].mxu0  ;;  %v5931_v0 = vpop.f32.mrb[56].mxu1 }
 0x17e   : > { %v8574_v14 = vadd.f32 %v5853_v7, %v5852_v43  ;;  %v5932_v38 = vpop.f32.mrb[57].mxu1 }
 0x17f   : > { %v5933_v42 = vadd.f32 %v5932_v38, %v5931_v0  ;;  %v5934_v47 = vpop.f32.mrb[58].mxu1 }
 0x180   : > { %v5935_v37 = vpop.f32.mrb[59].mxu1 }
 0x181   : > { %v8586_v20 = vadd.f32 %v5933_v42, %v8479_v3  ;;  %v5936_v2 = vadd.f32 %v5935_v37, %v5934_v47 }
 0x182   : > { %v6031_v28 = vpop.f32.mrb[64].mxu0 }
 0x183   : > { %v6032_v23 = vpop.f32.mrb[65].mxu0  ;;  %v8592_v45 = vadd.f32 %v5936_v2, %v8482_v6 }
 0x184   : > { %v6033_v30 = vadd.f32 %v6032_v23, %v6031_v28  ;;  %v6034_v62 = vpop.f32.mrb[66].mxu0 }
 0x185   : > { %v6035_v11 = vpop.f32.mrb[67].mxu0  ;;  %v5937_v1 = vpop.f32.mrb[60].mxu1 }
 0x186   : > { %v6036_v29 = vadd.f32 %v6035_v11, %v6034_v62  ;;  %v8583_v53 = vadd.f32 %v8515_v55, %v6033_v30  ;;  %v5938_v21 = vpop.f32.mrb[61].mxu1 }
 0x187   : > { %v5939_v55 = vadd.f32 %v5938_v21, %v5937_v1  ;;  %v5940_v32 = vpop.f32.mrb[62].mxu1 }
 0x188   : > { %v8589_v9 = vadd.f32 %v8519_v35, %v6036_v29  ;;  %v5941_v43 = vpop.f32.mrb[63].mxu1 }
 0x189   : > { %v8598_v35 = vadd.f32 %v5939_v55, %v8485_v58  ;;  %v5942_v52 = vadd.f32 %v5941_v43, %v5940_v32 }
 0x18a   : > { %v6037_v27 = vpop.f32.mrb[68].mxu0 }
 0x18b   : > { %v6038_v54 = vpop.f32.mrb[69].mxu0  ;;  %v8604_v7 = vadd.f32 %v5942_v52, %v8488_v57 }
 0x18c   : > { %v6039_v17 = vadd.f32 %v6038_v54, %v6037_v27  ;;  %v6040_v33 = vpop.f32.mrb[70].mxu0 }
 0x18d   : > { %v6041_v4 = vpop.f32.mrb[71].mxu0  ;;  %v5943_v34 = vpop.f32.mrb[64].mxu1 }
 0x18e   : > { %v6042_v13 = vadd.f32 %v6041_v4, %v6040_v33  ;;  %v8595_v3 = vadd.f32 %v8529_v51, %v6039_v17  ;;  %v5944_v23 = vpop.f32.mrb[65].mxu1 }
 0x18f   : > { %v5945_v51 = vadd.f32 %v5944_v23, %v5943_v34  ;;  %v5946_v30 = vpop.f32.mrb[66].mxu1 }
 0x190   : > { %v8601_v6 = vadd.f32 %v8533_v31, %v6042_v13  ;;  %v5947_v38 = vpop.f32.mrb[67].mxu1 }
 0x191   : > { %v8610_v31 = vadd.f32 %v5945_v51, %v8493_v25  ;;  %v5948_v11 = vadd.f32 %v5947_v38, %v5946_v30 }
 0x192   : > { %v6043_v24 = vpop.f32.mrb[72].mxu0 }
 0x193   : > { %v6044_v40 = vpop.f32.mrb[73].mxu0  ;;  %v8616_v42 = vadd.f32 %v5948_v11, %v8496_v59 }
 0x194   : > { %v6045_v60 = vadd.f32 %v6044_v40, %v6043_v24  ;;  %v6046_v28 = vpop.f32.mrb[74].mxu0 }
 0x195   : > { %v6047_v0 = vpop.f32.mrb[75].mxu0  ;;  %v5949_v37 = vpop.f32.mrb[68].mxu1 }
 0x196   : > { %v6048_v62 = vadd.f32 %v6047_v0, %v6046_v28  ;;  %v8607_v58 = vadd.f32 %v8542_v48, %v6045_v60  ;;  %v5950_v54 = vpop.f32.mrb[69].mxu1 }
 0x197   : > { %v5951_v48 = vadd.f32 %v5950_v54, %v5949_v37  ;;  %v5952_v17 = vpop.f32.mrb[70].mxu1 }
 0x198   : > { %v8613_v57 = vadd.f32 %v8546_v15, %v6048_v62  ;;  %v5953_v21 = vpop.f32.mrb[71].mxu1 }
 0x199   : > { %v8622_v15 = vadd.f32 %v5951_v48, %v8501_v50  ;;  %v5954_v4 = vadd.f32 %v5953_v21, %v5952_v17 }
 0x19a   : > { %v6049_v47 = vpop.f32.mrb[76].mxu0 }
 0x19b   : > { %v6050_v29 = vpop.f32.mrb[77].mxu0  ;;  %v8628_v55 = vadd.f32 %v5954_v4, %v8504_v46 }
 0x19c   : > { %v6051_v2 = vadd.f32 %v6050_v29, %v6049_v47  ;;  %v6052_v27 = vpop.f32.mrb[78].mxu0 }
 0x19d   : > { %v6053_v1 = vpop.f32.mrb[79].mxu0  ;;  %v5955_v43 = vpop.f32.mrb[72].mxu1 }
 0x19e   : > { %v6054_v33 = vadd.f32 %v6053_v1, %v6052_v27  ;;  %v8619_v25 = vadd.f32 %v8554_v41, %v6051_v2  ;;  %v5956_v40 = vpop.f32.mrb[73].mxu1 }
 0x19f   : > { %v5957_v41 = vadd.f32 %v5956_v40, %v5955_v43  ;;  %v5958_v60 = vpop.f32.mrb[74].mxu1 }
 0x1a0   : > { %v8625_v59 = vadd.f32 %v8558_v39, %v6054_v33  ;;  %v5959_v23 = vpop.f32.mrb[75].mxu1 }
 0x1a1   : > { %v8634_v39 = vadd.f32 %v5957_v41, %v8509_v16  ;;  %v5960_v0 = vadd.f32 %v5959_v23, %v5958_v60 }
 0x1a2   : > { %v6055_v32 = vpop.f32.mrb[80].mxu0 }
 0x1a3   : > { %v6056_v13 = vpop.f32.mrb[81].mxu0  ;;  %v8640_v51 = vadd.f32 %v5960_v0, %v8512_v12 }
 0x1a4   : > { %v6057_v52 = vadd.f32 %v6056_v13, %v6055_v32  ;;  %v6058_v24 = vpop.f32.mrb[82].mxu0 }
 0x1a5   : > { %v6059_v34 = vpop.f32.mrb[83].mxu0  ;;  %v5961_v38 = vpop.f32.mrb[76].mxu1 }
 0x1a6   : > { %v6060_v28 = vadd.f32 %v6059_v34, %v6058_v24  ;;  %v8631_v50 = vadd.f32 %v8566_v49, %v6057_v52  ;;  %v5962_v29 = vpop.f32.mrb[77].mxu1 }
 0x1a7   : > { %v5963_v49 = vadd.f32 %v5962_v29, %v5961_v38  ;;  %v5964_v2 = vpop.f32.mrb[78].mxu1 }
 0x1a8   : > { %v8637_v46 = vadd.f32 %v8570_v36, %v6060_v28  ;;  %v5965_v54 = vpop.f32.mrb[79].mxu1 }
 0x1a9   : > { %v8646_v36 = vadd.f32 %v5963_v49, %v8523_v44  ;;  %v5966_v1 = vadd.f32 %v5965_v54, %v5964_v2 }
 0x1aa   : > { %v6061_v30 = vpop.f32.mrb[84].mxu0 }
 0x1ab   : > { %v6062_v62 = vpop.f32.mrb[85].mxu0  ;;  %v8652_v48 = vadd.f32 %v5966_v1, %v8526_v56 }
 0x1ac   : > { %v6063_v11 = vadd.f32 %v6062_v62, %v6061_v30  ;;  %v6064_v47 = vpop.f32.mrb[86].mxu0 }
 0x1ad   : > { %v6065_v37 = vpop.f32.mrb[87].mxu0  ;;  %v5967_v21 = vpop.f32.mrb[80].mxu1 }
 0x1ae   : > { %v6066_v27 = vadd.f32 %v6065_v37, %v6064_v47  ;;  %v8643_v16 = vadd.f32 %v8577_v61, %v6063_v11  ;;  %v5968_v13 = vpop.f32.mrb[81].mxu1 }
 0x1af   : > { %v5969_v61 = vadd.f32 %v5968_v13, %v5967_v21  ;;  %v5970_v52 = vpop.f32.mrb[82].mxu1 }
 0x1b0   : > { %v8649_v12 = vadd.f32 %v8580_v19, %v6066_v27  ;;  %v5971_v40 = vpop.f32.mrb[83].mxu1 }
 0x1b1   : > { %v8658_v19 = vadd.f32 %v5969_v61, %v8537_v26  ;;  %v5972_v34 = vadd.f32 %v5971_v40, %v5970_v52 }
 0x1b2   : > { %v6067_v17 = vpop.f32.mrb[88].mxu0 }
 0x1b3   : > { %v6068_v33 = vpop.f32.mrb[89].mxu0  ;;  %v8664_v41 = vadd.f32 %v5972_v34, %v8539_v63 }
 0x1b4   : > { %v6069_v4 = vadd.f32 %v6068_v33, %v6067_v17  ;;  %v6070_v32 = vpop.f32.mrb[90].mxu0 }
 0x1b5   : > { %v6071_v43 = vpop.f32.mrb[91].mxu0 }
 0x1b6   : > { %v6072_v24 = vadd.f32 %v6071_v43, %v6070_v32  ;;  %v8655_v44 = vadd.f32 %v8586_v20, %v6069_v4 }
 0x1b8   : > { %v8661_v56 = vadd.f32 %v8592_v45, %v6072_v24 }
 0x1ba   : > { %v6073_v60 = vpop.f32.mrb[92].mxu0  ;;  %v5973_v23 = vpop.f32.mrb[84].mxu1 }
 0x1bb   : > { %v6074_v28 = vpop.f32.mrb[93].mxu0  ;;  %v5974_v62 = vpop.f32.mrb[85].mxu1 }
 0x1bc   : > { %v6075_v0 = vadd.f32 %v6074_v28, %v6073_v60  ;;  %v6076_v30 = vpop.f32.mrb[94].mxu0  ;;  %v5975_v20 = vadd.f32 %v5974_v62, %v5973_v23  ;;  %v5976_v11 = vpop.f32.mrb[86].mxu1 }
 0x1bd   : > { %v6077_v38 = vpop.f32.mrb[95].mxu0  ;;  %v5977_v29 = vpop.f32.mrb[87].mxu1 }
 0x1be   : > { %v6078_v47 = vadd.f32 %v6077_v38, %v6076_v30  ;;  %v8667_v26 = vadd.f32 %v8598_v35, %v6075_v0  ;;  %v8670_v45 = vadd.f32 %v5975_v20, %v8549_v8  ;;  %v5978_v37 = vadd.f32 %v5977_v29, %v5976_v11 }
 0x1c0   : > { %v8673_v63 = vadd.f32 %v8604_v7, %v6078_v47  ;;  %v8676_v49 = vadd.f32 %v5978_v37, %v8551_v5 }
 0x1c2   : > { %v6079_v2 = vpop.f32.mrb[96].mxu0 }
 0x1c3   : > { %v6080_v27 = vpop.f32.mrb[97].mxu0  ;;  %v5979_v54 = vpop.f32.mrb[88].mxu1 }
 0x1c4   : > { %v6081_v1 = vadd.f32 %v6080_v27, %v6079_v2  ;;  %v6082_v17 = vpop.f32.mrb[98].mxu0  ;;  %v5980_v33 = vpop.f32.mrb[89].mxu1 }
 0x1c5   : > { %v6083_v21 = vpop.f32.mrb[99].mxu0  ;;  %v5981_v35 = vadd.f32 %v5980_v33, %v5979_v54  ;;  %v5982_v4 = vpop.f32.mrb[90].mxu1 }
 0x1c6   : > { %v6084_v32 = vadd.f32 %v6083_v21, %v6082_v17  ;;  %v8679_v8 = vadd.f32 %v8610_v31, %v6081_v1  ;;  %v5983_v13 = vpop.f32.mrb[91].mxu1 }
 0x1c7   : > { %v6454_v7 = vadd.f32 %v5981_v35, %v8561_v22  ;;  %v5984_v43 = vadd.f32 %v5983_v13, %v5982_v4 }
 0x1c8   : > { %v8683_v5 = vadd.f32 %v8616_v42, %v6084_v32 }
 0x1c9   : > { %v6460_v61 = vadd.f32 %v5984_v43, %v8563_v10 }
 0x1ca   : > { %v6085_v52 = vpop.f32.mrb[100].mxu0 }
 0x1cb   : > { %v6086_v24 = vpop.f32.mrb[101].mxu0  ;;  %v5985_v40 = vpop.f32.mrb[92].mxu1 }
 0x1cc   : > { %v6087_v34 = vadd.f32 %v6086_v24, %v6085_v52  ;;  %v6088_v60 = vpop.f32.mrb[102].mxu0  ;;  %v5986_v28 = vpop.f32.mrb[93].mxu1 }
 0x1cd   : > { %v6089_v23 = vpop.f32.mrb[103].mxu0  ;;  %v5987_v0 = vadd.f32 %v5986_v28, %v5985_v40  ;;  %v5988_v30 = vpop.f32.mrb[94].mxu1 }
 0x1ce   : > { %v6090_v31 = vadd.f32 %v6089_v23, %v6088_v60  ;;  %v8687_v62 = vadd.f32 %v8622_v15, %v6087_v34  ;;  %v5989_v22 = vpop.f32.mrb[95].mxu1 }
 0x1cf   : > { %v6451_v38 = vadd.f32 %v5987_v0, %v8572_v18  ;;  %v5990_v42 = vadd.f32 %v5989_v22, %v5988_v30 }
 0x1d0   : > { %v8691_v20 = vadd.f32 %v8628_v55, %v6090_v31 }
 0x1d1   : > { %v6457_v10 = vadd.f32 %v5990_v42, %v8574_v14 }
 0x1d2   : > { %v6091_v11 = vpop.f32.mrb[104].mxu0 }
 0x1d3   : > { %v6092_v47 = vpop.f32.mrb[105].mxu0 }
 0x1d4   : > { %v6093_v29 = vadd.f32 %v6092_v47, %v6091_v11  ;;  %v6094_v37 = vpop.f32.mrb[106].mxu0 }
 0x1d5   : > { %v6095_v2 = vpop.f32.mrb[107].mxu0 }
 0x1d6   : > { %v6096_v27 = vadd.f32 %v6095_v2, %v6094_v37  ;;  %v8695_v54 = vadd.f32 %v8634_v39, %v6093_v29 }
 0x1d8   : > { %v8698_v15 = vadd.f32 %v8640_v51, %v6096_v27 }
 0x1db   : > { %v6097_v1 = vpop.f32.mrb[108].mxu0 }
 0x1dc   : > { %v6098_v18 = vpop.f32.mrb[109].mxu0 }
 0x1dd   : > { %v6099_v17 = vadd.f32 %v6098_v18, %v6097_v1  ;;  %v6100_v33 = vpop.f32.mrb[110].mxu0  ;;  %v8727_v18 = vld [vmem:[%s8886_s4] ss:$0 sm:$0xff] }
 0x1de   : > { %v6101_v55 = vpop.f32.mrb[111].mxu0 }
 0x1df   : > { %v6102_v21 = vadd.f32 %v6101_v55, %v6100_v33  ;;  %v8701_v14 = vadd.f32 %v8646_v36, %v6099_v17 }
 0x1e1   : > { %v8704_v35 = vadd.f32 %v8652_v48, %v6102_v21 }
 0x1e6   : > { %v6103_v4 = vpop.f32.mrb[112].mxu0 }
 0x1e7   : > { %v6104_v32 = vpop.f32.mrb[113].mxu0 }
 0x1e8   : > { %v6105_v13 = vadd.f32 %v6104_v32, %v6103_v4  ;;  %v6106_v39 = vpop.f32.mrb[114].mxu0 }
 0x1e9   : > { %v6107_v43 = vpop.f32.mrb[115].mxu0 }
 0x1ea   : > { %v6108_v52 = vadd.f32 %v6107_v43, %v6106_v39  ;;  %v8707_v51 = vadd.f32 %v8658_v19, %v6105_v13 }
 0x1ec   : > { %v8710_v24 = vadd.f32 %v8664_v41, %v6108_v52 }
 0x1f0   : > { %v6109_v40 = vpop.f32.mrb[116].mxu0 }
 0x1f1   : > { %v6110_v34 = vpop.f32.mrb[117].mxu0 }
 0x1f2   : > { %v6111_v60 = vadd.f32 %v6110_v34, %v6109_v40  ;;  %v6112_v36 = vpop.f32.mrb[118].mxu0 }
 0x1f3   : > { %v6113_v28 = vpop.f32.mrb[119].mxu0 }
 0x1f4   : > { %v6114_v23 = vadd.f32 %v6113_v28, %v6112_v36  ;;  %v8713_v48 = vadd.f32 %v8670_v45, %v6111_v60 }
 0x1f6   : > { %v8716_v0 = vadd.f32 %v8676_v49, %v6114_v23 }
 0x1f8   : > { %v6115_v30 = vpop.f32.mrb[120].mxu0 }
 0x1f9   : > { %v6116_v31 = vpop.f32.mrb[121].mxu0 }
 0x1fa   : > { %v6117_v22 = vadd.f32 %v6116_v31, %v6115_v30  ;;  %v6118_v19 = vpop.f32.mrb[122].mxu0 }
 0x1fb   : > { %v6119_v42 = vpop.f32.mrb[123].mxu0 }
 0x1fc   : > { %v6120_v41 = vadd.f32 %v6119_v42, %v6118_v19  ;;  %v8718_v11 = vadd.f32 %v6454_v7, %v6117_v22 }
 0x1fe   : > { %v8720_v47 = vadd.f32 %v6460_v61, %v6120_v41  ;;  %v8755_v41 = vld [vmem:[%s8884_s2] ss:$0 sm:$0xff] }
 0x200   : > { %v6121_v29 = vpop.f32.mrb[124].mxu0 }
 0x201   : > { %v6122_v37 = vpop.f32.mrb[125].mxu0 }
 0x202   : > { %v6123_v2 = vadd.f32 %v6122_v37, %v6121_v29  ;;  %v6124_v45 = vpop.f32.mrb[126].mxu0 }
 0x203   : > { %v6125_v27 = vpop.f32.mrb[127].mxu0 }
 0x204   : > { %v6126_v1 = vadd.f32 %v6125_v27, %v6124_v45  ;;  %v8722_v49 = vadd.f32 %v6451_v38, %v6123_v2 }
 0x206   : > { %v8729_v17 = vadd.f32 %v6457_v10, %v6126_v1 }
 0x208   : > { %v6337_v7 = vpop.f32.mrb[128].mxu0 }
 0x209   : > { %v4483_v61 = vadd.f32 %v6337_v7, %v8727_v18  ;;  %v4474_v33 = vpop.f32.mrb[129].mxu0 }
 0x20a   : > { %v4475_v55 = vadd.f32 %v8727_v18, %v4474_v33  ;;  %v6338_v21 = vpop.f32.mrb[130].mxu0 }
 0x20b   : > { %v4486_v4 = vadd.f32 %v6338_v21, %v8727_v18  ;;  %v4477_v32 = vpop.f32.mrb[131].mxu0 }
 0x20c   : > { %v4478_v38 = vadd.f32 %v8727_v18, %v4477_v32 }
 0x20d   : > { %v5641_v10 = vpack.c.bf16 %v4486_v4, %v4483_v61 }
 0x20e   : > { %v5636_v13 = vpack.c.bf16 %v4478_v38, %v4475_v55 }
 0x20f   : > { %5728 = vst [vmem:[%s8740_s18 + $0x8] sm:$0xff] %v5641_v10  }
 0x210   : > { %5637 = vst [vmem:[%s8740_s18] sm:$0xff] %v5636_v13   ;;  %v6341_v39 = vpop.f32.mrb[132].mxu0 }
 0x211   : > { %v4499_v43 = vadd.f32 %v6341_v39, %v8727_v18  ;;  %v4490_v52 = vpop.f32.mrb[133].mxu0 }
 0x212   : > { %v4491_v40 = vadd.f32 %v8727_v18, %v4490_v52  ;;  %v6342_v34 = vpop.f32.mrb[134].mxu0 }
 0x213   : > { %v4502_v60 = vadd.f32 %v6342_v34, %v8727_v18  ;;  %v4493_v36 = vpop.f32.mrb[135].mxu0 }
 0x214   : > { %v4494_v28 = vadd.f32 %v8727_v18, %v4493_v36 }
 0x215   : > { %v5651_v23 = vpack.c.bf16 %v4502_v60, %v4499_v43  ;;  %v6289_v42 = vpop.f32.mrb[0].mxu1 }
 0x216   : > { %v5646_v30 = vpack.c.bf16 %v4494_v28, %v4491_v40  ;;  %v6369_v2 = vadd.f32 %v8595_v3, %v6289_v42  ;;  %v3851_v45 = vpop.f32.mrb[1].mxu1 }
 0x217   : > { %5730 = vst [vmem:[%s8740_s18 + $0x18] sm:$0xff] %v5651_v23   ;;  %v6372_v7 = vadd.f32 %v8583_v53, %v3851_v45  ;;  %v6290_v61 = vpop.f32.mrb[2].mxu1 }
 0x218   : > { %5729 = vst [vmem:[%s8740_s18 + $0x10] sm:$0xff] %v5646_v30   ;;  %v6345_v31 = vpop.f32.mrb[136].mxu0  ;;  %v4019_v55 = vadd.f32 %v6369_v2, %v8755_v41  ;;  %v6375_v21 = vadd.f32 %v8601_v6, %v6290_v61  ;;  %v3854_v4 = vpop.f32.mrb[3].mxu1 }
 0x219   : > { %v4515_v22 = vadd.f32 %v6345_v31, %v8727_v18  ;;  %v4506_v19 = vpop.f32.mrb[137].mxu0  ;;  %v4017_v38 = vadd.f32 %v6372_v7, %v8755_v41  ;;  %v6378_v3 = vadd.f32 %v8589_v9, %v3854_v4 }
 0x21a   : > { %v4507_v29 = vadd.f32 %v8727_v18, %v4506_v19  ;;  %v6346_v37 = vpop.f32.mrb[138].mxu0  ;;  %v4020_v13 = vadd.f32 %v6375_v21, %v8755_v41  ;;  %v4051_v43 = vmax.f32 %v4019_v55, 0.0 }
 0x21b   : > { %v4518_v27 = vadd.f32 %v6346_v37, %v8727_v18  ;;  %v4509_v1 = vpop.f32.mrb[139].mxu0  ;;  %v4018_v53 = vadd.f32 %v6378_v3, %v8755_v41  ;;  %v4049_v34 = vmax.f32 %v4017_v38, 0.0 }
 0x21c   : > { %v4510_v33 = vadd.f32 %v8727_v18, %v4509_v1  ;;  %v4052_v52 = vmax.f32 %v4020_v13, 0.0 }
 0x21d   : > { %v5661_v32 = vpack.c.bf16 %v4518_v27, %v4515_v22  ;;  %v4050_v9 = vmax.f32 %v4018_v53, 0.0  ;;  %v6293_v60 = vpop.f32.mrb[4].mxu1 }
 0x21e   : > { %v5656_v10 = vpack.c.bf16 %v4510_v33, %v4507_v29  ;;  %v5561_v23 = vpack.c.bf16 %v4052_v52, %v4051_v43  ;;  %v6381_v30 = vadd.f32 %v8619_v25, %v6293_v60  ;;  %v3867_v31 = vpop.f32.mrb[5].mxu1 }
 0x21f   : > { %5732 = vst [vmem:[%s8740_s18 + $0x28] sm:$0xff] %v5661_v32   ;;  %v5556_v42 = vpack.c.bf16 %v4050_v9, %v4049_v34  ;;  %v6384_v29 = vadd.f32 %v8607_v58, %v3867_v31  ;;  %v6294_v37 = vpop.f32.mrb[6].mxu1 }
 0x220   : > { %5731 = vst [vmem:[%s8740_s18 + $0x20] sm:$0xff] %v5656_v10   ;;  %v6349_v39 = vpop.f32.mrb[140].mxu0  ;;  %5713 = vst [vmem:[%s8776_s26 + $0x8] sm:$0xff] %v5561_v23   ;;  %v4023_v45 = vadd.f32 %v6381_v30, %v8755_v41  ;;  %v6387_v27 = vadd.f32 %v8625_v59, %v6294_v37  ;;  %v3870_v1 = vpop.f32.mrb[7].mxu1 }
 0x221   : > { %v4531_v40 = vadd.f32 %v6349_v39, %v8727_v18  ;;  %v4522_v6 = vpop.f32.mrb[141].mxu0  ;;  %5557 = vst [vmem:[%s8776_s26] sm:$0xff] %v5556_v42   ;;  %v4021_v25 = vadd.f32 %v6384_v29, %v8755_v41  ;;  %v6390_v61 = vadd.f32 %v8613_v57, %v3870_v1 }
 0x222   : > { %v4523_v36 = vadd.f32 %v8727_v18, %v4522_v6  ;;  %v6350_v28 = vpop.f32.mrb[142].mxu0  ;;  %v4024_v55 = vadd.f32 %v6387_v27, %v8755_v41  ;;  %v4055_v4 = vmax.f32 %v4023_v45, 0.0 }
 0x223   : > { %v4534_v22 = vadd.f32 %v6350_v28, %v8727_v18  ;;  %v4525_v19 = vpop.f32.mrb[143].mxu0  ;;  %v4022_v58 = vadd.f32 %v6390_v61, %v8755_v41  ;;  %v4053_v3 = vmax.f32 %v4021_v25, 0.0 }
 0x224   : > { %v4526_v2 = vadd.f32 %v8727_v18, %v4525_v19  ;;  %v4056_v32 = vmax.f32 %v4024_v55, 0.0 }
 0x225   : > { %v5671_v7 = vpack.c.bf16 %v4534_v22, %v4531_v40  ;;  %v4054_v10 = vmax.f32 %v4022_v58, 0.0  ;;  %v6297_v13 = vpop.f32.mrb[8].mxu1 }
 0x226   : > { %v5666_v33 = vpack.c.bf16 %v4526_v2, %v4523_v36  ;;  %v5571_v39 = vpack.c.bf16 %v4056_v32, %v4055_v4  ;;  %v6393_v43 = vadd.f32 %v8643_v16, %v6297_v13  ;;  %v3883_v52 = vpop.f32.mrb[9].mxu1 }
 0x227   : > { %5734 = vst [vmem:[%s8740_s18 + $0x38] sm:$0xff] %v5671_v7   ;;  %v5566_v34 = vpack.c.bf16 %v4054_v10, %v4053_v3  ;;  %v6396_v9 = vadd.f32 %v8631_v50, %v3883_v52  ;;  %v6298_v60 = vpop.f32.mrb[10].mxu1 }
 0x228   : > { %5733 = vst [vmem:[%s8740_s18 + $0x30] sm:$0xff] %v5666_v33   ;;  %v6353_v21 = vpop.f32.mrb[144].mxu0  ;;  %5715 = vst [vmem:[%s8776_s26 + $0x18] sm:$0xff] %v5571_v39   ;;  %v4027_v28 = vadd.f32 %v6393_v43, %v8755_v41  ;;  %v6399_v23 = vadd.f32 %v8649_v12, %v6298_v60  ;;  %v3886_v30 = vpop.f32.mrb[11].mxu1 }
 0x229   : > { %v4547_v38 = vadd.f32 %v6353_v21, %v8727_v18  ;;  %v4538_v59 = vpop.f32.mrb[145].mxu0  ;;  %5714 = vst [vmem:[%s8776_s26 + $0x10] sm:$0xff] %v5566_v34   ;;  %v4025_v16 = vadd.f32 %v6396_v9, %v8755_v41  ;;  %v6402_v22 = vadd.f32 %v8637_v46, %v3886_v30 }
 0x22a   : > { %v4539_v53 = vadd.f32 %v8727_v18, %v4538_v59  ;;  %v6354_v57 = vpop.f32.mrb[146].mxu0  ;;  %v4028_v42 = vadd.f32 %v6399_v23, %v8755_v41  ;;  %v4059_v37 = vmax.f32 %v4027_v28, 0.0 }
 0x22b   : > { %v4550_v40 = vadd.f32 %v6354_v57, %v8727_v18  ;;  %v4541_v6 = vpop.f32.mrb[147].mxu0  ;;  %v4026_v50 = vadd.f32 %v6402_v22, %v8755_v41  ;;  %v4057_v27 = vmax.f32 %v4025_v16, 0.0 }
 0x22c   : > { %v4542_v36 = vadd.f32 %v8727_v18, %v4541_v6  ;;  %v4060_v2 = vmax.f32 %v4028_v42, 0.0 }
 0x22d   : > { %v5681_v31 = vpack.c.bf16 %v4550_v40, %v4547_v38  ;;  %v4058_v1 = vmax.f32 %v4026_v50, 0.0  ;;  %v6301_v7 = vpop.f32.mrb[12].mxu1 }
 0x22e   : > { %v5676_v19 = vpack.c.bf16 %v4542_v36, %v4539_v53  ;;  %v5581_v61 = vpack.c.bf16 %v4060_v2, %v4059_v37  ;;  %v6405_v33 = vadd.f32 %v8667_v26, %v6301_v7  ;;  %v3899_v55 = vpop.f32.mrb[13].mxu1 }
 0x22f   : > { %5736 = vst [vmem:[%s8740_s18 + $0x48] sm:$0xff] %v5681_v31   ;;  %v5576_v4 = vpack.c.bf16 %v4058_v1, %v4057_v27  ;;  %v6408_v32 = vadd.f32 %v8655_v44, %v3899_v55  ;;  %v6302_v38 = vpop.f32.mrb[14].mxu1 }
 0x230   : > { %5735 = vst [vmem:[%s8740_s18 + $0x40] sm:$0xff] %v5676_v19   ;;  %v6357_v29 = vpop.f32.mrb[148].mxu0  ;;  %5717 = vst [vmem:[%s8776_s26 + $0x28] sm:$0xff] %v5581_v61   ;;  %v4031_v3 = vadd.f32 %v6405_v33, %v8755_v41  ;;  %v6411_v10 = vadd.f32 %v8673_v63, %v6302_v38  ;;  %v3902_v13 = vpop.f32.mrb[15].mxu1 }
 0x231   : > { %v4563_v45 = vadd.f32 %v6357_v29, %v8727_v18  ;;  %v4554_v12 = vpop.f32.mrb[149].mxu0  ;;  %5716 = vst [vmem:[%s8776_s26 + $0x20] sm:$0xff] %v5576_v4   ;;  %v4029_v26 = vadd.f32 %v6408_v32, %v8755_v41  ;;  %v6414_v57 = vadd.f32 %v8661_v56, %v3902_v13 }
 0x232   : > { %v4555_v25 = vadd.f32 %v8727_v18, %v4554_v12  ;;  %v6358_v46 = vpop.f32.mrb[150].mxu0  ;;  %v4032_v43 = vadd.f32 %v6411_v10, %v8755_v41  ;;  %v4063_v40 = vmax.f32 %v4031_v3, 0.0 }
 0x233   : > { %v4566_v58 = vadd.f32 %v6358_v46, %v8727_v18  ;;  %v4557_v21 = vpop.f32.mrb[151].mxu0  ;;  %v4030_v44 = vadd.f32 %v6414_v57, %v8755_v41  ;;  %v4061_v9 = vmax.f32 %v4029_v26, 0.0 }
 0x234   : > { %v4558_v59 = vadd.f32 %v8727_v18, %v4557_v21  ;;  %v4064_v6 = vmax.f32 %v4032_v43, 0.0 }
 0x235   : > { %v5691_v53 = vpack.c.bf16 %v4566_v58, %v4563_v45  ;;  %v4062_v60 = vmax.f32 %v4030_v44, 0.0  ;;  %v6305_v36 = vpop.f32.mrb[16].mxu1 }
 0x236   : > { %v5686_v39 = vpack.c.bf16 %v4558_v59, %v4555_v25  ;;  %v5591_v23 = vpack.c.bf16 %v4064_v6, %v4063_v40  ;;  %v6417_v30 = vadd.f32 %v8687_v62, %v6305_v36  ;;  %v3915_v31 = vpop.f32.mrb[17].mxu1 }
 0x237   : > { %5738 = vst [vmem:[%s8740_s18 + $0x58] sm:$0xff] %v5691_v53   ;;  %v5586_v19 = vpack.c.bf16 %v4062_v60, %v4061_v9  ;;  %v6420_v42 = vadd.f32 %v8679_v8, %v3915_v31  ;;  %v6306_v50 = vpop.f32.mrb[18].mxu1 }
 0x238   : > { %5737 = vst [vmem:[%s8740_s18 + $0x50] sm:$0xff] %v5686_v39   ;;  %v6361_v52 = vpop.f32.mrb[152].mxu0  ;;  %5719 = vst [vmem:[%s8776_s26 + $0x38] sm:$0xff] %v5591_v23   ;;  %v4035_v37 = vadd.f32 %v6417_v30, %v8755_v41  ;;  %v6423_v2 = vadd.f32 %v8691_v20, %v6306_v50  ;;  %v3918_v45 = vpop.f32.mrb[19].mxu1 }
 0x239   : > { %v4579_v34 = vadd.f32 %v6361_v52, %v8727_v18  ;;  %v4570_v63 = vpop.f32.mrb[153].mxu0  ;;  %5718 = vst [vmem:[%s8776_s26 + $0x30] sm:$0xff] %v5586_v19   ;;  %v4033_v62 = vadd.f32 %v6420_v42, %v8755_v41  ;;  %v6426_v27 = vadd.f32 %v8683_v5, %v3918_v45 }
 0x23a   : > { %v4571_v28 = vadd.f32 %v8727_v18, %v4570_v63  ;;  %v6362_v56 = vpop.f32.mrb[154].mxu0  ;;  %v4036_v7 = vadd.f32 %v6423_v2, %v8755_v41  ;;  %v4067_v46 = vmax.f32 %v4035_v37, 0.0 }
 0x23b   : > { %v4582_v16 = vadd.f32 %v6362_v56, %v8727_v18  ;;  %v4573_v22 = vpop.f32.mrb[155].mxu0  ;;  %v4034_v8 = vadd.f32 %v6426_v27, %v8755_v41  ;;  %v4065_v55 = vmax.f32 %v4033_v62, 0.0 }
 0x23c   : > { %v4574_v29 = vadd.f32 %v8727_v18, %v4573_v22  ;;  %v4068_v61 = vmax.f32 %v4036_v7, 0.0 }
 0x23d   : > { %v5701_v12 = vpack.c.bf16 %v4582_v16, %v4579_v34  ;;  %v4066_v58 = vmax.f32 %v4034_v8, 0.0  ;;  %v6309_v21 = vpop.f32.mrb[20].mxu1 }
 0x23e   : > { %v5696_v1 = vpack.c.bf16 %v4574_v29, %v4571_v28  ;;  %v5601_v32 = vpack.c.bf16 %v4068_v61, %v4067_v46  ;;  %v6429_v38 = vadd.f32 %v8701_v14, %v6309_v21  ;;  %v3931_v59 = vpop.f32.mrb[21].mxu1 }
 0x23f   : > { %5740 = vst [vmem:[%s8740_s18 + $0x68] sm:$0xff] %v5701_v12   ;;  %v5596_v13 = vpack.c.bf16 %v4066_v58, %v4065_v55  ;;  %v6432_v53 = vadd.f32 %v8695_v54, %v3931_v59  ;;  %v6310_v26 = vpop.f32.mrb[22].mxu1 }
 0x240   : > { %5739 = vst [vmem:[%s8740_s18 + $0x60] sm:$0xff] %v5696_v1   ;;  %v6365_v25 = vpop.f32.mrb[156].mxu0  ;;  %5721 = vst [vmem:[%s8776_s26 + $0x48] sm:$0xff] %v5601_v32   ;;  %v4039_v39 = vadd.f32 %v6429_v38, %v8755_v41  ;;  %v6435_v43 = vadd.f32 %v8704_v35, %v6310_v26  ;;  %v3934_v44 = vpop.f32.mrb[23].mxu1 }
 0x241   : > { %v4595_v33 = vadd.f32 %v6365_v25, %v8727_v18  ;;  %v4586_v20 = vpop.f32.mrb[157].mxu0  ;;  %5720 = vst [vmem:[%s8776_s26 + $0x40] sm:$0xff] %v5596_v13   ;;  %v4037_v14 = vadd.f32 %v6432_v53, %v8755_v41  ;;  %v6438_v40 = vadd.f32 %v8698_v15, %v3934_v44 }
 0x242   : > { %v4587_v4 = vadd.f32 %v8727_v18, %v4586_v20  ;;  %v6366_v5 = vpop.f32.mrb[158].mxu0  ;;  %v4040_v34 = vadd.f32 %v6435_v43, %v8755_v41 }
 0x243   : > { %v4598_v3 = vadd.f32 %v6366_v5, %v8727_v18  ;;  %v4589_v10 = vpop.f32.mrb[159].mxu0  ;;  %v4038_v54 = vadd.f32 %v6438_v40, %v8755_v41  ;;  %v4069_v9 = vmax.f32 %v4037_v14, 0.0 }
 0x244   : > { %v4590_v57 = vadd.f32 %v8727_v18, %v4589_v10  ;;  %v4071_v18 = vmax.f32 %v4039_v39, 0.0  ;;  %v4072_v63 = vmax.f32 %v4040_v34, 0.0 }
 0x245   : > { %v5711_v52 = vpack.c.bf16 %v4598_v3, %v4595_v33  ;;  %v4070_v35 = vmax.f32 %v4038_v54, 0.0  ;;  %v6313_v60 = vpop.f32.mrb[24].mxu1 }
 0x246   : > { %v5706_v6 = vpack.c.bf16 %v4590_v57, %v4587_v4  ;;  %v5611_v36 = vpack.c.bf16 %v4072_v63, %v4071_v18  ;;  %v6441_v28 = vadd.f32 %v8713_v48, %v6313_v60  ;;  %v3947_v56 = vpop.f32.mrb[25].mxu1 }
 0x247   : > { %5742 = vst [vmem:[%s8740_s18 + $0x78] sm:$0xff] %v5711_v52   ;;  %v5606_v23 = vpack.c.bf16 %v4070_v35, %v4069_v9  ;;  %v6444_v15 = vadd.f32 %v8707_v51, %v3947_v56  ;;  %v6314_v30 = vpop.f32.mrb[26].mxu1 }
 0x248   : > { %5741 = vst [vmem:[%s8740_s18 + $0x70] sm:$0xff] %v5706_v6   ;;  %5723 = vst [vmem:[%s8776_s26 + $0x58] sm:$0xff] %v5611_v36   ;;  %v4043_v31 = vadd.f32 %v6441_v28, %v8755_v41  ;;  %v6447_v16 = vadd.f32 %v8716_v0, %v6314_v30  ;;  %v3950_v22 = vpop.f32.mrb[27].mxu1 }
 0x249   : > { %5722 = vst [vmem:[%s8776_s26 + $0x50] sm:$0xff] %v5606_v23   ;;  %v4041_v19 = vadd.f32 %v6444_v15, %v8755_v41  ;;  %v6450_v42 = vadd.f32 %v8710_v24, %v3950_v22 }
 0x24a   : > { %v4044_v50 = vadd.f32 %v6447_v16, %v8755_v41  ;;  %v4075_v29 = vmax.f32 %v4043_v31, 0.0 }
 0x24b   : > { %v4042_v48 = vadd.f32 %v6450_v42, %v8755_v41  ;;  %v4073_v37 = vmax.f32 %v4041_v19, 0.0 }
 0x24c   : > { %v4076_v51 = vmax.f32 %v4044_v50, 0.0 }
 0x24d   : > { %v4074_v2 = vmax.f32 %v4042_v48, 0.0  ;;  %v6317_v45 = vpop.f32.mrb[28].mxu1 }
 0x24e   : > { %v5621_v12 = vpack.c.bf16 %v4076_v51, %v4075_v29  ;;  %v6453_v0 = vadd.f32 %v8722_v49, %v6317_v45  ;;  %v3963_v62 = vpop.f32.mrb[29].mxu1 }
 0x24f   : > { %v5616_v27 = vpack.c.bf16 %v4074_v2, %v4073_v37  ;;  %v6456_v1 = vadd.f32 %v8718_v11, %v3963_v62  ;;  %v6318_v7 = vpop.f32.mrb[30].mxu1 }
 0x250   : > { %5725 = vst [vmem:[%s8776_s26 + $0x68] sm:$0xff] %v5621_v12   ;;  %v4047_v24 = vadd.f32 %v6453_v0, %v8755_v41  ;;  %v6459_v8 = vadd.f32 %v8729_v17, %v6318_v7  ;;  %v3966_v25 = vpop.f32.mrb[31].mxu1 }
 0x251   : > { %5724 = vst [vmem:[%s8776_s26 + $0x60] sm:$0xff] %v5616_v27   ;;  %v4045_v46 = vadd.f32 %v6456_v1, %v8755_v41  ;;  %v6462_v61 = vadd.f32 %v8720_v47, %v3966_v25 }
 0x252   : > { %v4048_v49 = vadd.f32 %v6459_v8, %v8755_v41  ;;  %v4079_v20 = vmax.f32 %v4047_v24, 0.0 }
 0x253   : > { %v4046_v33 = vadd.f32 %v6462_v61, %v8755_v41  ;;  %v4077_v55 = vmax.f32 %v4045_v46, 0.0 }
 0x254   : > { %v4080_v11 = vmax.f32 %v4048_v49, 0.0 }
 0x255   : > { %v4078_v58 = vmax.f32 %v4046_v33, 0.0 }
 0x256   : > { %v5631_v21 = vpack.c.bf16 %v4080_v11, %v4079_v20 }
 0x257   : > { %v5626_v4 = vpack.c.bf16 %v4078_v58, %v4077_v55 }
 0x258   : > { %5727 = vst [vmem:[%s8776_s26 + $0x78] sm:$0xff] %v5631_v21  }
 0x259   : > { %5726 = vst [vmem:[%s8776_s26 + $0x70] sm:$0xff] %v5626_v4  }
 0x25a PF: > { %s17_s21 = sadd.s32 1, %s6736_s21  }
 0x25b   : > { %p14_p4 = scmp.ge.s32.totalorder %s17_s21, 4  }
 0x25d   :  { %16 = sbr.rel (!%p14_p4) target bundleno = 1 (0x1), region = 89 }

// kernel: basic_block_forward.3
= control target key start
LH: loop header
LB: loop body
LE: loop exit
PB: predicated region body
PF: predicated region fallthrough
CT: control target
= control target key end

     0   :  { %s6323_s15 = smov 0   ;;  %s8260_s0 = inlined_call_operand.vmem [shape: bf16[2,1,18,18,128], index: 0, kind: input, shape index: {}]   ;;  %s8261_s1 = inlined_call_operand.vmem [shape: bf16[3,384,128], index: 1, kind: input, shape index: {}]   ;;  %s8262_s2 = inlined_call_operand.vmem [shape: f32[1,128], index: 2, kind: input, shape index: {}]   ;;  %s8263_s3 = inlined_call_operand.vmem [shape: bf16[2,16,16,128], index: 3, kind: input, shape index: {}]   ;;  %s8264_s4 = inlined_call_operand.vmem [shape: bf16[2,16,16,128], index: 4, kind: output, shape index: {}]  }
   0x1 LB: > { %s4645_s16 = sadd.s32 4294967295, %s6296_s15   ;;  %p4649_p0 = scmp.ge.s32.totalorder %s6296_s15, 1  ;;  %s6296_s15 = sphi %s6323_s15, %s14_s15  }
   0x2   : > { %p172_p1 = scmp.lt.s32.totalorder %s6296_s15, 3 }
   0x4   : > { %p173_p2 = pnand %p4649_p0, %p172_p1 }
   0x5   : > { %v6123_v0 = vld [vmem:[%s8261_s1 + $0x100] sm:$0xff] (!%p173_p2)   ;;  %v6126_v3 = vld [vmem:[%s8261_s1 + $0x108] sm:$0xff] (!%p173_p2)   ;;  %v6129_v6 = vld [vmem:[%s8261_s1 + $0x110] sm:$0xff] (!%p173_p2)   ;;  %p203_p3 = scmp.lt.s32.totalorder (!%p173_p2), %s4645_s16, 1  ;;  %vm718_vm0 = vcmask (!%p173_p2), 1042432   ;;  %vm719_vm1 = vcmask (!%p173_p2), 1046532  }
   0x6   : > { %176 = sbr.rel (%p173_p2) target bundleno = 564 (0x234), region = 36  ;;  %v6337_v1 = vld [vmem:[%s8261_s1 + $0x140] sm:$0xff] (!%p173_p2)   ;;  %5386 = vmatprep.subr.bf16.mxu0 (!%p173_p2), %v6123_v0  ;;  %v6350_v4 = vld [vmem:[%s8261_s1 + $0x148] sm:$0xff] (!%p173_p2)   ;;  %v6362_v7 = vld [vmem:[%s8261_s1 + $0x150] sm:$0xff] (!%p173_p2)   ;;  %vm267_vm2 = vsmask.f32 (!%p173_p2), 3328 }
   0x7   : > { %v6125_v2 = vld [vmem:[%s8261_s1 + $0xc0] sm:$0xff] (!%p173_p2)   ;;  %5938 = vmatprep.subr.bf16.mxu1 (!%p173_p2), %v6337_v1  ;;  %v6128_v5 = vld [vmem:[%s8261_s1 + $0xc8] sm:$0xff] (!%p173_p2)   ;;  %v6131_v8 = vld [vmem:[%s8261_s1 + $0xd0] sm:$0xff] (!%p173_p2)   ;;  %vm268_vm3 = vsmask.f32 (!%p173_p2), 7440 }
   0x8   : > { %5387 = vmatpush3.bf16.msra.mxu0 (!%p173_p2), %v6125_v2  ;;  %5946 = vmatpush3.bf16.msra.mxu1 (!%p173_p2), %v6337_v1  ;;  %v6132_v9 = vld [vmem:[%s8261_s1 + $0x118] sm:$0xff] (!%p173_p2)   ;;  %v6135_v12 = vld [vmem:[%s8261_s1 + $0x120] sm:$0xff] (!%p173_p2)   ;;  %v6138_v15 = vld [vmem:[%s8261_s1 + $0x128] sm:$0xff] (!%p173_p2)  }
   0x9   : > { %5388 = vmatprep.subr.bf16.mxu0 (!%p173_p2), %v6126_v3  ;;  %5939 = vmatprep.subr.bf16.mxu1 (!%p173_p2), %v6350_v4  ;;  %v6377_v10 = vld [vmem:[%s8261_s1 + $0x158] sm:$0xff] (!%p173_p2)   ;;  %v6390_v13 = vld [vmem:[%s8261_s1 + $0x160] sm:$0xff] (!%p173_p2)   ;;  %v6407_v16 = vld [vmem:[%s8261_s1 + $0x168] sm:$0xff] (!%p173_p2)  }
   0xa   : > { %v6134_v11 = vld [vmem:[%s8261_s1 + $0xd8] sm:$0xff] (!%p173_p2)   ;;  %v6137_v14 = vld [vmem:[%s8261_s1 + $0xe0] sm:$0xff] (!%p173_p2)   ;;  %v6140_v17 = vld [vmem:[%s8261_s1 + $0xe8] sm:$0xff] (!%p173_p2)  }
   0xb   : > { %v6141_v18 = vld [vmem:[%s8261_s1 + $0x130] sm:$0xff] (!%p173_p2)   ;;  %v6144_v21 = vld [vmem:[%s8261_s1 + $0x138] sm:$0xff] (!%p173_p2)   ;;  %vm6467_vm4 = vmor (!%p173_p2), %vm718_vm0, %vm719_vm1 }
   0xc   : > { %5389 = vmatpush3.bf16.msra.mxu0 (!%p173_p2), %v6128_v5  ;;  %5947 = vmatpush3.bf16.msra.mxu1 (!%p173_p2), %v6350_v4  ;;  %v6421_v19 = vld [vmem:[%s8261_s1 + $0x170] sm:$0xff] (!%p173_p2)   ;;  %v6437_v22 = vld [vmem:[%s8261_s1 + $0x178] sm:$0xff] (!%p173_p2)   ;;  %v6148_v49 = vld [vmem:[%s8261_s1 + $0x40] sm:$0xff] (!%p173_p2)  }
   0xd   : > { %5390 = vmatprep.subr.bf16.mxu0 %v6129_v6  ;;  %5940 = vmatprep.subr.bf16.mxu1 %v6362_v7  ;;  %s8270_s16 = smov (!%p203_p3, %s4645_s16), 1  ;;  %v6143_v20 = vld [vmem:[%s8261_s1 + $0xf0] sm:$0xff]   ;;  %v6146_v28 = vld [vmem:[%s8261_s1 + $0xf8] sm:$0xff]   ;;  %vm6484_vm5 = vmor %vm267_vm2, %vm268_vm3 }
   0xe   : > { %s6114_s27 = smul.u32 216, %s8270_s16  ;;  %v6149_v63 = vld [vmem:[%s8261_s1] sm:$0xff]  }
  0x10   : > { %5391 = vmatpush3.bf16.msra.mxu0 %v6131_v8  ;;  %5948 = vmatpush3.bf16.msra.mxu1 %v6362_v7  ;;  %s6426_s10 = scalar_lea.vmem %s8260_s0, %s6114_s27 }
  0x11   : > { %5392 = vmatprep.subr.bf16.mxu0 %v6132_v9  ;;  %5941 = vmatprep.subr.bf16.mxu1 %v6377_v10  ;;  %v6441_v23 = vld [vmem:[%s6426_s10 + $0xc] sm:$0xf]  ;;  %v6445_v24 = vld [vmem:[%s6426_s10 + $0x10] sm:$0xf]  ;;  %v6448_v25 = vld [vmem:[%s6426_s10 + $0x14] sm:$0x1] }
  0x12   : > { %v1139_v26 = vshrl.u32 %v6441_v23, 16  ;;  %v1142_v27 = vshll.u32 %v6441_v23, 16  ;;  %v1148_v29 = vshll.u32 %v6445_v24, 16  ;;  %v1152_v30 = vshrl.u32 %v6445_v24, 16  ;;  %v6460_v33 = vld [vmem:[%s6426_s10 + $0x70] sm:$0xf] }
  0x13   : > { %v1158_v31 = vshll.u32 %v6448_v25, 16  ;;  %v1591_v32 = vrot.slane %v6448_v25, 5  ;;  %v4759_v36 = vld [vmem:[%s6426_s10 + $0x74] sm:$0x1]  ;;  %v4775_v37 = vld [vmem:[%s6426_s10 + $0x6c] sm:$0xe]  ;;  %v4799_v61 = vcombine.low %v6441_v23, %v6445_v24 }
  0x14   : > { %5393 = vmatpush3.bf16.msra.mxu0 %v6134_v11  ;;  %5949 = vmatpush3.bf16.msra.mxu1 %v6377_v10  ;;  %v1141_v34 = vrot.slane %v1139_v26, 4  ;;  %v1144_v35 = vrot.slane %v1142_v27, 5  ;;  %v1150_v38 = vrot.slane %v1148_v29, 5  ;;  %v1154_v39 = vrot.slane %v1152_v30, 4  ;;  %v6472_v43 = vld [vmem:[%s6426_s10 + $0x7c] sm:$0xf] }
  0x15   : > { %5394 = vmatprep.subr.bf16.mxu0 %v6135_v12  ;;  %5942 = vmatprep.subr.bf16.mxu1 %v6390_v13  ;;  %v1160_v40 = vrot.slane %v1158_v31, 5  ;;  %v1350_v42 = vshll.u32 %v4759_v36, 16  ;;  %v4791_v45 = vrot.slane %v4775_v37, 9  ;;  %v1644_v46 = vrot.slane %v6460_v33, 5  ;;  %v6477_v48 = vld [vmem:[%s6426_s10 + $0x80] sm:$0x1] }
  0x16   : > { %v1145_v44 = vor.u32 %v1144_v35, %v1141_v34  ;;  %v1647_v47 = vrot.slane %v4759_v36, 5  ;;  %v1155_v51 = vor.u32 %v1154_v39, %v1150_v38  ;;  %v4776_v53 = vld [vmem:[%s6426_s10 + $0x78] sm:$0xe]  ;;  %v1651_v54 = vrot.slane %v6472_v43, 5  ;;  %v6150_v9 = vld [vmem:[%s8261_s1 + $0x48] sm:$0xff]  }
  0x17   : > { %v6488_v52 = vrot.slane %v1350_v42, 5  ;;  %v1654_v55 = vrot.slane %v6477_v48, 5  ;;  %v1645_v57 = vsel %vm6467_vm4, %v4791_v45, %v1644_v46  ;;  %v1646_v58 = vrot.slane %v1644_v46, 4  ;;  %v6533_v27 = vld [vmem:[%s6426_s10 + $0x88] sm:$0xf] }
  0x18   : > { %5395 = vmatpush3.bf16.msra.mxu0 %v6137_v14  ;;  %5950 = vmatpush3.bf16.msra.mxu1 %v6390_v13  ;;  %v1146_v56 = vrot.slane %v1145_v44, 4  ;;  %v4792_v59 = vrot.slane %v4776_v53, 9  ;;  %v1156_v60 = vrot.slane %v1155_v51, 4  ;;  %v1653_v62 = vrot.slane %v1651_v54, 4  ;;  %v6538_v30 = vld [vmem:[%s6426_s10 + $0x8c] sm:$0x1] }
  0x19   : > { %5396 = vmatprep.subr.bf16.mxu0 %v6138_v15  ;;  %5943 = vmatprep.subr.bf16.mxu1 %v6407_v16  ;;  %v1648_v2 = vsel %vm6467_vm4, %v1646_v58, %v1647_v47  ;;  %v1340_v11 = vshll.u32 %v6460_v33, 16  ;;  %v6517_v15 = vld [vmem:[%s6426_s10 + $0x18] sm:$0xf]  ;;  %v4777_v31 = vld [vmem:[%s6426_s10 + $0x84] sm:$0xe]  ;;  %v1658_v42 = vrot.slane %v6533_v27, 5 }
  0x1a   : > { %v1151_v0 = vsel %vm6484_vm5, %v1146_v56, %v1150_v38  ;;  %v1652_v3 = vsel %vm6467_vm4, %v4792_v59, %v1651_v54  ;;  %v1161_v5 = vsel %vm6484_vm5, %v1156_v60, %v1160_v40  ;;  %v4839_v6 = vcombine.low %v1645_v57, %v1648_v2  ;;  %v4742_v38 = vld [vmem:[%s6426_s10 + $0x94] sm:$0xf]  ;;  %v4762_v45 = vld [vmem:[%s6426_s10 + $0x98] sm:$0x1] }
  0x1b   : > { %v1655_v8 = vsel %vm6467_vm4, %v1653_v62, %v1654_v55  ;;  %v4815_v12 = vcombine.low %v1151_v0, %v1161_v5  ;;  %v1166_v23 = vshll.u32 %v6517_v15, 16  ;;  %v4793_v40 = vrot.slane %v4777_v31, 9  ;;  %v6153_v56 = vld [vmem:[%s8261_s1 + $0x50] sm:$0xff]   ;;  %v4779_v31 = vld [vmem:[%s6426_s10 + $0x9c] sm:$0xe] }
  0x1c   : > { %5397 = vmatpush3.bf16.msra.mxu0 %v6140_v17  ;;  %5951 = vmatpush3.bf16.msra.mxu1 %v6407_v16  ;;  %v4840_v14 = vcombine.low %v1652_v3, %v1655_v8  ;;  %v6520_v17 = vld [vmem:[%s6426_s10 + $0x1c] sm:$0xf]  ;;  %v1661_v44 = vrot.slane %v6538_v30, 5  ;;  %v1665_v51 = vrot.slane %v4742_v38, 5  ;;  %v1668_v53 = vrot.slane %v4762_v45, 5  ;;  %v6154_v57 = vld [vmem:[%s8261_s1 + $0x10] sm:$0xff]  }
  0x1d   : > { %5398 = vmatprep.subr.bf16.mxu0 %v6141_v18  ;;  %5944 = vmatprep.subr.bf16.mxu1 %v6421_v19  ;;  %v6523_v18 = vld [vmem:[%s6426_s10 + $0x20] sm:$0x1]  ;;  %v1172_v24 = vshll.u32 %v6520_v17, 16  ;;  %v1176_v26 = vshrl.u32 %v6520_v17, 16  ;;  %v1168_v35 = vrot.slane %v1166_v23, 5  ;;  %v1659_v54 = vsel %vm6467_vm4, %v4793_v40, %v1658_v42  ;;  %v6156_v8 = vld [vmem:[%s8261_s1 + $0x18] sm:$0xff]  }
  0x1e   : > { %5826 = vmatprep.mubr.bf16.mxu1 %v4839_v6  ;;  %2131 = vmatprep.mubr.bf16.mxu0 %v4815_v12  ;;  %v1598_v29 = vrot.slane %v6523_v18, 5  ;;  %v1660_v55 = vrot.slane %v1658_v42, 4  ;;  %v1667_v60 = vrot.slane %v1665_v51, 4  ;;  %v6577_v12 = vld [vmem:[%s6426_s10 + $0x24] sm:$0xf]  ;;  %v4795_v42 = vrot.slane %v4779_v31, 9 }
  0x1f   : > { %v1174_v36 = vrot.slane %v1172_v24, 5  ;;  %v1178_v37 = vrot.slane %v1176_v26, 4  ;;  %v4744_v24 = vld [vmem:[%s6426_s10 + $0xa0] sm:$0xf] }
  0x20   : > { %5399 = vmatpush3.bf16.msra.mxu0 %v6143_v20  ;;  %5952 = vmatpush3.bf16.msra.mxu1 %v6421_v19  ;;  %v6151_v20 = vld [vmem:[%s8261_s1 + $0x8] sm:$0xff]   ;;  %v1662_v62 = vsel %vm6467_vm4, %v1660_v55, %v1661_v44  ;;  %v1669_v6 = vsel %vm6467_vm4, %v1667_v60, %v1668_v53 }
  0x21   : > { %5400 = vmatprep.subr.bf16.mxu0 %v6144_v21  ;;  %5945 = vmatprep.subr.bf16.mxu1 %v6437_v22  ;;  %v1163_v21 = vshrl.u32 %v6517_v15, 16  ;;  %v1179_v47 = vor.u32 %v1178_v37, %v1174_v36  ;;  %v4841_v5 = vcombine.low %v1659_v54, %v1662_v62 }
  0x23   : > { %v1165_v34 = vrot.slane %v1163_v21, 4  ;;  %v1180_v59 = vrot.slane %v1179_v47, 4 }
  0x24   : > { %5401 = vmatpush3.bf16.msra.mxu0 %v6146_v28  ;;  %5953 = vmatpush3.bf16.msra.mxu1 %v6437_v22  ;;  %v1182_v28 = vshll.u32 %v6523_v18, 16  ;;  %v6201_v18 = vld [vmem:[%s8261_s1 + $0x1c8] sm:$0xff]  }
  0x25   : > { %5794 = vmatprep.subr.bf16.mxu0 %v6337_v1  ;;  %5522 = vmatprep.subr.bf16.mxu1 %v6148_v49  ;;  %v1169_v46 = vor.u32 %v1168_v35, %v1165_v34  ;;  %v4778_v49 = vld [vmem:[%s6426_s10 + $0x90] sm:$0xe]  ;;  %v1672_v34 = vrot.slane %v4744_v24, 5 }
  0x26   : > { %v1184_v39 = vrot.slane %v1182_v28, 5  ;;  %v4763_v28 = vld [vmem:[%s6426_s10 + $0xa4] sm:$0x1] }
  0x27   : > { %5827 = vmatmul.mubr.bf16.vlgmr.msra.gmra.mrb[0].mxu1 %v4840_v14  ;;  %2132 = vmatmul.mubr.bf16.vlgmr.msra.gmra.mrb[0].mxu0 %v4799_v61  ;;  %v1170_v58 = vrot.slane %v1169_v46, 4  ;;  %v6155_v61 = vld [vmem:[%s8261_s1 + $0x58] sm:$0xff]   ;;  %v6580_v14 = vld [vmem:[%s6426_s10 + $0x28] sm:$0xf]  ;;  %v1674_v44 = vrot.slane %v1672_v34, 4  ;;  %v1675_v45 = vrot.slane %v4763_v28, 5  ;;  %v1673_v55 = vsel %vm6467_vm4, %v4795_v42, %v1672_v34 }
  0x28   : > { %5523 = vmatpush3.bf16.msra.mxu1 %v6149_v63  ;;  %5795 = vmatpush3.bf16.msra.mxu0 %v6337_v1  ;;  %v4794_v1 = vrot.slane %v4778_v49, 9  ;;  %v4800_v63 = vcombine.low %v6517_v15, %v6520_v17  ;;  %v1185_v3 = vsel %vm6484_vm5, %v1180_v59, %v1184_v39  ;;  %v4753_v15 = vld [vmem:[%s6426_s10 + $0x2c] sm:$0x1]  ;;  %v1187_v17 = vshrl.u32 %v6577_v12, 16  ;;  %v4764_v46 = vld [vmem:[%s6426_s10 + $0xb0] sm:$0x1] }
  0x29   : > { %5524 = vmatprep.subr.bf16.mxu1 %v6150_v9  ;;  %5796 = vmatprep.subr.bf16.mxu0 %v6350_v4  ;;  %v1175_v2 = vsel %vm6484_vm5, %v1170_v58, %v1174_v36  ;;  %v1196_v21 = vshll.u32 %v6580_v14, 16  ;;  %v1200_v23 = vshrl.u32 %v6580_v14, 16  ;;  %v1206_v26 = vshll.u32 %v4753_v15, 16  ;;  %v4746_v39 = vld [vmem:[%s6426_s10 + $0xac] sm:$0xf] }
  0x2a   : > { %v1666_v0 = vsel %vm6467_vm4, %v4794_v1, %v1665_v51  ;;  %v4816_v9 = vcombine.low %v1175_v2, %v1185_v3  ;;  %5830 = vmatprep.mubr.bf16.mxu1 %v4841_v5  ;;  %v1189_v35 = vrot.slane %v1187_v17, 4  ;;  %v4780_v51 = vld [vmem:[%s6426_s10 + $0xa8] sm:$0xe]  ;;  %v1679_v53 = vrot.slane %v4746_v39, 5  ;;  %v4781_v28 = vld [vmem:[%s6426_s10 + $0xb4] sm:$0xe] }
  0x2b   : > { %v1198_v37 = vrot.slane %v1196_v21, 5  ;;  %v1202_v38 = vrot.slane %v1200_v23, 4  ;;  %v1208_v40 = vrot.slane %v1206_v26, 5  ;;  %v1682_v54 = vrot.slane %v4764_v46, 5  ;;  %v4748_v23 = vld [vmem:[%s6426_s10 + $0xb8] sm:$0xf] }
  0x2c   : > { %5525 = vmatpush3.bf16.msra.mxu1 %v6151_v20  ;;  %5797 = vmatpush3.bf16.msra.mxu0 %v6350_v4  ;;  %v4842_v4 = vcombine.low %v1666_v0, %v1669_v6  ;;  %v1190_v20 = vshll.u32 %v6577_v12, 16  ;;  %v1676_v1 = vsel %vm6467_vm4, %v1674_v44, %v1675_v45  ;;  %v1681_v60 = vrot.slane %v1679_v53, 4  ;;  %v6160_v0 = vld [vmem:[%s8261_s1 + $0x68] sm:$0xff]   ;;  %v4765_v26 = vld [vmem:[%s6426_s10 + $0xbc] sm:$0x1] }
  0x2d   : > { %5526 = vmatprep.subr.bf16.mxu1 %v6153_v56  ;;  %5798 = vmatprep.subr.bf16.mxu0 %v6362_v7  ;;  %v1203_v49 = vor.u32 %v1202_v38, %v1198_v37  ;;  %v4796_v56 = vrot.slane %v4780_v51, 9  ;;  %v4843_v59 = vcombine.low %v1673_v55, %v1676_v1  ;;  %v4801_v62 = vcombine.low %v6577_v12, %v6580_v14  ;;  %v6631_v12 = vld [vmem:[%s6426_s10 + $0x34] sm:$0xf]  ;;  %v4754_v14 = vld [vmem:[%s6426_s10 + $0x38] sm:$0x1] }
  0x2e   : > { %2139 = vmatprep.mubr.bf16.mxu0 %v4816_v9  ;;  %v1192_v36 = vrot.slane %v1190_v20, 5  ;;  %v6615_v2 = vrot.slane %v1340_v11, 5  ;;  %v1683_v6 = vsel %vm6467_vm4, %v1681_v60, %v1682_v54  ;;  %v1220_v20 = vshll.u32 %v6631_v12, 16  ;;  %v4750_v38 = vld [vmem:[%s6426_s10 + $0xc4] sm:$0xf] }
  0x2f   : > { %5831 = vmatmul.mubr.bf16.gmra.mrb[4].mxu1 %v4842_v4  ;;  %2140 = vmatmul.mubr.bf16.gmra.mrb[4].mxu0 %v4800_v63  ;;  %v1204_v58 = vrot.slane %v1203_v49, 4  ;;  %v1680_v63 = vsel %vm6467_vm4, %v4796_v56, %v1679_v53  ;;  %v6628_v4 = vld [vmem:[%s6426_s10 + $0x30] sm:$0xf]  ;;  %v1224_v21 = vshrl.u32 %v6631_v12, 16  ;;  %v1230_v24 = vshll.u32 %v4754_v14, 16 }
  0x30   : > { %5527 = vmatpush3.bf16.msra.mxu1 %v6154_v57  ;;  %5799 = vmatpush3.bf16.msra.mxu0 %v6362_v7  ;;  %v1193_v47 = vor.u32 %v1192_v36, %v1189_v35  ;;  %v6158_v57 = vld [vmem:[%s8261_s1 + $0x60] sm:$0xff]   ;;  %v4844_v9 = vcombine.low %v1680_v63, %v1683_v6  ;;  %v1211_v15 = vshrl.u32 %v6628_v4, 16  ;;  %v1214_v17 = vshll.u32 %v6628_v4, 16  ;;  %v4766_v45 = vld [vmem:[%s6426_s10 + $0xc8] sm:$0x1]  ;;  %v6163_v56 = vld [vmem:[%s8261_s1 + $0x70] sm:$0xff]  }
  0x31   : > { %5528 = vmatprep.subr.bf16.mxu1 %v6155_v61  ;;  %5800 = vmatprep.subr.bf16.mxu0 %v6377_v10  ;;  %v6159_v61 = vld [vmem:[%s8261_s1 + $0x20] sm:$0xff]   ;;  %v1209_v5 = vsel %vm6484_vm5, %v1204_v58, %v1208_v40  ;;  %v1686_v31 = vrot.slane %v4748_v23, 5  ;;  %v1222_v36 = vrot.slane %v1220_v20, 5  ;;  %v1232_v39 = vrot.slane %v1230_v24, 5  ;;  %v6166_v6 = vld [vmem:[%s8261_s1 + $0x38] sm:$0xff]  }
  0x32   : > { %v1194_v7 = vrot.slane %v1193_v47, 4  ;;  %5834 = vmatprep.mubr.bf16.mxu1 %v4843_v59  ;;  %v1213_v34 = vrot.slane %v1211_v15, 4  ;;  %v1216_v35 = vrot.slane %v1214_v17, 5  ;;  %v4797_v40 = vrot.slane %v4781_v28, 9  ;;  %v4782_v49 = vld [vmem:[%s6426_s10 + $0xc0] sm:$0xe] }
  0x33   : > { %v1688_v42 = vrot.slane %v1686_v31, 4  ;;  %v1689_v44 = vrot.slane %v4765_v26, 5  ;;  %v1693_v51 = vrot.slane %v4750_v38, 5  ;;  %v1696_v53 = vrot.slane %v4766_v45, 5  ;;  %v6164_v59 = vld [vmem:[%s8261_s1 + $0x30] sm:$0xff]  }
  0x34   : > { %5529 = vmatpush3.bf16.msra.mxu1 %v6156_v8  ;;  %5801 = vmatpush3.bf16.msra.mxu0 %v6377_v10  ;;  %v1199_v3 = vsel %vm6484_vm5, %v1194_v7, %v1198_v37  ;;  %v6161_v10 = vld [vmem:[%s8261_s1 + $0x28] sm:$0xff]   ;;  %v1344_v8 = vshrl.u32 %v6460_v33, 16  ;;  %v1226_v37 = vrot.slane %v1224_v21, 4  ;;  %v1217_v46 = vor.u32 %v1216_v35, %v1213_v34  ;;  %v6690_v20 = vld [vmem:[%s6426_s10] sm:$0xf] }
  0x35   : > { %5530 = vmatprep.subr.bf16.mxu1 %v6158_v57  ;;  %v4817_v11 = vcombine.low %v1199_v3, %v1209_v5  ;;  %5802 = vmatprep.subr.bf16.mxu0 %v6390_v13  ;;  %v1687_v54 = vsel %vm6467_vm4, %v4797_v40, %v1686_v31  ;;  %v1690_v55 = vsel %vm6467_vm4, %v1688_v42, %v1689_v44  ;;  %v4798_v1 = vrot.slane %v4782_v49, 9  ;;  %v6693_v23 = vld [vmem:[%s6426_s10 + $0x4] sm:$0xf]  ;;  %v251_v24 = vld [vmem:[%s6426_s10 + $0x8] sm:$0x1] }
  0x36   : > { %v1227_v47 = vor.u32 %v1226_v37, %v1222_v36  ;;  %v1218_v57 = vrot.slane %v1217_v46, 4  ;;  %v4845_v7 = vcombine.low %v1687_v54, %v1690_v55  ;;  %v1695_v58 = vrot.slane %v1693_v51, 4  ;;  %v6709_v49 = vld [vmem:[%s6426_s10 + $0x48] sm:$0xf]  ;;  %v6717_v55 = vld [vmem:[%s6426_s10 + $0x4c] sm:$0xf] }
  0x37   : > { %2147 = vmatprep.mubr.bf16.mxu0 %v4817_v11  ;;  %5835 = vmatmul.mubr.bf16.gmra.mrb[8].mxu1 %v4844_v9  ;;  %v4802_v60 = vcombine.low %v6628_v4, %v6631_v12  ;;  %v6664_v63 = vrot.slane %v1344_v8, 4  ;;  %v6678_v11 = vld [vmem:[%s6426_s10 + $0x3c] sm:$0xf]  ;;  %v6681_v9 = vld [vmem:[%s6426_s10 + $0x40] sm:$0xf]  ;;  %v271_v26 = vshrl.u32 %v6690_v20, 16  ;;  %v4671_v54 = vcombine.low %v6690_v20, %v6693_v23 }
  0x38   : > { %5531 = vmatpush3.bf16.msra.mxu1 %v6159_v61  ;;  %2148 = vmatmul.mubr.bf16.gmra.mrb[8].mxu0 %v4801_v62  ;;  %v1694_v61 = vsel %vm6467_vm4, %v4798_v1, %v1693_v51  ;;  %v6165_v62 = vld [vmem:[%s8261_s1 + $0x78] sm:$0xff]   ;;  %v1697_v5 = vsel %vm6467_vm4, %v1695_v58, %v1696_v53  ;;  %v4755_v4 = vld [vmem:[%s6426_s10 + $0x44] sm:$0x1]  ;;  %v1235_v12 = vshrl.u32 %v6678_v11, 16  ;;  %v1238_v14 = vshll.u32 %v6678_v11, 16 }
  0x39   : > { %5532 = vmatprep.subr.bf16.mxu1 %v6160_v0  ;;  %5803 = vmatpush3.bf16.msra.mxu0 %v6390_v13  ;;  %v1228_v13 = vrot.slane %v1227_v47, 4  ;;  %v1223_v0 = vsel %vm6484_vm5, %v1218_v57, %v1222_v36  ;;  %v4846_v8 = vcombine.low %v1694_v61, %v1697_v5  ;;  %v1244_v15 = vshll.u32 %v6681_v9, 16  ;;  %v6706_v47 = vld [vmem:[%s8261_s1 + $0x80] sm:$0xff]   ;;  %v4756_v58 = vld [vmem:[%s6426_s10 + $0x50] sm:$0x1] }
  0x3a   : > { %5804 = vmatprep.subr.bf16.mxu0 %v6407_v16  ;;  %5838 = vmatprep.mubr.bf16.mxu1 %v4845_v7  ;;  %v1248_v17 = vshrl.u32 %v6681_v9, 16  ;;  %v1254_v21 = vshll.u32 %v4755_v4, 16  ;;  %v1347_v28 = vor.u32 %v6664_v63, %v6615_v2  ;;  %v1237_v31 = vrot.slane %v1235_v12, 4  ;;  %v6734_v4 = vld [vmem:[%s6426_s10 + $0x10] sm:$0xf] }
  0x3b   : > { %v1233_v3 = vsel %vm6484_vm5, %v1228_v13, %v1232_v39  ;;  %v1240_v34 = vrot.slane %v1238_v14, 5  ;;  %v1246_v35 = vrot.slane %v1244_v15, 5  ;;  %v273_v38 = vrot.slane %v271_v26, 4 }
  0x3c   : > { %5533 = vmatpush3.bf16.msra.mxu1 %v6161_v10  ;;  %v1364_v10 = vshll.u32 %v6472_v43, 16  ;;  %v1250_v36 = vrot.slane %v1248_v17, 4  ;;  %v1256_v37 = vrot.slane %v1254_v21, 5  ;;  %v274_v39 = vshll.u32 %v6690_v20, 16  ;;  %v6739_v21 = vld [vmem:[%s6426_s10 + $0x14] sm:$0x1] }
  0x3d   : > { %5534 = vmatprep.subr.bf16.mxu1 %v6163_v56  ;;  %5805 = vmatpush3.bf16.msra.mxu0 %v6407_v16  ;;  %v4818_v16 = vcombine.low %v1223_v0, %v1233_v3  ;;  %v280_v40 = vshll.u32 %v6693_v23, 16  ;;  %v1241_v42 = vor.u32 %v1240_v34, %v1237_v31  ;;  %v284_v45 = vshrl.u32 %v6693_v23, 16 }
  0x3e   : > { %5806 = vmatprep.subr.bf16.mxu0 %v6421_v19  ;;  %v1251_v44 = vor.u32 %v1250_v36, %v1246_v35  ;;  %v290_v46 = vshll.u32 %v251_v24, 16  ;;  %v276_v51 = vrot.slane %v274_v39, 5  ;;  %v1268_v61 = vshll.u32 %v6717_v55, 16 }
  0x3f   : > { %2155 = vmatprep.mubr.bf16.mxu0 %v4818_v16  ;;  %5839 = vmatmul.mubr.bf16.gmra.mrb[12].mxu1 %v4846_v8  ;;  %v282_v53 = vrot.slane %v280_v40, 5  ;;  %v1242_v1 = vrot.slane %v1241_v42, 4  ;;  %v286_v57 = vrot.slane %v284_v45, 4  ;;  %v1272_v5 = vshrl.u32 %v6717_v55, 16  ;;  %v6174_v40 = vld [vmem:[%s8261_s1 + $0x88] sm:$0xff]  }
  0x40   : > { %5535 = vmatpush3.bf16.msra.mxu1 %v6164_v59  ;;  %2156 = vmatmul.mubr.bf16.gmra.mrb[12].mxu0 %v4802_v60  ;;  %v1252_v56 = vrot.slane %v1251_v44, 4  ;;  %v292_v13 = vrot.slane %v290_v46, 5  ;;  %v277_v7 = vor.u32 %v276_v51, %v273_v38  ;;  %v1259_v59 = vshrl.u32 %v6709_v49, 16  ;;  %v6752_v51 = vld [vmem:[%s6426_s10 + $0x54] sm:$0xf] }
  0x41   : > { %5536 = vmatprep.subr.bf16.mxu1 %v6165_v62  ;;  %5807 = vmatpush3.bf16.msra.mxu0 %v6421_v19  ;;  %v4803_v19 = vcombine.low %v6678_v11, %v6681_v9  ;;  %v1262_v60 = vshll.u32 %v6709_v49, 16  ;;  %v1247_v62 = vsel %vm6484_vm5, %v1242_v1, %v1246_v35  ;;  %v287_v3 = vor.u32 %v286_v57, %v282_v53  ;;  %v6760_v57 = vld [vmem:[%s6426_s10 + $0x58] sm:$0xf] }
  0x42   : > { %5808 = vmatprep.subr.bf16.mxu0 %v6437_v22  ;;  %v1257_v0 = vsel %vm6484_vm5, %v1252_v56, %v1256_v37  ;;  %v278_v8 = vrot.slane %v277_v7, 4  ;;  %v1261_v11 = vrot.slane %v1259_v59, 4  ;;  %v1274_v14 = vrot.slane %v1272_v5, 4  ;;  %v6198_v7 = vld [vmem:[%s8261_s1 + $0x1c0] sm:$0xff]  }
  0x43   : > { %v4819_v16 = vcombine.low %v1247_v62, %v1257_v0  ;;  %v1264_v9 = vrot.slane %v1262_v60, 5  ;;  %v288_v12 = vrot.slane %v287_v3, 4  ;;  %v1278_v15 = vshll.u32 %v4756_v58, 16  ;;  %v6771_v62 = vld [vmem:[%s6426_s10 + $0x18] sm:$0xf] }
  0x44   : > { %5537 = vmatpush3.bf16.msra.mxu1 %v6166_v6  ;;  %v6731_v6 = vld [vmem:[%s6426_s10 + $0xc] sm:$0xf]  ;;  %v283_v17 = vsel %vm6484_vm5, %v278_v8, %v282_v53  ;;  %v304_v35 = vshll.u32 %v6734_v4, 16  ;;  %v308_v45 = vshrl.u32 %v6734_v4, 16  ;;  %v314_v46 = vshll.u32 %v6739_v21, 16 }
  0x45   : > { %5842 = vmatprep.subr.bf16.mxu1 %v6706_v47  ;;  %5809 = vmatpush3.bf16.msra.mxu0 %v6437_v22  ;;  %v1270_v22 = vrot.slane %v1268_v61, 5  ;;  %v1265_v20 = vor.u32 %v1264_v9, %v1261_v11  ;;  %v295_v23 = vshrl.u32 %v6731_v6, 16  ;;  %v298_v24 = vshll.u32 %v6731_v6, 16  ;;  %v6779_v11 = vld [vmem:[%s6426_s10 + $0x1c] sm:$0xf] }
  0x46   : > { %2163 = vmatprep.mubr.bf16.mxu0 %v4819_v16  ;;  %v293_v26 = vsel %vm6484_vm5, %v288_v12, %v292_v13  ;;  %v1280_v34 = vrot.slane %v1278_v15, 5  ;;  %v306_v44 = vrot.slane %v304_v35, 5  ;;  %v733_v1 = vrot.slane %v6739_v21, 5  ;;  %v4757_v13 = vld [vmem:[%s6426_s10 + $0x5c] sm:$0x1]  ;;  %5658 = vmatprep.subr.bf16.mxu0 %v6198_v7 }
  0x47   : > { %v1275_v31 = vor.u32 %v1274_v14, %v1270_v22  ;;  %v4687_v36 = vcombine.low %v283_v17, %v293_v26  ;;  %v1266_v37 = vrot.slane %v1265_v20, 4  ;;  %v297_v38 = vrot.slane %v295_v23, 4  ;;  %v253_v12 = vld [vmem:[%s6426_s10 + $0x20] sm:$0x1]  ;;  %v6184_v35 = vld [vmem:[%s8261_s1 + $0x98] sm:$0xff]  }
  0x48   : > { %2164 = vmatmul.mubr.bf16.gmra.mrb[16].mxu0 %v4803_v19  ;;  %v300_v39 = vrot.slane %v298_v24, 5  ;;  %v4804_v56 = vcombine.low %v6709_v49, %v6717_v55  ;;  %v310_v59 = vrot.slane %v308_v45, 4  ;;  %v316_v60 = vrot.slane %v314_v46, 5 }
  0x49   : > { %v1276_v42 = vrot.slane %v1275_v31, 4  ;;  %2597 = vmatprep.mubr.bf16.mxu1 %v4687_v36  ;;  %v1271_v53 = vsel %vm6484_vm5, %v1266_v37, %v1270_v22  ;;  %v4672_v61 = vcombine.low %v6731_v6, %v6734_v4  ;;  %v1283_v0 = vshrl.u32 %v6752_v51, 16 }
  0x4a   : > { %v301_v19 = vor.u32 %v300_v39, %v297_v38  ;;  %2598 = vmatmul.mubr.bf16.vlgmr.msra.gmra.mrb[16].mxu1 %v4671_v54  ;;  %v1286_v54 = vshll.u32 %v6752_v51, 16  ;;  %v311_v3 = vor.u32 %v310_v59, %v306_v44  ;;  %v1292_v5 = vshll.u32 %v6760_v57, 16 }
  0x4b   : > { %v1281_v58 = vsel %vm6484_vm5, %v1276_v42, %v1280_v34  ;;  %5843 = vmatpush3.bf16.msra.mxu1 %v6706_v47  ;;  %v1296_v16 = vshrl.u32 %v6760_v57, 16  ;;  %v1302_v8 = vshll.u32 %v4757_v13, 16  ;;  %v6179_v47 = vld [vmem:[%s8261_s1 + $0x90] sm:$0xff]   ;;  %v1285_v9 = vrot.slane %v1283_v0, 4  ;;  %v6791_v34 = vld [vmem:[%s6426_s10 + $0x60] sm:$0xf] }
  0x4c   : > { %v4820_v49 = vcombine.low %v1271_v53, %v1281_v58  ;;  %v302_v55 = vrot.slane %v301_v19, 4  ;;  %5844 = vmatprep.subr.bf16.mxu1 %v6174_v40  ;;  %v1288_v4 = vrot.slane %v1286_v54, 5  ;;  %v319_v22 = vshrl.u32 %v6771_v62, 16  ;;  %v6815_v54 = vld [vmem:[%s6426_s10 + $0x24] sm:$0xf] }
  0x4d   : > { %v312_v14 = vrot.slane %v311_v3, 4  ;;  %v1294_v15 = vrot.slane %v1292_v5, 5  ;;  %v1298_v17 = vrot.slane %v1296_v16, 4  ;;  %v1304_v20 = vrot.slane %v1302_v8, 5  ;;  %v6822_v8 = vld [vmem:[%s6426_s10 + $0x28] sm:$0xf] }
  0x4e   : > { %2171 = vmatprep.mubr.bf16.mxu0 %v4820_v49  ;;  %v307_v6 = vsel %vm6484_vm5, %v302_v55, %v306_v44  ;;  %v1289_v23 = vor.u32 %v1288_v4, %v1285_v9  ;;  %v321_v24 = vrot.slane %v319_v22, 4  ;;  %v322_v26 = vshll.u32 %v6771_v62, 16  ;;  %v254_v4 = vld [vmem:[%s6426_s10 + $0x2c] sm:$0x1] }
  0x4f   : > { %v328_v31 = vshll.u32 %v6779_v11, 16  ;;  %5845 = vmatpush3.bf16.msra.mxu1 %v6174_v40  ;;  %v317_v36 = vsel %vm6484_vm5, %v312_v14, %v316_v60  ;;  %v1299_v37 = vor.u32 %v1298_v17, %v1294_v15  ;;  %v332_v38 = vshrl.u32 %v6779_v11, 16  ;;  %v6800_v40 = vld [vmem:[%s6426_s10 + $0x64] sm:$0xf]  ;;  %v4758_v60 = vld [vmem:[%s6426_s10 + $0x68] sm:$0x1] }
  0x50   : > { %2172 = vmatmul.mubr.bf16.gmra.mrb[20].mxu0 %v4804_v56  ;;  %v338_v39 = vshll.u32 %v253_v12, 16  ;;  %5846 = vmatprep.subr.bf16.mxu1 %v6179_v47  ;;  %v4688_v42 = vcombine.low %v307_v6, %v317_v36  ;;  %v1290_v44 = vrot.slane %v1289_v23, 4  ;;  %v324_v45 = vrot.slane %v322_v26, 5  ;;  %v6194_v26 = vld [vmem:[%s8261_s1 + $0xa8] sm:$0xff]  }
  0x51   : > { %v330_v46 = vrot.slane %v328_v31, 5  ;;  %v1300_v53 = vrot.slane %v1299_v37, 4  ;;  %v334_v19 = vrot.slane %v332_v38, 4  ;;  %v4805_v13 = vcombine.low %v6752_v51, %v6760_v57 }
  0x52   : > { %v340_v56 = vrot.slane %v338_v39, 5  ;;  %2605 = vmatprep.mubr.bf16.mxu1 %v4688_v42  ;;  %v1295_v7 = vsel %vm6484_vm5, %v1290_v44, %v1294_v15  ;;  %v325_v58 = vor.u32 %v324_v45, %v321_v24  ;;  %v4673_v59 = vcombine.low %v6771_v62, %v6779_v11  ;;  %v6189_v62 = vld [vmem:[%s8261_s1 + $0xa0] sm:$0xff]   ;;  %v6836_v39 = vld [vmem:[%s6426_s10 + $0x6c] sm:$0xf] }
  0x53   : > { %v1307_v49 = vshrl.u32 %v6791_v34, 16  ;;  %5847 = vmatpush3.bf16.msra.mxu1 %v6179_v47  ;;  %v1305_v55 = vsel %vm6484_vm5, %v1300_v53, %v1304_v20  ;;  %v335_v0 = vor.u32 %v334_v19, %v330_v46  ;;  %v1310_v51 = vshll.u32 %v6791_v34, 16 }
  0x54   : > { %2606 = vmatmul.mubr.bf16.gmra.mrb[20].mxu1 %v4672_v61  ;;  %v1316_v57 = vshll.u32 %v6800_v40, 16  ;;  %5848 = vmatprep.subr.bf16.mxu1 %v6184_v35  ;;  %v4821_v3 = vcombine.low %v1295_v7, %v1305_v55  ;;  %v326_v5 = vrot.slane %v325_v58, 4  ;;  %v1320_v61 = vshrl.u32 %v6800_v40, 16  ;;  %v6850_v55 = vld [vmem:[%s6426_s10 + $0x34] sm:$0xf] }
  0x55   : > { %v1309_v16 = vrot.slane %v1307_v49, 4  ;;  %v336_v11 = vrot.slane %v335_v0, 4  ;;  %v1312_v47 = vrot.slane %v1310_v51, 5  ;;  %v1326_v9 = vshll.u32 %v4758_v60, 16 }
  0x56   : > { %v1318_v6 = vrot.slane %v1316_v57, 5  ;;  %2179 = vmatprep.mubr.bf16.mxu0 %v4821_v3  ;;  %v331_v12 = vsel %vm6484_vm5, %v326_v5, %v330_v46  ;;  %v1322_v22 = vrot.slane %v1320_v61, 4  ;;  %v343_v14 = vshrl.u32 %v6815_v54, 16  ;;  %v255_v57 = vld [vmem:[%s6426_s10 + $0x38] sm:$0x1] }
  0x57   : > { %v346_v15 = vshll.u32 %v6815_v54, 16  ;;  %5849 = vmatpush3.bf16.msra.mxu1 %v6184_v35  ;;  %v341_v17 = vsel %vm6484_vm5, %v336_v11, %v340_v56  ;;  %v1313_v20 = vor.u32 %v1312_v47, %v1309_v16  ;;  %v1328_v23 = vrot.slane %v1326_v9, 5  ;;  %v6211_v9 = vld [vmem:[%s8261_s1 + $0xb8] sm:$0xff]  }
  0x58   : > { %2180 = vmatmul.mubr.bf16.gmra.mrb[24].mxu0 %v4805_v13  ;;  %v352_v24 = vshll.u32 %v6822_v8, 16  ;;  %5850 = vmatprep.subr.bf16.mxu1 %v6189_v62  ;;  %v4689_v31 = vcombine.low %v331_v12, %v341_v17  ;;  %v1323_v36 = vor.u32 %v1322_v22, %v1318_v6  ;;  %v345_v37 = vrot.slane %v343_v14, 4  ;;  %v6844_v13 = vld [vmem:[%s6426_s10 + $0x30] sm:$0xf]  ;;  %v6877_v14 = vld [vmem:[%s6426_s10 + $0x78] sm:$0xf] }
  0x59   : > { %v348_v38 = vrot.slane %v346_v15, 5  ;;  %v1314_v35 = vrot.slane %v1313_v20, 4  ;;  %v356_v44 = vshrl.u32 %v6822_v8, 16  ;;  %v362_v45 = vshll.u32 %v254_v4, 16 }
  0x5a   : > { %v354_v42 = vrot.slane %v352_v24, 5  ;;  %2613 = vmatprep.mubr.bf16.mxu1 %v4689_v31  ;;  %v1324_v46 = vrot.slane %v1323_v36, 4  ;;  %v4806_v19 = vcombine.low %v6791_v34, %v6800_v40  ;;  %v4674_v56 = vcombine.low %v6815_v54, %v6822_v8  ;;  %v6200_v34 = vld [vmem:[%s8261_s1 + $0xb0] sm:$0xff]  }
  0x5b   : > { %v349_v53 = vor.u32 %v348_v38, %v345_v37  ;;  %5851 = vmatpush3.bf16.msra.mxu1 %v6189_v62  ;;  %v1319_v7 = vsel %vm6484_vm5, %v1314_v35, %v1318_v6  ;;  %v358_v58 = vrot.slane %v356_v44, 4  ;;  %v364_v60 = vrot.slane %v362_v45, 5  ;;  %v6884_v37 = vld [vmem:[%s6426_s10 + $0x3c] sm:$0xf] }
  0x5c   : > { %2614 = vmatmul.mubr.bf16.gmra.mrb[24].mxu1 %v4673_v59  ;;  %v1331_v49 = vshrl.u32 %v6836_v39, 16  ;;  %5852 = vmatprep.subr.bf16.mxu1 %v6194_v26  ;;  %v1329_v40 = vsel %vm6484_vm5, %v1324_v46, %v1328_v23  ;;  %v1334_v59 = vshll.u32 %v6836_v39, 16  ;;  %v1348_v51 = vrot.slane %v1347_v28, 4 }
  0x5d   : > { %v350_v0 = vrot.slane %v349_v53, 4  ;;  %v4822_v54 = vcombine.low %v1319_v7, %v1329_v40  ;;  %v359_v62 = vor.u32 %v358_v58, %v354_v42  ;;  %v367_v5 = vshrl.u32 %v6844_v13, 16  ;;  %v6896_v53 = vld [vmem:[%s6426_s10 + $0x40] sm:$0xf] }
  0x5e   : > { %v1333_v3 = vrot.slane %v1331_v49, 4  ;;  %v1336_v61 = vrot.slane %v1334_v59, 5  ;;  %v1353_v8 = vsel %vm6484_vm5, %v1348_v51, %v6488_v52  ;;  %v370_v11 = vshll.u32 %v6844_v13, 16 }
  0x5f   : > { %v355_v16 = vsel %vm6484_vm5, %v350_v0, %v354_v42  ;;  %5853 = vmatpush3.bf16.msra.mxu1 %v6194_v26  ;;  %2187 = vmatprep.mubr.bf16.mxu0 %v4822_v54  ;;  %v360_v63 = vrot.slane %v359_v62, 4  ;;  %v369_v28 = vrot.slane %v367_v5, 4  ;;  %v376_v47 = vshll.u32 %v6850_v55, 16 }
  0x60   : > { %v380_v6 = vshrl.u32 %v6850_v55, 16  ;;  %5854 = vmatprep.subr.bf16.mxu1 %v6200_v34  ;;  %2188 = vmatmul.mubr.bf16.gmra.mrb[28].mxu0 %v4806_v19  ;;  %v1337_v4 = vor.u32 %v1336_v61, %v1333_v3  ;;  %v372_v12 = vrot.slane %v370_v11, 5  ;;  %v386_v52 = vshll.u32 %v255_v57, 16  ;;  %v6908_v57 = vld [vmem:[%s6426_s10 + $0x84] sm:$0xf] }
  0x61   : > { %v4807_v22 = vcombine.low %v6836_v39, %v6460_v33  ;;  %v365_v15 = vsel %vm6484_vm5, %v360_v63, %v364_v60  ;;  %v378_v17 = vrot.slane %v376_v47, 5  ;;  %v4675_v23 = vcombine.low %v6844_v13, %v6850_v55  ;;  %v256_v55 = vld [vmem:[%s6426_s10 + $0x44] sm:$0x1] }
  0x62   : > { %v382_v20 = vrot.slane %v380_v6, 4  ;;  %v4690_v24 = vcombine.low %v355_v16, %v365_v15  ;;  %v1338_v26 = vrot.slane %v1337_v4, 4  ;;  %v373_v31 = vor.u32 %v372_v12, %v369_v28  ;;  %v6915_v28 = vld [vmem:[%s6426_s10 + $0x48] sm:$0xf]  ;;  %v6921_v12 = vld [vmem:[%s6426_s10 + $0x4c] sm:$0xf] }
  0x63   : > { %v388_v36 = vrot.slane %v386_v52, 5  ;;  %5855 = vmatpush3.bf16.msra.mxu1 %v6200_v34  ;;  %v1355_v33 = vshrl.u32 %v6877_v14, 16  ;;  %v1358_v39 = vshll.u32 %v6877_v14, 16  ;;  %v1366_v35 = vrot.slane %v1364_v10, 5 }
  0x64   : > { %v383_v38 = vor.u32 %v382_v20, %v378_v17  ;;  %5856 = vmatprep.subr.bf16.mxu1 %v6211_v9  ;;  %2621 = vmatprep.mubr.bf16.mxu1 %v4690_v24  ;;  %v1343_v42 = vsel %vm6484_vm5, %v1338_v26, %v6615_v2  ;;  %v374_v44 = vrot.slane %v373_v31, 4  ;;  %v1368_v45 = vshrl.u32 %v6472_v43, 16  ;;  %v257_v31 = vld [vmem:[%s6426_s10 + $0x50] sm:$0x1] }
  0x65   : > { %v1374_v46 = vshll.u32 %v6477_v48, 16  ;;  %2622 = vmatmul.mubr.bf16.gmra.mrb[28].mxu1 %v4674_v56  ;;  %v4823_v19 = vcombine.low %v1343_v42, %v1353_v8  ;;  %v1357_v7 = vrot.slane %v1355_v33, 4  ;;  %v1360_v58 = vrot.slane %v1358_v39, 5  ;;  %v6243_v8 = vld [vmem:[%s6426_s10 + $0x7c] sm:$0xf] }
  0x66   : > { %v384_v13 = vrot.slane %v383_v38, 4  ;;  %v379_v10 = vsel %vm6484_vm5, %v374_v44, %v378_v17  ;;  %v1370_v60 = vrot.slane %v1368_v45, 4  ;;  %v391_v2 = vshrl.u32 %v6884_v37, 16 }
  0x67   : > { %v1376_v49 = vrot.slane %v1374_v46, 5  ;;  %5857 = vmatpush3.bf16.msra.mxu1 %v6211_v9  ;;  %2195 = vmatprep.mubr.bf16.mxu0 %v4823_v19  ;;  %v1361_v48 = vor.u32 %v1360_v58, %v1357_v7  ;;  %v394_v56 = vshll.u32 %v6884_v37, 16  ;;  %v400_v34 = vshll.u32 %v6896_v53, 16  ;;  %v6941_v58 = vld [vmem:[%s6426_s10 + $0x90] sm:$0xf] }
  0x68   : > { %v389_v43 = vsel %vm6484_vm5, %v384_v13, %v388_v36  ;;  %2196 = vmatmul.mubr.bf16.gmra.mrb[32].mxu0 %v4807_v22  ;;  %v1371_v0 = vor.u32 %v1370_v60, %v1366_v35  ;;  %v393_v59 = vrot.slane %v391_v2, 4  ;;  %v404_v51 = vshrl.u32 %v6896_v53, 16 }
  0x69   : > { %v4691_v40 = vcombine.low %v379_v10, %v389_v43  ;;  %v1362_v54 = vrot.slane %v1361_v48, 4  ;;  %v396_v62 = vrot.slane %v394_v56, 5  ;;  %v402_v3 = vrot.slane %v400_v34, 5  ;;  %v6244_v48 = vld [vmem:[%s6426_s10 + $0x88] sm:$0xf] }
  0x6a   : > { %v410_v5 = vshll.u32 %v256_v55, 16  ;;  %v1372_v16 = vrot.slane %v1371_v0, 4  ;;  %v406_v61 = vrot.slane %v404_v51, 4  ;;  %v4808_v11 = vcombine.low %v6877_v14, %v6243_v8 }
  0x6b   : > { %2629 = vmatprep.mubr.bf16.mxu1 %v4691_v40  ;;  %v4676_v63 = vcombine.low %v6884_v37, %v6896_v53  ;;  %v1367_v47 = vsel %vm6484_vm5, %v1362_v54, %v1366_v35  ;;  %v397_v6 = vor.u32 %v396_v62, %v393_v59  ;;  %v1379_v4 = vshrl.u32 %v6908_v57, 16  ;;  %v6949_v40 = vld [vmem:[%s6426_s10 + $0x54] sm:$0xf]  ;;  %v6955_v62 = vld [vmem:[%s6426_s10 + $0x58] sm:$0xf] }
  0x6c   : > { %v412_v9 = vrot.slane %v410_v5, 5  ;;  %v1377_v52 = vsel %vm6484_vm5, %v1372_v16, %v1376_v49  ;;  %v407_v22 = vor.u32 %v406_v61, %v402_v3  ;;  %v1382_v14 = vshll.u32 %v6908_v57, 16  ;;  %v6961_v16 = vld [vmem:[%s6426_s10 + $0x94] sm:$0xf] }
  0x6d   : > { %v1388_v15 = vshll.u32 %v6533_v27, 16  ;;  %2630 = vmatmul.mubr.bf16.gmra.mrb[32].mxu1 %v4675_v23  ;;  %v4824_v17 = vcombine.low %v1367_v47, %v1377_v52  ;;  %v398_v20 = vrot.slane %v397_v6, 4  ;;  %v1381_v24 = vrot.slane %v1379_v4, 4  ;;  %v6246_v4 = vld [vmem:[%s6426_s10 + $0x98] sm:$0x1] }
  0x6e   : > { %v1392_v26 = vshrl.u32 %v6533_v27, 16  ;;  %v408_v36 = vrot.slane %v407_v22, 4  ;;  %v1384_v37 = vrot.slane %v1382_v14, 5  ;;  %v1398_v33 = vshll.u32 %v6538_v30, 16  ;;  %v6220_v27 = vld [vmem:[%s8261_s1 + $0x200] sm:$0xff]  }
  0x6f   : > { %v1390_v38 = vrot.slane %v1388_v15, 5  ;;  %2203 = vmatprep.mubr.bf16.mxu0 %v4824_v17  ;;  %v403_v39 = vsel %vm6484_vm5, %v398_v20, %v402_v3  ;;  %v415_v42 = vshrl.u32 %v6915_v28, 16  ;;  %v418_v23 = vshll.u32 %v6915_v28, 16  ;;  %5890 = vmatprep.subr.bf16.mxu1 %v6220_v27  ;;  %v258_v52 = vld [vmem:[%s6426_s10 + $0x5c] sm:$0x1] }
  0x70   : > { %v1394_v35 = vrot.slane %v1392_v26, 4  ;;  %v413_v44 = vsel %vm6484_vm5, %v408_v36, %v412_v9  ;;  %2204 = vmatmul.mubr.bf16.gmra.mrb[36].mxu0 %v4808_v11  ;;  %v1385_v45 = vor.u32 %v1384_v37, %v1381_v24  ;;  %v1400_v30 = vrot.slane %v1398_v33, 5 }
  0x71   : > { %v424_v46 = vshll.u32 %v6921_v12, 16  ;;  %v4692_v53 = vcombine.low %v403_v39, %v413_v44  ;;  %v417_v13 = vrot.slane %v415_v42, 4  ;;  %v420_v7 = vrot.slane %v418_v23, 5  ;;  %v6976_v39 = vld [vmem:[%s6426_s10 + $0x9c] sm:$0xf] }
  0x72   : > { %v1395_v19 = vor.u32 %v1394_v35, %v1390_v38  ;;  %v1386_v10 = vrot.slane %v1385_v45, 4  ;;  %v428_v49 = vshrl.u32 %v6921_v12, 16  ;;  %v434_v55 = vshll.u32 %v257_v31, 16 }
  0x73   : > { %v426_v60 = vrot.slane %v424_v46, 5  ;;  %2637 = vmatprep.mubr.bf16.mxu1 %v4692_v53  ;;  %v421_v43 = vor.u32 %v420_v7, %v417_v13  ;;  %v4809_v56 = vcombine.low %v6908_v57, %v6244_v48  ;;  %v4677_v34 = vcombine.low %v6915_v28, %v6921_v12 }
  0x74   : > { %v1396_v2 = vrot.slane %v1395_v19, 4  ;;  %v1391_v0 = vsel %vm6484_vm5, %v1386_v10, %v1390_v38  ;;  %v430_v59 = vrot.slane %v428_v49, 4  ;;  %v436_v51 = vrot.slane %v434_v55, 5  ;;  %v6986_v10 = vld [vmem:[%s6426_s10 + $0x60] sm:$0xf] }
  0x75   : > { %v1403_v54 = vshrl.u32 %v6941_v58, 16  ;;  %2638 = vmatmul.mubr.bf16.gmra.mrb[36].mxu1 %v4676_v63  ;;  %v422_v3 = vrot.slane %v421_v43, 4  ;;  %v1406_v5 = vshll.u32 %v6941_v58, 16  ;;  %v1412_v61 = vshll.u32 %v6961_v16, 16 }
  0x76   : > { %v1401_v57 = vsel %vm6484_vm5, %v1396_v2, %v1400_v30  ;;  %v431_v11 = vor.u32 %v430_v59, %v426_v60  ;;  %v1416_v47 = vshrl.u32 %v6961_v16, 16  ;;  %v1422_v12 = vshll.u32 %v6246_v4, 16  ;;  %v6992_v2 = vld [vmem:[%s6426_s10 + $0x64] sm:$0xf]  ;;  %v259_v59 = vld [vmem:[%s6426_s10 + $0x68] sm:$0x1] }
  0x77   : > { %v4825_v8 = vcombine.low %v1391_v0, %v1401_v57  ;;  %v1405_v28 = vrot.slane %v1403_v54, 4  ;;  %v427_v6 = vsel %vm6484_vm5, %v422_v3, %v426_v60  ;;  %v1408_v9 = vrot.slane %v1406_v5, 5 }
  0x78   : > { %v1414_v63 = vrot.slane %v1412_v61, 5  ;;  %v432_v22 = vrot.slane %v431_v11, 4  ;;  %v1418_v14 = vrot.slane %v1416_v47, 4  ;;  %v439_v15 = vshrl.u32 %v6949_v40, 16 }
  0x79   : > { %2211 = vmatprep.mubr.bf16.mxu0 %v4825_v8  ;;  %v442_v17 = vshll.u32 %v6949_v40, 16  ;;  %v1409_v20 = vor.u32 %v1408_v9, %v1405_v28  ;;  %v1424_v24 = vrot.slane %v1422_v12, 5  ;;  %v448_v26 = vshll.u32 %v6955_v62, 16  ;;  %v7008_v8 = vld [vmem:[%s6426_s10 + $0xa8] sm:$0xf] }
  0x7a   : > { %2212 = vmatmul.mubr.bf16.gmra.mrb[40].mxu0 %v4809_v56  ;;  %v452_v31 = vshrl.u32 %v6955_v62, 16  ;;  %v437_v36 = vsel %vm6484_vm5, %v432_v22, %v436_v51  ;;  %v1419_v37 = vor.u32 %v1418_v14, %v1414_v63  ;;  %v441_v38 = vrot.slane %v439_v15, 4 }
  0x7b   : > { %v444_v33 = vrot.slane %v442_v17, 5  ;;  %v4693_v35 = vcombine.low %v427_v6, %v437_v36  ;;  %v1410_v42 = vrot.slane %v1409_v20, 4  ;;  %v450_v23 = vrot.slane %v448_v26, 5 }
  0x7c   : > { %v454_v27 = vrot.slane %v452_v31, 4  ;;  %v1420_v44 = vrot.slane %v1419_v37, 4  ;;  %v458_v30 = vshll.u32 %v258_v52, 16  ;;  %v4810_v46 = vcombine.low %v6941_v58, %v6961_v16 }
  0x7d   : > { %v445_v45 = vor.u32 %v444_v33, %v441_v38  ;;  %2645 = vmatprep.mubr.bf16.mxu1 %v4693_v35  ;;  %v1415_v53 = vsel %vm6484_vm5, %v1410_v42, %v1414_v63  ;;  %v4678_v13 = vcombine.low %v6949_v40, %v6955_v62  ;;  %v1427_v7 = vshrl.u32 %v6976_v39, 16  ;;  %v6995_v40 = vld [vmem:[%s6426_s10 + $0xa0] sm:$0xf]  ;;  %v6248_v62 = vld [vmem:[%s6426_s10 + $0xa4] sm:$0x1] }
  0x7e   : > { %v455_v19 = vor.u32 %v454_v27, %v450_v23  ;;  %2646 = vmatmul.mubr.bf16.gmra.mrb[40].mxu1 %v4677_v34  ;;  %v1425_v60 = vsel %vm6484_vm5, %v1420_v44, %v1424_v24  ;;  %v460_v49 = vrot.slane %v458_v30, 5  ;;  %v1430_v55 = vshll.u32 %v6976_v39, 16  ;;  %v7020_v33 = vld [vmem:[%s6426_s10 + $0x6c] sm:$0xf]  ;;  %v7028_v44 = vld [vmem:[%s6426_s10 + $0x70] sm:$0xf] }
  0x7f   : > { %v446_v58 = vrot.slane %v445_v45, 4  ;;  %v4826_v43 = vcombine.low %v1415_v53, %v1425_v60  ;;  %v1429_v56 = vrot.slane %v1427_v7, 4  ;;  %v1436_v0 = vshll.u32 %v6995_v40, 16  ;;  %v6250_v53 = vld [vmem:[%s6426_s10 + $0xb0] sm:$0x1] }
  0x80   : > { %v456_v48 = vrot.slane %v455_v19, 4  ;;  %v1432_v51 = vrot.slane %v1430_v55, 5  ;;  %v1440_v54 = vshrl.u32 %v6995_v40, 16  ;;  %v1446_v57 = vshll.u32 %v6248_v62, 16 }
  0x81   : > { %v451_v34 = vsel %vm6484_vm5, %v446_v58, %v450_v23  ;;  %2219 = vmatprep.mubr.bf16.mxu0 %v4826_v43  ;;  %v1438_v5 = vrot.slane %v1436_v0, 5  ;;  %v463_v16 = vshrl.u32 %v6986_v10, 16  ;;  %v466_v61 = vshll.u32 %v6986_v10, 16  ;;  %v7024_v23 = vld [vmem:[%s6426_s10 + $0xac] sm:$0xf] }
  0x82   : > { %v461_v3 = vsel %vm6484_vm5, %v456_v48, %v460_v49  ;;  %2220 = vmatmul.mubr.bf16.gmra.mrb[44].mxu0 %v4810_v46  ;;  %v1433_v28 = vor.u32 %v1432_v51, %v1429_v56  ;;  %v1442_v47 = vrot.slane %v1440_v54, 4  ;;  %v1448_v6 = vrot.slane %v1446_v57, 5  ;;  %v7039_v48 = vld [vmem:[%s6426_s10 + $0xb4] sm:$0xf] }
  0x83   : > { %v4694_v11 = vcombine.low %v451_v34, %v461_v3  ;;  %v465_v9 = vrot.slane %v463_v16, 4  ;;  %v468_v63 = vrot.slane %v466_v61, 5  ;;  %v472_v4 = vshll.u32 %v6992_v2, 16 }
  0x84   : > { %v476_v12 = vshrl.u32 %v6992_v2, 16  ;;  %v1434_v52 = vrot.slane %v1433_v28, 4  ;;  %v1443_v22 = vor.u32 %v1442_v47, %v1438_v5  ;;  %v482_v14 = vshll.u32 %v259_v59, 16 }
  0x85   : > { %2653 = vmatprep.mubr.bf16.mxu1 %v4694_v11  ;;  %v4811_v15 = vcombine.low %v6976_v39, %v6995_v40  ;;  %v469_v17 = vor.u32 %v468_v63, %v465_v9  ;;  %v474_v20 = vrot.slane %v472_v4, 5  ;;  %v4679_v26 = vcombine.low %v6986_v10, %v6992_v2 }
  0x86   : > { %v478_v24 = vrot.slane %v476_v12, 4  ;;  %2654 = vmatmul.mubr.bf16.gmra.mrb[44].mxu1 %v4678_v13  ;;  %v1439_v31 = vsel %vm6484_vm5, %v1434_v52, %v1438_v5  ;;  %v1444_v36 = vrot.slane %v1443_v22, 4  ;;  %v484_v37 = vrot.slane %v482_v14, 5  ;;  %v260_v13 = vld [vmem:[%s6426_s10 + $0x74] sm:$0x1] }
  0x87   : > { %v1451_v38 = vshrl.u32 %v7008_v8, 16  ;;  %v470_v39 = vrot.slane %v469_v17, 4  ;;  %v1454_v42 = vshll.u32 %v7008_v8, 16  ;;  %v1460_v27 = vshll.u32 %v7024_v23, 16  ;;  %v7054_v12 = vld [vmem:[%s6426_s10 + $0x78] sm:$0xf] }
  0x88   : > { %v479_v35 = vor.u32 %v478_v24, %v474_v20  ;;  %v1449_v45 = vsel %vm6484_vm5, %v1444_v36, %v1448_v6  ;;  %v1464_v46 = vshrl.u32 %v7024_v23, 16  ;;  %v1470_v19 = vshll.u32 %v6250_v53, 16  ;;  %v7060_v14 = vld [vmem:[%s6426_s10 + $0xb8] sm:$0xf]  ;;  %v7064_v17 = vld [vmem:[%s6426_s10 + $0x7c] sm:$0xf] }
  0x89   : > { %v1453_v30 = vrot.slane %v1451_v38, 4  ;;  %v4827_v7 = vcombine.low %v1439_v31, %v1449_v45  ;;  %v475_v10 = vsel %vm6484_vm5, %v470_v39, %v474_v20  ;;  %v1456_v58 = vrot.slane %v1454_v42, 5 }
  0x8a   : > { %v480_v60 = vrot.slane %v479_v35, 4  ;;  %v1462_v49 = vrot.slane %v1460_v27, 5  ;;  %v1466_v55 = vrot.slane %v1464_v46, 4  ;;  %v1472_v2 = vrot.slane %v1470_v19, 5 }
  0x8b   : > { %v487_v43 = vshrl.u32 %v7020_v33, 16  ;;  %2227 = vmatprep.mubr.bf16.mxu0 %v4827_v7  ;;  %v1457_v40 = vor.u32 %v1456_v58, %v1453_v30  ;;  %v490_v0 = vshll.u32 %v7020_v33, 16  ;;  %v496_v59 = vshll.u32 %v7028_v44, 16 }
  0x8c   : > { %v485_v56 = vsel %vm6484_vm5, %v480_v60, %v484_v37  ;;  %2228 = vmatmul.mubr.bf16.gmra.mrb[48].mxu0 %v4811_v15  ;;  %v1467_v51 = vor.u32 %v1466_v55, %v1462_v49  ;;  %v500_v62 = vshrl.u32 %v7028_v44, 16  ;;  %v506_v16 = vshll.u32 %v260_v13, 16  ;;  %v7079_v60 = vld [vmem:[%s6426_s10 + $0xc0] sm:$0xf] }
  0x8d   : > { %v4695_v34 = vcombine.low %v475_v10, %v485_v56  ;;  %v489_v54 = vrot.slane %v487_v43, 4  ;;  %v1458_v57 = vrot.slane %v1457_v40, 4  ;;  %v492_v3 = vrot.slane %v490_v0, 5 }
  0x8e   : > { %v498_v5 = vrot.slane %v496_v59, 5  ;;  %v1468_v61 = vrot.slane %v1467_v51, 4  ;;  %v502_v11 = vrot.slane %v500_v62, 4  ;;  %v4812_v28 = vcombine.low %v7008_v8, %v7024_v23  ;;  %v7071_v23 = vld [vmem:[%s6426_s10 + $0x80] sm:$0x1] }
  0x8f   : > { %2661 = vmatprep.mubr.bf16.mxu1 %v4695_v34  ;;  %v4680_v47 = vcombine.low %v7020_v33, %v7028_v44  ;;  %v1463_v6 = vsel %vm6484_vm5, %v1458_v57, %v1462_v49  ;;  %v493_v9 = vor.u32 %v492_v3, %v489_v54  ;;  %v508_v63 = vrot.slane %v506_v16, 5  ;;  %v6252_v33 = vld [vmem:[%s6426_s10 + $0xbc] sm:$0x1]  ;;  %v7098_v16 = vld [vmem:[%s6426_s10 + $0x84] sm:$0xf] }
  0x90   : > { %2662 = vmatmul.mubr.bf16.gmra.mrb[48].mxu1 %v4679_v26  ;;  %v1475_v4 = vshrl.u32 %v7039_v48, 16  ;;  %v1473_v52 = vsel %vm6484_vm5, %v1468_v61, %v1472_v2  ;;  %v503_v22 = vor.u32 %v502_v11, %v498_v5  ;;  %v1478_v8 = vshll.u32 %v7039_v48, 16 }
  0x91   : > { %v1484_v15 = vshll.u32 %v7060_v14, 16  ;;  %v4828_v20 = vcombine.low %v1463_v6, %v1473_v52  ;;  %v494_v24 = vrot.slane %v493_v9, 4  ;;  %v1488_v31 = vshrl.u32 %v7060_v14, 16  ;;  %v7102_v6 = vld [vmem:[%s6426_s10 + $0x88] sm:$0xf] }
  0x92   : > { %v1477_v26 = vrot.slane %v1475_v4, 4  ;;  %v504_v36 = vrot.slane %v503_v22, 4  ;;  %v1480_v37 = vrot.slane %v1478_v8, 5  ;;  %v1494_v39 = vshll.u32 %v6252_v33, 16 }
  0x93   : > { %v1486_v38 = vrot.slane %v1484_v15, 5  ;;  %2235 = vmatprep.mubr.bf16.mxu0 %v4828_v20  ;;  %v499_v35 = vsel %vm6484_vm5, %v494_v24, %v498_v5  ;;  %v1490_v42 = vrot.slane %v1488_v31, 4  ;;  %v511_v27 = vshrl.u32 %v7054_v12, 16  ;;  %v7110_v24 = vld [vmem:[%s6426_s10 + $0x8c] sm:$0x1] }
  0x94   : > { %v514_v44 = vshll.u32 %v7054_v12, 16  ;;  %v509_v45 = vsel %vm6484_vm5, %v504_v36, %v508_v63  ;;  %2236 = vmatmul.mubr.bf16.gmra.mrb[52].mxu0 %v4812_v28  ;;  %v1481_v30 = vor.u32 %v1480_v37, %v1477_v26  ;;  %v1496_v46 = vrot.slane %v1494_v39, 5  ;;  %v4767_v39 = vld [vmem:[%s6426_s10 + $0xc] sm:$0xe] }
  0x95   : > { %v520_v53 = vshll.u32 %v7064_v17, 16  ;;  %v4696_v19 = vcombine.low %v499_v35, %v509_v45  ;;  %v1491_v13 = vor.u32 %v1490_v42, %v1486_v38  ;;  %v513_v7 = vrot.slane %v511_v27, 4  ;;  %v7118_v45 = vld [vmem:[%s6426_s10 + $0x90] sm:$0xf] }
  0x96   : > { %v516_v10 = vrot.slane %v514_v44, 5  ;;  %v1482_v58 = vrot.slane %v1481_v30, 4  ;;  %v524_v55 = vshrl.u32 %v7064_v17, 16  ;;  %v530_v2 = vshll.u32 %v7071_v23, 16 }
  0x97   : > { %v522_v49 = vrot.slane %v520_v53, 5  ;;  %2669 = vmatprep.mubr.bf16.mxu1 %v4696_v19  ;;  %v1492_v43 = vrot.slane %v1491_v13, 4  ;;  %v4813_v40 = vcombine.low %v7039_v48, %v7060_v14  ;;  %v4681_v0 = vcombine.low %v7054_v12, %v7064_v17  ;;  %v7094_v48 = vld [vmem:[%s6426_s10 + $0xc4] sm:$0xf]  ;;  %v6254_v12 = vld [vmem:[%s6426_s10 + $0xc8] sm:$0x1] }
  0x98   : > { %v517_v56 = vor.u32 %v516_v10, %v513_v7  ;;  %2670 = vmatmul.mubr.bf16.gmra.mrb[52].mxu1 %v4680_v47  ;;  %v1487_v59 = vsel %vm6484_vm5, %v1482_v58, %v1486_v38  ;;  %v526_v34 = vrot.slane %v524_v55, 4  ;;  %v532_v51 = vrot.slane %v530_v2, 5 }
  0x99   : > { %v1499_v54 = vshrl.u32 %v7079_v60, 16  ;;  %v1497_v62 = vsel %vm6484_vm5, %v1492_v43, %v1496_v46  ;;  %v1502_v3 = vshll.u32 %v7079_v60, 16  ;;  %v1508_v5 = vshll.u32 %v7094_v48, 16 }
  0x9a   : > { %v518_v57 = vrot.slane %v517_v56, 4  ;;  %v4829_v61 = vcombine.low %v1487_v59, %v1497_v62  ;;  %v527_v11 = vor.u32 %v526_v34, %v522_v49  ;;  %v1512_v47 = vshrl.u32 %v7094_v48, 16  ;;  %v4768_v62 = vld [vmem:[%s6426_s10 + $0x18] sm:$0xe] }
  0x9b   : > { %v1501_v28 = vrot.slane %v1499_v54, 4  ;;  %v1504_v63 = vrot.slane %v1502_v3, 5  ;;  %v1510_v4 = vrot.slane %v1508_v5, 5  ;;  %v1518_v52 = vshll.u32 %v6254_v12, 16  ;;  %v4769_v5 = vld [vmem:[%s6426_s10 + $0x24] sm:$0xe] }
  0x9c   : > { %v523_v9 = vsel %vm6484_vm5, %v518_v57, %v522_v49  ;;  %2243 = vmatprep.mubr.bf16.mxu0 %v4829_v61  ;;  %v528_v22 = vrot.slane %v527_v11, 4  ;;  %v1514_v8 = vrot.slane %v1512_v47, 4  ;;  %v535_v14 = vshrl.u32 %v7098_v16, 16  ;;  %v7128_v49 = vld [vmem:[%s6426_s10 + $0x94] sm:$0xf] }
  0x9d   : > { %v538_v15 = vshll.u32 %v7098_v16, 16  ;;  %2244 = vmatmul.mubr.bf16.gmra.mrb[56].mxu0 %v4813_v40  ;;  %v1505_v17 = vor.u32 %v1504_v63, %v1501_v28  ;;  %v1520_v20 = vrot.slane %v1518_v52, 5  ;;  %v544_v26 = vshll.u32 %v7102_v6, 16  ;;  %v7134_v40 = vld [vmem:[%s6426_s10 + $0x98] sm:$0x1] }
  0x9e   : > { %v548_v31 = vshrl.u32 %v7102_v6, 16  ;;  %v533_v36 = vsel %vm6484_vm5, %v528_v22, %v532_v51  ;;  %v1515_v37 = vor.u32 %v1514_v8, %v1510_v4  ;;  %v537_v38 = vrot.slane %v535_v14, 4  ;;  %v7154_v14 = vld [vmem:[%s6426_s10 + $0x9c] sm:$0xf] }
  0x9f   : > { %v540_v33 = vrot.slane %v538_v15, 5  ;;  %v4697_v35 = vcombine.low %v523_v9, %v533_v36  ;;  %v1506_v42 = vrot.slane %v1505_v17, 4  ;;  %v546_v27 = vrot.slane %v544_v26, 5  ;;  %v6256_v17 = vld [vmem:[%s6426_s10 + $0x1c] sm:$0xf] }
  0xa0   : > { %v550_v44 = vrot.slane %v548_v31, 4  ;;  %v1516_v30 = vrot.slane %v1515_v37, 4  ;;  %v554_v53 = vshll.u32 %v7110_v24, 16  ;;  %v4814_v19 = vcombine.low %v7079_v60, %v7094_v48  ;;  %v6255_v60 = vld [vmem:[%s6426_s10 + $0x10] sm:$0xf] }
  0xa1   : > { %v541_v46 = vor.u32 %v540_v33, %v537_v38  ;;  %2677 = vmatprep.mubr.bf16.mxu1 %v4697_v35  ;;  %v1511_v13 = vsel %vm6484_vm5, %v1506_v42, %v1510_v4  ;;  %v4682_v10 = vcombine.low %v7098_v16, %v7102_v6  ;;  %v4783_v58 = vrot.slane %v4767_v39, 9  ;;  %v6257_v37 = vld [vmem:[%s6426_s10 + $0x28] sm:$0xf]  ;;  %v6258_v33 = vld [vmem:[%s6426_s10 + $0x2c] sm:$0x1] }
  0xa2   : > { %v551_v7 = vor.u32 %v550_v44, %v546_v27  ;;  %2678 = vmatmul.mubr.bf16.gmra.mrb[56].mxu1 %v4681_v0  ;;  %v1521_v55 = vsel %vm6484_vm5, %v1516_v30, %v1520_v20  ;;  %v556_v43 = vrot.slane %v554_v53, 5  ;;  %v1588_v56 = vrot.slane %v6255_v60, 5 }
  0xa3   : > { %v542_v2 = vrot.slane %v541_v46, 4  ;;  %v4830_v59 = vcombine.low %v1511_v13, %v1521_v55  ;;  %v559_v51 = vshrl.u32 %v7118_v45, 16  ;;  %v562_v54 = vshll.u32 %v7118_v45, 16 }
  0xa4   : > { %v552_v34 = vrot.slane %v551_v7, 4  ;;  %v1589_v57 = vsel %vm6467_vm4, %v4783_v58, %v1588_v56  ;;  %v1590_v3 = vrot.slane %v1588_v56, 4  ;;  %v568_v48 = vshll.u32 %v7128_v49, 16  ;;  %v6199_v7 = vld [vmem:[%s8261_s1 + $0x180] sm:$0xff]  }
  0xa5   : > { %v547_v0 = vsel %vm6484_vm5, %v542_v2, %v546_v27  ;;  %2251 = vmatprep.mubr.bf16.mxu0 %v4830_v59  ;;  %v561_v61 = vrot.slane %v559_v51, 4  ;;  %v564_v11 = vrot.slane %v562_v54, 5  ;;  %v572_v28 = vshrl.u32 %v7128_v49, 16  ;;  %v4770_v2 = vld [vmem:[%s6426_s10 + $0x30] sm:$0xe] }
  0xa6   : > { %v557_v16 = vsel %vm6484_vm5, %v552_v34, %v556_v43  ;;  %2252 = vmatmul.mubr.bf16.gmra.mrb[60].mxu0 %v4814_v19  ;;  %v1592_v9 = vsel %vm6467_vm4, %v1590_v3, %v1591_v32  ;;  %v570_v63 = vrot.slane %v568_v48, 5  ;;  %v578_v4 = vshll.u32 %v7134_v40, 16  ;;  %v7160_v32 = vld [vmem:[%s6426_s10 + $0xa0] sm:$0xf]  ;;  %v7173_v19 = vld [vmem:[%s6426_s10 + $0xa4] sm:$0x1] }
  0xa7   : > { %v4698_v47 = vcombine.low %v547_v0, %v557_v16  ;;  %v4831_v12 = vcombine.low %v1589_v57, %v1592_v9  ;;  %v565_v52 = vor.u32 %v564_v11, %v561_v61  ;;  %v574_v22 = vrot.slane %v572_v28, 4  ;;  %v4771_v59 = vld [vmem:[%s6426_s10 + $0x3c] sm:$0xe]  ;;  %v6259_v48 = vld [vmem:[%s6426_s10 + $0x34] sm:$0xf]  ;;  %v6202_v61 = vld [vmem:[%s8261_s1 + $0x188] sm:$0xff]  }
  0xa8   : > { %v4784_v8 = vrot.slane %v4768_v62, 9  ;;  %v580_v15 = vrot.slane %v578_v4, 5  ;;  %v1595_v20 = vrot.slane %v6256_v17, 5  ;;  %v4683_v25 = vcombine.low %v7118_v45, %v7128_v49  ;;  %v7196_v16 = vld [vmem:[%s6426_s10 + $0xa8] sm:$0xf] }
  0xa9   : > { %2685 = vmatprep.mubr.bf16.mxu1 %v4698_v47  ;;  %v4785_v26 = vrot.slane %v4769_v5, 9  ;;  %5810 = vmatprep.mubr.bf16.mxu0 %v4831_v12  ;;  %v566_v31 = vrot.slane %v565_v52, 4  ;;  %v575_v36 = vor.u32 %v574_v22, %v570_v63  ;;  %v1602_v38 = vrot.slane %v6257_v37, 5  ;;  %v6260_v28 = vld [vmem:[%s6426_s10 + $0x38] sm:$0x1] }
  0xaa   : > { %v1605_v39 = vrot.slane %v6258_v33, 5  ;;  %2686 = vmatmul.mubr.bf16.gmra.mrb[60].mxu1 %v4682_v10  ;;  %v1596_v35 = vsel %vm6467_vm4, %v4784_v8, %v1595_v20  ;;  %v1597_v42 = vrot.slane %v1595_v20, 4  ;;  %v583_v27 = vshrl.u32 %v7154_v14, 16  ;;  %v7205_v4 = vld [vmem:[%s6426_s10 + $0xac] sm:$0xf] }
  0xab   : > { %v586_v44 = vshll.u32 %v7154_v14, 16  ;;  %v571_v45 = vsel %vm6484_vm5, %v566_v31, %v570_v63  ;;  %v576_v30 = vrot.slane %v575_v36, 4  ;;  %v1603_v46 = vsel %vm6467_vm4, %v4785_v26, %v1602_v38  ;;  %v7213_v17 = vld [vmem:[%s6426_s10 + $0xb0] sm:$0x1]  ;;  %v6261_v20 = vld [vmem:[%s6426_s10 + $0x40] sm:$0xf] }
  0xac   : > { %v1604_v53 = vrot.slane %v1602_v38, 4  ;;  %v1599_v13 = vsel %vm6467_vm4, %v1597_v42, %v1598_v29  ;;  %v585_v10 = vrot.slane %v583_v27, 4  ;;  %v592_v55 = vshll.u32 %v7160_v32, 16  ;;  %v6262_v31 = vld [vmem:[%s6426_s10 + $0x44] sm:$0x1]  ;;  %v6205_v27 = vld [vmem:[%s8261_s1 + $0x190] sm:$0xff]  }
  0xad   : > { %v588_v58 = vrot.slane %v586_v44, 5  ;;  %v581_v43 = vsel %vm6484_vm5, %v576_v30, %v580_v15  ;;  %v4832_v60 = vcombine.low %v1596_v35, %v1599_v13  ;;  %v596_v56 = vshrl.u32 %v7160_v32, 16  ;;  %v6204_v15 = vld [vmem:[%s8261_s1 + $0x1d0] sm:$0xff]   ;;  %v4772_v38 = vld [vmem:[%s6426_s10 + $0x48] sm:$0xe] }
  0xae   : > { %v1606_v29 = vsel %vm6467_vm4, %v1604_v53, %v1605_v39  ;;  %v4699_v34 = vcombine.low %v571_v45, %v581_v43  ;;  %v594_v62 = vrot.slane %v592_v55, 5  ;;  %v602_v57 = vshll.u32 %v7173_v19, 16  ;;  %v6206_v53 = vld [vmem:[%s8261_s1 + $0x1d8] sm:$0xff]  }
  0xaf   : > { %v4833_v51 = vcombine.low %v1603_v46, %v1606_v29  ;;  %v589_v54 = vor.u32 %v588_v58, %v585_v10  ;;  %5811 = vmatmul.mubr.bf16.vlgmr.msra.gmra.mrb[64].mxu0 %v4832_v60  ;;  %v598_v0 = vrot.slane %v596_v56, 4  ;;  %v4786_v3 = vrot.slane %v4770_v2, 9  ;;  %v4773_v58 = vld [vmem:[%s6426_s10 + $0x54] sm:$0xe] }
  0xb0   : > { %v1609_v5 = vrot.slane %v6259_v48, 5  ;;  %2693 = vmatprep.mubr.bf16.mxu1 %v4699_v34  ;;  %5659 = vmatpush3.bf16.msra.mxu0 %v6199_v7  ;;  %v1612_v47 = vrot.slane %v6260_v28, 5  ;;  %v4684_v9 = vcombine.low %v7154_v14, %v7160_v32  ;;  %v4787_v63 = vrot.slane %v4771_v59, 9  ;;  %v6263_v59 = vld [vmem:[%s6426_s10 + $0x4c] sm:$0xf] }
  0xb1   : > { %v590_v11 = vrot.slane %v589_v54, 4  ;;  %5660 = vmatprep.subr.bf16.mxu0 %v6201_v18  ;;  %5814 = vmatprep.mubr.bf16.mxu0 %v4833_v51  ;;  %v599_v12 = vor.u32 %v598_v0, %v594_v62  ;;  %v604_v52 = vrot.slane %v602_v57, 5  ;;  %v1616_v26 = vrot.slane %v6261_v20, 5  ;;  %v7242_v51 = vld [vmem:[%s6426_s10 + $0xb4] sm:$0xf]  ;;  %v6207_v54 = vld [vmem:[%s8261_s1 + $0x198] sm:$0xff]  }
  0xb2   : > { %v1610_v22 = vsel %vm6467_vm4, %v4786_v3, %v1609_v5  ;;  %v1611_v8 = vrot.slane %v1609_v5, 4  ;;  %2694 = vmatmul.mubr.bf16.gmra.mrb[64].mxu1 %v4683_v25  ;;  %v1619_v36 = vrot.slane %v6262_v31, 5  ;;  %v607_v37 = vshrl.u32 %v7196_v16, 16  ;;  %v6264_v0 = vld [vmem:[%s6426_s10 + $0x50] sm:$0x1] }
  0xb3   : > { %v595_v14 = vsel %vm6484_vm5, %v590_v11, %v594_v62  ;;  %v600_v33 = vrot.slane %v599_v12, 4  ;;  %v610_v35 = vshll.u32 %v7196_v16, 16  ;;  %v616_v42 = vshll.u32 %v7205_v4, 16  ;;  %v7251_v5 = vld [vmem:[%s6426_s10 + $0xb8] sm:$0xf] }
  0xb4   : > { %v1613_v39 = vsel %vm6467_vm4, %v1611_v8, %v1612_v47  ;;  %5661 = vmatpush3.bf16.msra.mxu0 %v6202_v61  ;;  %v1617_v44 = vsel %vm6467_vm4, %v4787_v63, %v1616_v26  ;;  %v1618_v45 = vrot.slane %v1616_v26, 4  ;;  %v609_v30 = vrot.slane %v607_v37, 4  ;;  %v6209_v63 = vld [vmem:[%s8261_s1 + $0x1e0] sm:$0xff]   ;;  %v6265_v12 = vld [vmem:[%s6426_s10 + $0x58] sm:$0xf] }
  0xb5   : > { %v4834_v25 = vcombine.low %v1610_v22, %v1613_v39  ;;  %v605_v46 = vsel %vm6484_vm5, %v600_v33, %v604_v52  ;;  %5662 = vmatprep.subr.bf16.mxu0 %v6204_v15  ;;  %v612_v13 = vrot.slane %v610_v35, 5  ;;  %v618_v7 = vrot.slane %v616_v42, 5  ;;  %v6266_v52 = vld [vmem:[%s6426_s10 + $0x5c] sm:$0x1] }
  0xb6   : > { %v620_v10 = vshrl.u32 %v7205_v4, 16  ;;  %v4700_v55 = vcombine.low %v595_v14, %v605_v46  ;;  %v1620_v2 = vsel %vm6467_vm4, %v1618_v45, %v1619_v36  ;;  %v626_v43 = vshll.u32 %v7213_v17, 16  ;;  %v7267_v31 = vld [vmem:[%s6426_s10 + $0xbc] sm:$0x1]  ;;  %v4774_v36 = vld [vmem:[%s6426_s10 + $0x60] sm:$0xe] }
  0xb7   : > { %v4788_v60 = vrot.slane %v4772_v38, 9  ;;  %5815 = vmatmul.mubr.bf16.gmra.mrb[68].mxu0 %v4834_v25  ;;  %v4835_v18 = vcombine.low %v1617_v44, %v1620_v2  ;;  %v613_v29 = vor.u32 %v612_v13, %v609_v30  ;;  %v1623_v34 = vrot.slane %v6263_v59, 5  ;;  %v6210_v38 = vld [vmem:[%s8261_s1 + $0x1a0] sm:$0xff]   ;;  %v6212_v25 = vld [vmem:[%s8261_s1 + $0x1e8] sm:$0xff]  }
  0xb8   : > { %v622_v56 = vrot.slane %v620_v10, 4  ;;  %2701 = vmatprep.mubr.bf16.mxu1 %v4700_v55  ;;  %5663 = vmatpush3.bf16.msra.mxu0 %v6205_v27  ;;  %v628_v62 = vrot.slane %v626_v43, 5  ;;  %v1626_v57 = vrot.slane %v6264_v0, 5  ;;  %v4685_v3 = vcombine.low %v7196_v16, %v7205_v4  ;;  %v654_v30 = vld [vmem:[%s6426_s10] sm:$0xe] }
  0xb9   : > { %v4789_v48 = vrot.slane %v4773_v58, 9  ;;  %5664 = vmatprep.subr.bf16.mxu0 %v6206_v53  ;;  %5818 = vmatprep.mubr.bf16.mxu0 %v4835_v18  ;;  %v614_v61 = vrot.slane %v613_v29, 4  ;;  %v1624_v28 = vsel %vm6467_vm4, %v4788_v60, %v1623_v34  ;;  %v1625_v47 = vrot.slane %v1623_v34, 4  ;;  %v6267_v2 = vld [vmem:[%s6426_s10 + $0x64] sm:$0xf]  ;;  %v6213_v18 = vld [vmem:[%s8261_s1 + $0x1a8] sm:$0xff]  }
  0xba   : > { %v623_v11 = vor.u32 %v622_v56, %v618_v7  ;;  %2702 = vmatmul.mubr.bf16.gmra.mrb[68].mxu1 %v4684_v9  ;;  %v1630_v16 = vrot.slane %v6265_v12, 5  ;;  %v1633_v22 = vrot.slane %v6266_v52, 5  ;;  %v631_v8 = vshrl.u32 %v7242_v51, 16  ;;  %v7288_v60 = vld [vmem:[%s6426_s10 + $0x18] sm:$0xf] }
  0xbb   : > { %v634_v15 = vshll.u32 %v7242_v51, 16  ;;  %v619_v14 = vsel %vm6484_vm5, %v614_v61, %v618_v7  ;;  %v1627_v26 = vsel %vm6467_vm4, %v1625_v47, %v1626_v57  ;;  %v640_v9 = vshll.u32 %v7251_v5, 16  ;;  %v6268_v56 = vld [vmem:[%s6426_s10 + $0x68] sm:$0x1] }
  0xbc   : > { %v624_v20 = vrot.slane %v623_v11, 4  ;;  %5665 = vmatpush3.bf16.msra.mxu0 %v6207_v54  ;;  %v4836_v37 = vcombine.low %v1624_v28, %v1627_v26  ;;  %v1631_v33 = vsel %vm6467_vm4, %v4789_v48, %v1630_v16  ;;  %v1632_v39 = vrot.slane %v1630_v16, 4  ;;  %v6215_v11 = vld [vmem:[%s8261_s1 + $0x1f0] sm:$0xff]   ;;  %v6269_v28 = vld [vmem:[%s6426_s10 + $0x4] sm:$0xf] }
  0xbd   : > { %v633_v35 = vrot.slane %v631_v8, 4  ;;  %5666 = vmatprep.subr.bf16.mxu0 %v6209_v63  ;;  %v636_v27 = vrot.slane %v634_v15, 5  ;;  %v642_v44 = vrot.slane %v640_v9, 5  ;;  %v644_v45 = vshrl.u32 %v7251_v5, 16  ;;  %v6270_v47 = vld [vmem:[%s6426_s10 + $0x8] sm:$0x1] }
  0xbe   : > { %v629_v42 = vsel %vm6484_vm5, %v624_v20, %v628_v62  ;;  %v1634_v53 = vsel %vm6467_vm4, %v1632_v39, %v1633_v22  ;;  %v650_v13 = vshll.u32 %v7267_v31, 16  ;;  %v4790_v7 = vrot.slane %v4774_v36, 9  ;;  %v7297_v62 = vld [vmem:[%s6426_s10 + $0x1c] sm:$0xf]  ;;  %v7313_v15 = vld [vmem:[%s6426_s10 + $0x20] sm:$0x1] }
  0xbf   : > { %v4701_v46 = vcombine.low %v619_v14, %v629_v42  ;;  %5819 = vmatmul.mubr.bf16.gmra.mrb[72].mxu0 %v4836_v37  ;;  %v4837_v10 = vcombine.low %v1631_v33, %v1634_v53  ;;  %v637_v58 = vor.u32 %v636_v27, %v633_v35  ;;  %v646_v55 = vrot.slane %v644_v45, 4  ;;  %v655_v14 = vld [vmem:[%s6426_s10 + $0xc] sm:$0xe]  ;;  %v6216_v26 = vld [vmem:[%s8261_s1 + $0x1b0] sm:$0xff]   ;;  %v6217_v33 = vld [vmem:[%s8261_s1 + $0x1f8] sm:$0xff]  }
  0xc0   : > { %v1637_v43 = vrot.slane %v6267_v2, 5  ;;  %5667 = vmatpush3.bf16.msra.mxu0 %v6210_v38  ;;  %v652_v29 = vrot.slane %v650_v13, 5  ;;  %v1640_v59 = vrot.slane %v6268_v56, 5  ;;  %v4686_v34 = vcombine.low %v7242_v51, %v7251_v5 }
  0xc1   : > { %2709 = vmatprep.mubr.bf16.mxu1 %v4701_v46  ;;  %v4655_v54 = vrot.slane %v654_v30, 9  ;;  %5668 = vmatprep.subr.bf16.mxu0 %v6212_v25  ;;  %v638_v0 = vrot.slane %v637_v58, 4  ;;  %v647_v57 = vor.u32 %v646_v55, %v642_v44  ;;  %v723_v51 = vrot.slane %v6269_v28, 5  ;;  %v656_v25 = vld [vmem:[%s6426_s10 + $0x18] sm:$0xe] }
  0xc2   : > { %5822 = vmatprep.mubr.bf16.mxu0 %v4837_v10  ;;  %v1638_v48 = vsel %vm6467_vm4, %v4790_v7, %v1637_v43  ;;  %v1639_v61 = vrot.slane %v1637_v43, 4  ;;  %2710 = vmatmul.mubr.bf16.gmra.mrb[72].mxu1 %v4685_v3  ;;  %v726_v63 = vrot.slane %v6270_v47, 5  ;;  %v2937_v12 = vshrl.u32 %v7288_v60, 16  ;;  %v6271_v7 = vld [vmem:[%s6426_s10 + $0x10] sm:$0xf]  ;;  %v6218_v55 = vld [vmem:[%s8261_s1 + $0x1b8] sm:$0xff]  }
  0xc3   : > { %v2940_v16 = vshll.u32 %v7288_v60, 16  ;;  %v643_v52 = vsel %vm6484_vm5, %v638_v0, %v642_v44  ;;  %v648_v22 = vrot.slane %v647_v57, 4  ;;  %v2946_v3 = vshll.u32 %v7297_v62, 16  ;;  %v7334_v58 = vld [vmem:[%s6426_s10 + $0x24] sm:$0xf] }
  0xc4   : > { %v1641_v8 = vsel %vm6467_vm4, %v1639_v61, %v1640_v59  ;;  %5669 = vmatpush3.bf16.msra.mxu0 %v6213_v18  ;;  %v724_v9 = vsel %vm6467_vm4, %v4655_v54, %v723_v51  ;;  %v725_v36 = vrot.slane %v723_v51, 4  ;;  %v2939_v37 = vrot.slane %v2937_v12, 4  ;;  %v7358_v12 = vld [vmem:[%s6426_s10 + $0x2c] sm:$0x1] }
  0xc5   : > { %v4838_v20 = vcombine.low %v1638_v48, %v1641_v8  ;;  %v653_v38 = vsel %vm6484_vm5, %v648_v22, %v652_v29  ;;  %5670 = vmatprep.subr.bf16.mxu0 %v6215_v11  ;;  %v2942_v39 = vrot.slane %v2940_v16, 5  ;;  %v2948_v35 = vrot.slane %v2946_v3, 5  ;;  %v6272_v29 = vld [vmem:[%s6426_s10 + $0x1c] sm:$0xf]  ;;  %v7345_v48 = vld [vmem:[%s6426_s10 + $0x28] sm:$0xf] }
  0xc6   : > { %v2950_v42 = vshrl.u32 %v7297_v62, 16  ;;  %v4702_v27 = vcombine.low %v643_v52, %v653_v38  ;;  %v727_v44 = vsel %vm6467_vm4, %v725_v36, %v726_v63  ;;  %v2956_v45 = vshll.u32 %v7313_v15, 16 }
  0xc7   : > { %v4656_v30 = vrot.slane %v655_v14, 9  ;;  %5823 = vmatmul.mubr.bf16.gmra.mrb[76].mxu0 %v4838_v20  ;;  %v4703_v46 = vcombine.low %v724_v9, %v727_v44  ;;  %v2943_v53 = vor.u32 %v2942_v39, %v2939_v37  ;;  %v730_v10 = vrot.slane %v6271_v7, 5  ;;  %v657_v14 = vld [vmem:[%s6426_s10 + $0x24] sm:$0xe]  ;;  %v658_v9 = vld [vmem:[%s6426_s10 + $0x30] sm:$0xe] }
  0xc8   : > { %v2952_v13 = vrot.slane %v2950_v42, 4  ;;  %2717 = vmatprep.mubr.bf16.mxu1 %v4702_v27  ;;  %5671 = vmatpush3.bf16.msra.mxu0 %v6216_v26  ;;  %v2958_v2 = vrot.slane %v2956_v45, 5  ;;  %v5023_v43 = vcombine.low %v7288_v60, %v7297_v62  ;;  %v4657_v18 = vrot.slane %v656_v25, 9  ;;  %v6273_v60 = vld [vmem:[%s6426_s10 + $0x20] sm:$0x1] }
  0xc9   : > { %v737_v56 = vrot.slane %v6272_v29, 5  ;;  %5672 = vmatprep.subr.bf16.mxu0 %v6217_v33  ;;  %v2944_v59 = vrot.slane %v2943_v53, 4  ;;  %v731_v0 = vsel %vm6467_vm4, %v4656_v30, %v730_v10  ;;  %v732_v57 = vrot.slane %v730_v10, 4  ;;  %v6274_v25 = vld [vmem:[%s6426_s10 + $0x28] sm:$0xf] }
  0xca   : > { %v2953_v54 = vor.u32 %v2952_v13, %v2948_v35  ;;  %2718 = vmatmul.mubr.bf16.gmra.mrb[76].mxu1 %v4686_v34  ;;  %v740_v28 = vrot.slane %v6273_v60, 5  ;;  %v2961_v51 = vshrl.u32 %v7334_v58, 16  ;;  %v2964_v16 = vshll.u32 %v7334_v58, 16  ;;  %v7373_v44 = vld [vmem:[%s6426_s10 + $0x30] sm:$0xf]  ;;  %v6222_v13 = vld [vmem:[%s8261_s1 + $0x208] sm:$0xff]  }
  0xcb   : > { %v738_v61 = vsel %vm6467_vm4, %v4657_v18, %v737_v56  ;;  %v739_v11 = vrot.slane %v737_v56, 4  ;;  %5858 = vmatprep.mubr.bf16.mxu1 %v4703_v46  ;;  %v2949_v47 = vsel %vm6484_vm5, %v2944_v59, %v2948_v35  ;;  %v734_v34 = vsel %vm6467_vm4, %v732_v57, %v733_v1  ;;  %v6275_v30 = vld [vmem:[%s6426_s10 + $0x2c] sm:$0x1]  ;;  %v7382_v10 = vld [vmem:[%s6426_s10 + $0x34] sm:$0xf] }
  0xcc   : > { %v2954_v63 = vrot.slane %v2953_v54, 4  ;;  %5673 = vmatpush3.bf16.msra.mxu0 %v6218_v55  ;;  %v4704_v52 = vcombine.low %v731_v0, %v734_v34  ;;  %v2963_v8 = vrot.slane %v2961_v51, 4  ;;  %v2970_v3 = vshll.u32 %v7345_v48, 16  ;;  %v6276_v56 = vld [vmem:[%s6426_s10 + $0x34] sm:$0xf] }
  0xcd   : > { %v741_v22 = vsel %vm6467_vm4, %v739_v11, %v740_v28  ;;  %v2966_v1 = vrot.slane %v2964_v16, 5  ;;  %v2974_v26 = vshrl.u32 %v7345_v48, 16  ;;  %v2980_v38 = vshll.u32 %v7358_v12, 16  ;;  %v7398_v28 = vld [vmem:[%s6426_s10 + $0x38] sm:$0x1] }
  0xce   : > { %v2959_v21 = vsel %vm6484_vm5, %v2954_v63, %v2958_v2  ;;  %v4705_v20 = vcombine.low %v738_v61, %v741_v22  ;;  %v2972_v37 = vrot.slane %v2970_v3, 5  ;;  %v3396_v33 = vrot.slane %v7358_v12, 5  ;;  %v6224_v22 = vld [vmem:[%s8261_s1 + $0x210] sm:$0xff]  }
  0xcf   : > { %v5039_v36 = vcombine.low %v2949_v47, %v2959_v21  ;;  %v2967_v39 = vor.u32 %v2966_v1, %v2963_v8  ;;  %v2976_v35 = vrot.slane %v2974_v26, 4  ;;  %v4658_v42 = vrot.slane %v657_v14, 9  ;;  %v659_v47 = vld [vmem:[%s6426_s10 + $0x3c] sm:$0xe] }
  0xd0   : > { %v744_v27 = vrot.slane %v6274_v25, 5  ;;  %v2982_v45 = vrot.slane %v2980_v38, 5  ;;  %v747_v46 = vrot.slane %v6275_v30, 5  ;;  %v5024_v53 = vcombine.low %v7334_v58, %v7345_v48  ;;  %v6277_v58 = vld [vmem:[%s6426_s10 + $0x38] sm:$0x1] }
  0xd1   : > { %3929 = vmatprep.mubr.bf16.mxu0 %v5039_v36  ;;  %v4659_v7 = vrot.slane %v658_v9, 9  ;;  %v2968_v55 = vrot.slane %v2967_v39, 4  ;;  %v2977_v2 = vor.u32 %v2976_v35, %v2972_v37  ;;  %v751_v59 = vrot.slane %v6276_v56, 5  ;;  %v6279_v35 = vld [vmem:[%s6426_s10 + $0x40] sm:$0xf] }
  0xd2   : > { %3930 = vmatmul.mubr.bf16.vlgmr.msra.gmra.mrb[80].mxu0 %v5023_v43  ;;  %v745_v18 = vsel %vm6467_vm4, %v4658_v42, %v744_v27  ;;  %v746_v29 = vrot.slane %v744_v27, 4  ;;  %5859 = vmatmul.mubr.bf16.vlgmr.msra.gmra.mrb[80].mxu1 %v4704_v52  ;;  %v754_v54 = vrot.slane %v6277_v58, 5  ;;  %v2985_v0 = vshrl.u32 %v7373_v44, 16  ;;  %v6278_v43 = vld [vmem:[%s8261_s1 + $0x200] sm:$0xff]   ;;  %v7416_v25 = vld [vmem:[%s6426_s10 + $0x3c] sm:$0xf] }
  0xd3   : > { %v2988_v57 = vshll.u32 %v7373_v44, 16  ;;  %5891 = vmatpush3.bf16.msra.mxu1 %v6278_v43  ;;  %5862 = vmatprep.mubr.bf16.mxu1 %v4705_v20  ;;  %v2973_v61 = vsel %vm6484_vm5, %v2968_v55, %v2972_v37  ;;  %v2978_v11 = vrot.slane %v2977_v2, 4  ;;  %v2994_v51 = vshll.u32 %v7382_v10, 16  ;;  %v660_v20 = vld [vmem:[%s6426_s10 + $0x48] sm:$0xe] }
  0xd4   : > { %v748_v60 = vsel %vm6467_vm4, %v746_v29, %v747_v46  ;;  %5892 = vmatprep.subr.bf16.mxu1 %v6222_v13  ;;  %v752_v34 = vsel %vm6467_vm4, %v4659_v7, %v751_v59  ;;  %v753_v16 = vrot.slane %v751_v59, 4  ;;  %v2987_v52 = vrot.slane %v2985_v0, 4  ;;  %v7422_v55 = vld [vmem:[%s6426_s10 + $0x40] sm:$0xf]  ;;  %v6281_v59 = vld [vmem:[%s6426_s10 + $0x4c] sm:$0xf] }
  0xd5   : > { %v4706_v63 = vcombine.low %v745_v18, %v748_v60  ;;  %v2983_v8 = vsel %vm6484_vm5, %v2978_v11, %v2982_v45  ;;  %v2990_v3 = vrot.slane %v2988_v57, 5  ;;  %v2996_v14 = vrot.slane %v2994_v51, 5  ;;  %v6280_v45 = vld [vmem:[%s6426_s10 + $0x44] sm:$0x1]  ;;  %v6282_v58 = vld [vmem:[%s6426_s10 + $0x50] sm:$0x1] }
  0xd6   : > { %v2998_v21 = vshrl.u32 %v7382_v10, 16  ;;  %v5040_v1 = vcombine.low %v2973_v61, %v2983_v8  ;;  %v755_v26 = vsel %vm6467_vm4, %v753_v16, %v754_v54  ;;  %v3004_v9 = vshll.u32 %v7398_v28, 16  ;;  %v7438_v11 = vld [vmem:[%s6426_s10 + $0x44] sm:$0x1]  ;;  %v661_v51 = vld [vmem:[%s6426_s10 + $0x54] sm:$0xe] }
  0xd7   : > { %v4660_v36 = vrot.slane %v659_v47, 9  ;;  %5893 = vmatpush3.bf16.msra.mxu1 %v6222_v13  ;;  %v4707_v37 = vcombine.low %v752_v34, %v755_v26  ;;  %v2991_v38 = vor.u32 %v2990_v3, %v2987_v52  ;;  %v758_v42 = vrot.slane %v6279_v35, 5  ;;  %v6226_v13 = vld [vmem:[%s8261_s1 + $0x218] sm:$0xff]   ;;  %v6228_v52 = vld [vmem:[%s8261_s1 + $0x220] sm:$0xff]  }
  0xd8   : > { %v3000_v39 = vrot.slane %v2998_v21, 4  ;;  %3937 = vmatprep.mubr.bf16.mxu0 %v5040_v1  ;;  %v3006_v27 = vrot.slane %v3004_v9, 5  ;;  %v761_v30 = vrot.slane %v6280_v45, 5  ;;  %v5025_v46 = vcombine.low %v7373_v44, %v7382_v10  ;;  %5894 = vmatprep.subr.bf16.mxu1 %v6224_v22  ;;  %v662_v21 = vld [vmem:[%s6426_s10 + $0x60] sm:$0xe] }
  0xd9   : > { %v4661_v7 = vrot.slane %v660_v20, 9  ;;  %v2992_v2 = vrot.slane %v2991_v38, 4  ;;  %v759_v29 = vsel %vm6467_vm4, %v4660_v36, %v758_v42  ;;  %v760_v56 = vrot.slane %v758_v42, 4  ;;  %v7456_v42 = vld [vmem:[%s6426_s10 + $0x48] sm:$0xf] }
  0xda   : > { %3938 = vmatmul.mubr.bf16.gmra.mrb[84].mxu0 %v5024_v53  ;;  %v3001_v18 = vor.u32 %v3000_v39, %v2996_v14  ;;  %5863 = vmatmul.mubr.bf16.gmra.mrb[84].mxu1 %v4706_v63  ;;  %v765_v44 = vrot.slane %v6281_v59, 5  ;;  %v768_v54 = vrot.slane %v6282_v58, 5  ;;  %v3009_v0 = vshrl.u32 %v7416_v25, 16  ;;  %v6283_v39 = vld [vmem:[%s6426_s10 + $0x58] sm:$0xf] }
  0xdb   : > { %v3012_v57 = vshll.u32 %v7416_v25, 16  ;;  %5866 = vmatprep.mubr.bf16.mxu1 %v4707_v37  ;;  %v2997_v53 = vsel %vm6484_vm5, %v2992_v2, %v2996_v14  ;;  %v762_v61 = vsel %vm6467_vm4, %v760_v56, %v761_v30  ;;  %5895 = vmatpush3.bf16.msra.mxu1 %v6224_v22  ;;  %v3018_v60 = vshll.u32 %v7422_v55, 16  ;;  %v6284_v45 = vld [vmem:[%s6426_s10 + $0x5c] sm:$0x1]  ;;  %v6285_v58 = vld [vmem:[%s6426_s10 + $0x64] sm:$0xf] }
  0xdc   : > { %v3002_v43 = vrot.slane %v3001_v18, 4  ;;  %v4708_v47 = vcombine.low %v759_v29, %v762_v61  ;;  %v766_v63 = vsel %vm6467_vm4, %v4661_v7, %v765_v44  ;;  %v767_v34 = vrot.slane %v765_v44, 4  ;;  %5896 = vmatprep.subr.bf16.mxu1 %v6226_v13  ;;  %v7462_v18 = vld [vmem:[%s6426_s10 + $0x4c] sm:$0xf] }
  0xdd   : > { %v3011_v16 = vrot.slane %v3009_v0, 4  ;;  %v3014_v8 = vrot.slane %v3012_v57, 5  ;;  %v3020_v3 = vrot.slane %v3018_v60, 5  ;;  %v3022_v14 = vshrl.u32 %v7422_v55, 16  ;;  %v6230_v29 = vld [vmem:[%s8261_s1 + $0x228] sm:$0xff]  }
  0xde   : > { %v3007_v22 = vsel %vm6484_vm5, %v3002_v43, %v3006_v27  ;;  %v769_v1 = vsel %vm6467_vm4, %v767_v34, %v768_v54  ;;  %v3028_v26 = vshll.u32 %v7438_v11, 16  ;;  %v4662_v9 = vrot.slane %v661_v51, 9  ;;  %v6286_v54 = vld [vmem:[%s6426_s10 + $0x68] sm:$0x1]  ;;  %v7478_v60 = vld [vmem:[%s6426_s10 + $0x50] sm:$0x1] }
  0xdf   : > { %v5041_v20 = vcombine.low %v2997_v53, %v3007_v22  ;;  %v4709_v36 = vcombine.low %v766_v63, %v769_v1  ;;  %v3015_v37 = vor.u32 %v3014_v8, %v3011_v16  ;;  %v3024_v38 = vrot.slane %v3022_v14, 4  ;;  %5897 = vmatpush3.bf16.msra.mxu1 %v6226_v13  ;;  %v6232_v8 = vld [vmem:[%s8261_s1 + $0x230] sm:$0xff]  }
  0xe0   : > { %v772_v35 = vrot.slane %v6283_v39, 5  ;;  %v3030_v27 = vrot.slane %v3028_v26, 5  ;;  %v775_v30 = vrot.slane %v6284_v45, 5  ;;  %v5026_v7 = vcombine.low %v7416_v25, %v7422_v55  ;;  %5898 = vmatprep.subr.bf16.mxu1 %v6228_v52 }
  0xe1   : > { %3945 = vmatprep.mubr.bf16.mxu0 %v5041_v20  ;;  %v4663_v2 = vrot.slane %v662_v21, 9  ;;  %v3016_v13 = vrot.slane %v3015_v37, 4  ;;  %v3025_v56 = vor.u32 %v3024_v38, %v3020_v3  ;;  %v779_v25 = vrot.slane %v6285_v58, 5  ;;  %v664_v20 = vld [vmem:[%s6426_s10 + $0x78] sm:$0xe] }
  0xe2   : > { %3946 = vmatmul.mubr.bf16.gmra.mrb[88].mxu0 %v5025_v46  ;;  %v773_v59 = vsel %vm6467_vm4, %v4662_v9, %v772_v35  ;;  %v774_v44 = vrot.slane %v772_v35, 4  ;;  %5867 = vmatmul.mubr.bf16.gmra.mrb[88].mxu1 %v4708_v47  ;;  %v782_v0 = vrot.slane %v6286_v54, 5  ;;  %v3033_v57 = vshrl.u32 %v7456_v42, 16  ;;  %v663_v47 = vld [vmem:[%s6426_s10 + $0x6c] sm:$0xe]  ;;  %v6234_v58 = vld [vmem:[%s8261_s1 + $0x238] sm:$0xff]  }
  0xe3   : > { %v3036_v53 = vshll.u32 %v7456_v42, 16  ;;  %5870 = vmatprep.mubr.bf16.mxu1 %v4709_v36  ;;  %v3021_v46 = vsel %vm6484_vm5, %v3016_v13, %v3020_v3  ;;  %v3026_v43 = vrot.slane %v3025_v56, 4  ;;  %v3042_v51 = vshll.u32 %v7462_v18, 16  ;;  %5899 = vmatpush3.bf16.msra.mxu1 %v6228_v52  ;;  %v6287_v35 = vld [vmem:[%s6426_s10 + $0x70] sm:$0xf] }
  0xe4   : > { %v776_v61 = vsel %vm6467_vm4, %v774_v44, %v775_v30  ;;  %v780_v34 = vsel %vm6467_vm4, %v4663_v2, %v779_v25  ;;  %v781_v16 = vrot.slane %v779_v25, 4  ;;  %v3035_v22 = vrot.slane %v3033_v57, 4  ;;  %5900 = vmatprep.subr.bf16.mxu1 %v6230_v29  ;;  %v6288_v2 = vld [vmem:[%s6426_s10 + $0x74] sm:$0x1]  ;;  %v7502_v44 = vld [vmem:[%s6426_s10 + $0x58] sm:$0xf] }
  0xe5   : > { %v4710_v63 = vcombine.low %v773_v59, %v776_v61  ;;  %v3031_v3 = vsel %vm6484_vm5, %v3026_v43, %v3030_v27  ;;  %v3038_v14 = vrot.slane %v3036_v53, 5  ;;  %v3044_v21 = vrot.slane %v3042_v51, 5  ;;  %v7496_v27 = vld [vmem:[%s6426_s10 + $0x54] sm:$0xf]  ;;  %v6289_v57 = vld [vmem:[%s6426_s10 + $0x7c] sm:$0xf] }
  0xe6   : > { %v3046_v52 = vshrl.u32 %v7462_v18, 16  ;;  %v5042_v1 = vcombine.low %v3021_v46, %v3031_v3  ;;  %v783_v26 = vsel %vm6467_vm4, %v781_v16, %v782_v0  ;;  %v3052_v9 = vshll.u32 %v7478_v60, 16 }
  0xe7   : > { %v4664_v36 = vrot.slane %v663_v47, 9  ;;  %v4711_v37 = vcombine.low %v780_v34, %v783_v26  ;;  %v3039_v38 = vor.u32 %v3038_v14, %v3035_v22  ;;  %v786_v45 = vrot.slane %v6287_v35, 5  ;;  %5901 = vmatpush3.bf16.msra.mxu1 %v6230_v29  ;;  %v7518_v47 = vld [vmem:[%s6426_s10 + $0x5c] sm:$0x1]  ;;  %v665_v34 = vld [vmem:[%s6426_s10 + $0x84] sm:$0xe] }
  0xe8   : > { %v3048_v39 = vrot.slane %v3046_v52, 4  ;;  %3953 = vmatprep.mubr.bf16.mxu0 %v5042_v1  ;;  %v3054_v30 = vrot.slane %v3052_v9, 5  ;;  %v789_v13 = vrot.slane %v6288_v2, 5  ;;  %v5027_v56 = vcombine.low %v7456_v42, %v7462_v18  ;;  %5902 = vmatprep.subr.bf16.mxu1 %v6232_v8  ;;  %v666_v1 = vld [vmem:[%s6426_s10 + $0x90] sm:$0xe] }
  0xe9   : > { %v4665_v59 = vrot.slane %v664_v20, 9  ;;  %v3040_v25 = vrot.slane %v3039_v38, 4  ;;  %v787_v54 = vsel %vm6467_vm4, %v4664_v36, %v786_v45  ;;  %v788_v0 = vrot.slane %v786_v45, 4  ;;  %v7533_v45 = vld [vmem:[%s6426_s10 + $0x60] sm:$0xf] }
  0xea   : > { %3954 = vmatmul.mubr.bf16.gmra.mrb[92].mxu0 %v5026_v7  ;;  %v3049_v29 = vor.u32 %v3048_v39, %v3044_v21  ;;  %5871 = vmatmul.mubr.bf16.gmra.mrb[92].mxu1 %v4710_v63  ;;  %v793_v42 = vrot.slane %v6289_v57, 5  ;;  %v796_v53 = vrot.slane %v7071_v23, 5  ;;  %v3057_v46 = vshrl.u32 %v7496_v27, 16 }
  0xeb   : > { %v3060_v43 = vshll.u32 %v7496_v27, 16  ;;  %5874 = vmatprep.mubr.bf16.mxu1 %v4711_v37  ;;  %v3045_v7 = vsel %vm6484_vm5, %v3040_v25, %v3044_v21  ;;  %v790_v51 = vsel %vm6467_vm4, %v788_v0, %v789_v13  ;;  %v3066_v63 = vshll.u32 %v7502_v44, 16  ;;  %5903 = vmatpush3.bf16.msra.mxu1 %v6232_v8  ;;  %v7539_v25 = vld [vmem:[%s6426_s10 + $0x64] sm:$0xf] }
  0xec   : > { %v3050_v61 = vrot.slane %v3049_v29, 4  ;;  %v4712_v23 = vcombine.low %v787_v54, %v790_v51  ;;  %v794_v16 = vsel %vm6467_vm4, %v4665_v59, %v793_v42  ;;  %v795_v22 = vrot.slane %v793_v42, 4  ;;  %5904 = vmatprep.subr.bf16.mxu1 %v6234_v58 }
  0xed   : > { %v3059_v3 = vrot.slane %v3057_v46, 4  ;;  %v3062_v21 = vrot.slane %v3060_v43, 5  ;;  %v3068_v52 = vrot.slane %v3066_v63, 5  ;;  %v3070_v20 = vshrl.u32 %v7502_v44, 16  ;;  %v667_v63 = vld [vmem:[%s6426_s10 + $0x9c] sm:$0xe] }
  0xee   : > { %v3055_v14 = vsel %vm6484_vm5, %v3050_v61, %v3054_v30  ;;  %v797_v8 = vsel %vm6467_vm4, %v795_v22, %v796_v53  ;;  %v3076_v9 = vshll.u32 %v7518_v47, 16  ;;  %v4666_v36 = vrot.slane %v665_v34, 9 }
  0xef   : > { %v5043_v26 = vcombine.low %v3045_v7, %v3055_v14  ;;  %v4713_v37 = vcombine.low %v794_v16, %v797_v8  ;;  %v3063_v38 = vor.u32 %v3062_v21, %v3059_v3  ;;  %v3072_v39 = vrot.slane %v3070_v20, 4  ;;  %5905 = vmatpush3.bf16.msra.mxu1 %v6234_v58  ;;  %v7544_v58 = vld [vmem:[%s6426_s10 + $0x68] sm:$0x1] }
  0xf0   : > { %v800_v35 = vrot.slane %v7102_v6, 5  ;;  %v3078_v30 = vrot.slane %v3076_v9, 5  ;;  %v803_v2 = vrot.slane %v7110_v24, 5  ;;  %v5028_v13 = vcombine.low %v7496_v27, %v7502_v44 }
  0xf1   : > { %3961 = vmatprep.mubr.bf16.mxu0 %v5043_v26  ;;  %v4667_v59 = vrot.slane %v666_v1, 9  ;;  %v3064_v54 = vrot.slane %v3063_v38, 4  ;;  %v3073_v0 = vor.u32 %v3072_v39, %v3068_v52  ;;  %v807_v24 = vrot.slane %v7128_v49, 5  ;;  %v668_v38 = vld [vmem:[%s6426_s10 + $0xa8] sm:$0xe] }
  0xf2   : > { %3962 = vmatmul.mubr.bf16.gmra.mrb[96].mxu0 %v5027_v56  ;;  %v801_v6 = vsel %vm6467_vm4, %v4666_v36, %v800_v35  ;;  %v802_v57 = vrot.slane %v800_v35, 4  ;;  %5875 = vmatmul.mubr.bf16.gmra.mrb[0].mxu1 %v4712_v23  ;;  %v810_v27 = vrot.slane %v7134_v40, 5  ;;  %v3081_v53 = vshrl.u32 %v7533_v45, 16 }
  0xf3   : > { %v3084_v46 = vshll.u32 %v7533_v45, 16  ;;  %5878 = vmatprep.mubr.bf16.mxu1 %v4713_v37  ;;  %v3069_v43 = vsel %vm6484_vm5, %v3064_v54, %v3068_v52  ;;  %v3074_v7 = vrot.slane %v3073_v0, 4  ;;  %v3090_v51 = vshll.u32 %v7539_v25, 16 }
  0xf4   : > { %v804_v61 = vsel %vm6467_vm4, %v802_v57, %v803_v2  ;;  %v808_v40 = vsel %vm6467_vm4, %v4667_v59, %v807_v24  ;;  %v809_v23 = vrot.slane %v807_v24, 4  ;;  %v3083_v16 = vrot.slane %v3081_v53, 4  ;;  %v7572_v59 = vld [vmem:[%s6426_s10 + $0x6c] sm:$0xf] }
  0xf5   : > { %v4714_v49 = vcombine.low %v801_v6, %v804_v61  ;;  %v3079_v22 = vsel %vm6484_vm5, %v3074_v7, %v3078_v30  ;;  %v3086_v3 = vrot.slane %v3084_v46, 5  ;;  %v3092_v14 = vrot.slane %v3090_v51, 5  ;;  %v7588_v46 = vld [vmem:[%s6426_s10 + $0x74] sm:$0x1]  ;;  %v669_v51 = vld [vmem:[%s6426_s10 + $0xb4] sm:$0xe] }
  0xf6   : > { %v3094_v21 = vshrl.u32 %v7539_v25, 16  ;;  %v5044_v52 = vcombine.low %v3069_v43, %v3079_v22  ;;  %v811_v20 = vsel %vm6467_vm4, %v809_v23, %v810_v27  ;;  %v3100_v1 = vshll.u32 %v7544_v58, 16 }
  0xf7   : > { %v4668_v26 = vrot.slane %v667_v63, 9  ;;  %v4715_v8 = vcombine.low %v808_v40, %v811_v20  ;;  %v3087_v9 = vor.u32 %v3086_v3, %v3083_v16  ;;  %v814_v37 = vrot.slane %v7160_v32, 5 }
  0xf8   : > { %v3096_v36 = vrot.slane %v3094_v21, 4  ;;  %3969 = vmatprep.mubr.bf16.mxu0 %v5044_v52  ;;  %v3102_v39 = vrot.slane %v3100_v1, 5  ;;  %v817_v35 = vrot.slane %v7173_v19, 5  ;;  %v5029_v30 = vcombine.low %v7533_v45, %v7539_v25 }
  0xf9   : > { %v3088_v54 = vrot.slane %v3087_v9, 4  ;;  %v815_v32 = vsel %vm6467_vm4, %v4668_v26, %v814_v37  ;;  %v816_v6 = vrot.slane %v814_v37, 4  ;;  %v4669_v24 = vrot.slane %v668_v38, 9 }
  0xfa   : > { %v5402_v29 = vpop.f32.mrb[0].mxu0  ;;  %3970 = vmatmul.mubr.bf16.gmra.mrb[100].mxu0 %v5028_v13  ;;  %v3097_v0 = vor.u32 %v3096_v36, %v3092_v14  ;;  %5879 = vmatmul.mubr.bf16.gmra.mrb[4].mxu1 %v4714_v49  ;;  %v821_v19 = vrot.slane %v7205_v4, 5  ;;  %v824_v45 = vrot.slane %v7213_v17, 5  ;;  %v3108_v61 = vshll.u32 %v7572_v59, 16 }
  0xfb   : > { %v5403_v42 = vpop.f32.mrb[1].mxu0  ;;  %5882 = vmatprep.mubr.bf16.mxu1 %v4715_v8  ;;  %v3093_v13 = vsel %vm6484_vm5, %v3088_v54, %v3092_v14  ;;  %v818_v53 = vsel %vm6467_vm4, %v816_v6, %v817_v35  ;;  %v3124_v21 = vshll.u32 %v7588_v46, 16  ;;  %v4670_v26 = vrot.slane %v669_v51, 9  ;;  %v7603_v8 = vld [vmem:[%s6426_s10 + $0x78] sm:$0xf] }
  0xfc   : > { %v5405_v56 = vpop.f32.mrb[2].mxu0  ;;  %v7569_v2 = vadd.f32 %v5403_v42, %v5402_v29  ;;  %v7581_v29 = vld [vmem:[%s6426_s10 + $0x70] sm:$0xf]  ;;  %v3098_v27 = vrot.slane %v3097_v0, 4  ;;  %v4716_v7 = vcombine.low %v815_v32, %v818_v53  ;;  %v822_v4 = vsel %vm6467_vm4, %v4669_v24, %v821_v19  ;;  %v7617_v6 = vld [vmem:[%s6426_s10 + $0x80] sm:$0x1] }
  0xfd   : > { %v5406_v34 = vpop.f32.mrb[3].mxu0  ;;  %v823_v17 = vrot.slane %v821_v19, 4  ;;  %v3114_v40 = vshll.u32 %v7581_v29, 16  ;;  %v3118_v23 = vshrl.u32 %v7581_v29, 16  ;;  %v3110_v14 = vrot.slane %v3108_v61, 5 }
  0xfe   : > { %v7576_v57 = vadd.f32 %v5406_v34, %v5405_v56  ;;  %v3105_v56 = vshrl.u32 %v7572_v59, 16  ;;  %v3103_v34 = vsel %vm6484_vm5, %v3098_v27, %v3102_v39  ;;  %v3126_v36 = vrot.slane %v3124_v21, 5  ;;  %v7608_v39 = vld [vmem:[%s6426_s10 + $0x7c] sm:$0xf] }
  0xff   : > { %v5045_v22 = vcombine.low %v3093_v13, %v3103_v34  ;;  %v825_v3 = vsel %vm6467_vm4, %v823_v17, %v824_v45  ;;  %v3116_v20 = vrot.slane %v3114_v40, 5  ;;  %v3120_v1 = vrot.slane %v3118_v23, 4  ;;  %v4991_v13 = vld [vmem:[%s6426_s10 + $0x18] sm:$0xe] }
 0x100   : > { %v3107_v49 = vrot.slane %v3105_v56, 4  ;;  %v4717_v52 = vcombine.low %v822_v4, %v825_v3  ;;  %v828_v37 = vrot.slane %v7251_v5, 5  ;;  %v831_v38 = vrot.slane %v7267_v31, 5 }
 0x101   : > { %3977 = vmatprep.mubr.bf16.mxu0 %v5045_v22  ;;  %v3121_v35 = vor.u32 %v3120_v1, %v3116_v20  ;;  %v5030_v54 = vcombine.low %v7572_v59, %v7581_v29  ;;  %v3129_v19 = vshrl.u32 %v7603_v8, 16  ;;  %v3132_v45 = vshll.u32 %v7603_v8, 16  ;;  %v7639_v1 = vld [vmem:[%s6426_s10 + $0x84] sm:$0xf] }
 0x102   : > { %v5408_v42 = vpop.f32.mrb[4].mxu0  ;;  %v3111_v9 = vor.u32 %v3110_v14, %v3107_v49  ;;  %3978 = vmatmul.mubr.bf16.gmra.mrb[104].mxu0 %v5029_v30  ;;  %5883 = vmatmul.mubr.bf16.gmra.mrb[8].mxu1 %v4716_v7  ;;  %v829_v5 = vsel %vm6467_vm4, %v4670_v26, %v828_v37  ;;  %v830_v31 = vrot.slane %v828_v37, 4  ;;  %v3138_v59 = vshll.u32 %v7608_v39, 16 }
 0x103   : > { %v5409_v43 = vpop.f32.mrb[5].mxu0  ;;  %5886 = vmatprep.mubr.bf16.mxu1 %v4717_v52  ;;  %v3122_v30 = vrot.slane %v3121_v35, 4  ;;  %v3131_v56 = vrot.slane %v3129_v19, 4  ;;  %v3134_v61 = vrot.slane %v3132_v45, 5  ;;  %v3386_v14 = vrot.slane %v7297_v62, 5 }
 0x104   : > { %v5411_v63 = vpop.f32.mrb[6].mxu0  ;;  %v7612_v0 = vadd.f32 %v5409_v43, %v5408_v42  ;;  %v3112_v24 = vrot.slane %v3111_v9, 4  ;;  %v3142_v42 = vshrl.u32 %v7608_v39, 16  ;;  %v832_v53 = vsel %vm6467_vm4, %v830_v31, %v831_v38  ;;  %v7645_v38 = vld [vmem:[%s6426_s10 + $0x88] sm:$0xf] }
 0x105   : > { %v5412_v16 = vpop.f32.mrb[7].mxu0  ;;  %v3148_v43 = vshll.u32 %v7617_v6, 16  ;;  %v3127_v4 = vsel %vm6484_vm5, %v3122_v30, %v3126_v36  ;;  %v4718_v17 = vcombine.low %v829_v5, %v832_v53  ;;  %v3140_v51 = vrot.slane %v3138_v59, 5  ;;  %v7659_v30 = vld [vmem:[%s6426_s10 + $0x8c] sm:$0x1] }
 0x106   : > { %v7614_v32 = vadd.f32 %v5412_v16, %v5411_v63  ;;  %v3117_v27 = vsel %vm6484_vm5, %v3112_v24, %v3116_v20  ;;  %v4992_v63 = vld [vmem:[%s6426_s10 + $0x24] sm:$0xe]  ;;  %v3144_v40 = vrot.slane %v3142_v42, 4  ;;  %v5007_v16 = vrot.slane %v4991_v13, 9  ;;  %v4993_v42 = vld [vmem:[%s6426_s10 + $0x30] sm:$0xe] }
 0x107   : > { %v5046_v49 = vcombine.low %v3117_v27, %v3127_v4  ;;  %v3150_v23 = vrot.slane %v3148_v43, 5  ;;  %v3135_v3 = vor.u32 %v3134_v61, %v3131_v56  ;;  %v3389_v21 = vrot.slane %v7313_v15, 5  ;;  %v4994_v43 = vld [vmem:[%s6426_s10 + $0x3c] sm:$0xe] }
 0x108   : > { %v5031_v52 = vcombine.low %v7603_v8, %v7608_v39  ;;  %v3145_v26 = vor.u32 %v3144_v40, %v3140_v51  ;;  %v5008_v9 = vrot.slane %v4992_v63, 9  ;;  %v3393_v36 = vrot.slane %v7345_v48, 5 }
 0x109   : > { %3985 = vmatprep.mubr.bf16.mxu0 %v5046_v49  ;;  %v3136_v62 = vrot.slane %v3135_v3, 4  ;;  %v3387_v15 = vsel %vm6467_vm4, %v5007_v16, %v3386_v14  ;;  %v3388_v8 = vrot.slane %v3386_v14, 4  ;;  %v3153_v31 = vshrl.u32 %v7639_v1, 16  ;;  %v7678_v3 = vld [vmem:[%s6426_s10 + $0x90] sm:$0xf] }
 0x10a   : > { %3986 = vmatmul.mubr.bf16.gmra.mrb[108].mxu0 %v5030_v54  ;;  %5887 = vmatmul.mubr.bf16.gmra.mrb[12].mxu1 %v4718_v17  ;;  %v3146_v24 = vrot.slane %v3145_v26, 4  ;;  %v3394_v5 = vsel %vm6467_vm4, %v5008_v9, %v3393_v36  ;;  %v3395_v48 = vrot.slane %v3393_v36, 4  ;;  %v3156_v45 = vshll.u32 %v7639_v1, 16 }
 0x10b   : > { %v5414_v7 = vpop.f32.mrb[8].mxu0  ;;  %v3141_v19 = vsel %vm6484_vm5, %v3136_v62, %v3140_v51  ;;  %v3390_v54 = vsel %vm6467_vm4, %v3388_v8, %v3389_v21  ;;  %v3162_v59 = vshll.u32 %v7645_v38, 16  ;;  %v3155_v56 = vrot.slane %v3153_v31, 4 }
 0x10c   : > { %v5415_v34 = vpop.f32.mrb[9].mxu0  ;;  %v3151_v13 = vsel %vm6484_vm5, %v3146_v24, %v3150_v23  ;;  %v5055_v27 = vcombine.low %v3387_v15, %v3390_v54  ;;  %v3397_v53 = vsel %vm6467_vm4, %v3395_v48, %v3396_v33  ;;  %v3158_v17 = vrot.slane %v3156_v45, 5  ;;  %v7687_v15 = vld [vmem:[%s6426_s10 + $0x94] sm:$0xf]  ;;  %v7694_v48 = vld [vmem:[%s6426_s10 + $0x98] sm:$0x1] }
 0x10d   : > { %v5417_v22 = vpop.f32.mrb[10].mxu0  ;;  %v7642_v37 = vadd.f32 %v5415_v34, %v5414_v7  ;;  %v5047_v7 = vcombine.low %v3141_v19, %v3151_v13  ;;  %v5056_v4 = vcombine.low %v3394_v5, %v3397_v53  ;;  %v3164_v61 = vrot.slane %v3162_v59, 5 }
 0x10e   : > { %v5418_v20 = vpop.f32.mrb[11].mxu0  ;;  %5906 = vmatprep.mubr.bf16.mxu1 %v5055_v27  ;;  %v3166_v51 = vshrl.u32 %v7645_v38, 16  ;;  %v3172_v63 = vshll.u32 %v7659_v30, 16  ;;  %v5009_v34 = vrot.slane %v4993_v42, 9  ;;  %v3400_v49 = vrot.slane %v7382_v10, 5 }
 0x10f   : > { %v7649_v35 = vadd.f32 %v5418_v20, %v5417_v22  ;;  %3993 = vmatprep.mubr.bf16.mxu0 %v5047_v7  ;;  %v3159_v12 = vor.u32 %v3158_v17, %v3155_v56  ;;  %v3403_v33 = vrot.slane %v7398_v28, 5  ;;  %v5032_v23 = vcombine.low %v7639_v1, %v7645_v38  ;;  %v4996_v7 = vld [vmem:[%s6426_s10 + $0x54] sm:$0xe] }
 0x110   : > { %v5010_v16 = vrot.slane %v4994_v43, 9  ;;  %v3168_v14 = vrot.slane %v3166_v51, 4  ;;  %v3174_v21 = vrot.slane %v3172_v63, 5  ;;  %v3401_v20 = vsel %vm6467_vm4, %v5009_v34, %v3400_v49 }
 0x111   : > { %v3402_v10 = vrot.slane %v3400_v49, 4  ;;  %v3160_v9 = vrot.slane %v3159_v12, 4  ;;  %v3407_v28 = vrot.slane %v7422_v55, 5  ;;  %v3410_v36 = vrot.slane %v7438_v11, 5  ;;  %v4995_v55 = vld [vmem:[%s6426_s10 + $0x48] sm:$0xe] }
 0x112   : > { %3994 = vmatmul.mubr.bf16.gmra.mrb[112].mxu0 %v5031_v52  ;;  %5907 = vmatmul.mubr.bf16.vlgmr.msra.gmra.mrb[80].mxu1 %v5056_v4  ;;  %v3169_v8 = vor.u32 %v3168_v14, %v3164_v61  ;;  %v3177_v52 = vshrl.u32 %v7678_v3, 16  ;;  %v3180_v42 = vshll.u32 %v7678_v3, 16  ;;  %v3186_v13 = vshll.u32 %v7687_v15, 16  ;;  %v7713_v12 = vld [vmem:[%s6426_s10 + $0x9c] sm:$0xf] }
 0x113   : > { %v5420_v40 = vpop.f32.mrb[12].mxu0  ;;  %v3404_v24 = vsel %vm6467_vm4, %v3402_v10, %v3403_v33  ;;  %v3165_v11 = vsel %vm6484_vm5, %v3160_v9, %v3164_v61  ;;  %v3408_v19 = vsel %vm6467_vm4, %v5010_v16, %v3407_v28  ;;  %v3409_v54 = vrot.slane %v3407_v28, 4 }
 0x114   : > { %v5421_v22 = vpop.f32.mrb[13].mxu0  ;;  %v5057_v31 = vcombine.low %v3401_v20, %v3404_v24  ;;  %v3170_v45 = vrot.slane %v3169_v8, 4  ;;  %v3179_v59 = vrot.slane %v3177_v52, 4  ;;  %v3190_v53 = vshrl.u32 %v7687_v15, 16 }
 0x115   : > { %v5423_v26 = vpop.f32.mrb[14].mxu0  ;;  %v7684_v1 = vadd.f32 %v5421_v22, %v5420_v40  ;;  %v3411_v27 = vsel %vm6467_vm4, %v3409_v54, %v3410_v36  ;;  %v3196_v56 = vshll.u32 %v7694_v48, 16  ;;  %v5011_v43 = vrot.slane %v4995_v55, 9  ;;  %v7737_v54 = vld [vmem:[%s6426_s10 + $0xa4] sm:$0x1] }
 0x116   : > { %v5424_v62 = vpop.f32.mrb[15].mxu0  ;;  %5910 = vmatprep.mubr.bf16.mxu1 %v5057_v31  ;;  %v3175_v4 = vsel %vm6484_vm5, %v3170_v45, %v3174_v21  ;;  %v5058_v17 = vcombine.low %v3408_v19, %v3411_v27  ;;  %v3182_v61 = vrot.slane %v3180_v42, 5  ;;  %v3188_v51 = vrot.slane %v3186_v13, 5 }
 0x117   : > { %v7691_v5 = vadd.f32 %v5424_v62, %v5423_v26  ;;  %v5048_v63 = vcombine.low %v3165_v11, %v3175_v4  ;;  %v3192_v34 = vrot.slane %v3190_v53, 4  ;;  %v3198_v49 = vrot.slane %v3196_v56, 5  ;;  %v7725_v62 = vld [vmem:[%s6426_s10 + $0xa0] sm:$0xf] }
 0x118   : > { %v3414_v40 = vrot.slane %v7462_v18, 5  ;;  %v3183_v33 = vor.u32 %v3182_v61, %v3179_v59  ;;  %v3417_v16 = vrot.slane %v7478_v60, 5  ;;  %v5033_v22 = vcombine.low %v7678_v3, %v7687_v15  ;;  %v4997_v59 = vld [vmem:[%s6426_s10 + $0x60] sm:$0xe] }
 0x119   : > { %v5012_v14 = vrot.slane %v4996_v7, 9  ;;  %4001 = vmatprep.mubr.bf16.mxu0 %v5048_v63  ;;  %v3193_v21 = vor.u32 %v3192_v34, %v3188_v51  ;;  %v3421_v9 = vrot.slane %v7502_v44, 5  ;;  %v3424_v60 = vrot.slane %v7518_v47, 5 }
 0x11a   : > { %v3415_v10 = vsel %vm6467_vm4, %v5011_v43, %v3414_v40  ;;  %v3416_v26 = vrot.slane %v3414_v40, 4  ;;  %4002 = vmatmul.mubr.bf16.gmra.mrb[116].mxu0 %v5032_v23  ;;  %5911 = vmatmul.mubr.bf16.gmra.mrb[84].mxu1 %v5058_v17  ;;  %v3184_v28 = vrot.slane %v3183_v33, 4  ;;  %v3201_v8 = vshrl.u32 %v7713_v12, 16 }
 0x11b   : > { %v5426_v20 = vpop.f32.mrb[16].mxu0  ;;  %v3194_v24 = vrot.slane %v3193_v21, 4  ;;  %v3422_v44 = vsel %vm6467_vm4, %v5012_v14, %v3421_v9  ;;  %v3423_v23 = vrot.slane %v3421_v9, 4  ;;  %v3204_v53 = vshll.u32 %v7713_v12, 16 }
 0x11c   : > { %v5427_v18 = vpop.f32.mrb[17].mxu0  ;;  %v3418_v52 = vsel %vm6467_vm4, %v3416_v26, %v3417_v16  ;;  %v3189_v47 = vsel %vm6484_vm5, %v3184_v28, %v3188_v51  ;;  %v3203_v45 = vrot.slane %v3201_v8, 4  ;;  %v3210_v56 = vshll.u32 %v7725_v62, 16  ;;  %v4998_v51 = vld [vmem:[%s6426_s10 + $0x6c] sm:$0xe] }
 0x11d   : > { %v7722_v36 = vadd.f32 %v5427_v18, %v5426_v20  ;;  %v5429_v3 = vpop.f32.mrb[18].mxu0  ;;  %v5059_v11 = vcombine.low %v3415_v10, %v3418_v52  ;;  %v5538_v31 = vpop.f32.mrb[16].mxu1  ;;  %v3199_v42 = vsel %vm6484_vm5, %v3194_v24, %v3198_v49  ;;  %v3425_v13 = vsel %vm6467_vm4, %v3423_v23, %v3424_v60  ;;  %v7756_v26 = vld [vmem:[%s6426_s10 + $0xa8] sm:$0xf] }
 0x11e   : > { %v5430_v55 = vpop.f32.mrb[19].mxu0  ;;  %v5539_v27 = vpop.f32.mrb[17].mxu1  ;;  %v5049_v43 = vcombine.low %v3189_v47, %v3199_v42  ;;  %v5060_v7 = vcombine.low %v3422_v44, %v3425_v13  ;;  %v3214_v61 = vshrl.u32 %v7725_v62, 16  ;;  %v3206_v63 = vrot.slane %v3204_v53, 5  ;;  %v7767_v47 = vld [vmem:[%s6426_s10 + $0xac] sm:$0xf] }
 0x11f   : > { %v7734_v19 = vadd.f32 %v5430_v55, %v5429_v3  ;;  %5914 = vmatprep.mubr.bf16.mxu1 %v5059_v11  ;;  %v7746_v4 = vadd.f32 %v5539_v27, %v5538_v31  ;;  %v5541_v17 = vpop.f32.mrb[18].mxu1  ;;  %v3212_v34 = vrot.slane %v3210_v56, 5  ;;  %v3220_v49 = vshll.u32 %v7737_v54, 16  ;;  %v4999_v53 = vld [vmem:[%s6426_s10 + $0x78] sm:$0xe] }
 0x120   : > { %v5013_v40 = vrot.slane %v4997_v59, 9  ;;  %v5542_v33 = vpop.f32.mrb[19].mxu1  ;;  %4009 = vmatprep.mubr.bf16.mxu0 %v5049_v43  ;;  %v3216_v16 = vrot.slane %v3214_v61, 4  ;;  %v3428_v14 = vrot.slane %v7539_v25, 5  ;;  %v3431_v20 = vrot.slane %v7544_v58, 5 }
 0x121   : > { %v7753_v21 = vadd.f32 %v5542_v33, %v5541_v17  ;;  %v3207_v9 = vor.u32 %v3206_v63, %v3203_v45  ;;  %v3222_v18 = vrot.slane %v3220_v49, 5  ;;  %v5034_v28 = vcombine.low %v7713_v12, %v7725_v62  ;;  %v7775_v59 = vld [vmem:[%s6426_s10 + $0xb0] sm:$0x1]  ;;  %v5000_v33 = vld [vmem:[%s6426_s10 + $0x84] sm:$0xe] }
 0x122   : > { %v5014_v60 = vrot.slane %v4998_v51, 9  ;;  %4010 = vmatmul.mubr.bf16.gmra.mrb[120].mxu0 %v5033_v22  ;;  %5915 = vmatmul.mubr.bf16.gmra.mrb[88].mxu1 %v5060_v7  ;;  %v3217_v8 = vor.u32 %v3216_v16, %v3212_v34  ;;  %v3429_v25 = vsel %vm6467_vm4, %v5013_v40, %v3428_v14  ;;  %v3430_v58 = vrot.slane %v3428_v14, 4 }
 0x123   : > { %v5432_v10 = vpop.f32.mrb[20].mxu0  ;;  %v3435_v24 = vrot.slane %v7581_v29, 5  ;;  %v3208_v44 = vrot.slane %v3207_v9, 4  ;;  %v3438_v23 = vrot.slane %v7588_v46, 5  ;;  %v3225_v22 = vshrl.u32 %v7756_v26, 16 }
 0x124   : > { %v5433_v3 = vpop.f32.mrb[21].mxu0  ;;  %v3218_v11 = vrot.slane %v3217_v8, 4  ;;  %v3432_v31 = vsel %vm6467_vm4, %v3430_v58, %v3431_v20  ;;  %v3228_v17 = vshll.u32 %v7756_v26, 16  ;;  %v3234_v61 = vshll.u32 %v7767_v47, 16 }
 0x125   : > { %v5435_v52 = vpop.f32.mrb[22].mxu0  ;;  %v7764_v55 = vadd.f32 %v5433_v3, %v5432_v10  ;;  %v3436_v45 = vsel %vm6467_vm4, %v5014_v60, %v3435_v24  ;;  %v3437_v29 = vrot.slane %v3435_v24, 4  ;;  %v3213_v46 = vsel %vm6484_vm5, %v3208_v44, %v3212_v34 }
 0x126   : > { %v5436_v12 = vpop.f32.mrb[23].mxu0  ;;  %v5061_v42 = vcombine.low %v3429_v25, %v3432_v31  ;;  %v3227_v27 = vrot.slane %v3225_v22, 4  ;;  %v3223_v56 = vsel %vm6484_vm5, %v3218_v11, %v3222_v18  ;;  %v3238_v49 = vshrl.u32 %v7767_v47, 16  ;;  %v7794_v18 = vld [vmem:[%s6426_s10 + $0xb4] sm:$0xf] }
 0x127   : > { %v7779_v13 = vadd.f32 %v5436_v12, %v5435_v52  ;;  %v3439_v43 = vsel %vm6467_vm4, %v3437_v29, %v3438_v23  ;;  %v5544_v7 = vpop.f32.mrb[20].mxu1  ;;  %v5050_v51 = vcombine.low %v3213_v46, %v3223_v56  ;;  %v3244_v40 = vshll.u32 %v7775_v59, 16 }
 0x128   : > { %5918 = vmatprep.mubr.bf16.mxu1 %v5061_v42  ;;  %v5062_v63 = vcombine.low %v3436_v45, %v3439_v43  ;;  %v5545_v34 = vpop.f32.mrb[21].mxu1  ;;  %v3230_v20 = vrot.slane %v3228_v17, 5  ;;  %v3236_v10 = vrot.slane %v3234_v61, 5  ;;  %v5015_v9 = vrot.slane %v4999_v53, 9  ;;  %v7809_v42 = vld [vmem:[%s6426_s10 + $0xb8] sm:$0xf] }
 0x129   : > { %v7791_v16 = vadd.f32 %v5545_v34, %v5544_v7  ;;  %v5547_v14 = vpop.f32.mrb[22].mxu1  ;;  %4017 = vmatprep.mubr.bf16.mxu0 %v5050_v51  ;;  %v3240_v60 = vrot.slane %v3238_v49, 4  ;;  %v3246_v3 = vrot.slane %v3244_v40, 5  ;;  %v3442_v8 = vrot.slane %v7608_v39, 5  ;;  %v7821_v51 = vld [vmem:[%s6426_s10 + $0xbc] sm:$0x1] }
 0x12a   : > { %v3445_v25 = vrot.slane %v7617_v6, 5  ;;  %v5548_v58 = vpop.f32.mrb[23].mxu1  ;;  %4018 = vmatmul.mubr.bf16.gmra.mrb[124].mxu0 %v5034_v28  ;;  %5919 = vmatmul.mubr.bf16.gmra.mrb[92].mxu1 %v5062_v63  ;;  %v3231_v24 = vor.u32 %v3230_v20, %v3227_v27  ;;  %v5035_v44 = vcombine.low %v7756_v26, %v7767_v47  ;;  %v5016_v23 = vrot.slane %v5000_v33, 9  ;;  %v5001_v34 = vld [vmem:[%s6426_s10 + $0x90] sm:$0xe] }
 0x12b   : > { %v7798_v52 = vadd.f32 %v5548_v58, %v5547_v14  ;;  %v5438_v12 = vpop.f32.mrb[24].mxu0  ;;  %v3241_v22 = vor.u32 %v3240_v60, %v3236_v10  ;;  %v3443_v11 = vsel %vm6467_vm4, %v5015_v9, %v3442_v8  ;;  %v3444_v31 = vrot.slane %v3442_v8, 4  ;;  %v5002_v58 = vld [vmem:[%s6426_s10 + $0x9c] sm:$0xe] }
 0x12c   : > { %v3449_v39 = vrot.slane %v7645_v38, 5  ;;  %v5439_v6 = vpop.f32.mrb[25].mxu0  ;;  %v3232_v28 = vrot.slane %v3231_v24, 4  ;;  %v3452_v45 = vrot.slane %v7659_v30, 5  ;;  %v3249_v26 = vshrl.u32 %v7794_v18, 16 }
 0x12d   : > { %v7806_v29 = vadd.f32 %v5439_v6, %v5438_v12  ;;  %v5441_v46 = vpop.f32.mrb[26].mxu0  ;;  %v3242_v27 = vrot.slane %v3241_v22, 4  ;;  %v3446_v53 = vsel %vm6467_vm4, %v3444_v31, %v3445_v25  ;;  %v3252_v14 = vshll.u32 %v7794_v18, 16 }
 0x12e   : > { %v3450_v38 = vsel %vm6467_vm4, %v5016_v23, %v3449_v39  ;;  %v3451_v56 = vrot.slane %v3449_v39, 4  ;;  %v5442_v43 = vpop.f32.mrb[27].mxu0  ;;  %v3237_v30 = vsel %vm6484_vm5, %v3232_v28, %v3236_v10  ;;  %v5063_v7 = vcombine.low %v3443_v11, %v3446_v53  ;;  %v7840_v28 = vld [vmem:[%s6426_s10 + $0xc0] sm:$0xf] }
 0x12f   : > { %v5550_v17 = vpop.f32.mrb[24].mxu1  ;;  %v7818_v61 = vadd.f32 %v5442_v43, %v5441_v46  ;;  %v3251_v63 = vrot.slane %v3249_v26, 4  ;;  %v3247_v49 = vsel %vm6484_vm5, %v3242_v27, %v3246_v3  ;;  %v3258_v20 = vshll.u32 %v7809_v42, 16 }
 0x130   : > { %v3453_v40 = vsel %vm6467_vm4, %v3451_v56, %v3452_v45  ;;  %v5551_v33 = vpop.f32.mrb[25].mxu1  ;;  %v5051_v10 = vcombine.low %v3237_v30, %v3247_v49  ;;  %5922 = vmatprep.mubr.bf16.mxu1 %v5063_v7  ;;  %v3262_v25 = vshrl.u32 %v7809_v42, 16  ;;  %v3254_v24 = vrot.slane %v3252_v14, 5  ;;  %v7859_v14 = vld [vmem:[%s6426_s10 + $0xc8] sm:$0x1] }
 0x131   : > { %v5064_v9 = vcombine.low %v3450_v38, %v3453_v40  ;;  %v7830_v60 = vadd.f32 %v5551_v33, %v5550_v17  ;;  %v5553_v8 = vpop.f32.mrb[26].mxu1  ;;  %v3260_v3 = vrot.slane %v3258_v20, 5  ;;  %v3268_v23 = vshll.u32 %v7821_v51, 16 }
 0x132   : > { %v5017_v12 = vrot.slane %v5001_v34, 9  ;;  %v5554_v22 = vpop.f32.mrb[27].mxu1  ;;  %4025 = vmatprep.mubr.bf16.mxu0 %v5051_v10  ;;  %v3264_v11 = vrot.slane %v3262_v25, 4  ;;  %v3456_v31 = vrot.slane %v7687_v15, 5  ;;  %v3459_v39 = vrot.slane %v7694_v48, 5 }
 0x133   : > { %5923 = vmatmul.mubr.bf16.gmra.mrb[0].mxu1 %v5064_v9  ;;  %v7837_v6 = vadd.f32 %v5554_v22, %v5553_v8  ;;  %4026 = vmatmul.mubr.bf16.gmra.mrb[128].mxu0 %v5035_v44  ;;  %v3255_v45 = vor.u32 %v3254_v24, %v3251_v63  ;;  %v3270_v46 = vrot.slane %v3268_v23, 5  ;;  %v5036_v26 = vcombine.low %v7794_v18, %v7809_v42  ;;  %v5444_v53 = vpop.f32.mrb[28].mxu0  ;;  %v7851_v63 = vld [vmem:[%s6426_s10 + $0xc4] sm:$0xf]  ;;  %v5003_v8 = vld [vmem:[%s6426_s10 + $0xa8] sm:$0xe] }
 0x134   : > { %v5018_v27 = vrot.slane %v5002_v58, 9  ;;  %v3265_v38 = vor.u32 %v3264_v11, %v3260_v3  ;;  %v3457_v15 = vsel %vm6467_vm4, %v5017_v12, %v3456_v31  ;;  %v3458_v56 = vrot.slane %v3456_v31, 4  ;;  %v5445_v43 = vpop.f32.mrb[29].mxu0 }
 0x135   : > { %v3463_v48 = vrot.slane %v7725_v62, 5  ;;  %v3256_v30 = vrot.slane %v3255_v45, 4  ;;  %v3466_v44 = vrot.slane %v7737_v54, 5  ;;  %v7848_v7 = vadd.f32 %v5445_v43, %v5444_v53  ;;  %v5447_v17 = vpop.f32.mrb[30].mxu0  ;;  %v5004_v45 = vld [vmem:[%s6426_s10 + $0xb4] sm:$0xe] }
 0x136   : > { %v3273_v18 = vshrl.u32 %v7840_v28, 16  ;;  %v3266_v34 = vrot.slane %v3265_v38, 4  ;;  %v3460_v49 = vsel %vm6467_vm4, %v3458_v56, %v3459_v39  ;;  %v5448_v33 = vpop.f32.mrb[31].mxu0  ;;  %v3276_v23 = vshll.u32 %v7840_v28, 16  ;;  %v7878_v56 = vld [vmem:[%s6426_s10 + $0xcc] sm:$0xf] }
 0x137   : > { %v3464_v40 = vsel %vm6467_vm4, %v5018_v27, %v3463_v48  ;;  %v3465_v62 = vrot.slane %v3463_v48, 4  ;;  %v3261_v54 = vsel %vm6484_vm5, %v3256_v30, %v3260_v3  ;;  %v5065_v20 = vcombine.low %v3457_v15, %v3460_v49 }
 0x138   : > { %v7863_v10 = vadd.f32 %v5448_v33, %v5447_v17  ;;  %v3275_v9 = vrot.slane %v3273_v18, 4  ;;  %v3271_v25 = vsel %vm6484_vm5, %v3266_v34, %v3270_v46  ;;  %v5556_v24 = vpop.f32.mrb[28].mxu1  ;;  %v3282_v12 = vshll.u32 %v7851_v63, 16 }
 0x139   : > { %v3467_v58 = vsel %vm6467_vm4, %v3465_v62, %v3466_v44  ;;  %v5052_v22 = vcombine.low %v3261_v54, %v3271_v25  ;;  %5926 = vmatprep.mubr.bf16.mxu1 %v5065_v20  ;;  %v5557_v11 = vpop.f32.mrb[29].mxu1  ;;  %v3286_v31 = vshrl.u32 %v7851_v63, 16  ;;  %v3292_v39 = vshll.u32 %v7859_v14, 16 }
 0x13a   : > { %v5066_v3 = vcombine.low %v3464_v40, %v3467_v58  ;;  %v7875_v27 = vadd.f32 %v5557_v11, %v5556_v24  ;;  %v5559_v46 = vpop.f32.mrb[30].mxu1  ;;  %v3278_v53 = vrot.slane %v3276_v23, 5  ;;  %v3284_v38 = vrot.slane %v3282_v12, 5  ;;  %v7893_v24 = vld [vmem:[%s6426_s10 + $0xd0] sm:$0xf] }
 0x13b   : > { %v5019_v15 = vrot.slane %v5003_v8, 9  ;;  %4033 = vmatprep.mubr.bf16.mxu0 %v5052_v22  ;;  %v3288_v48 = vrot.slane %v3286_v31, 4  ;;  %v3294_v43 = vrot.slane %v3292_v39, 5  ;;  %v3470_v30 = vrot.slane %v7767_v47, 5  ;;  %v5560_v17 = vpop.f32.mrb[31].mxu1  ;;  %v5450_v18 = vpop.f32.mrb[32].mxu0 }
 0x13c   : > { %5927 = vmatmul.mubr.bf16.gmra.mrb[4].mxu1 %v5066_v3  ;;  %v3473_v44 = vrot.slane %v7775_v59, 5  ;;  %4034 = vmatmul.mubr.bf16.gmra.mrb[132].mxu0 %v5036_v26  ;;  %v3279_v34 = vor.u32 %v3278_v53, %v3275_v9  ;;  %v7882_v49 = vadd.f32 %v5560_v17, %v5559_v46  ;;  %v5037_v40 = vcombine.low %v7840_v28, %v7851_v63  ;;  %v5451_v33 = vpop.f32.mrb[33].mxu0  ;;  %v4990_v39 = vld [vmem:[%s6426_s10 + $0xd4] sm:$0x1]  ;;  %v5005_v46 = vld [vmem:[%s6426_s10 + $0xc0] sm:$0xe] }
 0x13d   : > { %v5020_v62 = vrot.slane %v5004_v45, 9  ;;  %v3289_v54 = vor.u32 %v3288_v48, %v3284_v38  ;;  %v3471_v20 = vsel %vm6467_vm4, %v5019_v15, %v3470_v30  ;;  %v3472_v8 = vrot.slane %v3470_v30, 4  ;;  %v5453_v59 = vpop.f32.mrb[34].mxu0 }
 0x13e   : > { %v3477_v47 = vrot.slane %v7809_v42, 5  ;;  %v3280_v25 = vrot.slane %v3279_v34, 4  ;;  %v3480_v26 = vrot.slane %v7821_v51, 5  ;;  %v7890_v9 = vadd.f32 %v5451_v33, %v5450_v18  ;;  %v5454_v58 = vpop.f32.mrb[35].mxu0  ;;  %v5006_v33 = vld [vmem:[%s6426_s10 + $0xcc] sm:$0xe] }
 0x13f   : > { %v3297_v28 = vshrl.u32 %v7878_v56, 16  ;;  %v3290_v23 = vrot.slane %v3289_v54, 4  ;;  %v3474_v12 = vsel %vm6467_vm4, %v3472_v8, %v3473_v44  ;;  %v7902_v31 = vadd.f32 %v5454_v58, %v5453_v59  ;;  %s5178_s10 = sshll.u32 %s8270_s16, 7 }
 0x140   : > { %v3478_v42 = vsel %vm6467_vm4, %v5020_v62, %v3477_v47  ;;  %v3479_v22 = vrot.slane %v3477_v47, 4  ;;  %v3285_v3 = vsel %vm6484_vm5, %v3280_v25, %v3284_v38  ;;  %v5067_v11 = vcombine.low %v3471_v20, %v3474_v12  ;;  %v5562_v51 = vpop.f32.mrb[32].mxu1  ;;  %s8121_s29 = scalar_lea.vmem %s8263_s3, %s5178_s10  ;;  %s8157_s8 = scalar_lea.vmem %s8264_s4, %s5178_s10 }
 0x141   : > { %v3299_v45 = vrot.slane %v3297_v28, 4  ;;  %v3295_v53 = vsel %vm6484_vm5, %v3290_v23, %v3294_v43  ;;  %v5563_v48 = vpop.f32.mrb[33].mxu1  ;;  %v3300_v30 = vshll.u32 %v7878_v56, 16  ;;  %v3306_v44 = vshll.u32 %v7893_v24, 16 }
 0x142   : > { %v3481_v15 = vsel %vm6467_vm4, %v3479_v22, %v3480_v26  ;;  %v5053_v38 = vcombine.low %v3285_v3, %v3295_v53  ;;  %5930 = vmatprep.mubr.bf16.mxu1 %v5067_v11  ;;  %v7912_v18 = vadd.f32 %v5563_v48, %v5562_v51  ;;  %v5565_v34 = vpop.f32.mrb[34].mxu1  ;;  %v3310_v62 = vshrl.u32 %v7893_v24, 16 }
 0x143   : > { %v5068_v17 = vcombine.low %v3478_v42, %v3481_v15  ;;  %v3302_v54 = vrot.slane %v3300_v30, 5  ;;  %v3308_v20 = vrot.slane %v3306_v44, 5  ;;  %v3316_v43 = vshll.u32 %v4990_v39, 16  ;;  %v5566_v47 = vpop.f32.mrb[35].mxu1  ;;  %v5456_v59 = vpop.f32.mrb[36].mxu0 }
 0x144   : > { %v5021_v8 = vrot.slane %v5005_v46, 9  ;;  %4041 = vmatprep.mubr.bf16.mxu0 %v5053_v38  ;;  %v3312_v25 = vrot.slane %v3310_v62, 4  ;;  %v3484_v26 = vrot.slane %v7851_v63, 5  ;;  %v3487_v58 = vrot.slane %v7859_v14, 5  ;;  %v5457_v23 = vpop.f32.mrb[37].mxu0 }
 0x145   : > { %5931 = vmatmul.mubr.bf16.gmra.mrb[8].mxu1 %v5068_v17  ;;  %v7918_v28 = vadd.f32 %v5566_v47, %v5565_v34  ;;  %4042 = vmatmul.mubr.bf16.gmra.mrb[136].mxu0 %v5037_v40  ;;  %v3303_v12 = vor.u32 %v3302_v54, %v3299_v45  ;;  %v3318_v42 = vrot.slane %v3316_v43, 5  ;;  %v5022_v22 = vrot.slane %v5006_v33, 9  ;;  %v5459_v3 = vpop.f32.mrb[38].mxu0 }
 0x146   : > { %v3313_v11 = vor.u32 %v3312_v25, %v3308_v20  ;;  %v3485_v51 = vsel %vm6467_vm4, %v5021_v8, %v3484_v26  ;;  %v3486_v46 = vrot.slane %v3484_v26, 4  ;;  %v3491_v53 = vrot.slane %v7893_v24, 5  ;;  %v5460_v15 = vpop.f32.mrb[39].mxu0 }
 0x147   : > { %v3304_v48 = vrot.slane %v3303_v12, 4  ;;  %v3494_v63 = vrot.slane %v4990_v39, 5  ;;  %v7923_v30 = vadd.f32 %v5457_v23, %v5456_v59  ;;  %v7925_v14 = vadd.f32 %v5460_v15, %v5459_v3 }
 0x148   : > { %v3314_v44 = vrot.slane %v3313_v11, 4  ;;  %v3488_v40 = vsel %vm6467_vm4, %v3486_v46, %v3487_v58  ;;  %v3492_v45 = vsel %vm6467_vm4, %v5022_v22, %v3491_v53  ;;  %v3493_v38 = vrot.slane %v3491_v53, 4  ;;  %v5568_v17 = vpop.f32.mrb[36].mxu1 }
 0x149   : > { %v3309_v34 = vsel %vm6484_vm5, %v3304_v48, %v3308_v20  ;;  %v5069_v62 = vcombine.low %v3485_v51, %v3488_v40  ;;  %v5569_v33 = vpop.f32.mrb[37].mxu1  ;;  %v5038_v54 = vcombine.low %v7878_v56, %v7893_v24 }
 0x14a   : > { %v3319_v39 = vsel %vm6484_vm5, %v3314_v44, %v3318_v42  ;;  %v3495_v43 = vsel %vm6467_vm4, %v3493_v38, %v3494_v63  ;;  %v7939_v8 = vadd.f32 %v5569_v33, %v5568_v17  ;;  %v5571_v47 = vpop.f32.mrb[38].mxu1 }
 0x14b   : > { %v5054_v59 = vcombine.low %v3309_v34, %v3319_v39  ;;  %5934 = vmatprep.mubr.bf16.mxu1 %v5069_v62  ;;  %v5070_v25 = vcombine.low %v3492_v45, %v3495_v43  ;;  %v5572_v26 = vpop.f32.mrb[39].mxu1 }
 0x14c   : > { %v7941_v58 = vadd.f32 %v5572_v26, %v5571_v47 }
 0x14d   : > { %v5462_v20 = vpop.f32.mrb[40].mxu0  ;;  %4049 = vmatprep.mubr.bf16.mxu0 %v5054_v59  ;;  %5935 = vmatmul.mubr.bf16.gmra.mrb[12].mxu1 %v5070_v25 }
 0x14e   : > { %v5463_v50 = vpop.f32.mrb[41].mxu0  ;;  %4050 = vmatmul.mubr.bf16.gmra.mrb[140].mxu0 %v5038_v54 }
 0x14f   : > { %v5464_v23 = vadd.f32 %v5463_v50, %v5462_v20  ;;  %v5465_v12 = vpop.f32.mrb[42].mxu0 }
 0x150   : > { %v5466_v56 = vpop.f32.mrb[43].mxu0 }
 0x151   : > { %v5467_v24 = vadd.f32 %v5466_v56, %v5465_v12  ;;  %v5574_v41 = vpop.f32.mrb[40].mxu1 }
 0x152   : > { %v5575_v42 = vpop.f32.mrb[41].mxu1 }
 0x153   : > { %v7943_v22 = vadd.f32 %v5575_v42, %v5574_v41  ;;  %v5577_v3 = vpop.f32.mrb[42].mxu1 }
 0x154   : > { %v5578_v11 = vpop.f32.mrb[43].mxu1 }
 0x155   : > { %v7945_v51 = vadd.f32 %v5578_v11, %v5577_v3  ;;  %v5468_v46 = vpop.f32.mrb[44].mxu0 }
 0x156   : > { %v5469_v53 = vpop.f32.mrb[45].mxu0 }
 0x157   : > { %v7947_v15 = vadd.f32 %v5469_v53, %v5468_v46  ;;  %v5471_v48 = vpop.f32.mrb[46].mxu0 }
 0x158   : > { %v5472_v63 = vpop.f32.mrb[47].mxu0 }
 0x159   : > { %v5580_v44 = vpop.f32.mrb[44].mxu1  ;;  %v5473_v40 = vadd.f32 %v5472_v63, %v5471_v48 }
 0x15a   : > { %v5581_v45 = vpop.f32.mrb[45].mxu1 }
 0x15b   : > { %v7949_v38 = vadd.f32 %v5581_v45, %v5580_v44  ;;  %v5583_v17 = vpop.f32.mrb[46].mxu1 }
 0x15c   : > { %v5584_v34 = vpop.f32.mrb[47].mxu1 }
 0x15d   : > { %v7951_v62 = vadd.f32 %v5584_v34, %v5583_v17 }
 0x15f   : > { %v5474_v33 = vpop.f32.mrb[48].mxu0 }
 0x160   : > { %v5475_v39 = vpop.f32.mrb[49].mxu0 }
 0x161   : > { %v7953_v54 = vadd.f32 %v5475_v39, %v5474_v33  ;;  %v5477_v43 = vpop.f32.mrb[50].mxu0 }
 0x162   : > { %v5478_v59 = vpop.f32.mrb[51].mxu0 }
 0x163   : > { %v5586_v47 = vpop.f32.mrb[48].mxu1  ;;  %v7955_v26 = vadd.f32 %v5478_v59, %v5477_v43 }
 0x164   : > { %v5587_v25 = vpop.f32.mrb[49].mxu1 }
 0x165   : > { %v5588_v20 = vadd.f32 %v5587_v25, %v5586_v47  ;;  %v5589_v50 = vpop.f32.mrb[50].mxu1 }
 0x166   : > { %v5590_v12 = vpop.f32.mrb[51].mxu1 }
 0x167   : > { %v7958_v56 = vadd.f32 %v5588_v20, %v7890_v9  ;;  %v5591_v41 = vadd.f32 %v5590_v12, %v5589_v50  ;;  %v5480_v42 = vpop.f32.mrb[52].mxu0 }
 0x168   : > { %v5481_v11 = vpop.f32.mrb[53].mxu0 }
 0x169   : > { %v7961_v3 = vadd.f32 %v5591_v41, %v7902_v31  ;;  %v7963_v46 = vadd.f32 %v5481_v11, %v5480_v42  ;;  %v5483_v53 = vpop.f32.mrb[54].mxu0 }
 0x16a   : > { %v5484_v48 = vpop.f32.mrb[55].mxu0 }
 0x16b   : > { %v5592_v63 = vpop.f32.mrb[52].mxu1  ;;  %v7965_v44 = vadd.f32 %v5484_v48, %v5483_v53 }
 0x16c   : > { %v5593_v45 = vpop.f32.mrb[53].mxu1 }
 0x16d   : > { %v5594_v17 = vadd.f32 %v5593_v45, %v5592_v63  ;;  %v5595_v34 = vpop.f32.mrb[54].mxu1 }
 0x16e   : > { %v5596_v33 = vpop.f32.mrb[55].mxu1 }
 0x16f   : > { %v7968_v9 = vadd.f32 %v5594_v17, %v7923_v30  ;;  %v5597_v39 = vadd.f32 %v5596_v33, %v5595_v34 }
 0x170   : > { %v5486_v43 = vpop.f32.mrb[56].mxu0 }
 0x171   : > { %v7971_v31 = vadd.f32 %v5597_v39, %v7925_v14  ;;  %v5487_v47 = vpop.f32.mrb[57].mxu0 }
 0x172   : > { %v7973_v59 = vadd.f32 %v5487_v47, %v5486_v43  ;;  %v5489_v25 = vpop.f32.mrb[58].mxu0 }
 0x173   : > { %v5490_v20 = vpop.f32.mrb[59].mxu0 }
 0x174   : > { %v7975_v50 = vadd.f32 %v5490_v20, %v5489_v25 }
 0x175   : > { %v5598_v12 = vpop.f32.mrb[56].mxu1 }
 0x176   : > { %v5599_v41 = vpop.f32.mrb[57].mxu1 }
 0x177   : > { %v5600_v42 = vadd.f32 %v5599_v41, %v5598_v12  ;;  %v5601_v11 = vpop.f32.mrb[58].mxu1 }
 0x178   : > { %v5602_v53 = vpop.f32.mrb[59].mxu1 }
 0x179   : > { %v7977_v48 = vadd.f32 %v5600_v42, %v5464_v23  ;;  %v5603_v30 = vadd.f32 %v5602_v53, %v5601_v11  ;;  %v5492_v63 = vpop.f32.mrb[60].mxu0 }
 0x17a   : > { %v5493_v45 = vpop.f32.mrb[61].mxu0 }
 0x17b   : > { %v7979_v17 = vadd.f32 %v5603_v30, %v5467_v24  ;;  %v7981_v14 = vadd.f32 %v5493_v45, %v5492_v63  ;;  %v5495_v34 = vpop.f32.mrb[62].mxu0 }
 0x17c   : > { %v5496_v33 = vpop.f32.mrb[63].mxu0 }
 0x17d   : > { %v5604_v39 = vpop.f32.mrb[60].mxu1  ;;  %v7983_v43 = vadd.f32 %v5496_v33, %v5495_v34 }
 0x17e   : > { %v5605_v47 = vpop.f32.mrb[61].mxu1 }
 0x17f   : > { %v5606_v25 = vadd.f32 %v5605_v47, %v5604_v39  ;;  %v5607_v20 = vpop.f32.mrb[62].mxu1 }
 0x180   : > { %v5608_v12 = vpop.f32.mrb[63].mxu1 }
 0x181   : > { %v7986_v41 = vadd.f32 %v5606_v25, %v7947_v15  ;;  %v5609_v23 = vadd.f32 %v5608_v12, %v5607_v20 }
 0x182   : > { %v5812_v42 = vpop.f32.mrb[64].mxu0 }
 0x183   : > { %v7988_v11 = vadd.f32 %v5609_v23, %v5473_v40  ;;  %v2303_v24 = vadd.f32 %v5812_v42, %v7612_v0  ;;  %v2294_v53 = vpop.f32.mrb[65].mxu0 }
 0x184   : > { %v2295_v30 = vadd.f32 %v7569_v2, %v2294_v53  ;;  %v5813_v63 = vpop.f32.mrb[66].mxu0 }
 0x185   : > { %v7993_v45 = vadd.f32 %v7791_v16, %v2303_v24  ;;  %v5610_v34 = vpop.f32.mrb[64].mxu1  ;;  %v2306_v33 = vadd.f32 %v5813_v63, %v7614_v32  ;;  %v2297_v39 = vpop.f32.mrb[67].mxu0 }
 0x186   : > { %v7997_v15 = vadd.f32 %v7746_v4, %v2295_v30  ;;  %v5611_v47 = vpop.f32.mrb[65].mxu1  ;;  %v2298_v40 = vadd.f32 %v7576_v57, %v2297_v39 }
 0x187   : > { %v5612_v25 = vadd.f32 %v5611_v47, %v5610_v34  ;;  %v8001_v0 = vadd.f32 %v7798_v52, %v2306_v33  ;;  %v5613_v20 = vpop.f32.mrb[66].mxu1 }
 0x188   : > { %v8004_v2 = vadd.f32 %v7753_v21, %v2298_v40  ;;  %v5614_v16 = vpop.f32.mrb[67].mxu1 }
 0x189   : > { %v8007_v12 = vadd.f32 %v5612_v25, %v7953_v54  ;;  %v5615_v32 = vadd.f32 %v5614_v16, %v5613_v20 }
 0x18a   : > { %v5816_v23 = vpop.f32.mrb[68].mxu0 }
 0x18b   : > { %v8010_v4 = vadd.f32 %v5615_v32, %v7955_v26  ;;  %v2319_v42 = vadd.f32 %v5816_v23, %v7684_v1  ;;  %v2310_v57 = vpop.f32.mrb[69].mxu0 }
 0x18c   : > { %v2311_v24 = vadd.f32 %v7642_v37, %v2310_v57  ;;  %v5817_v52 = vpop.f32.mrb[70].mxu0 }
 0x18d   : > { %v8015_v53 = vadd.f32 %v7875_v27, %v2319_v42  ;;  %v5616_v21 = vpop.f32.mrb[68].mxu1  ;;  %v2322_v30 = vadd.f32 %v5817_v52, %v7691_v5  ;;  %v2313_v63 = vpop.f32.mrb[71].mxu0 }
 0x18e   : > { %v8019_v54 = vadd.f32 %v7830_v60, %v2311_v24  ;;  %v5617_v34 = vpop.f32.mrb[69].mxu1  ;;  %v2314_v26 = vadd.f32 %v7649_v35, %v2313_v63 }
 0x18f   : > { %v5618_v33 = vadd.f32 %v5617_v34, %v5616_v21  ;;  %v8023_v1 = vadd.f32 %v7882_v49, %v2322_v30  ;;  %v5619_v39 = vpop.f32.mrb[70].mxu1 }
 0x190   : > { %v8026_v37 = vadd.f32 %v7837_v6, %v2314_v26  ;;  %v5620_v27 = vpop.f32.mrb[71].mxu1 }
 0x191   : > { %v8029_v47 = vadd.f32 %v5618_v33, %v7963_v46  ;;  %v5621_v5 = vadd.f32 %v5620_v27, %v5619_v39 }
 0x192   : > { %v5820_v40 = vpop.f32.mrb[72].mxu0 }
 0x193   : > { %v8032_v60 = vadd.f32 %v5621_v5, %v7965_v44  ;;  %v2335_v25 = vadd.f32 %v5820_v40, %v7764_v55  ;;  %v2326_v35 = vpop.f32.mrb[73].mxu0 }
 0x194   : > { %v2327_v20 = vadd.f32 %v7722_v36, %v2326_v35  ;;  %v5821_v49 = vpop.f32.mrb[74].mxu0 }
 0x195   : > { %v8037_v16 = vadd.f32 %v7939_v8, %v2335_v25  ;;  %v5622_v6 = vpop.f32.mrb[72].mxu1  ;;  %v2338_v32 = vadd.f32 %v5821_v49, %v7779_v13  ;;  %v2329_v23 = vpop.f32.mrb[75].mxu0 }
 0x196   : > { %v8041_v46 = vadd.f32 %v7912_v18, %v2327_v20  ;;  %v5623_v42 = vpop.f32.mrb[73].mxu1  ;;  %v2330_v44 = vadd.f32 %v7734_v19, %v2329_v23 }
 0x197   : > { %v5624_v57 = vadd.f32 %v5623_v42, %v5622_v6  ;;  %v8045_v55 = vadd.f32 %v7941_v58, %v2338_v32  ;;  %v5625_v24 = vpop.f32.mrb[74].mxu1 }
 0x198   : > { %v8048_v36 = vadd.f32 %v7918_v28, %v2330_v44  ;;  %v5626_v8 = vpop.f32.mrb[75].mxu1 }
 0x199   : > { %v8051_v52 = vadd.f32 %v5624_v57, %v7973_v59  ;;  %v5627_v13 = vadd.f32 %v5626_v8, %v5625_v24 }
 0x19a   : > { %v5824_v21 = vpop.f32.mrb[76].mxu0 }
 0x19b   : > { %v8054_v18 = vadd.f32 %v5627_v13, %v7975_v50  ;;  %v2351_v30 = vadd.f32 %v5824_v21, %v7848_v7  ;;  %v2342_v19 = vpop.f32.mrb[77].mxu0 }
 0x19c   : > { %v2343_v63 = vadd.f32 %v7806_v29, %v2342_v19  ;;  %v5825_v58 = vpop.f32.mrb[78].mxu0 }
 0x19d   : > { %v8059_v34 = vadd.f32 %v7949_v38, %v2351_v30  ;;  %v5628_v28 = vpop.f32.mrb[76].mxu1  ;;  %v2354_v26 = vadd.f32 %v5825_v58, %v7863_v10  ;;  %v2345_v33 = vpop.f32.mrb[79].mxu0 }
 0x19e   : > { %v8063_v59 = vadd.f32 %v7943_v22, %v2343_v63  ;;  %v5629_v39 = vpop.f32.mrb[77].mxu1  ;;  %v2346_v50 = vadd.f32 %v7818_v61, %v2345_v33 }
 0x19f   : > { %v5630_v27 = vadd.f32 %v5629_v39, %v5628_v28  ;;  %v8067_v7 = vadd.f32 %v7951_v62, %v2354_v26  ;;  %v5631_v5 = vpop.f32.mrb[78].mxu1 }
 0x1a0   : > { %v2651_v29 = vadd.f32 %v7945_v51, %v2346_v50  ;;  %v5632_v40 = vpop.f32.mrb[79].mxu1 }
 0x1a1   : > { %v8071_v38 = vadd.f32 %v5630_v27, %v7981_v14  ;;  %v5633_v25 = vadd.f32 %v5632_v40, %v5631_v5 }
 0x1a3   : > { %v8074_v10 = vadd.f32 %v5633_v25, %v7983_v43 }
 0x1a5   : > { %v5674_v22 = vpop.f32.mrb[80].mxu0 }
 0x1a6   : > { %v5675_v35 = vpop.f32.mrb[81].mxu0 }
 0x1a7   : > { %v5676_v20 = vadd.f32 %v5675_v35, %v5674_v22  ;;  %v5677_v49 = vpop.f32.mrb[82].mxu0 }
 0x1a8   : > { %v5678_v61 = vpop.f32.mrb[83].mxu0 }
 0x1a9   : > { %v5679_v6 = vadd.f32 %v5678_v61, %v5677_v49  ;;  %v8077_v62 = vadd.f32 %v5676_v20, %v7997_v15 }
 0x1ab   : > { %v8080_v32 = vadd.f32 %v5679_v6, %v8004_v2 }
 0x1ad   : > { %v5680_v51 = vpop.f32.mrb[84].mxu0 }
 0x1ae   : > { %v5681_v23 = vpop.f32.mrb[85].mxu0 }
 0x1af   : > { %v5682_v14 = vadd.f32 %v5681_v23, %v5680_v51  ;;  %v5683_v42 = vpop.f32.mrb[86].mxu0 }
 0x1b0   : > { %v5684_v44 = vpop.f32.mrb[87].mxu0 }
 0x1b1   : > { %v5685_v57 = vadd.f32 %v5684_v44, %v5683_v42  ;;  %v5956_v43 = vadd.f32 %v5682_v14, %v7993_v45 }
 0x1b3   : > { %v8084_v24 = vadd.f32 %v5685_v57, %v8001_v0 }
 0x1b5   : > { %v5686_v8 = vpop.f32.mrb[88].mxu0 }
 0x1b6   : > { %v5687_v13 = vpop.f32.mrb[89].mxu0 }
 0x1b7   : > { %v5688_v21 = vadd.f32 %v5687_v13, %v5686_v8  ;;  %v5689_v30 = vpop.f32.mrb[90].mxu0 }
 0x1b8   : > { %v5690_v15 = vpop.f32.mrb[91].mxu0 }
 0x1b9   : > { %v5691_v19 = vadd.f32 %v5690_v15, %v5689_v30  ;;  %v8087_v2 = vadd.f32 %v5688_v21, %v8019_v54 }
 0x1bb   : > { %v8090_v63 = vadd.f32 %v5691_v19, %v8026_v37 }
 0x1bd   : > { %v5692_v58 = vpop.f32.mrb[92].mxu0 }
 0x1be   : > { %v5693_v28 = vpop.f32.mrb[93].mxu0 }
 0x1bf   : > { %v5694_v26 = vadd.f32 %v5693_v28, %v5692_v58  ;;  %v5695_v33 = vpop.f32.mrb[94].mxu0  ;;  %v5356_v58 = vld [vmem:[%s8121_s29 + $0x8] sm:$0xff]  }
 0x1c0   : > { %v5696_v45 = vpop.f32.mrb[95].mxu0 }
 0x1c1   : > { %v5697_v39 = vadd.f32 %v5696_v45, %v5695_v33  ;;  %v8093_v0 = vadd.f32 %v5694_v26, %v8015_v53  ;;  %v5213_v26 = vld [vmem:[%s8121_s29] sm:$0xff]  }
 0x1c2   : > { %v8134_v45 = vld [vmem:[%s8262_s2] ss:$0 sm:$0xff] }
 0x1c3   : > { %v8096_v50 = vadd.f32 %v5697_v39, %v8023_v1 }
 0x1c5   : > { %v5698_v27 = vpop.f32.mrb[96].mxu0 }
 0x1c6   : > { %v5699_v5 = vpop.f32.mrb[97].mxu0 }
 0x1c7   : > { %v5700_v40 = vadd.f32 %v5699_v5, %v5698_v27  ;;  %v5701_v54 = vpop.f32.mrb[98].mxu0  ;;  %v5218_v5 = vunpack.c.l.bf16 %v5356_v58 }
 0x1c8   : > { %v5702_v25 = vpop.f32.mrb[99].mxu0 }
 0x1c9   : > { %v5703_v22 = vadd.f32 %v5702_v25, %v5701_v54  ;;  %v8099_v37 = vadd.f32 %v5700_v40, %v8041_v46 }
 0x1cb   : > { %v8102_v35 = vadd.f32 %v5703_v22, %v8048_v36 }
 0x1cd   : > { %v5704_v20 = vpop.f32.mrb[100].mxu0 }
 0x1ce   : > { %v5705_v49 = vpop.f32.mrb[101].mxu0 }
 0x1cf   : > { %v5706_v61 = vadd.f32 %v5705_v49, %v5704_v20  ;;  %v5707_v53 = vpop.f32.mrb[102].mxu0  ;;  %v5219_v20 = vunpack.c.h.bf16 %v5356_v58 }
 0x1d0   : > { %v5708_v6 = vpop.f32.mrb[103].mxu0 }
 0x1d1   : > { %v5709_v1 = vadd.f32 %v5708_v6, %v5707_v53  ;;  %v8105_v51 = vadd.f32 %v5706_v61, %v8037_v16 }
 0x1d3   : > { %v8108_v23 = vadd.f32 %v5709_v1, %v8045_v55 }
 0x1d5   : > { %v5710_v14 = vpop.f32.mrb[104].mxu0 }
 0x1d6   : > { %v5711_v46 = vpop.f32.mrb[105].mxu0 }
 0x1d7   : > { %v5712_v42 = vadd.f32 %v5711_v46, %v5710_v14  ;;  %v5713_v44 = vpop.f32.mrb[106].mxu0 }
 0x1d8   : > { %v5714_v36 = vpop.f32.mrb[107].mxu0 }
 0x1d9   : > { %v5715_v57 = vadd.f32 %v5714_v36, %v5713_v44  ;;  %v8111_v8 = vadd.f32 %v5712_v42, %v8063_v59  ;;  %v5215_v42 = vunpack.c.h.bf16 %v5213_v26  ;;  %v5358_v36 = vld [vmem:[%s8121_s29 + $0x18] sm:$0xff]  }
 0x1db   : > { %v8113_v13 = vadd.f32 %v5715_v57, %v2651_v29  ;;  %v5357_v57 = vld [vmem:[%s8121_s29 + $0x10] sm:$0xff]  }
 0x1dc   : > { %v5222_v58 = vunpack.c.l.bf16 %v5357_v57 }
 0x1dd   : > { %v5716_v21 = vpop.f32.mrb[108].mxu0 }
 0x1de   : > { %v5717_v30 = vpop.f32.mrb[109].mxu0 }
 0x1df   : > { %v5718_v16 = vadd.f32 %v5717_v30, %v5716_v21  ;;  %v5719_v15 = vpop.f32.mrb[110].mxu0 }
 0x1e0   : > { %v5720_v19 = vpop.f32.mrb[111].mxu0 }
 0x1e1   : > { %v5721_v55 = vadd.f32 %v5720_v19, %v5719_v15  ;;  %v8124_v59 = vadd.f32 %v5718_v16, %v8059_v34 }
 0x1e3   : > { %v8127_v29 = vadd.f32 %v5721_v55, %v8067_v7  ;;  %v5214_v7 = vunpack.c.l.bf16 %v5213_v26  ;;  %v5226_v55 = vunpack.c.l.bf16 %v5358_v36 }
 0x1e5   : > { %v5722_v28 = vpop.f32.mrb[112].mxu0  ;;  %v5908_v33 = vpop.f32.mrb[80].mxu1 }
 0x1e6   : > { %v5723_v39 = vpop.f32.mrb[113].mxu0  ;;  %v5957_v27 = vadd.f32 %v5956_v43, %v5908_v33  ;;  %v4092_v54 = vpop.f32.mrb[81].mxu1 }
 0x1e7   : > { %v5724_v40 = vadd.f32 %v5723_v39, %v5722_v28  ;;  %v5725_v25 = vpop.f32.mrb[114].mxu0  ;;  %v5961_v34 = vadd.f32 %v8077_v62, %v4092_v54  ;;  %v5909_v22 = vpop.f32.mrb[82].mxu1 }
 0x1e8   : > { %v5726_v49 = vpop.f32.mrb[115].mxu0  ;;  %v4260_v61 = vadd.f32 %v5957_v27, %v8134_v45  ;;  %v5965_v53 = vadd.f32 %v8084_v24, %v5909_v22  ;;  %v4095_v1 = vpop.f32.mrb[83].mxu1  ;;  %v5227_v27 = vunpack.c.h.bf16 %v5358_v36 }
 0x1e9   : > { %v5727_v6 = vadd.f32 %v5726_v49, %v5725_v25  ;;  %v8140_v43 = vadd.f32 %v7958_v56, %v5724_v40  ;;  %v4258_v14 = vadd.f32 %v5961_v34, %v8134_v45  ;;  %v5969_v46 = vadd.f32 %v8080_v32, %v4095_v1 }
 0x1ea   : > { %v4356_v62 = vadd.f32 %v5218_v5, %v4260_v61  ;;  %v4261_v44 = vadd.f32 %v5965_v53, %v8134_v45  ;;  %v5223_v61 = vunpack.c.h.bf16 %v5357_v57 }
 0x1eb   : > { %v8148_v21 = vadd.f32 %v7961_v3, %v5727_v6  ;;  %v4354_v24 = vadd.f32 %v5214_v7, %v4258_v14  ;;  %v4259_v30 = vadd.f32 %v5969_v46, %v8134_v45 }
 0x1ec   : > { %v4357_v16 = vadd.f32 %v5219_v20, %v4261_v44  ;;  %v4388_v32 = vmax.f32 %v4356_v62, 0.0  ;;  %v5359_v62 = vld [vmem:[%s8121_s29 + $0x20] sm:$0xff]  }
 0x1ed   : > { %v4355_v56 = vadd.f32 %v5215_v42, %v4259_v30  ;;  %v5728_v15 = vpop.f32.mrb[116].mxu0  ;;  %v5912_v19 = vpop.f32.mrb[84].mxu1  ;;  %v4386_v5 = vmax.f32 %v4354_v24, 0.0  ;;  %v5360_v42 = vld [vmem:[%s8121_s29 + $0x28] sm:$0xff]  }
 0x1ee   : > { %v4389_v28 = vmax.f32 %v4357_v16, 0.0  ;;  %v5973_v26 = vadd.f32 %v8093_v0, %v5912_v19  ;;  %v5729_v33 = vpop.f32.mrb[117].mxu0  ;;  %v4108_v39 = vpop.f32.mrb[85].mxu1 }
 0x1ef   : > { %v4387_v3 = vmax.f32 %v4355_v56, 0.0  ;;  %v5730_v40 = vadd.f32 %v5729_v33, %v5728_v15  ;;  %v5977_v54 = vadd.f32 %v8087_v2, %v4108_v39  ;;  %v5731_v25 = vpop.f32.mrb[118].mxu0  ;;  %v5913_v34 = vpop.f32.mrb[86].mxu1  ;;  %v5234_v56 = vunpack.c.l.bf16 %v5360_v42 }
 0x1f0   : > { %v5284_v0 = vpack.c.bf16 %v4389_v28, %v4388_v32  ;;  %v4264_v7 = vadd.f32 %v5973_v26, %v8134_v45  ;;  %v5981_v22 = vadd.f32 %v8096_v50, %v5913_v34  ;;  %v5732_v20 = vpop.f32.mrb[119].mxu0  ;;  %v4111_v49 = vpop.f32.mrb[87].mxu1  ;;  %v5230_v15 = vunpack.c.l.bf16 %v5359_v62 }
 0x1f1   : > { %v5279_v53 = vpack.c.bf16 %v4387_v3, %v4386_v5  ;;  %v4262_v6 = vadd.f32 %v5977_v54, %v8134_v45  ;;  %v5733_v1 = vadd.f32 %v5732_v20, %v5731_v25  ;;  %v5985_v14 = vadd.f32 %v8090_v63, %v4111_v49 }
 0x1f2   : > { %5371 = vst [vmem:[%s8157_s8 + $0x8] sm:$0xff] %v5284_v0   ;;  %v4360_v2 = vadd.f32 %v5226_v55, %v4264_v7  ;;  %v4265_v46 = vadd.f32 %v5981_v22, %v8134_v45  ;;  %v8169_v44 = vadd.f32 %v7968_v9, %v5730_v40  ;;  %v5235_v26 = vunpack.c.h.bf16 %v5360_v42 }
 0x1f3   : > { %5280 = vst [vmem:[%s8157_s8] sm:$0xff] %v5279_v53   ;;  %v4358_v50 = vadd.f32 %v5222_v58, %v4262_v6  ;;  %v4263_v36 = vadd.f32 %v5985_v14, %v8134_v45  ;;  %v8174_v57 = vadd.f32 %v7971_v31, %v5733_v1  ;;  %v5231_v34 = vunpack.c.h.bf16 %v5359_v62  ;;  %v5361_v53 = vld [vmem:[%s8121_s29 + $0x30] sm:$0xff]  }
 0x1f4   : > { %v4361_v24 = vadd.f32 %v5227_v27, %v4265_v46  ;;  %v4392_v19 = vmax.f32 %v4360_v2, 0.0 }
 0x1f5   : > { %v4359_v30 = vadd.f32 %v5223_v61, %v4263_v36  ;;  %v5734_v16 = vpop.f32.mrb[120].mxu0  ;;  %v5916_v63 = vpop.f32.mrb[88].mxu1  ;;  %v4390_v33 = vmax.f32 %v4358_v50, 0.0  ;;  %v5362_v61 = vld [vmem:[%s8121_s29 + $0x38] sm:$0xff]   ;;  %v5238_v50 = vunpack.c.l.bf16 %v5361_v53 }
 0x1f6   : > { %v4393_v55 = vmax.f32 %v4361_v24, 0.0  ;;  %v5989_v32 = vadd.f32 %v8105_v51, %v5916_v63  ;;  %v5735_v28 = vpop.f32.mrb[121].mxu0  ;;  %v4124_v9 = vpop.f32.mrb[89].mxu1  ;;  %v5242_v62 = vunpack.c.l.bf16 %v5362_v61  ;;  %v5243_v63 = vunpack.c.h.bf16 %v5362_v61 }
 0x1f7   : > { %v4391_v58 = vmax.f32 %v4359_v30, 0.0  ;;  %v5736_v39 = vadd.f32 %v5735_v28, %v5734_v16  ;;  %v5993_v31 = vadd.f32 %v8099_v37, %v4124_v9  ;;  %v5737_v27 = vpop.f32.mrb[122].mxu0  ;;  %v5917_v5 = vpop.f32.mrb[90].mxu1 }
 0x1f8   : > { %v5294_v3 = vpack.c.bf16 %v4393_v55, %v4392_v19  ;;  %v4268_v40 = vadd.f32 %v5989_v32, %v8134_v45  ;;  %v5997_v54 = vadd.f32 %v8108_v23, %v5917_v5  ;;  %v5738_v51 = vpop.f32.mrb[123].mxu0  ;;  %v4127_v25 = vpop.f32.mrb[91].mxu1 }
 0x1f9   : > { %v5289_v0 = vpack.c.bf16 %v4391_v58, %v4390_v33  ;;  %v4266_v7 = vadd.f32 %v5993_v31, %v8134_v45  ;;  %v5739_v22 = vadd.f32 %v5738_v51, %v5737_v27  ;;  %v6001_v20 = vadd.f32 %v8102_v35, %v4127_v25  ;;  %v5363_v25 = vld [vmem:[%s8121_s29 + $0x40] sm:$0xff]  }
 0x1fa   : > { %5373 = vst [vmem:[%s8157_s8 + $0x18] sm:$0xff] %v5294_v3   ;;  %v4364_v37 = vadd.f32 %v5234_v56, %v4268_v40  ;;  %v4269_v49 = vadd.f32 %v5997_v54, %v8134_v45  ;;  %v8187_v6 = vadd.f32 %v7977_v48, %v5736_v39  ;;  %v5239_v58 = vunpack.c.h.bf16 %v5361_v53  ;;  %v5364_v40 = vld [vmem:[%s8121_s29 + $0x48] sm:$0xff]  }
 0x1fb   : > { %5372 = vst [vmem:[%s8157_s8 + $0x10] sm:$0xff] %v5289_v0   ;;  %v4362_v23 = vadd.f32 %v5230_v15, %v4266_v7  ;;  %v4267_v1 = vadd.f32 %v6001_v20, %v8134_v45  ;;  %v8192_v14 = vadd.f32 %v7979_v17, %v5739_v22  ;;  %v5250_v20 = vunpack.c.l.bf16 %v5364_v40 }
 0x1fc   : > { %v4365_v2 = vadd.f32 %v5235_v26, %v4269_v49  ;;  %v4396_v36 = vmax.f32 %v4364_v37, 0.0 }
 0x1fd   : > { %v4363_v46 = vadd.f32 %v5231_v34, %v4267_v1  ;;  %v5740_v42 = vpop.f32.mrb[124].mxu0  ;;  %v5920_v35 = vpop.f32.mrb[92].mxu1  ;;  %v4394_v56 = vmax.f32 %v4362_v23, 0.0  ;;  %v5246_v23 = vunpack.c.l.bf16 %v5363_v25 }
 0x1fe   : > { %v4397_v24 = vmax.f32 %v4365_v2, 0.0  ;;  %v6005_v30 = vadd.f32 %v8124_v59, %v5920_v35  ;;  %v5741_v16 = vpop.f32.mrb[125].mxu0  ;;  %v4140_v48 = vpop.f32.mrb[93].mxu1  ;;  %v5251_v35 = vunpack.c.h.bf16 %v5364_v40 }
 0x1ff   : > { %v4395_v15 = vmax.f32 %v4363_v46, 0.0  ;;  %v5742_v19 = vadd.f32 %v5741_v16, %v5740_v42  ;;  %v6009_v17 = vadd.f32 %v8111_v8, %v4140_v48  ;;  %v5743_v55 = vpop.f32.mrb[126].mxu0  ;;  %v5921_v32 = vpop.f32.mrb[94].mxu1 }
 0x200   : > { %v5304_v28 = vpack.c.bf16 %v4397_v24, %v4396_v36  ;;  %v4272_v9 = vadd.f32 %v6005_v30, %v8134_v45  ;;  %v6013_v26 = vadd.f32 %v8127_v29, %v5921_v32  ;;  %v5744_v59 = vpop.f32.mrb[127].mxu0  ;;  %v4143_v33 = vpop.f32.mrb[95].mxu1 }
 0x201   : > { %v5299_v39 = vpack.c.bf16 %v4395_v15, %v4394_v56  ;;  %v4270_v31 = vadd.f32 %v6009_v17, %v8134_v45  ;;  %v5745_v27 = vadd.f32 %v5744_v59, %v5743_v55  ;;  %v6017_v5 = vadd.f32 %v8113_v13, %v4143_v33  ;;  %v5365_v59 = vld [vmem:[%s8121_s29 + $0x50] sm:$0xff]  }
 0x202   : > { %5375 = vst [vmem:[%s8157_s8 + $0x28] sm:$0xff] %v5304_v28   ;;  %v4368_v8 = vadd.f32 %v5242_v62, %v4272_v9  ;;  %v4273_v3 = vadd.f32 %v6013_v26, %v8134_v45  ;;  %v6031_v54 = vadd.f32 %v7986_v41, %v5742_v19  ;;  %v5366_v28 = vld [vmem:[%s8121_s29 + $0x58] sm:$0xff]  }
 0x203   : > { %5374 = vst [vmem:[%s8157_s8 + $0x20] sm:$0xff] %v5299_v39   ;;  %v4366_v51 = vadd.f32 %v5238_v50, %v4270_v31  ;;  %v4271_v29 = vadd.f32 %v6017_v5, %v8134_v45  ;;  %v6037_v34 = vadd.f32 %v7988_v11, %v5745_v27 }
 0x204   : > { %v4369_v0 = vadd.f32 %v5243_v63, %v4273_v3  ;;  %v4400_v37 = vmax.f32 %v4368_v8, 0.0 }
 0x205   : > { %v4367_v7 = vadd.f32 %v5239_v58, %v4271_v29  ;;  %v4398_v1 = vmax.f32 %v4366_v51, 0.0  ;;  %v5254_v29 = vunpack.c.l.bf16 %v5365_v59 }
 0x206   : > { %v5924_v22 = vpop.f32.mrb[0].mxu1  ;;  %v4401_v13 = vmax.f32 %v4369_v0, 0.0  ;;  %v5746_v49 = vpop.f32.mrb[128].mxu0 }
 0x207   : > { %v6020_v61 = vadd.f32 %v8169_v44, %v5924_v22  ;;  %v4156_v53 = vpop.f32.mrb[1].mxu1  ;;  %v4399_v41 = vmax.f32 %v4367_v7, 0.0  ;;  %v5747_v2 = vpop.f32.mrb[129].mxu0 }
 0x208   : > { %v6023_v46 = vadd.f32 %v8140_v43, %v4156_v53  ;;  %v5925_v42 = vpop.f32.mrb[2].mxu1  ;;  %v5314_v11 = vpack.c.bf16 %v4401_v13, %v4400_v37  ;;  %v5748_v50 = vadd.f32 %v5747_v2, %v5746_v49  ;;  %v5749_v36 = vpop.f32.mrb[130].mxu0  ;;  %v5247_v43 = vunpack.c.h.bf16 %v5363_v25 }
 0x209   : > { %v4276_v62 = vadd.f32 %v6020_v61, %v8134_v45  ;;  %v6026_v24 = vadd.f32 %v8174_v57, %v5925_v42  ;;  %v4159_v44 = vpop.f32.mrb[3].mxu1  ;;  %v5309_v30 = vpack.c.bf16 %v4399_v41, %v4398_v1  ;;  %v5750_v48 = vpop.f32.mrb[131].mxu0  ;;  %v5259_v25 = vunpack.c.h.bf16 %v5366_v28  ;;  %v5368_v42 = vld [vmem:[%s8121_s29 + $0x68] sm:$0xff]  }
 0x20a   : > { %v4274_v16 = vadd.f32 %v6023_v46, %v8134_v45  ;;  %v6029_v63 = vadd.f32 %v8148_v21, %v4159_v44  ;;  %5377 = vst [vmem:[%s8157_s8 + $0x38] sm:$0xff] %v5314_v11   ;;  %v5751_v19 = vadd.f32 %v5750_v48, %v5749_v36  ;;  %v6046_v17 = vadd.f32 %v8007_v12, %v5748_v50 }
 0x20b   : > { %v4372_v56 = vadd.f32 %v5250_v20, %v4276_v62  ;;  %v4277_v15 = vadd.f32 %v6026_v24, %v8134_v45  ;;  %5376 = vst [vmem:[%s8157_s8 + $0x30] sm:$0xff] %v5309_v30   ;;  %v5258_v12 = vunpack.c.l.bf16 %v5366_v28  ;;  %v5255_v53 = vunpack.c.h.bf16 %v5365_v59  ;;  %v5367_v62 = vld [vmem:[%s8121_s29 + $0x60] sm:$0xff]  }
 0x20c   : > { %v4370_v55 = vadd.f32 %v5246_v23, %v4274_v16  ;;  %v4275_v57 = vadd.f32 %v6029_v63, %v8134_v45  ;;  %v8221_v9 = vadd.f32 %v8010_v4, %v5751_v19  ;;  %v5266_v48 = vunpack.c.l.bf16 %v5368_v42 }
 0x20d   : > { %v4373_v32 = vadd.f32 %v5251_v35, %v4277_v15  ;;  %v4404_v21 = vmax.f32 %v4372_v56, 0.0  ;;  %v5262_v15 = vunpack.c.l.bf16 %v5367_v62 }
 0x20e   : > { %v4371_v26 = vadd.f32 %v5247_v43, %v4275_v57  ;;  %v4402_v39 = vmax.f32 %v4370_v55, 0.0  ;;  %v5267_v55 = vunpack.c.h.bf16 %v5368_v42 }
 0x20f   : > { %v4405_v33 = vmax.f32 %v4373_v32, 0.0  ;;  %v5928_v58 = vpop.f32.mrb[4].mxu1  ;;  %v5752_v27 = vpop.f32.mrb[132].mxu0 }
 0x210   : > { %v4403_v31 = vmax.f32 %v4371_v26, 0.0  ;;  %v6032_v5 = vadd.f32 %v6031_v54, %v5928_v58  ;;  %v4172_v8 = vpop.f32.mrb[5].mxu1  ;;  %v5753_v40 = vpop.f32.mrb[133].mxu0 }
 0x211   : > { %v5324_v3 = vpack.c.bf16 %v4405_v33, %v4404_v21  ;;  %v6035_v51 = vadd.f32 %v8187_v6, %v4172_v8  ;;  %v5929_v4 = vpop.f32.mrb[6].mxu1  ;;  %v5754_v22 = vadd.f32 %v5753_v40, %v5752_v27  ;;  %v5755_v20 = vpop.f32.mrb[134].mxu0 }
 0x212   : > { %v5319_v0 = vpack.c.bf16 %v4403_v31, %v4402_v39  ;;  %v4280_v7 = vadd.f32 %v6032_v5, %v8134_v45  ;;  %v6038_v37 = vadd.f32 %v6037_v34, %v5929_v4  ;;  %v4175_v13 = vpop.f32.mrb[7].mxu1  ;;  %v5756_v49 = vpop.f32.mrb[135].mxu0  ;;  %v5263_v39 = vunpack.c.h.bf16 %v5367_v62 }
 0x213   : > { %5379 = vst [vmem:[%s8157_s8 + $0x48] sm:$0xff] %v5324_v3   ;;  %v4278_v54 = vadd.f32 %v6035_v51, %v8134_v45  ;;  %v6041_v61 = vadd.f32 %v8192_v14, %v4175_v13  ;;  %v5757_v1 = vadd.f32 %v5756_v49, %v5755_v20  ;;  %v6043_v41 = vadd.f32 %v8029_v47, %v5754_v22 }
 0x214   : > { %5378 = vst [vmem:[%s8157_s8 + $0x40] sm:$0xff] %v5319_v0   ;;  %v4376_v6 = vadd.f32 %v5258_v12, %v4280_v7  ;;  %v4281_v23 = vadd.f32 %v6038_v37, %v8134_v45 }
 0x215   : > { %v4374_v2 = vadd.f32 %v5254_v29, %v4278_v54  ;;  %v4279_v46 = vadd.f32 %v6041_v61, %v8134_v45  ;;  %v6049_v35 = vadd.f32 %v8032_v60, %v5757_v1  ;;  %v5369_v29 = vld [vmem:[%s8121_s29 + $0x70] sm:$0xff]  }
 0x216   : > { %v4377_v34 = vadd.f32 %v5259_v25, %v4281_v23  ;;  %v4408_v50 = vmax.f32 %v4376_v6, 0.0  ;;  %v5270_v54 = vunpack.c.l.bf16 %v5369_v29  ;;  %v5370_v23 = vld [vmem:[%s8121_s29 + $0x78] sm:$0xff]  }
 0x217   : > { %v4375_v11 = vadd.f32 %v5255_v53, %v4279_v46  ;;  %v4406_v24 = vmax.f32 %v4374_v2, 0.0  ;;  %v5271_v46 = vunpack.c.h.bf16 %v5369_v29 }
 0x218   : > { %v4409_v36 = vmax.f32 %v4377_v34, 0.0  ;;  %v5932_v14 = vpop.f32.mrb[8].mxu1  ;;  %v5758_v30 = vpop.f32.mrb[136].mxu0 }
 0x219   : > { %v4407_v44 = vmax.f32 %v4375_v11, 0.0  ;;  %v6044_v16 = vadd.f32 %v6043_v41, %v5932_v14  ;;  %v4188_v63 = vpop.f32.mrb[9].mxu1  ;;  %v5759_v43 = vpop.f32.mrb[137].mxu0 }
 0x21a   : > { %v5334_v47 = vpack.c.bf16 %v4409_v36, %v4408_v50  ;;  %v6047_v56 = vadd.f32 %v6046_v17, %v4188_v63  ;;  %v5933_v19 = vpop.f32.mrb[10].mxu1  ;;  %v5760_v32 = vadd.f32 %v5759_v43, %v5758_v30  ;;  %v5761_v28 = vpop.f32.mrb[138].mxu0  ;;  %v5274_v50 = vunpack.c.l.bf16 %v5370_v23 }
 0x21b   : > { %v5329_v60 = vpack.c.bf16 %v4407_v44, %v4406_v24  ;;  %v4284_v57 = vadd.f32 %v6044_v16, %v8134_v45  ;;  %v6050_v26 = vadd.f32 %v6049_v35, %v5933_v19  ;;  %v4191_v59 = vpop.f32.mrb[11].mxu1  ;;  %v5762_v33 = vpop.f32.mrb[139].mxu0  ;;  %v5275_v30 = vunpack.c.h.bf16 %v5370_v23 }
 0x21c   : > { %5381 = vst [vmem:[%s8157_s8 + $0x58] sm:$0xff] %v5334_v47   ;;  %v4282_v21 = vadd.f32 %v6047_v56, %v8134_v45  ;;  %v6053_v58 = vadd.f32 %v8221_v9, %v4191_v59  ;;  %v5763_v27 = vadd.f32 %v5762_v33, %v5761_v28  ;;  %v6058_v5 = vadd.f32 %v8051_v52, %v5760_v32 }
 0x21d   : > { %5380 = vst [vmem:[%s8157_s8 + $0x50] sm:$0xff] %v5329_v60   ;;  %v4380_v17 = vadd.f32 %v5266_v48, %v4284_v57  ;;  %v4285_v31 = vadd.f32 %v6050_v26, %v8134_v45 }
 0x21e   : > { %v4378_v12 = vadd.f32 %v5262_v15, %v4282_v21  ;;  %v4283_v8 = vadd.f32 %v6053_v58, %v8134_v45  ;;  %v6064_v40 = vadd.f32 %v8054_v18, %v5763_v27 }
 0x21f   : > { %v4381_v3 = vadd.f32 %v5267_v55, %v4285_v31  ;;  %v4412_v4 = vmax.f32 %v4380_v17, 0.0 }
 0x220   : > { %v4379_v51 = vadd.f32 %v5263_v39, %v4283_v8  ;;  %v5936_v9 = vpop.f32.mrb[12].mxu1  ;;  %v4410_v0 = vmax.f32 %v4378_v12, 0.0 }
 0x221   : > { %v4413_v25 = vmax.f32 %v4381_v3, 0.0  ;;  %v5764_v22 = vpop.f32.mrb[140].mxu0  ;;  %v4204_v20 = vpop.f32.mrb[13].mxu1 }
 0x222   : > { %v4411_v7 = vmax.f32 %v4379_v51, 0.0  ;;  %v5765_v52 = vpop.f32.mrb[141].mxu0  ;;  %v6059_v13 = vadd.f32 %v6058_v5, %v4204_v20  ;;  %v5937_v49 = vpop.f32.mrb[14].mxu1 }
 0x223   : > { %v5344_v37 = vpack.c.bf16 %v4413_v25, %v4412_v4  ;;  %v5766_v53 = vadd.f32 %v5765_v52, %v5764_v22  ;;  %v5767_v18 = vpop.f32.mrb[142].mxu0  ;;  %v4207_v6 = vpop.f32.mrb[15].mxu1 }
 0x224   : > { %v5339_v61 = vpack.c.bf16 %v4411_v7, %v4410_v0  ;;  %v4286_v1 = vadd.f32 %v6059_v13, %v8134_v45  ;;  %v5768_v41 = vpop.f32.mrb[143].mxu0  ;;  %v6065_v2 = vadd.f32 %v6064_v40, %v4207_v6 }
 0x225   : > { %5383 = vst [vmem:[%s8157_s8 + $0x68] sm:$0xff] %v5344_v37   ;;  %v6055_v34 = vadd.f32 %v8071_v38, %v5766_v53  ;;  %v5769_v42 = vadd.f32 %v5768_v41, %v5767_v18 }
 0x226   : > { %5382 = vst [vmem:[%s8157_s8 + $0x60] sm:$0xff] %v5339_v61   ;;  %v4382_v35 = vadd.f32 %v5270_v54, %v4286_v1  ;;  %v4287_v11 = vadd.f32 %v6065_v2, %v8134_v45 }
 0x227   : > { %v6056_v62 = vadd.f32 %v6055_v34, %v5936_v9  ;;  %v6061_v36 = vadd.f32 %v8074_v10, %v5769_v42 }
 0x228   : > { %v4383_v14 = vadd.f32 %v5271_v46, %v4287_v11  ;;  %v4414_v16 = vmax.f32 %v4382_v35, 0.0 }
 0x229   : > { %v4288_v24 = vadd.f32 %v6056_v62, %v8134_v45  ;;  %v6062_v44 = vadd.f32 %v6061_v36, %v5937_v49 }
 0x22a   : > { %v4415_v48 = vmax.f32 %v4383_v14, 0.0 }
 0x22b   : > { %v4384_v63 = vadd.f32 %v5274_v50, %v4288_v24  ;;  %v4289_v38 = vadd.f32 %v6062_v44, %v8134_v45 }
 0x22c   : > { %v5349_v47 = vpack.c.bf16 %v4415_v48, %v4414_v16 }
 0x22d   : > { %v4385_v43 = vadd.f32 %v5275_v30, %v4289_v38  ;;  %v4416_v56 = vmax.f32 %v4384_v63, 0.0 }
 0x22e   : > { %5384 = vst [vmem:[%s8157_s8 + $0x70] sm:$0xff] %v5349_v47  }
 0x22f   : > { %v4417_v15 = vmax.f32 %v4385_v43, 0.0 }
 0x231   : > { %v5354_v19 = vpack.c.bf16 %v4417_v15, %v4416_v56 }
 0x233   : > { %5385 = vst [vmem:[%s8157_s8 + $0x78] sm:$0xff] %v5354_v19  }
 0x234 PF: > { %s14_s15 = sadd.s32 1, %s6296_s15  }
 0x235   : > { %p11_p4 = scmp.ge.s32.totalorder %s14_s15, 4  }
 0x237   :  { %13 = sbr.rel (!%p11_p4) target bundleno = 1 (0x1), region = 73 }

</bundles_post_ra>
